<compile_context>
chip_gen: v7x
topology: tpu7x:2x2x1
jax: 0.10.0
libtpu: 0.0.40
codegen_flags: <defaults>
</compile_context>

<pallas_src>
import functools

import jax
import jax.numpy as jnp
from jax import lax
from jax.experimental import pallas as pl
from jax.experimental.pallas import tpu as pltpu


def _residual_kernel(x_hbm, w1_ref, w2_ref, o_ref, xpad_ref, sem,
                     *, TH, W, C, H, mxu_dtype):
    """One (batch b, row-tile i) step.

    x_hbm:    (B, H*W, C)  full input, left in HBM (manual DMA)
    w1_ref:   (9, C, C)    3x3 weights, (dy*3+dx, Cin, Cout), resident in VMEM
    w2_ref:   (C, C)       1x1 weights, (Cin, Cout), resident in VMEM
    o_ref:    (TH*W, C)    output tile (auto-pipelined, lane-dense)
    xpad_ref: ((TH+2)*W, C) VMEM scratch: x tile + one halo image-row above/below
    sem:      (3,) DMA semaphores
    """
    b = pl.program_id(0)
    i = pl.program_id(1)
    n_h = pl.num_programs(1)

    rows = TH * W                      # flattened rows of one output tile
    row0 = i * TH                      # first image row of this tile

    # ---- single HBM read: body rows + clamped halo rows -> VMEM scratch ----
    body_start = pl.multiple_of(row0 * W, rows)
    body_cp = pltpu.make_async_copy(
        x_hbm.at[b, pl.ds(body_start, rows)],
        xpad_ref.at[pl.ds(W, rows)],
        sem.at[0])
    top_row = jnp.maximum(row0 - 1, 0)           # clamped; zeroed below if i == 0
    top_cp = pltpu.make_async_copy(
        x_hbm.at[b, pl.ds(top_row * W, W)],
        xpad_ref.at[pl.ds(0, W)],
        sem.at[1])
    bot_row = jnp.minimum(row0 + TH, H - 1)      # clamped; zeroed below if last tile
    bot_cp = pltpu.make_async_copy(
        x_hbm.at[b, pl.ds(bot_row * W, W)],
        xpad_ref.at[pl.ds((TH + 1) * W, W)],
        sem.at[2])
    body_cp.start(); top_cp.start(); bot_cp.start()
    body_cp.wait(); top_cp.wait(); bot_cp.wait()

    # Zero vertical halo at the image borders (conv2d padding=1 semantics).
    @pl.when(i == 0)
    def _():
        xpad_ref[pl.ds(0, W), :] = jnp.zeros((W, C), xpad_ref.dtype)

    @pl.when(i == n_h - 1)
    def _():
        xpad_ref[pl.ds((TH + 1) * W, W), :] = jnp.zeros((W, C), xpad_ref.dtype)

    # ---- 3x3 conv: 3 row bands x 3 masked horizontal shifts -> 9 MXU matmuls ----
    col = lax.broadcasted_iota(jnp.int32, (rows, 1), 0) % W
    ok_l = col > 0          # left tap reads column x-1: invalid at x == 0
    ok_r = col < (W - 1)    # right tap reads column x+1: invalid at x == W-1

    prec = (lax.Precision.HIGHEST
            if jnp.dtype(mxu_dtype) == jnp.dtype(jnp.float32) else None)

    acc = jnp.zeros((rows, C), jnp.float32)
    x_tile = None
    for dy in range(3):
        # Band dy covers image rows [row0 - 1 + dy, row0 - 1 + dy + TH); offsets
        # dy*W are sublane-aligned static slices of the flattened scratch.
        band = xpad_ref[pl.ds(dy * W, rows), :]                  # f32 (rows, C)
        if dy == 1:
            x_tile = band                                        # residual input
        # Horizontal taps: shift by +/-1 in the flattened index (XLU roll), then
        # mask the elements that wrapped across an image-row boundary (zero pad).
        left = jnp.where(ok_l, pltpu.roll(band, 1, axis=0), 0.0)
        right = jnp.where(ok_r, pltpu.roll(band, rows - 1, axis=0), 0.0)
        acc = acc + jnp.dot(left.astype(mxu_dtype), w1_ref[dy * 3 + 0],
                            preferred_element_type=jnp.float32, precision=prec)
        acc = acc + jnp.dot(band.astype(mxu_dtype), w1_ref[dy * 3 + 1],
                            preferred_element_type=jnp.float32, precision=prec)
        acc = acc + jnp.dot(right.astype(mxu_dtype), w1_ref[dy * 3 + 2],
                            preferred_element_type=jnp.float32, precision=prec)

    # ---- ReLU -> 1x1 conv -> residual add (elementwise kept in f32) ----
    h = jnp.maximum(acc, 0.0)
    y = jnp.dot(h.astype(mxu_dtype), w2_ref[...],
                preferred_element_type=jnp.float32, precision=prec)
    o_ref[...] = (x_tile + y).astype(o_ref.dtype)


def _pick_tile_h(H, W):
    """Largest divisor TH of H with TH*W <= 128 rows: keeps the f32 acc /
    shifted bands comfortably inside the 64-vreg file (per-grid-step overhead
    is only ~0.35us, so finer tiles are cheap)."""
    best = 1
    for th in range(1, H + 1):
        if H % th == 0 and th * W <= 128:
            best = th
    return best


def residual_layer_pallas_nhwc(x_nhwc, w1_oihw, w2_oihw, *,
                               tile_h=None, mxu_dtype=jnp.bfloat16):
    """NHWC-native ResidualLayer forward (preferred entry point)."""
    B, H, W, C = x_nhwc.shape
    assert w1_oihw.shape == (C, C, 3, 3), w1_oihw.shape
    assert w2_oihw.shape[:2] == (C, C), w2_oihw.shape

    TH = _pick_tile_h(H, W) if tile_h is None else tile_h
    assert H % TH == 0, (H, TH)
    n_h = H // TH
    rows = TH * W

    # Conv weights -> MXU-friendly layouts (tiny; cast to the MXU operand dtype).
    #   3x3: OIHW -> (kh*kw, Cin, Cout);  1x1: OIHW -> (Cin, Cout)
    w1 = jnp.transpose(w1_oihw, (2, 3, 1, 0)).reshape(9, C, C).astype(mxu_dtype)
    w2 = jnp.transpose(w2_oihw[:, :, 0, 0], (1, 0)).astype(mxu_dtype)

    # Free metadata reshape: kernel sees one lane-dense (H*W, C) slab per image.
    x_flat = x_nhwc.reshape(B, H * W, C)

    # Explicit VMEM budget (v7x only has 64 MiB physical / 32 MiB default scoped):
    # halo'd input scratch + double-buffered output block + resident weights (x2).
    a_sz = x_nhwc.dtype.itemsize
    w_sz = jnp.dtype(mxu_dtype).itemsize
    vmem_needed = ((TH + 2) * W * C * a_sz
                   + 2 * rows * C * a_sz
                   + 2 * 10 * C * C * w_sz)
    vmem_limit = int(min(max(2 * vmem_needed + (4 << 20), 8 << 20), 48 << 20))

    kernel = functools.partial(_residual_kernel, TH=TH, W=W, C=C, H=H,
                               mxu_dtype=mxu_dtype)

    out_flat = pl.pallas_call(
        kernel,
        out_shape=jax.ShapeDtypeStruct((B, H * W, C), x_nhwc.dtype),
        grid_spec=pltpu.PrefetchScalarGridSpec(
            num_scalar_prefetch=0,
            grid=(B, n_h),
            in_specs=[
                pl.BlockSpec(memory_space=pl.ANY),                 # x stays in HBM
                pl.BlockSpec((9, C, C), lambda b, i: (0, 0, 0)),   # resident weights
                pl.BlockSpec((C, C), lambda b, i: (0, 0)),
            ],
            out_specs=pl.BlockSpec((None, rows, C), lambda b, i: (b, i, 0)),
            scratch_shapes=[
                pltpu.VMEM(((TH + 2) * W, C), x_nhwc.dtype),       # halo'd x tile
                pltpu.SemaphoreType.DMA((3,)),
            ]),
        compiler_params=pltpu.CompilerParams(
            dimension_semantics=("parallel", "parallel"),
            vmem_limit_bytes=vmem_limit),
    )(x_flat, w1, w2)

    return out_flat.reshape(B, H, W, C)


def residual_layer_pallas(x_nchw, w1_oihw, w2_oihw, **kw):
    """PyTorch-layout (NCHW) entry point matching ResidualLayer.forward.

    The NCHW<->NHWC transposes here are demo-boundary glue only; an NHWC
    pipeline should call residual_layer_pallas_nhwc directly and skip both.
    """
    x_nhwc = jnp.transpose(x_nchw, (0, 2, 3, 1))
    out_nhwc = residual_layer_pallas_nhwc(x_nhwc, w1_oihw, w2_oihw, **kw)
    return jnp.transpose(out_nhwc, (0, 3, 1, 2))


def _reference_jax(x_nchw, w1_oihw, w2_oihw):
    """Pure-JAX reference (lax convs, highest precision) for correctness."""
    dn = lax.conv_dimension_numbers(x_nchw.shape, w1_oihw.shape,
                                    ("NCHW", "OIHW", "NCHW"))
    h = lax.conv_general_dilated(x_nchw, w1_oihw, (1, 1), ((1, 1), (1, 1)),
                                 dimension_numbers=dn,
                                 precision=lax.Precision.HIGHEST)
    h = jnp.maximum(h, 0.0)
    y = lax.conv_general_dilated(h, w2_oihw, (1, 1), ((0, 0), (0, 0)),
                                 dimension_numbers=dn,
                                 precision=lax.Precision.HIGHEST)
    return x_nchw + y


if __name__ == "__main__":
    # C=128 keeps the channel (lane) axis dense, per the perf review; spatial /
    # batch kept small so the demo is quick.
    B, C, H, W = 2, 128, 16, 16

    key = jax.random.PRNGKey(0)
    kx, k1, k2 = jax.random.split(key, 3)
    x = jax.random.normal(kx, (B, C, H, W), dtype=jnp.float32)
    w1 = jax.random.normal(k1, (C, C, 3, 3), dtype=jnp.float32) * 0.1   # OIHW, no bias
    w2 = jax.random.normal(k2, (C, C, 1, 1), dtype=jnp.float32) * 0.1   # OIHW, no bias

    ref = _reference_jax(x, w1, w2)

    # 1) f32 MXU operands, 2 row-tiles: tight check of taps / halo / tiling logic.
    out_f32 = jax.block_until_ready(
        residual_layer_pallas(x, w1, w2, mxu_dtype=jnp.float32))
    assert out_f32.shape == (B, C, H, W)
    assert jnp.allclose(out_f32, ref, rtol=1e-3, atol=1e-3), "f32 mismatch vs reference"

    # 2) Default fast path: bf16 MXU operands with f32 accumulation (looser,
    #    normalized tolerance for the reduced-precision matmuls).
    out_bf16 = jax.block_until_ready(residual_layer_pallas(x, w1, w2, tile_h=8))
    rel_err = float(jnp.max(jnp.abs(out_bf16 - ref)) / jnp.max(jnp.abs(ref)))
    assert rel_err < 3e-2, f"bf16 mismatch vs reference (rel_err={rel_err})"

    # 3) Single-tile config (TH == H) exercises the n_h == 1 halo path.
    out_one = jax.block_until_ready(
        residual_layer_pallas(x, w1, w2, tile_h=16, mxu_dtype=jnp.float32))
    assert jnp.allclose(out_one, ref, rtol=1e-3, atol=1e-3), "single-tile mismatch"

    print("KERNEL_OK")
</pallas_src>

<mosaic_0001>
module attributes {stable_mosaic.version = 11 : i64} {
  func.func @_residual_kernel(%arg0: i32, %arg1: i32, %arg2: memref<2x256x128xf32, #tpu.memory_space<any>>, %arg3: memref<9x128x128xf32, #tpu.memory_space<vmem>>, %arg4: memref<128x128xf32, #tpu.memory_space<vmem>>, %arg5: memref<1x128x128xf32, #tpu.memory_space<vmem>>, %arg6: memref<160x128xf32, #tpu.memory_space<vmem>>, %arg7: memref<3x!tpu.dma_semaphore, #tpu.memory_space<semaphore_mem>>) attributes {dimension_semantics = [#tpu.dimension_semantics<parallel>, #tpu.dimension_semantics<parallel>], iteration_bounds = array<i64: 2, 2>, scalar_prefetch = 0 : i64, scratch_operands = 2 : i64, tpu.core_type = #tpu.core_type<tc>, window_params = [{}, {pipeline_mode = #tpu.pipeline_mode<synchronous>, transform_indices = @transform_1, window_bounds = array<i64: 9, 128, 128>}, {pipeline_mode = #tpu.pipeline_mode<synchronous>, transform_indices = @transform_2, window_bounds = array<i64: 128, 128>}, {transform_indices = @transform_3, window_bounds = array<i64: 1, 128, 128>}]} {
    %c8_i32 = arith.constant 8 : i32
    %0 = arith.muli %arg1, %c8_i32 : i32
    %c16_i32 = arith.constant 16 : i32
    %1 = arith.muli %0, %c16_i32 : i32
    %2 = tpu.assume_multiple %1, 128 : i32
    %c1_i32 = arith.constant 1 : i32
    %3 = arith.subi %0, %c1_i32 : i32
    %c0_i32 = arith.constant 0 : i32
    %4 = arith.maxsi %3, %c0_i32 : i32
    %c16_i32_0 = arith.constant 16 : i32
    %5 = arith.muli %4, %c16_i32_0 : i32
    %c8_i32_1 = arith.constant 8 : i32
    %6 = arith.addi %0, %c8_i32_1 : i32
    %c15_i32 = arith.constant 15 : i32
    %7 = arith.minsi %6, %c15_i32 : i32
    %c16_i32_2 = arith.constant 16 : i32
    %8 = arith.muli %7, %c16_i32_2 : i32
    %c0_i32_3 = arith.constant 0 : i32
    %c0_i32_4 = arith.constant 0 : i32
    %9 = tpu.memref_slice %arg2[%arg0, %2, %c0_i32_4] : memref<2x256x128xf32, #tpu.memory_space<any>> -> memref<1x128x128xf32, #tpu.memory_space<any>>
    %10 = tpu.memref_squeeze %9 : memref<1x128x128xf32, #tpu.memory_space<any>> -> memref<128x128xf32, #tpu.memory_space<any>>
    %c16_i32_5 = arith.constant 16 : i32
    %c0_i32_6 = arith.constant 0 : i32
    %11 = tpu.memref_slice %arg6[%c16_i32_5, %c0_i32_6] : memref<160x128xf32, #tpu.memory_space<vmem>> -> memref<128x128xf32, #tpu.memory_space<vmem>>
    %12 = tpu.memref_slice %arg7[%c0_i32_3] : memref<3x!tpu.dma_semaphore, #tpu.memory_space<semaphore_mem>> -> memref<1x!tpu.dma_semaphore, #tpu.memory_space<semaphore_mem>>
    %13 = tpu.memref_squeeze %12 : memref<1x!tpu.dma_semaphore, #tpu.memory_space<semaphore_mem>> -> memref<!tpu.dma_semaphore, #tpu.memory_space<semaphore_mem>>
    tpu.enqueue_dma source(%10 : memref<128x128xf32, #tpu.memory_space<any>>) target(%11 : memref<128x128xf32, #tpu.memory_space<vmem>>) target_semaphore(%13 : memref<!tpu.dma_semaphore, #tpu.memory_space<semaphore_mem>>)
    %c1_i32_7 = arith.constant 1 : i32
    %c0_i32_8 = arith.constant 0 : i32
    %14 = tpu.memref_slice %arg2[%arg0, %5, %c0_i32_8] : memref<2x256x128xf32, #tpu.memory_space<any>> -> memref<1x16x128xf32, #tpu.memory_space<any>>
    %15 = tpu.memref_squeeze %14 : memref<1x16x128xf32, #tpu.memory_space<any>> -> memref<16x128xf32, #tpu.memory_space<any>>
    %c0_i32_9 = arith.constant 0 : i32
    %c0_i32_10 = arith.constant 0 : i32
    %16 = tpu.memref_slice %arg6[%c0_i32_9, %c0_i32_10] : memref<160x128xf32, #tpu.memory_space<vmem>> -> memref<16x128xf32, #tpu.memory_space<vmem>>
    %17 = tpu.memref_slice %arg7[%c1_i32_7] : memref<3x!tpu.dma_semaphore, #tpu.memory_space<semaphore_mem>> -> memref<1x!tpu.dma_semaphore, #tpu.memory_space<semaphore_mem>>
    %18 = tpu.memref_squeeze %17 : memref<1x!tpu.dma_semaphore, #tpu.memory_space<semaphore_mem>> -> memref<!tpu.dma_semaphore, #tpu.memory_space<semaphore_mem>>
    tpu.enqueue_dma source(%15 : memref<16x128xf32, #tpu.memory_space<any>>) target(%16 : memref<16x128xf32, #tpu.memory_space<vmem>>) target_semaphore(%18 : memref<!tpu.dma_semaphore, #tpu.memory_space<semaphore_mem>>)
    %c2_i32 = arith.constant 2 : i32
    %c0_i32_11 = arith.constant 0 : i32
    %19 = tpu.memref_slice %arg2[%arg0, %8, %c0_i32_11] : memref<2x256x128xf32, #tpu.memory_space<any>> -> memref<1x16x128xf32, #tpu.memory_space<any>>
    %20 = tpu.memref_squeeze %19 : memref<1x16x128xf32, #tpu.memory_space<any>> -> memref<16x128xf32, #tpu.memory_space<any>>
    %c144_i32 = arith.constant 144 : i32
    %c0_i32_12 = arith.constant 0 : i32
    %21 = tpu.memref_slice %arg6[%c144_i32, %c0_i32_12] : memref<160x128xf32, #tpu.memory_space<vmem>> -> memref<16x128xf32, #tpu.memory_space<vmem>>
    %22 = tpu.memref_slice %arg7[%c2_i32] : memref<3x!tpu.dma_semaphore, #tpu.memory_space<semaphore_mem>> -> memref<1x!tpu.dma_semaphore, #tpu.memory_space<semaphore_mem>>
    %23 = tpu.memref_squeeze %22 : memref<1x!tpu.dma_semaphore, #tpu.memory_space<semaphore_mem>> -> memref<!tpu.dma_semaphore, #tpu.memory_space<semaphore_mem>>
    tpu.enqueue_dma source(%20 : memref<16x128xf32, #tpu.memory_space<any>>) target(%21 : memref<16x128xf32, #tpu.memory_space<vmem>>) target_semaphore(%23 : memref<!tpu.dma_semaphore, #tpu.memory_space<semaphore_mem>>)
    %c0_i32_13 = arith.constant 0 : i32
    %c0_i32_14 = arith.constant 0 : i32
    %24 = tpu.memref_slice %arg2[%arg0, %2, %c0_i32_14] : memref<2x256x128xf32, #tpu.memory_space<any>> -> memref<1x128x128xf32, #tpu.memory_space<any>>
    %25 = tpu.memref_squeeze %24 : memref<1x128x128xf32, #tpu.memory_space<any>> -> memref<128x128xf32, #tpu.memory_space<any>>
    %c16_i32_15 = arith.constant 16 : i32
    %c0_i32_16 = arith.constant 0 : i32
    %26 = tpu.memref_slice %arg6[%c16_i32_15, %c0_i32_16] : memref<160x128xf32, #tpu.memory_space<vmem>> -> memref<128x128xf32, #tpu.memory_space<vmem>>
    %27 = tpu.memref_slice %arg7[%c0_i32_13] : memref<3x!tpu.dma_semaphore, #tpu.memory_space<semaphore_mem>> -> memref<1x!tpu.dma_semaphore, #tpu.memory_space<semaphore_mem>>
    %28 = tpu.memref_squeeze %27 : memref<1x!tpu.dma_semaphore, #tpu.memory_space<semaphore_mem>> -> memref<!tpu.dma_semaphore, #tpu.memory_space<semaphore_mem>>
    tpu.wait_dma2 semaphore(%28 : memref<!tpu.dma_semaphore, #tpu.memory_space<semaphore_mem>>) src(%25 : memref<128x128xf32, #tpu.memory_space<any>>) dst(%26 : memref<128x128xf32, #tpu.memory_space<vmem>>)
    %c1_i32_17 = arith.constant 1 : i32
    %c0_i32_18 = arith.constant 0 : i32
    %29 = tpu.memref_slice %arg2[%arg0, %5, %c0_i32_18] : memref<2x256x128xf32, #tpu.memory_space<any>> -> memref<1x16x128xf32, #tpu.memory_space<any>>
    %30 = tpu.memref_squeeze %29 : memref<1x16x128xf32, #tpu.memory_space<any>> -> memref<16x128xf32, #tpu.memory_space<any>>
    %c0_i32_19 = arith.constant 0 : i32
    %c0_i32_20 = arith.constant 0 : i32
    %31 = tpu.memref_slice %arg6[%c0_i32_19, %c0_i32_20] : memref<160x128xf32, #tpu.memory_space<vmem>> -> memref<16x128xf32, #tpu.memory_space<vmem>>
    %32 = tpu.memref_slice %arg7[%c1_i32_17] : memref<3x!tpu.dma_semaphore, #tpu.memory_space<semaphore_mem>> -> memref<1x!tpu.dma_semaphore, #tpu.memory_space<semaphore_mem>>
    %33 = tpu.memref_squeeze %32 : memref<1x!tpu.dma_semaphore, #tpu.memory_space<semaphore_mem>> -> memref<!tpu.dma_semaphore, #tpu.memory_space<semaphore_mem>>
    tpu.wait_dma2 semaphore(%33 : memref<!tpu.dma_semaphore, #tpu.memory_space<semaphore_mem>>) src(%30 : memref<16x128xf32, #tpu.memory_space<any>>) dst(%31 : memref<16x128xf32, #tpu.memory_space<vmem>>)
    %c2_i32_21 = arith.constant 2 : i32
    %c0_i32_22 = arith.constant 0 : i32
    %34 = tpu.memref_slice %arg2[%arg0, %8, %c0_i32_22] : memref<2x256x128xf32, #tpu.memory_space<any>> -> memref<1x16x128xf32, #tpu.memory_space<any>>
    %35 = tpu.memref_squeeze %34 : memref<1x16x128xf32, #tpu.memory_space<any>> -> memref<16x128xf32, #tpu.memory_space<any>>
    %c144_i32_23 = arith.constant 144 : i32
    %c0_i32_24 = arith.constant 0 : i32
    %36 = tpu.memref_slice %arg6[%c144_i32_23, %c0_i32_24] : memref<160x128xf32, #tpu.memory_space<vmem>> -> memref<16x128xf32, #tpu.memory_space<vmem>>
    %37 = tpu.memref_slice %arg7[%c2_i32_21] : memref<3x!tpu.dma_semaphore, #tpu.memory_space<semaphore_mem>> -> memref<1x!tpu.dma_semaphore, #tpu.memory_space<semaphore_mem>>
    %38 = tpu.memref_squeeze %37 : memref<1x!tpu.dma_semaphore, #tpu.memory_space<semaphore_mem>> -> memref<!tpu.dma_semaphore, #tpu.memory_space<semaphore_mem>>
    tpu.wait_dma2 semaphore(%38 : memref<!tpu.dma_semaphore, #tpu.memory_space<semaphore_mem>>) src(%35 : memref<16x128xf32, #tpu.memory_space<any>>) dst(%36 : memref<16x128xf32, #tpu.memory_space<vmem>>)
    %c0_i32_25 = arith.constant 0 : i32
    %39 = arith.cmpi eq, %arg1, %c0_i32_25 : i32
    %40 = arith.extui %39 : i1 to i32
    %c0_i32_26 = arith.constant 0 : i32
    %41 = arith.cmpi ne, %40, %c0_i32_26 : i32
    scf.if %41 {
      %cst_86 = arith.constant 0.000000e+00 : f32
      %144 = vector.broadcast %cst_86 : f32 to vector<16x128xf32>
      %c0_87 = arith.constant 0 : index
      %c0_88 = arith.constant 0 : index
      %145 = vector.load %arg6[%c0_87, %c0_88] : memref<160x128xf32, #tpu.memory_space<vmem>>, vector<16x128xf32>
      tpu.vector_store %arg6[%c0_87, %c0_88], %144 {strides = array<i32>} : memref<160x128xf32, #tpu.memory_space<vmem>>, vector<16x128xf32>,
    } else {
    }
    %c1_i32_27 = arith.constant 1 : i32
    %42 = arith.cmpi eq, %arg1, %c1_i32_27 : i32
    %43 = arith.extui %42 : i1 to i32
    %c0_i32_28 = arith.constant 0 : i32
    %44 = arith.cmpi ne, %43, %c0_i32_28 : i32
    scf.if %44 {
      %cst_86 = arith.constant 0.000000e+00 : f32
      %144 = vector.broadcast %cst_86 : f32 to vector<16x128xf32>
      %c144 = arith.constant 144 : index
      %c0_87 = arith.constant 0 : index
      %145 = vector.load %arg6[%c144, %c0_87] : memref<160x128xf32, #tpu.memory_space<vmem>>, vector<16x128xf32>
      tpu.vector_store %arg6[%c144, %c0_87], %144 {strides = array<i32>} : memref<160x128xf32, #tpu.memory_space<vmem>>, vector<16x128xf32>,
    } else {
    }
    %45 = tpu.iota {dimensions = array<i32: 0>} : vector<128x1xi32>
    %c16_i32_29 = arith.constant 16 : i32
    %c0_i32_30 = arith.constant 0 : i32
    %46 = arith.cmpi eq, %c16_i32_29, %c0_i32_30 : i32
    %c1_i32_31 = arith.constant 1 : i32
    %47 = arith.select %46, %c1_i32_31, %c16_i32_29 : i32
    %48 = vector.broadcast %47 : i32 to vector<128x1xi32>
    %49 = arith.remsi %45, %48 : vector<128x1xi32>
    %c0_i32_32 = arith.constant 0 : i32
    %50 = vector.broadcast %c0_i32_32 : i32 to vector<128x1xi32>
    %51 = arith.cmpi ne, %49, %50 : vector<128x1xi32>
    %c0_i32_33 = arith.constant 0 : i32
    %52 = vector.broadcast %c0_i32_33 : i32 to vector<128x1xi32>
    %53 = arith.cmpi slt, %49, %52 : vector<128x1xi32>
    %c0_i32_34 = arith.constant 0 : i32
    %54 = arith.cmpi slt, %47, %c0_i32_34 : i32
    %55 = vector.broadcast %54 : i1 to vector<128x1xi1>
    %56 = vector.broadcast %55 : vector<128x1xi1> to vector<128x1xi1>
    %57 = arith.xori %53, %56 : vector<128x1xi1>
    %58 = arith.andi %57, %51 : vector<128x1xi1>
    %59 = vector.broadcast %47 : i32 to vector<128x1xi32>
    %60 = arith.addi %49, %59 : vector<128x1xi32>
    %61 = arith.select %58, %60, %49 : vector<128x1xi1>, vector<128x1xi32>
    %c0_i32_35 = arith.constant 0 : i32
    %62 = vector.broadcast %c0_i32_35 : i32 to vector<128x1xi32>
    %63 = arith.cmpi sgt, %61, %62 : vector<128x1xi32>
    %c15_i32_36 = arith.constant 15 : i32
    %64 = vector.broadcast %c15_i32_36 : i32 to vector<128x1xi32>
    %65 = arith.cmpi slt, %61, %64 : vector<128x1xi32>
    %cst = arith.constant 0.000000e+00 : f32
    %66 = vector.broadcast %cst : f32 to vector<128x128xf32>
    %c0 = arith.constant 0 : index
    %c0_37 = arith.constant 0 : index
    %67 = vector.load %arg6[%c0, %c0_37] : memref<160x128xf32, #tpu.memory_space<vmem>>, vector<128x128xf32>
    %c1_i32_38 = arith.constant 1 : i32
    %68 = tpu.dynamic_rotate %67 by %c1_i32_38 dim 0 : vector<128x128xf32>, i32 -> vector<128x128xf32>
    %cst_39 = arith.constant 0.000000e+00 : f32
    %69 = vector.shape_cast %63 : vector<128x1xi1> to vector<128x1xi1>
    %70 = vector.broadcast %69 : vector<128x1xi1> to vector<128x128xi1>
    %71 = vector.broadcast %cst_39 : f32 to vector<128x128xf32>
    %72 = arith.select %70, %68, %71 : vector<128x128xi1>, vector<128x128xf32>
    %c127_i32 = arith.constant 127 : i32
    %73 = tpu.dynamic_rotate %67 by %c127_i32 dim 0 : vector<128x128xf32>, i32 -> vector<128x128xf32>
    %cst_40 = arith.constant 0.000000e+00 : f32
    %74 = vector.shape_cast %65 : vector<128x1xi1> to vector<128x1xi1>
    %75 = vector.broadcast %74 : vector<128x1xi1> to vector<128x128xi1>
    %76 = vector.broadcast %cst_40 : f32 to vector<128x128xf32>
    %77 = arith.select %75, %73, %76 : vector<128x128xi1>, vector<128x128xf32>
    %c0_41 = arith.constant 0 : index
    %c0_42 = arith.constant 0 : index
    %c0_43 = arith.constant 0 : index
    %78 = vector.load %arg3[%c0_41, %c0_42, %c0_43] : memref<9x128x128xf32, #tpu.memory_space<vmem>>, vector<1x128x128xf32>
    %79 = vector.shape_cast %78 : vector<1x128x128xf32> to vector<128x128xf32>
    %cst_44 = arith.constant dense<0.000000e+00> : vector<128x128xf32>
    %80 = tpu.matmul %72, %79, %cst_44 {dimension_numbers = #tpu.dot_dimension_numbers<[1], [0], [0], [1], [0, 0, 1, 1], [], []>, precision = #tpu.contract_precision<fp32>} : vector<128x128xf32>, vector<128x128xf32>, vector<128x128xf32> -> vector<128x128xf32>
    %81 = arith.addf %66, %80 : vector<128x128xf32>
    %c1 = arith.constant 1 : index
    %c0_45 = arith.constant 0 : index
    %c0_46 = arith.constant 0 : index
    %82 = vector.load %arg3[%c1, %c0_45, %c0_46] : memref<9x128x128xf32, #tpu.memory_space<vmem>>, vector<1x128x128xf32>
    %83 = vector.shape_cast %82 : vector<1x128x128xf32> to vector<128x128xf32>
    %cst_47 = arith.constant dense<0.000000e+00> : vector<128x128xf32>
    %84 = tpu.matmul %67, %83, %cst_47 {dimension_numbers = #tpu.dot_dimension_numbers<[1], [0], [0], [1], [0, 0, 1, 1], [], []>, precision = #tpu.contract_precision<fp32>} : vector<128x128xf32>, vector<128x128xf32>, vector<128x128xf32> -> vector<128x128xf32>
    %85 = arith.addf %81, %84 : vector<128x128xf32>
    %c2 = arith.constant 2 : index
    %c0_48 = arith.constant 0 : index
    %c0_49 = arith.constant 0 : index
    %86 = vector.load %arg3[%c2, %c0_48, %c0_49] : memref<9x128x128xf32, #tpu.memory_space<vmem>>, vector<1x128x128xf32>
    %87 = vector.shape_cast %86 : vector<1x128x128xf32> to vector<128x128xf32>
    %cst_50 = arith.constant dense<0.000000e+00> : vector<128x128xf32>
    %88 = tpu.matmul %77, %87, %cst_50 {dimension_numbers = #tpu.dot_dimension_numbers<[1], [0], [0], [1], [0, 0, 1, 1], [], []>, precision = #tpu.contract_precision<fp32>} : vector<128x128xf32>, vector<128x128xf32>, vector<128x128xf32> -> vector<128x128xf32>
    %89 = arith.addf %85, %88 : vector<128x128xf32>
    %c16 = arith.constant 16 : index
    %c0_51 = arith.constant 0 : index
    %90 = vector.load %arg6[%c16, %c0_51] : memref<160x128xf32, #tpu.memory_space<vmem>>, vector<128x128xf32>
    %c1_i32_52 = arith.constant 1 : i32
    %91 = tpu.dynamic_rotate %90 by %c1_i32_52 dim 0 : vector<128x128xf32>, i32 -> vector<128x128xf32>
    %cst_53 = arith.constant 0.000000e+00 : f32
    %92 = vector.shape_cast %63 : vector<128x1xi1> to vector<128x1xi1>
    %93 = vector.broadcast %92 : vector<128x1xi1> to vector<128x128xi1>
    %94 = vector.broadcast %cst_53 : f32 to vector<128x128xf32>
    %95 = arith.select %93, %91, %94 : vector<128x128xi1>, vector<128x128xf32>
    %c127_i32_54 = arith.constant 127 : i32
    %96 = tpu.dynamic_rotate %90 by %c127_i32_54 dim 0 : vector<128x128xf32>, i32 -> vector<128x128xf32>
    %cst_55 = arith.constant 0.000000e+00 : f32
    %97 = vector.shape_cast %65 : vector<128x1xi1> to vector<128x1xi1>
    %98 = vector.broadcast %97 : vector<128x1xi1> to vector<128x128xi1>
    %99 = vector.broadcast %cst_55 : f32 to vector<128x128xf32>
    %100 = arith.select %98, %96, %99 : vector<128x128xi1>, vector<128x128xf32>
    %c3 = arith.constant 3 : index
    %c0_56 = arith.constant 0 : index
    %c0_57 = arith.constant 0 : index
    %101 = vector.load %arg3[%c3, %c0_56, %c0_57] : memref<9x128x128xf32, #tpu.memory_space<vmem>>, vector<1x128x128xf32>
    %102 = vector.shape_cast %101 : vector<1x128x128xf32> to vector<128x128xf32>
    %cst_58 = arith.constant dense<0.000000e+00> : vector<128x128xf32>
    %103 = tpu.matmul %95, %102, %cst_58 {dimension_numbers = #tpu.dot_dimension_numbers<[1], [0], [0], [1], [0, 0, 1, 1], [], []>, precision = #tpu.contract_precision<fp32>} : vector<128x128xf32>, vector<128x128xf32>, vector<128x128xf32> -> vector<128x128xf32>
    %104 = arith.addf %89, %103 : vector<128x128xf32>
    %c4 = arith.constant 4 : index
    %c0_59 = arith.constant 0 : index
    %c0_60 = arith.constant 0 : index
    %105 = vector.load %arg3[%c4, %c0_59, %c0_60] : memref<9x128x128xf32, #tpu.memory_space<vmem>>, vector<1x128x128xf32>
    %106 = vector.shape_cast %105 : vector<1x128x128xf32> to vector<128x128xf32>
    %cst_61 = arith.constant dense<0.000000e+00> : vector<128x128xf32>
    %107 = tpu.matmul %90, %106, %cst_61 {dimension_numbers = #tpu.dot_dimension_numbers<[1], [0], [0], [1], [0, 0, 1, 1], [], []>, precision = #tpu.contract_precision<fp32>} : vector<128x128xf32>, vector<128x128xf32>, vector<128x128xf32> -> vector<128x128xf32>
    %108 = arith.addf %104, %107 : vector<128x128xf32>
    %c5 = arith.constant 5 : index
    %c0_62 = arith.constant 0 : index
    %c0_63 = arith.constant 0 : index
    %109 = vector.load %arg3[%c5, %c0_62, %c0_63] : memref<9x128x128xf32, #tpu.memory_space<vmem>>, vector<1x128x128xf32>
    %110 = vector.shape_cast %109 : vector<1x128x128xf32> to vector<128x128xf32>
    %cst_64 = arith.constant dense<0.000000e+00> : vector<128x128xf32>
    %111 = tpu.matmul %100, %110, %cst_64 {dimension_numbers = #tpu.dot_dimension_numbers<[1], [0], [0], [1], [0, 0, 1, 1], [], []>, precision = #tpu.contract_precision<fp32>} : vector<128x128xf32>, vector<128x128xf32>, vector<128x128xf32> -> vector<128x128xf32>
    %112 = arith.addf %108, %111 : vector<128x128xf32>
    %c32 = arith.constant 32 : index
    %c0_65 = arith.constant 0 : index
    %113 = vector.load %arg6[%c32, %c0_65] : memref<160x128xf32, #tpu.memory_space<vmem>>, vector<128x128xf32>
    %c1_i32_66 = arith.constant 1 : i32
    %114 = tpu.dynamic_rotate %113 by %c1_i32_66 dim 0 : vector<128x128xf32>, i32 -> vector<128x128xf32>
    %cst_67 = arith.constant 0.000000e+00 : f32
    %115 = vector.shape_cast %63 : vector<128x1xi1> to vector<128x1xi1>
    %116 = vector.broadcast %115 : vector<128x1xi1> to vector<128x128xi1>
    %117 = vector.broadcast %cst_67 : f32 to vector<128x128xf32>
    %118 = arith.select %116, %114, %117 : vector<128x128xi1>, vector<128x128xf32>
    %c127_i32_68 = arith.constant 127 : i32
    %119 = tpu.dynamic_rotate %113 by %c127_i32_68 dim 0 : vector<128x128xf32>, i32 -> vector<128x128xf32>
    %cst_69 = arith.constant 0.000000e+00 : f32
    %120 = vector.shape_cast %65 : vector<128x1xi1> to vector<128x1xi1>
    %121 = vector.broadcast %120 : vector<128x1xi1> to vector<128x128xi1>
    %122 = vector.broadcast %cst_69 : f32 to vector<128x128xf32>
    %123 = arith.select %121, %119, %122 : vector<128x128xi1>, vector<128x128xf32>
    %c6 = arith.constant 6 : index
    %c0_70 = arith.constant 0 : index
    %c0_71 = arith.constant 0 : index
    %124 = vector.load %arg3[%c6, %c0_70, %c0_71] : memref<9x128x128xf32, #tpu.memory_space<vmem>>, vector<1x128x128xf32>
    %125 = vector.shape_cast %124 : vector<1x128x128xf32> to vector<128x128xf32>
    %cst_72 = arith.constant dense<0.000000e+00> : vector<128x128xf32>
    %126 = tpu.matmul %118, %125, %cst_72 {dimension_numbers = #tpu.dot_dimension_numbers<[1], [0], [0], [1], [0, 0, 1, 1], [], []>, precision = #tpu.contract_precision<fp32>} : vector<128x128xf32>, vector<128x128xf32>, vector<128x128xf32> -> vector<128x128xf32>
    %127 = arith.addf %112, %126 : vector<128x128xf32>
    %c7 = arith.constant 7 : index
    %c0_73 = arith.constant 0 : index
    %c0_74 = arith.constant 0 : index
    %128 = vector.load %arg3[%c7, %c0_73, %c0_74] : memref<9x128x128xf32, #tpu.memory_space<vmem>>, vector<1x128x128xf32>
    %129 = vector.shape_cast %128 : vector<1x128x128xf32> to vector<128x128xf32>
    %cst_75 = arith.constant dense<0.000000e+00> : vector<128x128xf32>
    %130 = tpu.matmul %113, %129, %cst_75 {dimension_numbers = #tpu.dot_dimension_numbers<[1], [0], [0], [1], [0, 0, 1, 1], [], []>, precision = #tpu.contract_precision<fp32>} : vector<128x128xf32>, vector<128x128xf32>, vector<128x128xf32> -> vector<128x128xf32>
    %131 = arith.addf %127, %130 : vector<128x128xf32>
    %c8 = arith.constant 8 : index
    %c0_76 = arith.constant 0 : index
    %c0_77 = arith.constant 0 : index
    %132 = vector.load %arg3[%c8, %c0_76, %c0_77] : memref<9x128x128xf32, #tpu.memory_space<vmem>>, vector<1x128x128xf32>
    %133 = vector.shape_cast %132 : vector<1x128x128xf32> to vector<128x128xf32>
    %cst_78 = arith.constant dense<0.000000e+00> : vector<128x128xf32>
    %134 = tpu.matmul %123, %133, %cst_78 {dimension_numbers = #tpu.dot_dimension_numbers<[1], [0], [0], [1], [0, 0, 1, 1], [], []>, precision = #tpu.contract_precision<fp32>} : vector<128x128xf32>, vector<128x128xf32>, vector<128x128xf32> -> vector<128x128xf32>
    %135 = arith.addf %131, %134 : vector<128x128xf32>
    %cst_79 = arith.constant 0.000000e+00 : f32
    %136 = vector.broadcast %cst_79 : f32 to vector<128x128xf32>
    %137 = arith.maximumf %135, %136 : vector<128x128xf32>
    %c0_80 = arith.constant 0 : index
    %c0_81 = arith.constant 0 : index
    %138 = vector.load %arg4[%c0_80, %c0_81] : memref<128x128xf32, #tpu.memory_space<vmem>>, vector<128x128xf32>
    %cst_82 = arith.constant dense<0.000000e+00> : vector<128x128xf32>
    %139 = tpu.matmul %137, %138, %cst_82 {dimension_numbers = #tpu.dot_dimension_numbers<[1], [0], [0], [1], [0, 0, 1, 1], [], []>, precision = #tpu.contract_precision<fp32>} : vector<128x128xf32>, vector<128x128xf32>, vector<128x128xf32> -> vector<128x128xf32>
    %140 = arith.addf %90, %139 : vector<128x128xf32>
    %c0_83 = arith.constant 0 : index
    %c0_84 = arith.constant 0 : index
    %c0_85 = arith.constant 0 : index
    %141 = vector.load %arg5[%c0_83, %c0_84, %c0_85] : memref<1x128x128xf32, #tpu.memory_space<vmem>>, vector<1x128x128xf32>
    %142 = vector.shape_cast %141 : vector<1x128x128xf32> to vector<128x128xf32>
    %143 = vector.shape_cast %140 : vector<128x128xf32> to vector<1x128x128xf32>
    tpu.vector_store %arg5[%c0_83, %c0_84, %c0_85], %143 {strides = array<i32>} : memref<1x128x128xf32, #tpu.memory_space<vmem>>, vector<1x128x128xf32>,
    return
  }
  func.func @transform_1(%arg0: i32, %arg1: i32) -> (i32, i32, i32) {
    %c0_i32 = arith.constant 0 : i32
    %c0_i32_0 = arith.constant 0 : i32
    %c0_i32_1 = arith.constant 0 : i32
    %c0_i32_2 = arith.constant 0 : i32
    return %c0_i32, %c0_i32_0, %c0_i32_1 : i32, i32, i32
  }
  func.func @transform_2(%arg0: i32, %arg1: i32) -> (i32, i32) {
    %c0_i32 = arith.constant 0 : i32
    %c0_i32_0 = arith.constant 0 : i32
    %c0_i32_1 = arith.constant 0 : i32
    return %c0_i32, %c0_i32_0 : i32, i32
  }
  func.func @transform_3(%arg0: i32, %arg1: i32) -> (i32, i32, i32) {
    %c0_i32 = arith.constant 0 : i32
    %c0_i32_0 = arith.constant 0 : i32
    return %arg0, %arg1, %c0_i32 : i32, i32, i32
  }
}

</mosaic_0001>

<bundles_post_ra>
// kernel: tpu_custom_call.1
= control target key start
LH: loop header
LB: loop body
LE: loop exit
PB: predicated region body
PF: predicated region fallthrough
CT: control target
= control target key end

     0   :  { %s30211_s0 = inlined_call_operand.hbm [shape: f32[2,256,128], index: 0, kind: input, shape index: {}]   ;;  %s30212_s1 = inlined_call_operand.hbm [shape: f32[9,128,128], index: 1, kind: input, shape index: {}]   ;;  %s30213_s2 = inlined_call_operand.hbm [shape: f32[128,128], index: 2, kind: input, shape index: {}]   ;;  %s30214_s3 = inlined_call_operand.hbm [shape: f32[2,256,128], index: 3, kind: output, shape index: {}]  }
   0x1   :  { %31306 = sst [smem:[#allocation150_spill]] %s30212_s1 }
   0x2   :  { %31307 = sst [smem:[#allocation151_spill]] %s30213_s2 }
   0x3   :  { %8 = vsyncpa [#allocation5], 0 }
   0x4   :  { %9 = vsyncpa [#allocation8], 0 }
   0x5   :  { %10 = vsyncpa [#allocation6], 0 }
   0x6   :  { %12 = vsyncpa [#allocation6 + $0x1], 0  ;;  %s22839_s12 = smov 0   ;;  %s22841_s13 = smov 0  }
   0x7   :  { %s22843_s14 = smov 0   ;;  %s22845_s15 = smov 0  }
   0x8   :  { %s22847_s16 = smov 0   ;;  %s22849_s17 = smov 0  }
   0x9   :  { %s22851_s18 = smov 0   ;;  %s22853_s19 = smov 0  }
   0xa LB: > { %31308 = sst [smem:[#allocation24_spill]] %s22797_s17  ;;  %s14213_s20 = sadd.s32 4294967295, %s22805_s19   ;;  %s22805_s19 = sphi %s22853_s19, %s18_s19   ;;  %s22801_s18 = sphi %s22851_s18, %s33416_s18   ;;  %s22797_s17 = sphi %s22849_s17, %s33415_s17   ;;  %s22793_s16 = sphi %s22847_s16, %s33414_s16   ;;  %s22789_s15 = sphi %s22845_s15, %s33413_s15   ;;  %s22785_s14 = sphi %s22843_s14, %s33419_s14   ;;  %s22781_s13 = sphi %s22841_s13, %s33418_s13   ;;  %s22777_s12 = sphi %s22839_s12, %s33417_s12  }
   0xb   : > { %31309 = sst [smem:[#allocation25_spill]] %s22801_s18  ;;  %s14214_s21 = sadd.s32 4294967294, %s22805_s19  }
   0xc   : > { %s27_s22 = sadd.s32 1, %s22797_s17  ;;  %s30_s23 = sadd.s32 1, %s22801_s18 }
   0xd   : > { %p28_p0 = scmp.ge.s32.totalorder %s27_s22, 2  ;;  %s81_s24 = sadd.s32 1, %s22785_s14 }
   0xe   : > { %p91_p1 = scmp.ne.s32.totalorder %s22785_s14, %s22781_s13  ;;  %p92_p2 = scmp.eq.s32.totalorder %s14213_s20, 3 }
   0xf   : > { %s33421_s22 = smov (%p28_p0, %s27_s22), 0  ;;  %s33423_s23 = smov (!%p28_p0, %s30_s23), %s22801_s18 }
  0x10   : > { %31310 = sst [smem:[#allocation26_spill]] %s33421_s22  ;;  %s77_s25 = ssub.s32 %s22797_s17, %s33421_s22 }
  0x11   : > { %p22891_p3 = por %p92_p2, %p91_p1  ;;  %p32_p4 = scmp.ge.s32.totalorder %s33423_s23, 2 }
  0x12   : > { %p97_p5 = scmp.ne.s32.totalorder %s22781_s13, %s22777_s12  ;;  %p98_p6 = scmp.eq.s32.totalorder %s14214_s21, 3 }
  0x13   : > { %s31311_s26 = scalar_select %p22891_p3, 1, 0 }
  0x14   : > { %p14215_p7 = scmp.ge.s32.totalorder %s22805_s19, 1  ;;  %s33425_s23 = smov (%p32_p4, %s33423_s23), 0 }
  0x15   : > { %31312 = sst [smem:[#allocation27_spill]] %s33425_s23  ;;  %p22900_p8 = por %p98_p6, %p97_p5 }
  0x16   : > { %p105_p9 = scmp.lt.s32.totalorder %s22805_s19, 5  ;;  %s76_s28 = ssub.s32 %s22801_s18, %s33425_s23 }
  0x17   : > { %s31313_s27 = scalar_select %p22900_p8, 1, 0 }
  0x18   : > { %s78_s29 = sor.u32 %s77_s25, %s76_s28  ;;  %p22907_p10 = pnand %p14215_p7, %p105_p9 }
  0x19   : > { %p79_p11 = scmp.eq.s32.totalorder %s78_s29, 0  ;;  %p22911_p12 = scmp.eq.s32.totalorder %s14213_s20, 0 }
  0x1a   : > { %s31314_s30 = scalar_select %p22907_p10, 1, 0 }
  0x1b   : > { %s31315_s4 = scalar_select %p22911_p12, 1, 0 }
  0x1c   : > { %p22380_p13 = pneg %p22907_p10  ;;  %s22807_s6 = smov [#allocation4]  }
  0x1d   : > { %s22918_s5 = scalar_select %p79_p11, %s22785_s14, %s81_s24  }
  0x1e   : > { %s117_s7 = sshll.u32 %s22807_s6, 4  ;;  %p22922_p0 = pnand %p22911_p12, %p22380_p13  ;;  %s118_s7 = int_to_ptr.vmem [resolvable:$true] %s117_s7 }
  0x1f   : > { %s31317_s1 = sld [smem:[#allocation150_spill]] }
  0x20   : > { %p22571_p2 = pneg %p22922_p0 }
  0x25   : > { %s22569_s11 = scalar_lea.hbm %s31317_s1, 18432 }
  0x26   : > { %p22570_p1 = scmp.ne.s32.totalorder %s31317_s1, %s22569_s11  ;;  %p22576_p6 = scmp.lt.u32.totalorder %s22569_s11, %s31317_s1 }
  0x28   : > { %p22572_p4 = pnand %p22571_p2, %p22570_p1 }
  0x2a   : > { %p22573_p5 = pneg %p22572_p4 }
  0x2c   : > { %p22578_p7 = pnand %p22576_p6, %p22573_p5 }
  0x2e   : > { %22581 = shalt.err (!%p22578_p7)
}
  0x2f   : > { %s22582_s28 = scalar_lea.vmem %s118_s7, 18432  ;;  %p22590_p8 = scmp.lt.s32.totalorder %s118_s7, %s118_s7 }
  0x30   : > { %p22583_p9 = scmp.ne.s32.totalorder %s118_s7, %s22582_s28  ;;  %p22591_p3 = scmp.lt.s32.totalorder %s22582_s28, %s22582_s28 }
  0x32   : > { %p22585_p11 = pnand %p22583_p9, %p22571_p2  ;;  %p22592_p12 = por %p22591_p3, %p22590_p8 }
  0x34   : > { %p22586_p13 = pneg %p22585_p11 }
  0x36   : > { %p22593_p10 = pnand %p22592_p12, %p22586_p13 }
  0x38   : > { %22596 = shalt.err (!%p22593_p10)
}
  0x39   : > { %s22808_s29 = smov 128   ;;  %s22809_s6 = smov 8  }
  0x3a   : > { %22383 = dma.hbm_to_vmem [thread:$0]  (!%p22922_p0), %s31317_s1, 18432, %s118_s7, [#allocation5], %s22808_s29, %s22808_s29, %s22809_s6  }
  0x3b   : > { %s22810_s11 = smov [#allocation7]   ;;  %s31318_s2 = sld [smem:[#allocation151_spill]] }
  0x3c   : > { %s130_s20 = sshll.u32 %s22810_s11, 4  ;;  %s131_s20 = int_to_ptr.vmem [resolvable:$true] %s130_s20 }
  0x41   : > { %s22597_s25 = scalar_lea.hbm %s31318_s2, 2048 }
  0x42   : > { %p22598_p3 = scmp.ne.s32.totalorder %s31318_s2, %s22597_s25  ;;  %p22604_p12 = scmp.lt.u32.totalorder %s22597_s25, %s31318_s2 }
  0x44   : > { %p22600_p8 = pnand %p22598_p3, %p22571_p2 }
  0x46   : > { %p22601_p10 = pneg %p22600_p8 }
  0x48   : > { %p22606_p1 = pnand %p22604_p12, %p22601_p10 }
  0x4a   : > { %22609 = shalt.err (!%p22606_p1)
}
  0x4b   : > { %s22610_s7 = scalar_lea.vmem %s131_s20, 2048  ;;  %p22618_p7 = scmp.lt.s32.totalorder %s131_s20, %s131_s20 }
  0x4c   : > { %p22611_p4 = scmp.ne.s32.totalorder %s131_s20, %s22610_s7  ;;  %p22619_p9 = scmp.lt.s32.totalorder %s22610_s7, %s22610_s7 }
  0x4e   : > { %p22613_p5 = pnand %p22611_p4, %p22571_p2  ;;  %p22620_p11 = por %p22619_p9, %p22618_p7 }
  0x50   : > { %p22614_p6 = pneg %p22613_p5 }
  0x52   : > { %p22621_p13 = pnand %p22620_p11, %p22614_p6 }
  0x54   : > { %22624 = shalt.err (!%p22621_p13)
}
  0x55   : > { %22386 = dma.hbm_to_vmem [thread:$0]  (!%p22922_p0), %s31318_s2, 2048, %s131_s20, [#allocation8], %s22808_s29, %s22808_s29, %s22809_s6  }
  0x56   : > { %p31319_p3 = scmp.ne.s32.totalorder %s31314_s30, 0 }
  0x58   : > { %146 = sbr.rel (%p31319_p3) target bundleno = 1922 (0x782), region = 28 }
  0x5f   : > { %p31320_p8 = scmp.ne.s32.totalorder %s31315_s4, 0 }
  0x61   : > { %22758 = dma.done.wait (%p31320_p8), [#allocation5], 18432  }
  0x62   : > { %22760 = vsyncadd (%p31320_p8), [#allocation5], 4294948864 }
  0x63   : > { %22762 = dma.done.wait (%p31320_p8), [#allocation8], 2048  }
  0x64   : > { %22764 = vsyncadd (%p31320_p8), [#allocation8], 4294965248  ;;  %s30222_s18 = sand.u32 1, %s22781_s13   ;;  %s14223_s22 = sshll.u32 %s22789_s15, 7 }
  0x65   : > { %s22982_s30 = sshll.u32 %s30222_s18, 7  ;;  %s22985_s8 = sshll.u32 %s22793_s16, 8 }
  0x66   : > { %s179_s29 = sadd.s32 %s22985_s8, %s14223_s22  ;;  %s22811_s20 = smov [#allocation2 + $0x10]  }
  0x67   : > { %s14228_s6 = sshll.u32 %s179_s29, 4  ;;  %s190_s21 = sshll.u32 %s22811_s20, 4  ;;  %s191_s21 = int_to_ptr.vmem [resolvable:$true] %s190_s21 }
  0x68   : > { %s181_s4 = scalar_lea.hbm %s30211_s0, %s14228_s6  ;;  %s14222_s24 = sshll.u32 %s22789_s15, 3 }
  0x69   : > { %s22625_s25 = scalar_lea.hbm %s181_s4, 2048  ;;  %s22995_s23 = scalar_lea.hbm %s30211_s0, 8192 }
  0x6a   : > { %p22626_p0 = scmp.ne.s32.totalorder %s181_s4, %s22625_s25  ;;  %p22628_p2 = scmp.lt.u32.totalorder %s181_s4, %s30211_s0 }
  0x6b   : > { %p22629_p10 = scmp.lt.u32.totalorder %s22995_s23, %s22625_s25  ;;  %p22631_p1 = scmp.lt.u32.totalorder %s22625_s25, %s181_s4 }
  0x6d   : > { %p22630_p12 = por %p22629_p10, %p22628_p2 }
  0x6f   : > { %p22632_p4 = por %p22631_p1, %p22630_p12 }
  0x71   : > { %p22633_p5 = pnand %p22632_p4, %p22626_p0 }
  0x73   : > { %22636 = shalt.err (!%p22633_p5)  }
  0x74   : > { %s22637_s22 = scalar_lea.vmem %s191_s21, 2048  ;;  %s22812_s29 = smov [#allocation2]  }
  0x75   : > { %p22638_p6 = scmp.ne.s32.totalorder %s191_s21, %s22637_s22  ;;  %s22639_s6 = sshll.u32 %s22812_s29, 4  ;;  %s23001_s6 = int_to_ptr.vmem [resolvable:$false] %s22639_s6 }
  0x76   : > { %s23004_s10 = scalar_lea.vmem %s23001_s6, 2560  ;;  %p22642_p7 = scmp.lt.s32.totalorder %s191_s21, %s23001_s6 }
  0x77   : > { %p22643_p9 = scmp.lt.s32.totalorder %s23004_s10, %s22637_s22 }
  0x79   : > { %p22644_p11 = por %p22643_p9, %p22642_p7 }
  0x7b   : > { %p22645_p13 = pnand %p22644_p11, %p22638_p6 }
  0x7d   : > { %22648 = shalt.err (!%p22645_p13)  }
  0x7e   : > { %193 = dma.hbm_to_vmem [thread:$0]  %s181_s4, 2048, %s191_s21, [#allocation3] }
  0x7f   : > { %s14224_s18 = sadd.s32 4294967295, %s14222_s24  ;;  %s174_s11 = sadd.s32 8, %s14222_s24 }
  0x80   : > { %p171_p3 = scmp.gt.s32.totalorder %s14224_s18, 0  ;;  %p175_p8 = scmp.lt.s32.totalorder %s174_s11, 15 }
  0x81   : > { %s22813_s1 = smov [#allocation2 + $0x90]  }
  0x82   : > { %s33427_s18 = smov (!%p171_p3, %s14224_s18), 0  ;;  %s221_s22 = sshll.u32 %s22813_s1, 4  ;;  %s222_s22 = int_to_ptr.vmem [resolvable:$true] %s221_s22 }
  0x83   : > { %s14225_s20 = sshll.u32 %s33427_s18, 4 }
  0x84   : > { %s194_s25 = sadd.s32 %s22985_s8, %s14225_s20 }
  0x85   : > { %s14229_s28 = sshll.u32 %s194_s25, 4 }
  0x86   : > { %s196_s29 = scalar_lea.hbm %s30211_s0, %s14229_s28 }
  0x87   : > { %s22649_s2 = scalar_lea.hbm %s196_s29, 256  ;;  %p22652_p2 = scmp.lt.u32.totalorder %s196_s29, %s30211_s0 }
  0x88   : > { %p22650_p0 = scmp.ne.s32.totalorder %s196_s29, %s22649_s2  ;;  %p22653_p10 = scmp.lt.u32.totalorder %s22995_s23, %s22649_s2 }
  0x89   : > { %p22655_p1 = scmp.lt.u32.totalorder %s22649_s2, %s196_s29 }
  0x8a   : > { %p22654_p12 = por %p22653_p10, %p22652_p2 }
  0x8c   : > { %p22656_p4 = por %p22655_p1, %p22654_p12 }
  0x8e   : > { %p22657_p5 = pnand %p22656_p4, %p22650_p0 }
  0x90   : > { %22660 = shalt.err (!%p22657_p5)  }
  0x91   : > { %s22661_s21 = scalar_lea.vmem %s23001_s6, 256  ;;  %p22666_p7 = scmp.lt.s32.totalorder %s23001_s6, %s23001_s6 }
  0x92   : > { %p22662_p6 = scmp.ne.s32.totalorder %s23001_s6, %s22661_s21  ;;  %p22667_p9 = scmp.lt.s32.totalorder %s23004_s10, %s22661_s21 }
  0x94   : > { %p22668_p11 = por %p22667_p9, %p22666_p7 }
  0x96   : > { %p22669_p13 = pnand %p22668_p11, %p22662_p6 }
  0x98   : > { %22672 = shalt.err (!%p22669_p13)  }
  0x99   : > { %208 = dma.hbm_to_vmem [thread:$0]  %s196_s29, 256, %s23001_s6, [#allocation3 + $0x1] }
  0x9a   : > { %s33429_s11 = smov (!%p175_p8, %s174_s11), 15 }
  0x9b   : > { %s14226_s1 = sshll.u32 %s33429_s11, 4 }
  0x9c   : > { %s209_s2 = sadd.s32 %s22985_s8, %s14226_s1 }
  0x9d   : > { %s14230_s17 = sshll.u32 %s209_s2, 4 }
  0x9e   : > { %s211_s20 = scalar_lea.hbm %s30211_s0, %s14230_s17 }
  0x9f   : > { %s22673_s25 = scalar_lea.hbm %s211_s20, 256  ;;  %p22676_p0 = scmp.lt.u32.totalorder %s211_s20, %s30211_s0 }
  0xa0   : > { %p22674_p3 = scmp.ne.s32.totalorder %s211_s20, %s22673_s25  ;;  %p22677_p2 = scmp.lt.u32.totalorder %s22995_s23, %s22673_s25 }
  0xa1   : > { %p22679_p12 = scmp.lt.u32.totalorder %s22673_s25, %s211_s20 }
  0xa2   : > { %p22678_p10 = por %p22677_p2, %p22676_p0 }
  0xa4   : > { %p22680_p1 = por %p22679_p12, %p22678_p10 }
  0xa6   : > { %p22681_p4 = pnand %p22680_p1, %p22674_p3 }
  0xa8   : > { %22684 = shalt.err (!%p22681_p4)  }
  0xa9   : > { %s22685_s11 = scalar_lea.vmem %s222_s22, 256  ;;  %p22690_p5 = scmp.lt.s32.totalorder %s222_s22, %s23001_s6 }
  0xaa   : > { %p22686_p8 = scmp.ne.s32.totalorder %s222_s22, %s22685_s11  ;;  %p22691_p6 = scmp.lt.s32.totalorder %s23004_s10, %s22685_s11 }
  0xac   : > { %p22692_p7 = por %p22691_p6, %p22690_p5 }
  0xae   : > { %p22693_p9 = pnand %p22692_p7, %p22686_p8 }
  0xb0   : > { %22696 = shalt.err (!%p22693_p9)  }
  0xb1   : > { %224 = dma.hbm_to_vmem [thread:$0]  %s211_s20, 256, %s222_s22, [#allocation3 + $0x2] }
  0xb2   : > { %s23034_s8 = scalar_lea.vmem [#allocation9], %s22982_s30 }
  0xb3   : > { %22765 = dma.done.wait [#allocation3], 2048 }
  0xb4   : > { %22766 = vsyncadd [#allocation3], 4294965248 }
  0xb5   : > { %22767 = dma.done.wait [#allocation3 + $0x1], 256 }
  0xb6   : > { %22768 = vsyncadd [#allocation3 + $0x1], 4294967040 }
  0xb7   : > { %22769 = dma.done.wait [#allocation3 + $0x2], 256 }
  0xb8   : > { %22770 = vsyncadd [#allocation3 + $0x2], 4294967040  ;;  %p14231_p11 = scmp.ne.s32.totalorder %s22789_s15, 0 }
  0xb9   : > { %v22814_v0 = vmov (!%p14231_p11), 0.0  }
  0xba   : > { %236 = sbr.rel (%p14231_p11) target bundleno = 193 (0xc1), region = 52  ;;  %237 = vst [vmem:[#allocation2] sm:$0xff] (!%p14231_p11), %v22814_v0  ;;  %238 = vst [vmem:[#allocation2 + $0x8] sm:$0xff] (!%p14231_p11), %v22814_v0 }
  0xc1 PF: > { %p14232_p13 = scmp.ne.s32.totalorder %s22789_s15, 1 }
  0xc2   : > { %v22815_v1 = vmov (!%p14232_p13), 0.0  }
  0xc3   : > { %242 = sbr.rel (%p14232_p13) target bundleno = 202 (0xca), region = 56  ;;  %243 = vst [vmem:[#allocation2 + $0x90] sm:$0xff] (!%p14232_p13), %v22815_v1  ;;  %244 = vst [vmem:[#allocation2 + $0x98] sm:$0xff] (!%p14232_p13), %v22815_v1 }
  0xca PF: > { %v23038_v2 = vld [vmem:[#allocation4 + $0x80] sm:$0xff]  ;;  %v23040_v3 = vld [vmem:[#allocation4 + $0x88] sm:$0xff]  ;;  %v23049_v9 = vld [vmem:[#allocation4 + $0x90] sm:$0xff]  ;;  %s14234_s30 = sshll.u32 %s22789_s15, 4  ;;  %s14235_s23 = sshll.u32 %s22793_s16, 5 }
  0xcb   : > { %v23042_v4 = vld [vmem:[#allocation4 + $0x200] sm:$0xff]  ;;  %v698_v5 = vand.u32 4294901760, %v23038_v2  ;;  %v701_v6 = vand.u32 4294901760, %v23040_v3  ;;  %v23046_v7 = vld [vmem:[#allocation4 + $0x208] sm:$0xff]  ;;  %v23051_v10 = vld [vmem:[#allocation4 + $0x98] sm:$0xff]  ;;  %v30245_v12 = vand.u32 4294901760, %v23049_v9  ;;  %s14089_s6 = sadd.s32 %s14235_s23, %s14234_s30 }
  0xcc   : > { %v6037_v8 = vand.u32 4294901760, %v23042_v4  ;;  %v6040_v11 = vand.u32 4294901760, %v23046_v7  ;;  %v30242_v13 = vand.u32 4294901760, %v23051_v10  ;;  %v23056_v14 = vld [vmem:[#allocation4 + $0x210] sm:$0xff]  ;;  %v23058_v15 = vld [vmem:[#allocation4 + $0x218] sm:$0xff]  ;;  %v23060_v16 = vld [vmem:[#allocation4 + $0xa0] sm:$0xff] }
  0xcd   : > { %v23066_v17 = vpack.c.bf16 %v701_v6, %v698_v5  ;;  %v30229_v18 = vand.u32 4294901760, %v23056_v14  ;;  %v30228_v19 = vand.u32 4294901760, %v23058_v15  ;;  %v23070_v20 = vld [vmem:[#allocation4 + $0xa8] sm:$0xff]  ;;  %v30227_v21 = vand.u32 4294901760, %v23060_v16  ;;  %v23073_v22 = vld [vmem:[#allocation4 + $0x220] sm:$0xff]  ;;  %v23091_v28 = vld [vmem:[#allocation4 + $0xb0] sm:$0xff] }
  0xce   : > { %v23075_v23 = vld [vmem:[#allocation4 + $0x228] sm:$0xff]  ;;  %v23081_v24 = vpack.c.bf16 %v6040_v11, %v6037_v8  ;;  %v23087_v25 = vpack.c.bf16 %v30242_v13, %v30245_v12  ;;  %v30226_v26 = vand.u32 4294901760, %v23070_v20  ;;  %v30225_v27 = vand.u32 4294901760, %v23073_v22  ;;  %v23093_v29 = vld [vmem:[#allocation4 + $0xb8] sm:$0xff]  ;;  %v23095_v30 = vld [vmem:[#allocation4 + $0x230] sm:$0xff]  ;;  %s14236_s15 = sshll.u32 %s14089_s6, 7 }
  0xcf   : > { %31321 = vst [vmem:[#allocation28_spill] sm:$0xff] %v23066_v17  ;;  %19523 = vmatprep.subr.bf16.mxu1 %v23066_v17  ;;  %v23102_v31 = vpack.c.bf16 %v30228_v19, %v30229_v18  ;;  %v30224_v32 = vand.u32 4294901760, %v23075_v23  ;;  %v30233_v33 = vand.u32 4294901760, %v23091_v28  ;;  %v23106_v34 = vld [vmem:[#allocation4 + $0x238] sm:$0xff]  ;;  %v23108_v35 = vld [vmem:[#allocation4 + $0xc0] sm:$0xff]  ;;  %v23110_v36 = vld [vmem:[#allocation4 + $0xc8] sm:$0xff]  ;;  %s30151_s29 = scalar_lea.hbm %s30214_s3, %s14236_s15 }
  0xd0   : > { %31322 = vst [vmem:[#allocation29_spill] sm:$0xff] %v23081_v24  ;;  %31323 = vst [vmem:[#allocation30_spill] sm:$0xff] %v23087_v25  ;;  %20291 = vmatprep.subr.bf16.mxu0 %v23081_v24  ;;  %19525 = vmatpush3.bf16.msra.mxu1 %v23066_v17  ;;  %v30230_v37 = vand.u32 4294901760, %v23093_v29  ;;  %v30232_v38 = vand.u32 4294901760, %v23095_v30  ;;  %v30231_v39 = vand.u32 4294901760, %v23106_v34  ;;  %v23117_v40 = vld [vmem:[#allocation4 + $0x240] sm:$0xff]  ;;  %v23129_v43 = vpack.c.bf16 %v30226_v26, %v30227_v21 }
  0xd1   : > { %31324 = vst [vmem:[#allocation31_spill] sm:$0xff] %v23102_v31  ;;  %v23119_v41 = vld [vmem:[#allocation4 + $0x248] sm:$0xff]  ;;  %v23121_v42 = vld [vmem:[#allocation4 + $0xd0] sm:$0xff]  ;;  %20293 = vmatpush3.bf16.msra.mxu0 %v23081_v24  ;;  %19527 = vmatprep.subr.bf16.mxu1 %v23087_v25  ;;  %v30237_v44 = vand.u32 4294901760, %v23108_v35  ;;  %v30234_v45 = vand.u32 4294901760, %v23110_v36  ;;  %v30236_v46 = vand.u32 4294901760, %v23117_v40  ;;  %v23145_v50 = vpack.c.bf16 %v30224_v32, %v30225_v27 }
  0xd2   : > { %31325 = vst [vmem:[#allocation32_spill] sm:$0xff] %v23129_v43  ;;  %v23134_v47 = vld [vmem:[#allocation4 + $0xd8] sm:$0xff]  ;;  %v23136_v48 = vld [vmem:[#allocation4 + $0x250] sm:$0xff]  ;;  %20295 = vmatprep.subr.bf16.mxu0 %v23102_v31  ;;  %v30235_v51 = vand.u32 4294901760, %v23119_v41  ;;  %v30239_v52 = vand.u32 4294901760, %v23121_v42  ;;  %v23150_v54 = vld [vmem:[#allocation4 + $0xe0] sm:$0xff]  ;;  %v23174_v32 = vpack.c.bf16 %v30230_v37, %v30233_v33  ;;  %v23180_v27 = vpack.c.bf16 %v30231_v39, %v30232_v38 }
  0xd3   : > { %v23138_v49 = vld [vmem:[#allocation4 + $0x258] sm:$0xff]  ;;  %31326 = vst [vmem:[#allocation33_spill] sm:$0xff] %v23145_v50  ;;  %v30238_v53 = vand.u32 4294901760, %v23134_v47  ;;  %v23152_v55 = vld [vmem:[#allocation4 + $0xe8] sm:$0xff]  ;;  %v23154_v56 = vld [vmem:[#allocation4 + $0x260] sm:$0xff]  ;;  %v30241_v57 = vand.u32 4294901760, %v23136_v48  ;;  %v23190_v37 = vpack.c.bf16 %v30234_v45, %v30237_v44 }
  0xd4   : > { %v30240_v58 = vand.u32 4294901760, %v23138_v49  ;;  %v30244_v59 = vand.u32 4294901760, %v23150_v54  ;;  %v23159_v60 = vld [vmem:[#allocation4 + $0x268] sm:$0xff]  ;;  %19529 = vmatpush3.bf16.msra.mxu1 %v23087_v25  ;;  %v30243_v61 = vand.u32 4294901760, %v23152_v55  ;;  %v30247_v62 = vand.u32 4294901760, %v23154_v56  ;;  %v23164_v63 = vld [vmem:[#allocation4 + $0xf0] sm:$0xff] }
  0xd5   : > { %v23166_v0 = vld [vmem:[#allocation4 + $0xf8] sm:$0xff]  ;;  %v486_v1 = vld [vmem:[#allocation2] sm:$0xff]  ;;  %20297 = vmatpush3.bf16.msra.mxu0 %v23102_v31  ;;  %19531 = vmatprep.subr.bf16.mxu1 %v23129_v43  ;;  %31327 = vst [vmem:[#allocation34_spill] sm:$0xff] %v23174_v32  ;;  %31328 = vst [vmem:[#allocation35_spill] sm:$0xff] %v23180_v27  ;;  %v30246_v26 = vand.u32 4294901760, %v23159_v60  ;;  %v23196_v39 = vpack.c.bf16 %v30235_v51, %v30236_v46  ;;  %v23202_v38 = vpack.c.bf16 %v30238_v53, %v30239_v52  ;;  %s14092_s16 = sshll.u32 %s23034_s8, 4  ;;  %s30153_s16 = int_to_ptr.vmem [resolvable:$true] %s14092_s16 }
  0xd6   : > { %v23183_v21 = vld [vmem:[#allocation4 + $0x270] sm:$0xff]  ;;  %v487_v18 = vld [vmem:[#allocation2 + $0x8] sm:$0xff]  ;;  %20299 = vmatprep.subr.bf16.mxu0 %v23145_v50  ;;  %31329 = vst [vmem:[#allocation36_spill] sm:$0xff] %v23190_v37  ;;  %v23208_v33 = vpack.c.bf16 %v30240_v58, %v30241_v57  ;;  %v23210_v45 = vld [vmem:[#allocation4 + $0x278] sm:$0xff]  ;;  %v23216_v51 = vpack.c.bf16 %v30243_v61, %v30244_v59  ;;  %v23220_v53 = vand.u32 4294901760, %v486_v1  ;;  %v31346_v25 = vand.u32 4294901760, %v23166_v0 }
  0xd7   : > { %v4588_v19 = vld [vmem:[#allocation2 + $0x10] sm:$0xff]  ;;  %31330 = vst [vmem:[#allocation37_spill] sm:$0xff] %v23196_v39  ;;  %31331 = vst [vmem:[#allocation38_spill] sm:$0xff] %v23202_v38  ;;  %v4589_v52 = vld [vmem:[#allocation2 + $0x18] sm:$0xff]  ;;  %v23227_v58 = vpack.c.bf16 %v30246_v26, %v30247_v62  ;;  %v23232_v61 = vand.u32 4294901760, %v487_v18  ;;  %v23243_v26 = vsub.f32 %v23038_v2, %v698_v5  ;;  %v23248_v62 = vsub.f32 %v23040_v3, %v701_v6  ;;  %s33410_s22 = sand.u32 1, %s22781_s13  }
  0xd8   : > { %31332 = vst [vmem:[#allocation39_spill] sm:$0xff] %v23208_v33  ;;  %31333 = vst [vmem:[#allocation40_spill] sm:$0xff] %v23216_v51  ;;  %19533 = vmatpush3.bf16.msra.mxu1 %v23129_v43  ;;  %v23230_v13 = vand.u32 4294901760, %v4588_v19  ;;  %v23238_v12 = vsub.f32 %v486_v1, %v23220_v53  ;;  %v23257_v1 = vand.u32 4294901760, %v4589_v52  ;;  %v23262_v2 = vsub.f32 %v23042_v4, %v6037_v8  ;;  %v4592_v17 = vld [vmem:[#allocation2 + $0x30] sm:$0xff]  ;;  %s30159_s4 = scalar_lea.sflag [#allocation6], %s33410_s22 }
  0xd9   : > { %31334 = vst [vmem:[#allocation41_spill] sm:$0xff] %v23227_v58  ;;  %31336 = vst [vmem:[#allocation43_spill] sm:$0xff] %v23232_v61  ;;  %20301 = vmatpush3.bf16.msra.mxu0 %v23145_v50  ;;  %19535 = vmatprep.subr.bf16.mxu1 %v23174_v32  ;;  %v23255_v59 = vsub.f32 %v487_v18, %v23232_v61  ;;  %v30251_v3 = vand.u32 4294901760, %v23243_v26  ;;  %v30254_v6 = vand.u32 4294901760, %v23248_v62  ;;  %s22697_s21 = scalar_lea.vmem %s30153_s16, 2048  ;;  %p33411_p0 = scmp.ne.s32.totalorder %s31311_s26, 0 }
  0xda   : > { %31335 = vst [vmem:[#allocation42_spill] sm:$0xff] %v23230_v13  ;;  %31337 = vst [vmem:[#allocation44_spill] sm:$0xff] %v23238_v12  ;;  %20303 = vmatprep.subr.bf16.mxu0 %v23180_v27  ;;  %v23252_v57 = vsub.f32 %v4588_v19, %v23230_v13  ;;  %v30250_v5 = vand.u32 4294901760, %v23238_v12  ;;  %v23270_v19 = vsub.f32 %v23046_v7, %v6040_v11  ;;  %p22698_p3 = scmp.ne.s32.totalorder %s30153_s16, %s22697_s21  ;;  %s22816_s1 = smov [#allocation9]  }
  0xdb   : > { %31339 = vst [vmem:[#allocation46_spill] sm:$0xff] %v23255_v59  ;;  %v30263_v44 = vand.u32 4294901760, %v23255_v59  ;;  %v23278_v4 = vsub.f32 %v4589_v52, %v23257_v1  ;;  %v942_v11 = vsub.f32 %v23243_v26, %v30251_v3  ;;  %v949_v46 = vsub.f32 %v23248_v62, %v30254_v6  ;;  %s22701_s2 = sshll.u32 %s22816_s1, 4  ;;  %s22702_s2 = int_to_ptr.vmem [resolvable:$false] %s22701_s2 }
  0xdc   : > { %31338 = vst [vmem:[#allocation45_spill] sm:$0xff] %v23252_v57  ;;  %19537 = vmatpush3.bf16.msra.mxu1 %v23174_v32  ;;  %v23274_v18 = vand.u32 4294901760, %v23252_v57  ;;  %v781_v7 = vsub.f32 %v23238_v12, %v30250_v5  ;;  %v31343_v3 = vand.u32 4294901760, %v23262_v2  ;;  %v31344_v43 = vand.u32 4294901760, %v23270_v19  ;;  %p22699_p2 = pnand %p22698_p3, %p33411_p0  ;;  %s22703_s17 = scalar_lea.vmem %s22702_s2, 4096 }
  0xdd   : > { %31341 = vst [vmem:[#allocation48_spill] sm:$0xff] %v23278_v4  ;;  %20305 = vmatpush3.bf16.msra.mxu0 %v23180_v27  ;;  %19539 = vmatprep.subr.bf16.mxu1 %v23190_v37  ;;  %v23299_v27 = vsub.f32 %v23255_v59, %v30263_v44  ;;  %v23302_v5 = vand.u32 4294901760, %v23278_v4  ;;  %v943_v50 = vand.u32 4294901760, %v942_v11  ;;  %v950_v52 = vand.u32 4294901760, %v949_v46  ;;  %v4591_v46 = vld [vmem:[#allocation2 + $0x28] sm:$0xff]  ;;  %p22704_p12 = scmp.lt.s32.totalorder %s30153_s16, %s22702_s2  ;;  %p22705_p1 = scmp.lt.s32.totalorder %s22703_s17, %s22697_s21 }
  0xde   : > { %31340 = vst [vmem:[#allocation47_spill] sm:$0xff] %v23274_v18  ;;  %20307 = vmatprep.subr.bf16.mxu0 %v23196_v39  ;;  %v6120_v8 = vsub.f32 %v23252_v57, %v23274_v18  ;;  %v6281_v32 = vsub.f32 %v23262_v2, %v31343_v3  ;;  %v782_v6 = vand.u32 4294901760, %v781_v7  ;;  %v6288_v31 = vsub.f32 %v23270_v19, %v31344_v43  ;;  %v4590_v18 = vld [vmem:[#allocation2 + $0x20] sm:$0xff]  ;;  %p22700_p10 = pneg %p22699_p2 }
  0xdf   : > { %31342 = vst [vmem:[#allocation49_spill] sm:$0xff] %v23302_v5  ;;  %v31345_v44 = vand.u32 4294901760, %v23164_v63  ;;  %v6130_v3 = vsub.f32 %v23278_v4, %v23302_v5  ;;  %v31348_v43 = vand.u32 4294901760, %v23183_v21  ;;  %v31349_v11 = vand.u32 4294901760, %v23210_v45  ;;  %p22706_p4 = por %p22705_p1, %p22704_p12 }
  0xe0   : > { %19541 = vmatpush3.bf16.msra.mxu1 %v23190_v37  ;;  %v23317_v57 = vand.u32 4294901760, %v6120_v8  ;;  %v6282_v7 = vand.u32 4294901760, %v6281_v32  ;;  %v6289_v8 = vand.u32 4294901760, %v6288_v31  ;;  %16194 = vmatprep.mubr.f32.mxu1 %v782_v6  ;;  %v23335_v5 = vand.u32 4294901760, %v4590_v18 }
  0xe1   : > { %v23315_v24 = vpack.c.bf16 %v31346_v25, %v31345_v44  ;;  %20309 = vmatpush3.bf16.msra.mxu0 %v23196_v39  ;;  %19543 = vmatprep.subr.bf16.mxu1 %v23202_v38  ;;  %v23327_v37 = vpack.c.bf16 %v31349_v11, %v31348_v43  ;;  %v23330_v44 = vpack.c.bf16 %v950_v52, %v943_v50  ;;  %v23333_v32 = vand.u32 4294901760, %v6130_v3  ;;  %p22707_p8 = pnand %p22706_p4, %p22700_p10 }
  0xe2   : > { %20311 = vmatprep.subr.bf16.mxu0 %v23208_v33  ;;  %31351 = vst [vmem:[#allocation52_spill] sm:$0xff] %v23335_v5  ;;  %v31352_v39 = vand.u32 4294901760, %v23049_v9  ;;  %v31353_v43 = vand.u32 4294901760, %v23051_v10  ;;  %17538 = vmatprep.mubr.f32.mxu0 %v23317_v57  ;;  %v23348_v31 = vpack.c.bf16 %v6289_v8, %v6282_v7  ;;  %v23350_v50 = vand.u32 4294901760, %v4591_v46 }
  0xe3   : > { %31347 = vst [vmem:[#allocation50_spill] sm:$0xff] %v23315_v24  ;;  %31350 = vst [vmem:[#allocation51_spill] sm:$0xff] %v23327_v37  ;;  %v31355_v6 = vand.u32 4294901760, %v23056_v14  ;;  %v31356_v3 = vand.u32 4294901760, %v23058_v15  ;;  %v23368_v8 = vand.u32 4294901760, %v4592_v17 }
  0xe4   : > { %v23340_v4 = vsub.f32 %v23049_v9, %v31352_v39  ;;  %v23345_v11 = vsub.f32 %v23051_v10, %v31353_v43  ;;  %31354 = vst [vmem:[#allocation53_spill] sm:$0xff] %v23350_v50  ;;  %19545 = vmatpush3.bf16.msra.mxu1 %v23202_v38  ;;  %v23364_v10 = vsub.f32 %v4590_v18, %v23335_v5  ;;  %v31360_v18 = vand.u32 4294901760, %v23060_v16 }
  0xe5   : > { %v23355_v52 = vsub.f32 %v23056_v14, %v31355_v6  ;;  %v23360_v9 = vsub.f32 %v23058_v15, %v31356_v3  ;;  %31358 = vst [vmem:[#allocation55_spill] sm:$0xff] %v23368_v8  ;;  %20313 = vmatpush3.bf16.msra.mxu0 %v23208_v33  ;;  %19547 = vmatprep.subr.bf16.mxu1 %v23216_v51 }
  0xe6   : > { %31357 = vst [vmem:[#allocation54_spill] sm:$0xff] %v23364_v10  ;;  %v30284_v39 = vand.u32 4294901760, %v23340_v4  ;;  %v30285_v7 = vand.u32 4294901760, %v23345_v11  ;;  %v23373_v14 = vsub.f32 %v4591_v46, %v23350_v50  ;;  %v23380_v6 = vsub.f32 %v23060_v16, %v31360_v18  ;;  %20315 = vmatprep.subr.bf16.mxu0 %v23227_v58 }
  0xe7   : > { %v23384_v3 = vand.u32 4294901760, %v23364_v10  ;;  %v23393_v43 = vsub.f32 %v4592_v17, %v23368_v8  ;;  %v31364_v16 = vand.u32 4294901760, %v23355_v52  ;;  %v31365_v33 = vand.u32 4294901760, %v23360_v9  ;;  %v4593_v8 = vld [vmem:[#allocation2 + $0x38] sm:$0xff] }
  0xe8   : > { %31359 = vst [vmem:[#allocation56_spill] sm:$0xff] %v23373_v14  ;;  %v956_v25 = vsub.f32 %v23340_v4, %v30284_v39  ;;  %v963_v46 = vsub.f32 %v23345_v11, %v30285_v7  ;;  %v23396_v15 = vand.u32 4294901760, %v23373_v14  ;;  %19549 = vmatpush3.bf16.msra.mxu1 %v23216_v51  ;;  %v31367_v51 = vand.u32 4294901760, %v23380_v6 }
  0xe9   : > { %31361 = vst [vmem:[#allocation57_spill] sm:$0xff] %v23384_v3  ;;  %31362 = vst [vmem:[#allocation58_spill] sm:$0xff] %v23393_v43  ;;  %v6295_v18 = vsub.f32 %v23355_v52, %v31364_v16  ;;  %v6302_v38 = vsub.f32 %v23360_v9, %v31365_v33  ;;  %v6140_v7 = vsub.f32 %v23364_v10, %v23384_v3  ;;  %v23409_v12 = vand.u32 4294901760, %v23393_v43 }
  0xea   : > { %31363 = vst [vmem:[#allocation59_spill] sm:$0xff] %v23396_v15  ;;  %v957_v17 = vand.u32 4294901760, %v956_v25  ;;  %v964_v59 = vand.u32 4294901760, %v963_v46  ;;  %20317 = vmatpush3.bf16.msra.mxu0 %v23227_v58  ;;  %19551 = vmatprep.subr.bf16.mxu1 %v23315_v24  ;;  %v6150_v33 = vsub.f32 %v23373_v14, %v23396_v15  ;;  %v970_v50 = vsub.f32 %v23380_v6, %v31367_v51  ;;  %v4594_v15 = vld [vmem:[#allocation2 + $0x40] sm:$0xff]  ;;  %v4595_v51 = vld [vmem:[#allocation2 + $0x48] sm:$0xff] }
  0xeb   : > { %31366 = vst [vmem:[#allocation60_spill] sm:$0xff] %v23409_v12  ;;  %v6296_v16 = vand.u32 4294901760, %v6295_v18  ;;  %v6303_v39 = vand.u32 4294901760, %v6302_v38  ;;  %20319 = vmatprep.subr.bf16.mxu0 %v23327_v37  ;;  %v23419_v25 = vand.u32 4294901760, %v6140_v7  ;;  %v6160_v3 = vsub.f32 %v23393_v43, %v23409_v12 }
  0xec   : > { %v19558_v46 = vpack.c.bf16 %v964_v59, %v957_v17  ;;  %v31368_v58 = vand.u32 4294901760, %v23070_v20  ;;  %v23428_v18 = vand.u32 4294901760, %v6150_v33  ;;  %v971_v14 = vand.u32 4294901760, %v970_v50  ;;  %19553 = vmatpush3.bf16.msra.mxu1 %v23315_v24 }
  0xed   : > { %v20326_v38 = vpack.c.bf16 %v6303_v39, %v6296_v16  ;;  %v23430_v5 = vand.u32 4294901760, %v4593_v8  ;;  %v23433_v7 = vand.u32 4294901760, %v6160_v3  ;;  %v31370_v17 = vand.u32 4294901760, %v23073_v22  ;;  %19555 = vmatprep.subr.bf16.mxu1 %v23330_v44 }
  0xee   : > { %v23426_v10 = vsub.f32 %v23070_v20, %v31368_v58  ;;  %v31371_v20 = vand.u32 4294901760, %v23075_v23  ;;  %20321 = vmatpush3.bf16.msra.mxu0 %v23327_v37  ;;  %v23451_v39 = vand.u32 4294901760, %v4594_v15  ;;  %v31374_v3 = vand.u32 4294901760, %v23091_v28 }
  0xef   : > { %31369 = vst [vmem:[#allocation61_spill] sm:$0xff] %v23430_v5  ;;  %v23439_v12 = vsub.f32 %v23073_v22, %v31370_v17  ;;  %v23449_v50 = vsub.f32 %v4593_v8, %v23430_v5  ;;  %v31375_v22 = vand.u32 4294901760, %v23093_v29  ;;  %20323 = vmatprep.subr.bf16.mxu0 %v23348_v31 }
  0xf0   : > { %v30312_v59 = vand.u32 4294901760, %v23426_v10  ;;  %v23444_v58 = vsub.f32 %v23075_v23, %v31371_v20  ;;  %31373 = vst [vmem:[#allocation63_spill] sm:$0xff] %v23451_v39  ;;  %v23456_v33 = vsub.f32 %v23091_v28, %v31374_v3  ;;  %v23469_v20 = vand.u32 4294901760, %v4595_v51 }
  0xf1   : > { %31372 = vst [vmem:[#allocation62_spill] sm:$0xff] %v23449_v50  ;;  %v23461_v16 = vsub.f32 %v23093_v29, %v31375_v22  ;;  %v30313_v8 = vand.u32 4294901760, %v23439_v12  ;;  %v31377_v28 = vand.u32 4294901760, %v23299_v27  ;;  %v23474_v3 = vand.u32 4294901760, %v23449_v50  ;;  %17539 = vmatmul.mubr.f32.vlgmr.msra.gmra.mrb[0].mxu0 %v23333_v32 }
  0xf2   : > { %v977_v23 = vsub.f32 %v23426_v10, %v30312_v59  ;;  %v30314_v17 = vand.u32 4294901760, %v23444_v58  ;;  %31376 = vst [vmem:[#allocation64_spill] sm:$0xff] %v23469_v20  ;;  %v23477_v29 = vsub.f32 %v4594_v15, %v23451_v39  ;;  %v30321_v22 = vand.u32 4294901760, %v23456_v33  ;;  %20325 = vmatpush3.bf16.msra.mxu0 %v23348_v31  ;;  %17541 = vmatprep.mubr.f32.mxu0 %v23419_v25 }
  0xf3   : > { %16195 = vmatmul.mubr.f32.vlgmr.msra.gmra.mrb[0].mxu1 %v31377_v28  ;;  %31378 = vst [vmem:[#allocation65_spill] sm:$0xff] %v23474_v3  ;;  %v6309_v27 = vsub.f32 %v23439_v12, %v30313_v8  ;;  %v23490_v15 = vsub.f32 %v4595_v51, %v23469_v20  ;;  %v6170_v37 = vsub.f32 %v23449_v50, %v23474_v3  ;;  %v31382_v8 = vand.u32 4294901760, %v23461_v16  ;;  %v4596_v51 = vld [vmem:[#allocation2 + $0x50] sm:$0xff] }
  0xf4   : > { %31379 = vst [vmem:[#allocation66_spill] sm:$0xff] %v23477_v29  ;;  %19557 = vmatpush3.bf16.msra.mxu1 %v23330_v44  ;;  %v978_v59 = vand.u32 4294901760, %v977_v23  ;;  %v6316_v28 = vsub.f32 %v23444_v58, %v30314_v17  ;;  %16197 = vmatprep.mubr.f32.mxu1 %v23317_v57  ;;  %v23497_v44 = vand.u32 4294901760, %v23477_v29  ;;  %v984_v23 = vsub.f32 %v23456_v33, %v30321_v22 }
  0xf5   : > { %31380 = vst [vmem:[#allocation67_spill] sm:$0xff] %v23490_v15  ;;  %v991_v17 = vsub.f32 %v23461_v16, %v31382_v8  ;;  %19559 = vmatprep.subr.bf16.mxu1 %v19558_v46  ;;  %v6310_v57 = vand.u32 4294901760, %v6309_v27  ;;  %v23507_v3 = vand.u32 4294901760, %v23490_v15  ;;  %20327 = vmatprep.subr.bf16.mxu0 %v20326_v38  ;;  %v6171_v50 = vand.u32 4294901760, %v6170_v37  ;;  %v4597_v37 = vld [vmem:[#allocation2 + $0x58] sm:$0xff] }
  0xf6   : > { %31381 = vst [vmem:[#allocation68_spill] sm:$0xff] %v23497_v44  ;;  %v19562_v31 = vpack.c.bf16 %v978_v59, %v971_v14  ;;  %v6317_v24 = vand.u32 4294901760, %v6316_v28  ;;  %v6180_v22 = vsub.f32 %v23477_v29, %v23497_v44  ;;  %v985_v43 = vand.u32 4294901760, %v984_v23  ;;  %17542 = vmatmul.mubr.f32.gmra.mrb[2].mxu0 %v23428_v18 }
  0xf7   : > { %31383 = vst [vmem:[#allocation69_spill] sm:$0xff] %v23507_v3  ;;  %16198 = vmatmul.mubr.f32.gmra.mrb[2].mxu1 %v23333_v32  ;;  %v992_v20 = vand.u32 4294901760, %v991_v17  ;;  %v6190_v14 = vsub.f32 %v23490_v15, %v23507_v3  ;;  %v31384_v59 = vand.u32 4294901760, %v23095_v30  ;;  %v23520_v32 = vand.u32 4294901760, %v4596_v51  ;;  %20329 = vmatpush3.bf16.msra.mxu0 %v20326_v38 }
  0xf8   : > { %19561 = vmatpush3.bf16.msra.mxu1 %v19558_v46  ;;  %v20330_v8 = vpack.c.bf16 %v6317_v24, %v6310_v57  ;;  %16200 = vmatprep.mubr.f32.mxu1 %v23419_v25  ;;  %v6181_v28 = vand.u32 4294901760, %v6180_v22  ;;  %v31386_v23 = vand.u32 4294901760, %v23106_v34  ;;  %v31387_v46 = vand.u32 4294901760, %v23108_v35 }
  0xf9   : > { %v23518_v27 = vsub.f32 %v23095_v30, %v31384_v59  ;;  %31385 = vst [vmem:[#allocation70_spill] sm:$0xff] %v23520_v32  ;;  %v19566_v17 = vpack.c.bf16 %v992_v20, %v985_v43  ;;  %17544 = vmatprep.mubr.f32.mxu0 %v23433_v7  ;;  %19563 = vmatprep.subr.bf16.mxu1 %v19562_v31  ;;  %v6191_v30 = vand.u32 4294901760, %v6190_v14  ;;  %v31389_v43 = vand.u32 4294901760, %v23110_v36 }
  0xfa   : > { %v23526_v24 = vsub.f32 %v23106_v34, %v31386_v23  ;;  %v23531_v57 = vsub.f32 %v23108_v35, %v31387_v46  ;;  %v23536_v25 = vsub.f32 %v4596_v51, %v23520_v32  ;;  %20331 = vmatprep.subr.bf16.mxu0 %v20330_v8  ;;  %v23546_v22 = vand.u32 4294901760, %v4597_v37  ;;  %17545 = vmatmul.mubr.f32.gmra.mrb[4].mxu0 %v6171_v50 }
  0xfb   : > { %v30326_v38 = vand.u32 4294901760, %v23518_v27  ;;  %v23541_v20 = vsub.f32 %v23110_v36, %v31389_v43  ;;  %16201 = vmatmul.mubr.f32.gmra.mrb[4].mxu1 %v23428_v18  ;;  %v31391_v14 = vand.u32 4294901760, %v23117_v40  ;;  %v31393_v23 = vand.u32 4294901760, %v23119_v41  ;;  %20333 = vmatpush3.bf16.msra.mxu0 %v20330_v8 }
  0xfc   : > { %31388 = vst [vmem:[#allocation71_spill] sm:$0xff] %v23536_v25  ;;  %v30328_v34 = vand.u32 4294901760, %v23526_v24  ;;  %v30327_v35 = vand.u32 4294901760, %v23531_v57  ;;  %31390 = vst [vmem:[#allocation72_spill] sm:$0xff] %v23546_v22  ;;  %19565 = vmatpush3.bf16.msra.mxu1 %v19562_v31  ;;  %v23557_v18 = vand.u32 4294901760, %v23536_v25  ;;  %16203 = vmatprep.mubr.f32.mxu1 %v23433_v7  ;;  %v23573_v43 = vsub.f32 %v4597_v37, %v23546_v22 }
  0xfd   : > { %v23551_v59 = vsub.f32 %v23117_v40, %v31391_v14  ;;  %v6323_v36 = vsub.f32 %v23518_v27, %v30326_v38  ;;  %v30333_v51 = vand.u32 4294901760, %v23541_v20  ;;  %v23563_v46 = vsub.f32 %v23119_v41, %v31393_v23  ;;  %v4598_v38 = vld [vmem:[#allocation2 + $0x60] sm:$0xff]  ;;  %17547 = vmatprep.mubr.f32.mxu0 %v6181_v28  ;;  %19567 = vmatprep.subr.bf16.mxu1 %v19566_v17 }
  0xfe   : > { %31392 = vst [vmem:[#allocation73_spill] sm:$0xff] %v23557_v18  ;;  %v6330_v40 = vsub.f32 %v23526_v24, %v30328_v34  ;;  %v998_v31 = vsub.f32 %v23531_v57, %v30327_v35  ;;  %31394 = vst [vmem:[#allocation74_spill] sm:$0xff] %v23573_v43  ;;  %v6200_v7 = vsub.f32 %v23536_v25, %v23557_v18  ;;  %v23583_v37 = vand.u32 4294901760, %v23573_v43 }
  0xff   : > { %v30340_v14 = vand.u32 4294901760, %v23551_v59  ;;  %v6324_v41 = vand.u32 4294901760, %v6323_v36  ;;  %v1005_v8 = vsub.f32 %v23541_v20, %v30333_v51  ;;  %v30341_v23 = vand.u32 4294901760, %v23563_v46  ;;  %16204 = vmatmul.mubr.f32.gmra.mrb[6].mxu1 %v6171_v50  ;;  %17548 = vmatmul.mubr.f32.gmra.mrb[6].mxu0 %v6191_v30  ;;  %v4599_v50 = vld [vmem:[#allocation2 + $0x68] sm:$0xff] }
 0x100   : > { %v6331_v35 = vand.u32 4294901760, %v6330_v40  ;;  %v999_v34 = vand.u32 4294901760, %v998_v31  ;;  %31395 = vst [vmem:[#allocation75_spill] sm:$0xff] %v23583_v37  ;;  %19569 = vmatpush3.bf16.msra.mxu1 %v19566_v17  ;;  %v6201_v36 = vand.u32 4294901760, %v6200_v7  ;;  %v23591_v44 = vand.u32 4294901760, %v4598_v38  ;;  %16206 = vmatprep.mubr.f32.mxu1 %v6181_v28  ;;  %v4600_v28 = vld [vmem:[#allocation2 + $0x70] sm:$0xff] }
 0x101   : > { %v6337_v3 = vsub.f32 %v23551_v59, %v30340_v14  ;;  %v1006_v18 = vand.u32 4294901760, %v1005_v8  ;;  %v6344_v51 = vsub.f32 %v23563_v46, %v30341_v23  ;;  %v6210_v31 = vsub.f32 %v23573_v43, %v23583_v37 }
 0x102   : > { %31396 = vst [vmem:[#allocation76_spill] sm:$0xff] %v23591_v44  ;;  %v20334_v40 = vpack.c.bf16 %v6331_v35, %v6324_v41  ;;  %v31397_v15 = vand.u32 4294901760, %v23121_v42  ;;  %17550 = vmatprep.mubr.f32.mxu0 %v6201_v36  ;;  %v23601_v8 = vsub.f32 %v4598_v38, %v23591_v44  ;;  %v31399_v23 = vand.u32 4294901760, %v23134_v47 }
 0x103   : > { %v6338_v25 = vand.u32 4294901760, %v6337_v3  ;;  %v19570_v17 = vpack.c.bf16 %v1006_v18, %v999_v34  ;;  %v6345_v7 = vand.u32 4294901760, %v6344_v51  ;;  %16207 = vmatmul.mubr.f32.gmra.mrb[8].mxu1 %v6191_v30  ;;  %v6211_v3 = vand.u32 4294901760, %v6210_v31 }
 0x104   : > { %v23598_v14 = vsub.f32 %v23121_v42, %v31397_v15  ;;  %31398 = vst [vmem:[#allocation77_spill] sm:$0xff] %v23601_v8  ;;  %v23606_v35 = vsub.f32 %v23134_v47, %v31399_v23  ;;  %20335 = vmatprep.subr.bf16.mxu0 %v20334_v40  ;;  %v23609_v37 = vand.u32 4294901760, %v4599_v50  ;;  %v31401_v42 = vand.u32 4294901760, %v23136_v48  ;;  %16209 = vmatprep.mubr.f32.mxu1 %v6201_v36 }
 0x105   : > { %20337 = vmatpush3.bf16.msra.mxu0 %v20334_v40  ;;  %19571 = vmatprep.subr.bf16.mxu1 %v19570_v17  ;;  %v20338_v38 = vpack.c.bf16 %v6345_v7, %v6338_v25  ;;  %v23617_v34 = vand.u32 4294901760, %v23601_v8  ;;  %v31403_v30 = vand.u32 4294901760, %v23138_v49  ;;  %v23632_v23 = vand.u32 4294901760, %v4600_v28 }
 0x106   : > { %v30345_v41 = vand.u32 4294901760, %v23598_v14  ;;  %31400 = vst [vmem:[#allocation78_spill] sm:$0xff] %v23609_v37  ;;  %v23614_v15 = vsub.f32 %v23136_v48, %v31401_v42  ;;  %v30344_v47 = vand.u32 4294901760, %v23606_v35  ;;  %17551 = vmatmul.mubr.f32.gmra.mrb[8].mxu0 %v6211_v3  ;;  %19573 = vmatpush3.bf16.msra.mxu1 %v19570_v17  ;;  %v23629_v51 = vsub.f32 %v4599_v50, %v23609_v37 }
 0x107   : > { %31402 = vst [vmem:[#allocation79_spill] sm:$0xff] %v23617_v34  ;;  %v23623_v18 = vsub.f32 %v23138_v49, %v31403_v30  ;;  %31405 = vst [vmem:[#allocation81_spill] sm:$0xff] %v23632_v23  ;;  %20339 = vmatprep.subr.bf16.mxu0 %v20338_v38  ;;  %v6220_v40 = vsub.f32 %v23601_v8, %v23617_v34  ;;  %v31406_v17 = vand.u32 4294901760, %v23150_v54  ;;  %16210 = vmatmul.mubr.f32.gmra.mrb[10].mxu1 %v6211_v3 }
 0x108   : > { %v1012_v48 = vsub.f32 %v23598_v14, %v30345_v41  ;;  %31404 = vst [vmem:[#allocation80_spill] sm:$0xff] %v23629_v51  ;;  %v30348_v25 = vand.u32 4294901760, %v23614_v15  ;;  %v1019_v49 = vsub.f32 %v23606_v35, %v30344_v47  ;;  %v23646_v42 = vand.u32 4294901760, %v23629_v51  ;;  %v23654_v47 = vld [vmem:[#allocation2 + $0x78] sm:$0xff] }
 0x109   : > { %v23643_v50 = vsub.f32 %v23150_v54, %v31406_v17  ;;  %v23652_v30 = vsub.f32 %v4600_v28, %v23632_v23  ;;  %31409 = vst [vmem:[#allocation84_spill] sm:$0xff] %v23654_v47  ;;  %20341 = vmatpush3.bf16.msra.mxu0 %v20338_v38  ;;  %v6221_v41 = vand.u32 4294901760, %v6220_v40  ;;  %v31410_v54 = vand.u32 4294901760, %v23623_v18 }
 0x10a   : > { %v1013_v7 = vand.u32 4294901760, %v1012_v48  ;;  %31407 = vst [vmem:[#allocation82_spill] sm:$0xff] %v23646_v42  ;;  %v6351_v36 = vsub.f32 %v23614_v15, %v30348_v25  ;;  %v1020_v31 = vand.u32 4294901760, %v1019_v49  ;;  %v6230_v17 = vsub.f32 %v23629_v51, %v23646_v42 }
 0x10b   : > { %31408 = vst [vmem:[#allocation83_spill] sm:$0xff] %v23652_v30  ;;  %v6358_v3 = vsub.f32 %v23623_v18, %v31410_v54  ;;  %v30357_v48 = vand.u32 4294901760, %v23643_v50  ;;  %v23663_v25 = vand.u32 4294901760, %v23652_v30  ;;  %v31412_v28 = vand.u32 4294901760, %v23152_v55  ;;  %17553 = vmatprep.mubr.f32.mxu0 %v6221_v41  ;;  %16212 = vmatprep.mubr.f32.mxu1 %v6221_v41 }
 0x10c   : > { %v6352_v34 = vand.u32 4294901760, %v6351_v36  ;;  %v19574_v38 = vpack.c.bf16 %v1020_v31, %v1013_v7  ;;  %v23674_v54 = vand.u32 4294901760, %v23654_v47  ;;  %v4602_v36 = vld [vmem:[#allocation2 + $0x80] sm:$0xff]  ;;  %v6231_v42 = vand.u32 4294901760, %v6230_v17 }
 0x10d   : > { %31411 = vst [vmem:[#allocation85_spill] sm:$0xff] %v23663_v25  ;;  %v23668_v8 = vsub.f32 %v23152_v55, %v31412_v28  ;;  %v6359_v40 = vand.u32 4294901760, %v6358_v3  ;;  %v1026_v49 = vsub.f32 %v23643_v50, %v30357_v48  ;;  %v6240_v51 = vsub.f32 %v23652_v30, %v23663_v25  ;;  %v4603_v48 = vld [vmem:[#allocation2 + $0x88] sm:$0xff] }
 0x10e   : > { %31413 = vst [vmem:[#allocation86_spill] sm:$0xff] %v23674_v54  ;;  %v31414_v55 = vand.u32 4294901760, %v23154_v56  ;;  %19575 = vmatprep.subr.bf16.mxu1 %v19574_v38  ;;  %v23686_v3 = vsub.f32 %v23654_v47, %v23674_v54  ;;  %v31416_v28 = vand.u32 4294901760, %v23159_v60  ;;  %17554 = vmatmul.mubr.f32.gmra.mrb[10].mxu0 %v6231_v42 }
 0x10f   : > { %v20342_v41 = vpack.c.bf16 %v6359_v40, %v6352_v34  ;;  %v1027_v7 = vand.u32 4294901760, %v1026_v49  ;;  %19577 = vmatpush3.bf16.msra.mxu1 %v19574_v38  ;;  %v6241_v43 = vand.u32 4294901760, %v6240_v51  ;;  %v31417_v25 = vand.u32 4294901760, %v23668_v8 }
 0x110   : > { %v23682_v31 = vsub.f32 %v23154_v56, %v31414_v55  ;;  %31415 = vst [vmem:[#allocation87_spill] sm:$0xff] %v23686_v3  ;;  %v23691_v17 = vsub.f32 %v23159_v60, %v31416_v28  ;;  %v23697_v40 = vand.u32 4294901760, %v4602_v36  ;;  %16213 = vmatmul.mubr.f32.gmra.mrb[12].mxu1 %v6231_v42  ;;  %v23700_v49 = vand.u32 4294901760, %v23686_v3 }
 0x111   : > { %v1033_v56 = vsub.f32 %v23668_v8, %v31417_v25  ;;  %20343 = vmatprep.subr.bf16.mxu0 %v20342_v41  ;;  %v31420_v55 = vand.u32 4294901760, %v23164_v63  ;;  %v31421_v51 = vand.u32 4294901760, %v23166_v0  ;;  %17556 = vmatprep.mubr.f32.mxu0 %v6241_v43  ;;  %v23719_v60 = vand.u32 4294901760, %v4603_v48 }
 0x112   : > { %v30364_v34 = vand.u32 4294901760, %v23682_v31  ;;  %31418 = vst [vmem:[#allocation88_spill] sm:$0xff] %v23697_v40  ;;  %31419 = vst [vmem:[#allocation89_spill] sm:$0xff] %v23700_v49  ;;  %20345 = vmatpush3.bf16.msra.mxu0 %v20342_v41  ;;  %v23717_v47 = vsub.f32 %v4602_v36, %v23697_v40  ;;  %16215 = vmatprep.mubr.f32.mxu1 %v6241_v43 }
 0x113   : > { %v23706_v38 = vsub.f32 %v23164_v63, %v31420_v55  ;;  %v23711_v25 = vsub.f32 %v23166_v0, %v31421_v51  ;;  %v1034_v28 = vand.u32 4294901760, %v1033_v56  ;;  %31423 = vst [vmem:[#allocation91_spill] sm:$0xff] %v23719_v60  ;;  %v6250_v63 = vsub.f32 %v23686_v3, %v23700_v49 }
 0x114   : > { %v6365_v42 = vsub.f32 %v23682_v31, %v30364_v34  ;;  %31422 = vst [vmem:[#allocation90_spill] sm:$0xff] %v23717_v47  ;;  %v31424_v55 = vand.u32 4294901760, %v23691_v17  ;;  %v30375_v34 = vand.u32 4294901760, %v23717_v47  ;;  %v23730_v36 = vsub.f32 %v4603_v48, %v23719_v60 }
 0x115   : > { %v30372_v41 = vand.u32 4294901760, %v23706_v38  ;;  %v30371_v56 = vand.u32 4294901760, %v23711_v25  ;;  %v19578_v51 = vpack.c.bf16 %v1034_v28, %v1027_v7  ;;  %v6251_v29 = vand.u32 4294901760, %v6250_v63 }
 0x116   : > { %v6372_v0 = vsub.f32 %v23691_v17, %v31424_v55  ;;  %v6366_v30 = vand.u32 4294901760, %v6365_v42  ;;  %v6260_v7 = vsub.f32 %v23717_v47, %v30375_v34  ;;  %v30378_v28 = vand.u32 4294901760, %v23730_v36 }
 0x117   : > { %v1040_v49 = vsub.f32 %v23706_v38, %v30372_v41  ;;  %v1047_v43 = vsub.f32 %v23711_v25, %v30371_v56  ;;  %19579 = vmatprep.subr.bf16.mxu1 %v19578_v51  ;;  %v31425_v48 = vand.u32 4294901760, %v23183_v21  ;;  %v31426_v63 = vand.u32 4294901760, %v23210_v45  ;;  %17557 = vmatmul.mubr.f32.gmra.mrb[12].mxu0 %v6251_v29 }
 0x118   : > { %v6373_v40 = vand.u32 4294901760, %v6372_v0  ;;  %19581 = vmatpush3.bf16.msra.mxu1 %v19578_v51  ;;  %v6261_v3 = vand.u32 4294901760, %v6260_v7  ;;  %v6270_v34 = vsub.f32 %v23730_v36, %v30378_v28  ;;  %v31428_v7 = vand.u32 4294901760, %v23248_v62 }
 0x119   : > { %v23745_v42 = vsub.f32 %v23183_v21, %v31425_v48  ;;  %v23750_v55 = vsub.f32 %v23210_v45, %v31426_v63  ;;  %v1041_v56 = vand.u32 4294901760, %v1040_v49  ;;  %v1048_v41 = vand.u32 4294901760, %v1047_v43  ;;  %16216 = vmatmul.mubr.f32.gmra.mrb[14].mxu1 %v6251_v29 }
 0x11a   : > { %v20346_v0 = vpack.c.bf16 %v6373_v40, %v6366_v30  ;;  %16250 = vmatprep.mubr.f32.mxu1 %v23220_v53  ;;  %v19586_v45 = vpack.c.bf16 %v23248_v62, %v23243_v26  ;;  %17559 = vmatprep.mubr.f32.mxu0 %v6261_v3  ;;  %v6271_v30 = vand.u32 4294901760, %v6270_v34  ;;  %v19590_v3 = vpack.c.bf16 %v23345_v11, %v23340_v4 }
 0x11b   : > { %v6378_v47 = vand.u32 4294901760, %v23745_v42  ;;  %v6385_v21 = vand.u32 4294901760, %v23750_v55  ;;  %v19582_v48 = vpack.c.bf16 %v1048_v41, %v1041_v56  ;;  %v20354_v56 = vpack.c.bf16 %v23270_v19, %v23262_v2 }
 0x11c   : > { %20347 = vmatprep.subr.bf16.mxu0 %v20346_v0  ;;  %17560 = vmatmul.mubr.f32.gmra.mrb[14].mxu0 %v6271_v30  ;;  %v20358_v34 = vpack.c.bf16 %v23360_v9, %v23355_v52  ;;  %v31427_v43 = vand.u32 4294901760, %v23243_v26  ;;  %v31434_v26 = vand.u32 4294901760, %v23360_v9  ;;  %v31435_v62 = vand.u32 4294901760, %v23380_v6 }
 0x11d   : > { %20349 = vmatpush3.bf16.msra.mxu0 %v20346_v0  ;;  %v6379_v29 = vsub.f32 %v23745_v42, %v6378_v47  ;;  %v6386_v40 = vsub.f32 %v23750_v55, %v6385_v21  ;;  %19583 = vmatprep.subr.bf16.mxu1 %v19582_v48  ;;  %v31429_v0 = vand.u32 4294901760, %v23262_v2  ;;  %v31436_v2 = vand.u32 4294901760, %v23426_v10 }
 0x11e   : > { %19585 = vmatpush3.bf16.msra.mxu1 %v19582_v48  ;;  %17594 = vmatprep.mubr.f32.mxu0 %v23230_v13  ;;  %v23774_v63 = vpack.c.bf16 %v31428_v7, %v31427_v43  ;;  %v31430_v48 = vand.u32 4294901760, %v23270_v19  ;;  %v31440_v9 = vand.u32 4294901760, %v23461_v16 }
 0x11f   : > { %v6380_v49 = vand.u32 4294901760, %v6379_v29  ;;  %v6387_v51 = vand.u32 4294901760, %v6386_v40  ;;  %19587 = vmatprep.subr.bf16.mxu1 %v19586_v45  ;;  %v31431_v29 = vand.u32 4294901760, %v23340_v4  ;;  %v31432_v40 = vand.u32 4294901760, %v23345_v11 }
 0x120   : > { %v23780_v30 = vpack.c.bf16 %v31430_v48, %v31429_v0  ;;  %v23798_v19 = vpack.c.bf16 %v31436_v2, %v31435_v62  ;;  %v31437_v4 = vand.u32 4294901760, %v23439_v12  ;;  %v31438_v11 = vand.u32 4294901760, %v23444_v58 }
 0x121   : > { %v20350_v41 = vpack.c.bf16 %v6387_v51, %v6380_v49  ;;  %16251 = vmatmul.mubr.f32.vlgmr.msra.gmra.mrb[0].mxu1 %v23232_v61  ;;  %v23786_v49 = vpack.c.bf16 %v31432_v40, %v31431_v29  ;;  %v31433_v51 = vand.u32 4294901760, %v23355_v52  ;;  %v31439_v52 = vand.u32 4294901760, %v23456_v33 }
 0x122   : > { %19589 = vmatpush3.bf16.msra.mxu1 %v19586_v45  ;;  %v23804_v43 = vpack.c.bf16 %v31438_v11, %v31437_v4  ;;  %16253 = vmatprep.mubr.f32.mxu1 %v23230_v13  ;;  %v31441_v45 = vand.u32 4294901760, %v23518_v27  ;;  %v31442_v0 = vand.u32 4294901760, %v23526_v24  ;;  %v31443_v29 = vand.u32 4294901760, %v23531_v57 }
 0x123   : > { %v23792_v28 = vpack.c.bf16 %v31434_v26, %v31433_v51  ;;  %20351 = vmatprep.subr.bf16.mxu0 %v20350_v41  ;;  %v23810_v7 = vpack.c.bf16 %v31440_v9, %v31439_v52  ;;  %v31444_v40 = vand.u32 4294901760, %v23541_v20  ;;  %v31445_v26 = vand.u32 4294901760, %v23551_v59  ;;  %19591 = vmatprep.subr.bf16.mxu1 %v19590_v3 }
 0x124   : > { %20353 = vmatpush3.bf16.msra.mxu0 %v20350_v41  ;;  %v23817_v48 = vpack.c.bf16 %v31442_v0, %v31441_v45  ;;  %v31446_v62 = vand.u32 4294901760, %v23563_v46  ;;  %v31447_v41 = vand.u32 4294901760, %v23598_v14  ;;  %v31448_v4 = vand.u32 4294901760, %v23606_v35 }
 0x125   : > { %v23823_v51 = vpack.c.bf16 %v31444_v40, %v31443_v29  ;;  %20355 = vmatprep.subr.bf16.mxu0 %v20354_v56  ;;  %v31449_v52 = vand.u32 4294901760, %v23614_v15  ;;  %v31450_v9 = vand.u32 4294901760, %v23623_v18  ;;  %v31451_v0 = vand.u32 4294901760, %v23643_v50  ;;  %16254 = vmatmul.mubr.f32.gmra.mrb[2].mxu1 %v23257_v1 }
 0x126   : > { %v23829_v2 = vpack.c.bf16 %v31446_v62, %v31445_v26  ;;  %v23835_v11 = vpack.c.bf16 %v31448_v4, %v31447_v41  ;;  %v31452_v29 = vand.u32 4294901760, %v23668_v8  ;;  %v19594_v26 = vpack.c.bf16 %v23426_v10, %v23380_v6  ;;  %19593 = vmatpush3.bf16.msra.mxu1 %v19590_v3  ;;  %v31458_v6 = vld [vmem:[#allocation53_spill] sm:$0xff]  ;;  %v31475_v3 = vld [vmem:[#allocation62_spill] sm:$0xff] }
 0x127   : > { %v23841_v45 = vpack.c.bf16 %v31450_v9, %v31449_v52  ;;  %v31453_v62 = vand.u32 4294901760, %v23682_v31  ;;  %v31454_v41 = vand.u32 4294901760, %v23691_v17  ;;  %v31455_v52 = vand.u32 4294901760, %v23706_v38  ;;  %17595 = vmatmul.mubr.f32.vlgmr.msra.gmra.mrb[0].mxu0 %v23257_v1 }
 0x128   : > { %v23847_v40 = vpack.c.bf16 %v31452_v29, %v31451_v0  ;;  %v31456_v9 = vand.u32 4294901760, %v23711_v25  ;;  %v23864_v61 = vpack.c.bf16 %v6385_v21, %v6378_v47  ;;  %20357 = vmatpush3.bf16.msra.mxu0 %v20354_v56  ;;  %v31457_v0 = vld [vmem:[#allocation52_spill] sm:$0xff]  ;;  %v20362_v10 = vpack.c.bf16 %v23444_v58, %v23439_v12  ;;  %19595 = vmatprep.subr.bf16.mxu1 %v19594_v26  ;;  %v31459_v47 = vld [vmem:[#allocation55_spill] sm:$0xff]  ;;  %v31474_v56 = vld [vmem:[#allocation33_spill] sm:$0xff] }
 0x129   : > { %v23856_v4 = vpack.c.bf16 %v31454_v41, %v31453_v62  ;;  %17597 = vmatprep.mubr.f32.mxu0 %v31457_v0  ;;  %20359 = vmatprep.subr.bf16.mxu0 %v20358_v34  ;;  %v19598_v29 = vpack.c.bf16 %v23461_v16, %v23456_v33  ;;  %v20366_v21 = vpack.c.bf16 %v23526_v24, %v23518_v27  ;;  %v31460_v33 = vld [vmem:[#allocation64_spill] sm:$0xff]  ;;  %v31478_v62 = vld [vmem:[#allocation35_spill] sm:$0xff] }
 0x12a   : > { %v23862_v13 = vpack.c.bf16 %v31456_v9, %v31455_v52  ;;  %16256 = vmatprep.mubr.f32.mxu1 %v31457_v0  ;;  %19597 = vmatpush3.bf16.msra.mxu1 %v19594_v26  ;;  %v19602_v12 = vpack.c.bf16 %v23541_v20, %v23531_v57  ;;  %v20370_v58 = vpack.c.bf16 %v23563_v46, %v23551_v59  ;;  %v31461_v46 = vld [vmem:[#allocation88_spill] sm:$0xff]  ;;  %v31477_v26 = vld [vmem:[#allocation66_spill] sm:$0xff]  ;;  %v31479_v41 = vld [vmem:[#allocation67_spill] sm:$0xff] }
 0x12b   : > { %16257 = vmatmul.mubr.f32.gmra.mrb[4].mxu1 %v31458_v6  ;;  %17598 = vmatmul.mubr.f32.gmra.mrb[2].mxu0 %v31458_v6  ;;  %v19606_v16 = vpack.c.bf16 %v23606_v35, %v23598_v14  ;;  %v20374_v27 = vpack.c.bf16 %v23623_v18, %v23614_v15  ;;  %v19610_v24 = vpack.c.bf16 %v23668_v8, %v23643_v50  ;;  %v31462_v14 = vld [vmem:[#allocation44_spill] sm:$0xff]  ;;  %v31463_v8 = vld [vmem:[#allocation46_spill] sm:$0xff]  ;;  %v31465_v15 = vld [vmem:[#allocation45_spill] sm:$0xff] }
 0x12c   : > { %20361 = vmatpush3.bf16.msra.mxu0 %v20358_v34  ;;  %17600 = vmatprep.mubr.f32.mxu0 %v31459_v47  ;;  %v20378_v57 = vpack.c.bf16 %v23691_v17, %v23682_v31  ;;  %v19614_v20 = vpack.c.bf16 %v23711_v25, %v23706_v38  ;;  %v20382_v59 = vpack.c.bf16 %v23750_v55, %v23745_v42  ;;  %v31464_v35 = vld [vmem:[#allocation28_spill] sm:$0xff]  ;;  %v31466_v18 = vld [vmem:[#allocation29_spill] sm:$0xff]  ;;  %v31468_v31 = vld [vmem:[#allocation30_spill] sm:$0xff] }
 0x12d   : > { %20363 = vmatprep.subr.bf16.mxu0 %v20362_v10  ;;  %16259 = vmatprep.mubr.f32.mxu1 %v31459_v47  ;;  %v31467_v50 = vld [vmem:[#allocation48_spill] sm:$0xff]  ;;  %v31469_v17 = vld [vmem:[#allocation54_spill] sm:$0xff]  ;;  %v31470_v38 = vld [vmem:[#allocation31_spill] sm:$0xff] }
 0x12e   : > { %19599 = vmatprep.subr.bf16.mxu1 %v19598_v29  ;;  %v31471_v25 = vld [vmem:[#allocation56_spill] sm:$0xff]  ;;  %v31473_v55 = vld [vmem:[#allocation58_spill] sm:$0xff]  ;;  %v31481_v9 = vld [vmem:[#allocation71_spill] sm:$0xff] }
 0x12f   : > { %16260 = vmatmul.mubr.f32.gmra.mrb[6].mxu1 %v23430_v5  ;;  %17601 = vmatmul.mubr.f32.gmra.mrb[4].mxu0 %v23430_v5  ;;  %v31472_v42 = vld [vmem:[#allocation32_spill] sm:$0xff]  ;;  %v31476_v34 = vld [vmem:[#allocation34_spill] sm:$0xff]  ;;  %v24107_v5 = vld [vmem:[#allocation4 + $0x2c8] sm:$0xff] }
 0x130   : > { %19601 = vmatpush3.bf16.msra.mxu1 %v19598_v29  ;;  %20365 = vmatpush3.bf16.msra.mxu0 %v20362_v10  ;;  %v31480_v52 = vld [vmem:[#allocation36_spill] sm:$0xff]  ;;  %v31482_v10 = vld [vmem:[#allocation37_spill] sm:$0xff]  ;;  %v31483_v29 = vld [vmem:[#allocation74_spill] sm:$0xff] }
 0x131   : > { %17603 = vmatprep.mubr.f32.mxu0 %v23451_v39  ;;  %20367 = vmatprep.subr.bf16.mxu0 %v20366_v21  ;;  %v24136_v47 = vld [vmem:[#allocation4 + $0x58] sm:$0xff] }
 0x132   : > { %16262 = vmatprep.mubr.f32.mxu1 %v23451_v39  ;;  %19603 = vmatprep.subr.bf16.mxu1 %v19602_v12  ;;  %v24082_v39 = vld [vmem:[#allocation4 + $0x48] sm:$0xff] }
 0x133   : > { %16263 = vmatmul.mubr.f32.gmra.mrb[8].mxu1 %v31460_v33  ;;  %17604 = vmatmul.mubr.f32.gmra.mrb[6].mxu0 %v31460_v33 }
 0x134   : > { %19605 = vmatpush3.bf16.msra.mxu1 %v19602_v12  ;;  %20369 = vmatpush3.bf16.msra.mxu0 %v20366_v21  ;;  %v31484_v21 = vld [vmem:[#allocation38_spill] sm:$0xff]  ;;  %v31485_v12 = vld [vmem:[#allocation77_spill] sm:$0xff] }
 0x135   : > { %17606 = vmatprep.mubr.f32.mxu0 %v23520_v32  ;;  %20371 = vmatprep.subr.bf16.mxu0 %v20370_v58 }
 0x136   : > { %16265 = vmatprep.mubr.f32.mxu1 %v23520_v32  ;;  %19607 = vmatprep.subr.bf16.mxu1 %v19606_v16 }
 0x137   : > { %16266 = vmatmul.mubr.f32.gmra.mrb[10].mxu1 %v23546_v22  ;;  %17607 = vmatmul.mubr.f32.gmra.mrb[8].mxu0 %v23546_v22  ;;  %v24025_v22 = vld [vmem:[#allocation4 + $0x2b8] sm:$0xff] }
 0x138   : > { %19609 = vmatpush3.bf16.msra.mxu1 %v19606_v16  ;;  %20373 = vmatpush3.bf16.msra.mxu0 %v20370_v58  ;;  %v31486_v58 = vld [vmem:[#allocation39_spill] sm:$0xff]  ;;  %v245_v16 = vlaneseq  ;;  %31505 = vst [vmem:[#allocation30_spill] sm:$0xff] %v24025_v22 }
 0x139   : > { %17609 = vmatprep.mubr.f32.mxu0 %v23591_v44  ;;  %20375 = vmatprep.subr.bf16.mxu0 %v20374_v27 }
 0x13a   : > { %16268 = vmatprep.mubr.f32.mxu1 %v23591_v44  ;;  %19611 = vmatprep.subr.bf16.mxu1 %v19610_v24  ;;  %v31503_v44 = vand.u32 4294901760, %v31463_v8 }
 0x13b   : > { %16269 = vmatmul.mubr.f32.gmra.mrb[12].mxu1 %v23609_v37  ;;  %17610 = vmatmul.mubr.f32.gmra.mrb[10].mxu0 %v23609_v37  ;;  %v31502_v37 = vld [vmem:[#allocation84_spill] sm:$0xff] }
 0x13c   : > { %19613 = vmatpush3.bf16.msra.mxu1 %v19610_v24  ;;  %20377 = vmatpush3.bf16.msra.mxu0 %v20374_v27  ;;  %v31487_v27 = vld [vmem:[#allocation80_spill] sm:$0xff] }
 0x13d   : > { %17612 = vmatprep.mubr.f32.mxu0 %v23632_v23  ;;  %20379 = vmatprep.subr.bf16.mxu0 %v20378_v57  ;;  %v31488_v24 = vld [vmem:[#allocation40_spill] sm:$0xff] }
 0x13e   : > { %16271 = vmatprep.mubr.f32.mxu1 %v23632_v23  ;;  %19615 = vmatprep.subr.bf16.mxu1 %v19614_v20  ;;  %v31498_v23 = vand.u32 4294901760, %v31462_v14 }
 0x13f   : > { %16272 = vmatmul.mubr.f32.gmra.mrb[14].mxu1 %v23674_v54  ;;  %17613 = vmatmul.mubr.f32.gmra.mrb[12].mxu0 %v23674_v54  ;;  %v31497_v54 = vld [vmem:[#allocation51_spill] sm:$0xff] }
 0x140   : > { %19617 = vmatpush3.bf16.msra.mxu1 %v19614_v20  ;;  %20381 = vmatpush3.bf16.msra.mxu0 %v20378_v57  ;;  %v31489_v57 = vld [vmem:[#allocation83_spill] sm:$0xff]  ;;  %v31490_v20 = vld [vmem:[#allocation41_spill] sm:$0xff] }
 0x141   : > { %17615 = vmatprep.mubr.f32.mxu0 %v31461_v46  ;;  %20383 = vmatprep.subr.bf16.mxu0 %v20382_v59  ;;  %v24001_v46 = vld [vmem:[#allocation4 + $0x28] sm:$0xff]  ;;  %31539 = vst [vmem:[#allocation83_spill] sm:$0xff] %v24136_v47 }
 0x142   : > { %16306 = vmatprep.mubr.f32.mxu1 %v31462_v14  ;;  %19619 = vmatprep.subr.bf16.mxu1 %v31464_v35  ;;  %31495 = vst [vmem:[#allocation44_spill] sm:$0xff] %v24001_v46 }
 0x143   : > { %16307 = vmatmul.mubr.f32.vlgmr.msra.gmra.mrb[0].mxu1 %v31463_v8  ;;  %17616 = vmatmul.mubr.f32.gmra.mrb[14].mxu0 %v23719_v60  ;;  %v23999_v60 = vld [vmem:[#allocation4 + $0x20] sm:$0xff]  ;;  %v31507_v8 = vmov 0 }
 0x144   : > { %19621 = vmatpush3.bf16.msra.mxu1 %v31464_v35  ;;  %20385 = vmatpush3.bf16.msra.mxu0 %v20382_v59  ;;  %v23970_v59 = vld [vmem:[#allocation4] sm:$0xff] }
 0x145   : > { %17650 = vmatprep.mubr.f32.mxu0 %v31465_v15  ;;  %20387 = vmatprep.subr.bf16.mxu0 %v31466_v18 }
 0x146   : > { %16309 = vmatprep.mubr.f32.mxu1 %v31465_v15  ;;  %19623 = vmatprep.subr.bf16.mxu1 %v31468_v31  ;;  %v23972_v15 = vld [vmem:[#allocation4 + $0x8] sm:$0xff] }
 0x147   : > { %16310 = vmatmul.mubr.f32.gmra.mrb[2].mxu1 %v31467_v50  ;;  %17651 = vmatmul.mubr.f32.vlgmr.msra.gmra.mrb[0].mxu0 %v31467_v50  ;;  %v23974_v50 = vshrl.u32 %v245_v16, 7  ;;  %v31506_v16 = vld [vmem:[#allocation47_spill] sm:$0xff] }
 0x148   : > { %19625 = vmatpush3.bf16.msra.mxu1 %v31468_v31  ;;  %20389 = vmatpush3.bf16.msra.mxu0 %v31466_v18 }
 0x149   : > { %17653 = vmatprep.mubr.f32.mxu0 %v31469_v17  ;;  %20391 = vmatprep.subr.bf16.mxu0 %v31470_v38  ;;  %31491 = vst [vmem:[#allocation52_spill] sm:$0xff] %v23974_v50  ;;  %vm30626_vm0 = vcmp.lt.s32.totalorder %v23974_v50, 1  ;;  %vm30635_vm2 = vcmp.lt.s32.totalorder %v23974_v50, 7 }
 0x14a   : > { %16312 = vmatprep.mubr.f32.mxu1 %v31469_v17  ;;  %19627 = vmatprep.subr.bf16.mxu1 %v31472_v42  ;;  %v31492_v17 = vld [vmem:[#allocation87_spill] sm:$0xff] }
 0x14b   : > { %16313 = vmatmul.mubr.f32.gmra.mrb[4].mxu1 %v31471_v25  ;;  %17654 = vmatmul.mubr.f32.gmra.mrb[2].mxu0 %v31471_v25  ;;  %v31493_v25 = vld [vmem:[#allocation50_spill] sm:$0xff] }
 0x14c   : > { %19629 = vmatpush3.bf16.msra.mxu1 %v31472_v42  ;;  %20393 = vmatpush3.bf16.msra.mxu0 %v31470_v38  ;;  %v31558_v42 = vand.u32 4294901760, %v24107_v5  ;;  %v24215_v38 = vld [vmem:[#allocation4 + $0x78] sm:$0xff] }
 0x14d   : > { %17656 = vmatprep.mubr.f32.mxu0 %v31473_v55  ;;  %20395 = vmatprep.subr.bf16.mxu0 %v31474_v56 }
 0x14e   : > { %16315 = vmatprep.mubr.f32.mxu1 %v31473_v55  ;;  %19631 = vmatprep.subr.bf16.mxu1 %v31476_v34  ;;  %v23978_v55 = vld [vmem:[#allocation4 + $0x280] sm:$0xff] }
 0x14f   : > { %16316 = vmatmul.mubr.f32.gmra.mrb[6].mxu1 %v31475_v3  ;;  %17657 = vmatmul.mubr.f32.gmra.mrb[4].mxu0 %v31475_v3  ;;  %v23980_v3 = vld [vmem:[#allocation4 + $0x288] sm:$0xff]  ;;  %v31517_v14 = vand.u32 4294901760, %v23978_v55 }
 0x150   : > { %19633 = vmatpush3.bf16.msra.mxu1 %v31476_v34  ;;  %20397 = vmatpush3.bf16.msra.mxu0 %v31474_v56  ;;  %v24109_v56 = vld [vmem:[#allocation4 + $0x50] sm:$0xff] }
 0x151   : > { %17659 = vmatprep.mubr.f32.mxu0 %v31477_v26  ;;  %20399 = vmatprep.subr.bf16.mxu0 %v31478_v62 }
 0x152   : > { %16318 = vmatprep.mubr.f32.mxu1 %v31477_v26  ;;  %19635 = vmatprep.subr.bf16.mxu1 %v31480_v52  ;;  %v23982_v26 = vld [vmem:[#allocation4 + $0x10] sm:$0xff] }
 0x153   : > { %16319 = vmatmul.mubr.f32.gmra.mrb[8].mxu1 %v31479_v41  ;;  %17660 = vmatmul.mubr.f32.gmra.mrb[6].mxu0 %v31479_v41  ;;  %v23986_v41 = vld [vmem:[#allocation4 + $0x18] sm:$0xff] }
 0x154   : > { %19637 = vmatpush3.bf16.msra.mxu1 %v31480_v52  ;;  %20401 = vmatpush3.bf16.msra.mxu0 %v31478_v62  ;;  %v24080_v62 = vld [vmem:[#allocation4 + $0x40] sm:$0xff] }
 0x155   : > { %17662 = vmatprep.mubr.f32.mxu0 %v31481_v9  ;;  %20403 = vmatprep.subr.bf16.mxu0 %v31482_v10 }
 0x156   : > { %16321 = vmatprep.mubr.f32.mxu1 %v31481_v9  ;;  %19639 = vmatprep.subr.bf16.mxu1 %v31484_v21  ;;  %v23988_v9 = vld [vmem:[#allocation4 + $0x290] sm:$0xff] }
 0x157   : > { %16322 = vmatmul.mubr.f32.gmra.mrb[10].mxu1 %v31483_v29  ;;  %17663 = vmatmul.mubr.f32.gmra.mrb[8].mxu0 %v31483_v29  ;;  %v23990_v29 = vld [vmem:[#allocation4 + $0x298] sm:$0xff] }
 0x158   : > { %19641 = vmatpush3.bf16.msra.mxu1 %v31484_v21  ;;  %20405 = vmatpush3.bf16.msra.mxu0 %v31482_v10  ;;  %v24023_v21 = vld [vmem:[#allocation4 + $0x2b0] sm:$0xff]  ;;  %v31511_v10 = vrot.slane %v31502_v37, 7  ;;  %v31524_v37 = vand.u32 4294901760, %v23988_v9 }
 0x159   : > { %17665 = vmatprep.mubr.f32.mxu0 %v31485_v12  ;;  %20407 = vmatprep.subr.bf16.mxu0 %v31486_v58  ;;  %31504 = vst [vmem:[#allocation48_spill] sm:$0xff] %v24023_v21 }
 0x15a   : > { %16324 = vmatprep.mubr.f32.mxu1 %v31485_v12  ;;  %19643 = vmatprep.subr.bf16.mxu1 %v31488_v24  ;;  %v23992_v12 = vld [vmem:[#allocation2] sm:$0xff] }
 0x15b   : > { %16325 = vmatmul.mubr.f32.gmra.mrb[12].mxu1 %v31487_v27  ;;  %17666 = vmatmul.mubr.f32.gmra.mrb[10].mxu0 %v31487_v27  ;;  %v31494_v27 = vld [vmem:[#allocation90_spill] sm:$0xff] }
 0x15c   : > { %19645 = vmatpush3.bf16.msra.mxu1 %v31488_v24  ;;  %20409 = vmatpush3.bf16.msra.mxu0 %v31486_v58  ;;  %v24011_v24 = vld [vmem:[#allocation4 + $0x30] sm:$0xff]  ;;  %v31510_v58 = vrot.slane %v23992_v12, 7 }
 0x15d   : > { %17668 = vmatprep.mubr.f32.mxu0 %v31489_v57  ;;  %20411 = vmatprep.subr.bf16.mxu0 %v31490_v20  ;;  %31500 = vst [vmem:[#allocation45_spill] sm:$0xff] %v24011_v24 }
 0x15e   : > { %16327 = vmatprep.mubr.f32.mxu1 %v31489_v57  ;;  %19647 = vmatprep.subr.bf16.mxu1 %v31493_v25  ;;  %v24013_v57 = vld [vmem:[#allocation4 + $0x38] sm:$0xff]  ;;  %v534_v32 = vsel %vm30626_vm0, %v31511_v10, %v31510_v58  ;;  %v31514_v10 = vand.u32 4294901760, %v23970_v59  ;;  %v31515_v58 = vand.u32 4294901760, %v23972_v15 }
 0x15f   : > { %16328 = vmatmul.mubr.f32.gmra.mrb[14].mxu1 %v31492_v17  ;;  %17669 = vmatmul.mubr.f32.gmra.mrb[12].mxu0 %v31492_v17  ;;  %31501 = vst [vmem:[#allocation29_spill] sm:$0xff] %v24013_v57  ;;  %v266_v17 = vand.u32 15, %v23974_v50 }
 0x160   : > { %19649 = vmatpush3.bf16.msra.mxu1 %v31493_v25  ;;  %20413 = vmatpush3.bf16.msra.mxu0 %v31490_v20  ;;  %v24003_v25 = vld [vmem:[#allocation4 + $0x2a0] sm:$0xff]  ;;  %v24009_v20 = vld [vmem:[#allocation4 + $0x2a8] sm:$0xff]  ;;  %v24072_v52 = vpack.c.bf16 %v31515_v58, %v31514_v10  ;;  %v31522_v10 = vand.u32 4294901760, %v23986_v41 }
 0x161   : > { %17671 = vmatprep.mubr.f32.mxu0 %v31494_v27  ;;  %31496 = vst [vmem:[#allocation46_spill] sm:$0xff] %v24003_v25  ;;  %20415 = vmatprep.subr.bf16.mxu0 %v31497_v54  ;;  %31499 = vst [vmem:[#allocation28_spill] sm:$0xff] %v24009_v20  ;;  %vm24044_vm1 = vcmp.gt.s32.totalorder %v266_v17, 0  ;;  %v31518_v17 = vand.u32 4294901760, %v23980_v3 }
 0x162   : > { %16362 = vmatprep.mubr.f32.mxu1 %v31498_v23  ;;  %19651 = vmatprep.subr.bf16.mxu1 %v23774_v63  ;;  %v31508_v8 = vsel %vm24044_vm1, 4294967295, %v31507_v8  ;;  %v24059_v23 = vld [vmem:[#allocation2 + $0x18] sm:$0xff]  ;;  %31516 = vst [vmem:[#allocation58_spill] sm:$0xff] %v24072_v52  ;;  %v31528_v52 = vand.u32 4294901760, %v24001_v46  ;;  %v24213_v46 = vld [vmem:[#allocation4 + $0x70] sm:$0xff] }
 0x163   : > { %16363 = vmatmul.mubr.f32.vlgmr.msra.gmra.mrb[0].mxu1 %v31503_v44  ;;  %17672 = vmatmul.mubr.f32.gmra.mrb[14].mxu0 %v23730_v36  ;;  %31509 = vst [vmem:[#allocation54_spill] sm:$0xff] %v31508_v8  ;;  %v247_v44 = vadd.s32 8, %v23974_v50  ;;  %v24078_v33 = vpack.c.bf16 %v31518_v17, %v31517_v14  ;;  %v31525_v14 = vand.u32 4294901760, %v23990_v29 }
 0x164   : > { %19653 = vmatpush3.bf16.msra.mxu1 %v23774_v63  ;;  %20417 = vmatpush3.bf16.msra.mxu0 %v31497_v54  ;;  %v31512_v63 = vld [vmem:[#allocation49_spill] sm:$0xff] }
 0x165   : > { %17706 = vmatprep.mubr.f32.mxu0 %v31506_v16  ;;  %20419 = vmatprep.subr.bf16.mxu0 %v23780_v30  ;;  %v24063_v54 = vld [vmem:[#allocation2 + $0x8] sm:$0xff]  ;;  %31519 = vst [vmem:[#allocation62_spill] sm:$0xff] %v24078_v33  ;;  %v24097_v17 = vpack.c.bf16 %v31525_v14, %v31524_v37  ;;  %v31527_v33 = vand.u32 4294901760, %v23999_v60  ;;  %v31537_v37 = vand.u32 4294901760, %v24025_v22 }
 0x166   : > { %16365 = vmatprep.mubr.f32.mxu1 %v31506_v16  ;;  %19655 = vmatprep.subr.bf16.mxu1 %v23786_v49  ;;  %v24056_v16 = vld [vmem:[#allocation2 + $0x10] sm:$0xff] }
 0x167   : > { %16366 = vmatmul.mubr.f32.gmra.mrb[2].mxu1 %v31512_v63  ;;  %31513 = vst [vmem:[#allocation56_spill] sm:$0xff] %v24056_v16  ;;  %17707 = vmatmul.mubr.f32.vlgmr.msra.gmra.mrb[0].mxu0 %v31512_v63  ;;  %v31521_v63 = vand.u32 4294901760, %v23982_v26  ;;  %31526 = vst [vmem:[#allocation67_spill] sm:$0xff] %v24097_v17  ;;  %v24103_v34 = vpack.c.bf16 %v31528_v52, %v31527_v33  ;;  %v31530_v33 = vand.u32 4294901760, %v24003_v25  ;;  %v31531_v52 = vand.u32 4294901760, %v24009_v20  ;;  %v31540_v25 = vld [vmem:[#allocation59_spill] sm:$0xff] }
 0x168   : > { %19657 = vmatpush3.bf16.msra.mxu1 %v23786_v49  ;;  %20421 = vmatpush3.bf16.msra.mxu0 %v23780_v30  ;;  %v31520_v49 = vld [vmem:[#allocation57_spill] sm:$0xff]  ;;  %v24105_v30 = vld [vmem:[#allocation4 + $0x2c0] sm:$0xff]  ;;  %v31534_v17 = vand.u32 4294901760, %v24013_v57  ;;  %31560 = vst [vmem:[#allocation59_spill] sm:$0xff] %v24213_v46 }
 0x169   : > { %17709 = vmatprep.mubr.f32.mxu0 %v31520_v49  ;;  %v24091_v58 = vpack.c.bf16 %v31522_v10, %v31521_v63  ;;  %31529 = vst [vmem:[#allocation71_spill] sm:$0xff] %v24103_v34  ;;  %v567_v63 = vsel %vm24044_vm1, %v534_v32, 0.0  ;;  %v24113_v10 = vld [vmem:[#allocation2 + $0x20] sm:$0xff]  ;;  %20423 = vmatprep.subr.bf16.mxu0 %v23792_v28  ;;  %v24122_v14 = vpack.c.bf16 %v31531_v52, %v31530_v33  ;;  %v31533_v34 = vand.u32 4294901760, %v24011_v24  ;;  %v24163_v57 = vld [vmem:[#allocation4 + $0x2e8] sm:$0xff] }
 0x16a   : > { %16368 = vmatprep.mubr.f32.mxu1 %v31520_v49  ;;  %v31536_v32 = vand.u32 4294901760, %v24023_v21  ;;  %v24138_v49 = vld [vmem:[#allocation4 + $0x2d0] sm:$0xff]  ;;  %19659 = vmatprep.subr.bf16.mxu1 %v23798_v19  ;;  %v24161_v21 = vld [vmem:[#allocation4 + $0x2e0] sm:$0xff]  ;;  %v24165_v24 = vand.u32 4294901760, %v567_v63  ;;  %v248_v33 = vadd.s32 16, %v23974_v50  ;;  %v31548_v20 = vld [vmem:[#allocation65_spill] sm:$0xff] }
 0x16b   : > { %31523 = vst [vmem:[#allocation66_spill] sm:$0xff] %v24091_v58  ;;  %31532 = vst [vmem:[#allocation74_spill] sm:$0xff] %v24122_v14  ;;  %v24128_v8 = vpack.c.bf16 %v31534_v17, %v31533_v34  ;;  %16369 = vmatmul.mubr.f32.gmra.mrb[4].mxu1 %v31540_v25  ;;  %v24144_v34 = vld [vmem:[#allocation4 + $0x2d8] sm:$0xff]  ;;  %v24146_v17 = vld [vmem:[#allocation4 + $0x60] sm:$0xff]  ;;  %v273_v14 = vand.u32 15, %v247_v44  ;;  %17710 = vmatmul.mubr.f32.gmra.mrb[2].mxu0 %v31540_v25  ;;  %v31545_v44 = vrot.slane %v24063_v54, 7 }
 0x16c   : > { %v24134_v58 = vpack.c.bf16 %v31537_v37, %v31536_v32  ;;  %v31541_v37 = vrot.slane %v24059_v23, 1  ;;  %v31542_v32 = vrot.slane %v24056_v16, 1  ;;  %19661 = vmatpush3.bf16.msra.mxu1 %v23798_v19  ;;  %31543 = vst [vmem:[#allocation87_spill] sm:$0xff] %v24165_v24  ;;  %20425 = vmatpush3.bf16.msra.mxu0 %v23792_v28  ;;  %v31553_v52 = vrot.slane %v24059_v23, 1 }
 0x16d   : > { %31535 = vst [vmem:[#allocation77_spill] sm:$0xff] %v24128_v8  ;;  %v24148_v8 = vld [vmem:[#allocation4 + $0x68] sm:$0xff]  ;;  %20427 = vmatprep.subr.bf16.mxu0 %v23804_v43  ;;  %19663 = vmatprep.subr.bf16.mxu1 %v23810_v7  ;;  %vm24189_vm3 = vcmp.lt.s32.totalorder %v273_v14, 15  ;;  %v31554_v28 = vand.u32 4294901760, %v24080_v62  ;;  %v31557_v14 = vand.u32 4294901760, %v24105_v30 }
 0x16e   : > { %31538 = vst [vmem:[#allocation80_spill] sm:$0xff] %v24134_v58  ;;  %v4682_v58 = vsel %vm30635_vm2, %v31542_v32, %v31541_v37  ;;  %v31544_v37 = vld [vmem:[#allocation60_spill] sm:$0xff]  ;;  %v31546_v32 = vrot.slane %v23992_v12, 7  ;;  %v31555_v12 = vand.u32 4294901760, %v24082_v39 }
 0x16f   : > { %17712 = vmatprep.mubr.f32.mxu0 %v31544_v37  ;;  %16371 = vmatprep.mubr.f32.mxu1 %v31544_v37  ;;  %v24183_v19 = vand.u32 4294901760, %v4682_v58  ;;  %v31552_v37 = vrot.slane %v24113_v10, 1  ;;  %v24211_v6 = vpack.c.bf16 %v31558_v42, %v31557_v14  ;;  %31561 = vst [vmem:[#allocation60_spill] sm:$0xff] %v24215_v38  ;;  %v24230_v42 = vld [vmem:[#allocation4 + $0x2f0] sm:$0xff]  ;;  %v31568_v14 = vand.u32 4294901760, %v23970_v59 }
 0x170   : > { %v533_v22 = vsel %vm30626_vm0, %v31546_v32, %v31545_v44  ;;  %16372 = vmatmul.mubr.f32.gmra.mrb[6].mxu1 %v31548_v20  ;;  %v31549_v32 = vmov 0  ;;  %17713 = vmatmul.mubr.f32.gmra.mrb[4].mxu0 %v31548_v20  ;;  %v24205_v44 = vpack.c.bf16 %v31555_v12, %v31554_v28  ;;  %v24218_v20 = vsub.f32 %v567_v63, %v24165_v24 }
 0x171   : > { %31547 = vst [vmem:[#allocation90_spill] sm:$0xff] %v24183_v19  ;;  %v31550_v32 = vsel %vm24189_vm3, 4294967295, %v31549_v32  ;;  %v4681_v25 = vsel %vm30635_vm2, %v31553_v52, %v31552_v37  ;;  %19665 = vmatpush3.bf16.msra.mxu1 %v23810_v7  ;;  %31559 = vst [vmem:[#allocation57_spill] sm:$0xff] %v24211_v6  ;;  %v24220_v7 = vand.u32 4294901760, %v533_v22  ;;  %20429 = vmatpush3.bf16.msra.mxu0 %v23804_v43  ;;  %v31564_v52 = vld [vmem:[#allocation68_spill] sm:$0xff]  ;;  %v31565_v28 = vand.u32 4294901760, %v24109_v56 }
 0x172   : > { %31551 = vst [vmem:[#allocation47_spill] sm:$0xff] %v31550_v32  ;;  %31556 = vst [vmem:[#allocation49_spill] sm:$0xff] %v24205_v44  ;;  %17715 = vmatprep.mubr.f32.mxu0 %v31564_v52  ;;  %v31566_v12 = vand.u32 4294901760, %v24136_v47  ;;  %v24235_v6 = vsub.f32 %v23970_v59, %v31568_v14  ;;  %v280_v63 = vand.u32 15, %v248_v33  ;;  %v504_v24 = vrot.slane %v24056_v16, 7  ;;  %20431 = vmatprep.subr.bf16.mxu0 %v23817_v48  ;;  %v31577_v14 = vld [vmem:[#allocation69_spill] sm:$0xff] }
 0x173   : > { %31562 = vst [vmem:[#allocation65_spill] sm:$0xff] %v24218_v20  ;;  %31563 = vst [vmem:[#allocation92_spill] sm:$0xff] %v24220_v7  ;;  %16374 = vmatprep.mubr.f32.mxu1 %v31564_v52  ;;  %v31570_v43 = vand.u32 4294901760, %v24138_v49  ;;  %v31571_v47 = vand.u32 4294901760, %v24144_v34  ;;  %v24253_v59 = vsub.f32 %v4682_v58, %v24183_v19  ;;  %v4685_v33 = vsel %vm24189_vm3, %v4681_v25, 0.0  ;;  %19667 = vmatprep.subr.bf16.mxu1 %v23823_v51  ;;  %v24274_v25 = vld [vmem:[#allocation4 + $0x2f8] sm:$0xff] }
 0x174   : > { %v24228_v37 = vpack.c.bf16 %v31566_v12, %v31565_v28  ;;  %31569 = vst [vmem:[#allocation93_spill] sm:$0xff] %v24235_v6  ;;  %v31573_v12 = vand.u32 4294901760, %v24146_v17  ;;  %16375 = vmatmul.mubr.f32.gmra.mrb[8].mxu1 %v31577_v14  ;;  %v31578_v52 = vand.u32 4294901760, %v24161_v21  ;;  %v31581_v58 = vand.u32 4294901760, %v23972_v15  ;;  %17716 = vmatmul.mubr.f32.gmra.mrb[6].mxu0 %v31577_v14  ;;  %v31584_v16 = vld [vmem:[#allocation73_spill] sm:$0xff]  ;;  %v31592_v19 = vld [vmem:[#allocation75_spill] sm:$0xff] }
 0x175   : > { %v24244_v28 = vpack.c.bf16 %v31571_v47, %v31570_v43  ;;  %31576 = vst [vmem:[#allocation96_spill] sm:$0xff] %v24253_v59  ;;  %v31579_v47 = vand.u32 4294901760, %v24163_v57  ;;  %19669 = vmatpush3.bf16.msra.mxu1 %v23823_v51  ;;  %20433 = vmatpush3.bf16.msra.mxu0 %v23817_v48  ;;  %v24285_v14 = vand.u32 4294901760, %v4685_v33  ;;  %vm24287_vm4 = vcmp.gt.s32.totalorder %v280_v63, 0  ;;  %v24303_v63 = vld [vmem:[#allocation2 + $0x28] sm:$0xff] }
 0x176   : > { %31567 = vst [vmem:[#allocation68_spill] sm:$0xff] %v24228_v37  ;;  %v31574_v37 = vand.u32 4294901760, %v24148_v8  ;;  %17718 = vmatprep.mubr.f32.mxu0 %v31584_v16  ;;  %v31586_v51 = vmov 0  ;;  %20435 = vmatprep.subr.bf16.mxu0 %v23829_v2  ;;  %v31590_v32 = vand.u32 4294901760, %v23978_v55 }
 0x177   : > { %31572 = vst [vmem:[#allocation94_spill] sm:$0xff] %v24244_v28  ;;  %v24263_v43 = vpack.c.bf16 %v31579_v47, %v31578_v52  ;;  %v24279_v47 = vsub.f32 %v533_v22, %v24220_v7  ;;  %31585 = vst [vmem:[#allocation73_spill] sm:$0xff] %v24285_v14  ;;  %v31587_v51 = vsel %vm24287_vm4, 4294967295, %v31586_v51  ;;  %16377 = vmatprep.mubr.f32.mxu1 %v31584_v16  ;;  %v4655_v52 = vrot.slane %v24303_v63, 1  ;;  %v31606_v7 = vld [vmem:[#allocation82_spill] sm:$0xff] }
 0x178   : > { %v24250_v44 = vpack.c.bf16 %v31574_v37, %v31573_v12  ;;  %v24270_v12 = vsub.f32 %v23972_v15, %v31581_v58  ;;  %v249_v37 = vadd.s32 24, %v23974_v50  ;;  %31588 = vst [vmem:[#allocation99_spill] sm:$0xff] %v31587_v51  ;;  %v31589_v58 = vrot.slane %v24063_v54, 7  ;;  %16378 = vmatmul.mubr.f32.gmra.mrb[10].mxu1 %v31592_v19  ;;  %19671 = vmatprep.subr.bf16.mxu1 %v23835_v11 }
 0x179   : > { %31580 = vst [vmem:[#allocation69_spill] sm:$0xff] %v24263_v43  ;;  %31583 = vst [vmem:[#allocation98_spill] sm:$0xff] %v24279_v47  ;;  %v24301_v15 = vsub.f32 %v23978_v55, %v31590_v32  ;;  %v505_v54 = vrot.slane %v24059_v23, 7  ;;  %v31594_v16 = vand.u32 4294901760, %v24215_v38  ;;  %v31596_v32 = vand.u32 4294901760, %v23980_v3  ;;  %17719 = vmatmul.mubr.f32.gmra.mrb[8].mxu0 %v31592_v19  ;;  %19673 = vmatpush3.bf16.msra.mxu1 %v23835_v11  ;;  %v24326_v38 = vld [vmem:[#allocation2 + $0x30] sm:$0xff] }
 0x17a   : > { %31575 = vst [vmem:[#allocation95_spill] sm:$0xff] %v24250_v44  ;;  %31582 = vst [vmem:[#allocation97_spill] sm:$0xff] %v24270_v12  ;;  %v532_v22 = vsel %vm30626_vm0, %v31589_v58, %v504_v24  ;;  %v31593_v58 = vand.u32 4294901760, %v24213_v46  ;;  %v287_v46 = vand.u32 15, %v249_v37  ;;  %20437 = vmatpush3.bf16.msra.mxu0 %v23829_v2  ;;  %v31598_v55 = vld [vmem:[#allocation79_spill] sm:$0xff]  ;;  %v31603_v2 = vand.u32 4294901760, %v24253_v59  ;;  %19675 = vmatprep.subr.bf16.mxu1 %v23847_v40 }
 0x17b   : > { %31591 = vst [vmem:[#allocation100_spill] sm:$0xff] %v24301_v15  ;;  %v24320_v43 = vsub.f32 %v23980_v3, %v31596_v32  ;;  %v569_v23 = vsel %vm24287_vm4, %v532_v22, 0.0  ;;  %17721 = vmatprep.mubr.f32.mxu0 %v31598_v55  ;;  %v31599_v3 = vand.u32 4294901760, %v24218_v20  ;;  %v31601_v22 = vand.u32 4294901760, %v24235_v6  ;;  %20439 = vmatprep.subr.bf16.mxu0 %v23841_v45 }
 0x17c   : > { %v24313_v48 = vpack.c.bf16 %v31594_v16, %v31593_v58  ;;  %v250_v16 = vadd.s32 32, %v23974_v50  ;;  %v24344_v32 = vsub.f32 %v4685_v33, %v24285_v14  ;;  %16380 = vmatprep.mubr.f32.mxu1 %v31598_v55  ;;  %v24351_v58 = vsub.f32 %v24253_v59, %v31603_v2 }
 0x17d   : > { %31597 = vst [vmem:[#allocation101_spill] sm:$0xff] %v24320_v43  ;;  %v24335_v19 = vsub.f32 %v24218_v20, %v31599_v3  ;;  %v24341_v37 = vsub.f32 %v24235_v6, %v31601_v22  ;;  %v31605_v11 = vrot.slane %v24113_v10, 1  ;;  %v531_v33 = vsel %vm30626_vm0, %v504_v24, %v505_v54  ;;  %16381 = vmatmul.mubr.f32.gmra.mrb[12].mxu1 %v31606_v7  ;;  %v31616_v20 = vld [vmem:[#allocation85_spill] sm:$0xff] }
 0x17e   : > { %31595 = vst [vmem:[#allocation75_spill] sm:$0xff] %v24313_v48  ;;  %31602 = vst [vmem:[#allocation102_spill] sm:$0xff] %v24344_v32  ;;  %v31607_v55 = vand.u32 4294901760, %v24230_v42  ;;  %v31608_v51 = vand.u32 4294901760, %v24274_v25  ;;  %v31610_v3 = vand.u32 4294901760, %v24270_v12  ;;  %17722 = vmatmul.mubr.f32.gmra.mrb[10].mxu0 %v31606_v7  ;;  %19677 = vmatpush3.bf16.msra.mxu1 %v23847_v40  ;;  %vm24376_vm5 = vcmp.lt.s32.totalorder %v287_v46, 15 }
 0x17f   : > { %31600 = vst [vmem:[#allocation79_spill] sm:$0xff] %v24335_v19  ;;  %31604 = vst [vmem:[#allocation103_spill] sm:$0xff] %v24351_v58  ;;  %v4680_v22 = vsel %vm30635_vm2, %v31605_v11, %v4655_v52  ;;  %v24372_v11 = vand.u32 4294901760, %v569_v23  ;;  %v31612_v24 = vmov 0  ;;  %v31615_v14 = vrot.slane %v24326_v38, 1  ;;  %20441 = vmatpush3.bf16.msra.mxu0 %v23841_v45  ;;  %17724 = vmatprep.mubr.f32.mxu0 %v31616_v20 }
 0x180   : > { %v24366_v2 = vpack.c.bf16 %v31608_v51, %v31607_v55  ;;  %v2235_v59 = vsub.f32 %v24270_v12, %v31610_v3  ;;  %v31613_v24 = vsel %vm24376_vm5, 4294967295, %v31612_v24  ;;  %v294_v55 = vand.u32 15, %v250_v16  ;;  %20443 = vmatprep.subr.bf16.mxu0 %v23856_v4  ;;  %16383 = vmatprep.mubr.f32.mxu1 %v31616_v20 }
 0x181   : > { %31611 = vst [vmem:[#allocation104_spill] sm:$0xff] %v24372_v11  ;;  %31614 = vst [vmem:[#allocation105_spill] sm:$0xff] %v31613_v24  ;;  %v4679_v51 = vsel %vm30635_vm2, %v4655_v52, %v31615_v14  ;;  %v506_v3 = vrot.slane %v24113_v10, 7  ;;  %v31617_v7 = vand.u32 4294901760, %v24279_v47  ;;  %v24393_v12 = vand.u32 4294901760, %v4680_v22  ;;  %19679 = vmatprep.subr.bf16.mxu1 %v23862_v13 }
 0x182   : > { %31609 = vst [vmem:[#allocation82_spill] sm:$0xff] %v24366_v2  ;;  %v24395_v6 = vand.u32 4294901760, %v531_v33  ;;  %v2229_v52 = vand.u32 4294901760, %v24341_v37  ;;  %v31621_v14 = vand.u32 4294901760, %v24301_v15  ;;  %v2236_v46 = vand.u32 4294901760, %v2235_v59  ;;  %19681 = vmatpush3.bf16.msra.mxu1 %v23862_v13 }
 0x183   : > { %v24390_v40 = vsub.f32 %v24279_v47, %v31617_v7  ;;  %31619 = vst [vmem:[#allocation106_spill] sm:$0xff] %v24393_v12  ;;  %v31622_v7 = vld [vmem:[#allocation89_spill] sm:$0xff]  ;;  %v31623_v47 = vand.u32 4294901760, %v24320_v43  ;;  %v31624_v20 = vand.u32 4294901760, %v23982_v26  ;;  %v4687_v37 = vsel %vm24376_vm5, %v4679_v51, 0.0  ;;  %20445 = vmatpush3.bf16.msra.mxu0 %v23856_v4  ;;  %19683 = vmatprep.subr.bf16.mxu1 %v31464_v35 }
 0x184   : > { %31620 = vst [vmem:[#allocation107_spill] sm:$0xff] %v24395_v6  ;;  %v7600_v16 = vsub.f32 %v24301_v15, %v31621_v14  ;;  %16384 = vmatmul.mubr.f32.gmra.mrb[14].mxu1 %v31622_v7  ;;  %17725 = vmatmul.mubr.f32.gmra.mrb[12].mxu0 %v31622_v7  ;;  %v24420_v14 = vsub.f32 %v569_v23, %v24372_v11  ;;  %v31627_v59 = vand.u32 4294901760, %v23986_v41  ;;  %vm24427_vm6 = vcmp.gt.s32.totalorder %v294_v55, 0 }
 0x185   : > { %31618 = vst [vmem:[#allocation85_spill] sm:$0xff] %v24390_v40  ;;  %v7607_v2 = vsub.f32 %v24320_v43, %v31623_v47  ;;  %v24413_v10 = vsub.f32 %v23982_v26, %v31624_v20  ;;  %v31629_v47 = vmov 0  ;;  %v530_v26 = vsel %vm30626_vm0, %v505_v54, %v506_v3  ;;  %20447 = vmatprep.subr.bf16.mxu0 %v23864_v61  ;;  %v24452_v54 = vld [vmem:[#allocation2 + $0x38] sm:$0xff] }
 0x186   : > { %31626 = vst [vmem:[#allocation108_spill] sm:$0xff] %v24420_v14  ;;  %v24425_v45 = vsub.f32 %v23986_v41, %v31627_v59  ;;  %v31630_v47 = vsel %vm24427_vm6, 4294967295, %v31629_v47  ;;  %v31632_v51 = vand.u32 4294901760, %v31494_v27  ;;  %v31633_v23 = vand.u32 4294901760, %v24344_v32  ;;  %16418 = vmatprep.mubr.f32.mxu1 %v23220_v53  ;;  %v24506_v59 = vld [vmem:[#allocation2 + $0x40] sm:$0xff]  ;;  %v31757_v40 = vld [vmem:[#allocation51_spill] sm:$0xff] }
 0x187   : > { %31625 = vst [vmem:[#allocation89_spill] sm:$0xff] %v24413_v10  ;;  %31631 = vst [vmem:[#allocation110_spill] sm:$0xff] %v31630_v47  ;;  %v24443_v41 = vsub.f32 %v4680_v22, %v24393_v12  ;;  %v24446_v55 = vsub.f32 %v531_v33, %v24395_v6  ;;  %v7601_v4 = vand.u32 4294901760, %v7600_v16  ;;  %v24450_v27 = vand.u32 4294901760, %v4687_v37  ;;  %20449 = vmatpush3.bf16.msra.mxu0 %v23864_v61 }
 0x188   : > { %31628 = vst [vmem:[#allocation109_spill] sm:$0xff] %v24425_v45  ;;  %17727 = vmatprep.mubr.f32.mxu0 %v31632_v51  ;;  %v24440_v7 = vsub.f32 %v24344_v32, %v31633_v23  ;;  %v4657_v20 = vrot.slane %v24452_v54, 1  ;;  %v31638_v51 = vld [vmem:[#allocation43_spill] sm:$0xff]  ;;  %v7608_v22 = vand.u32 4294901760, %v7607_v2  ;;  %v571_v23 = vsel %vm24427_vm6, %v530_v26, 0.0  ;;  %20451 = vmatprep.subr.bf16.mxu0 %v31466_v18 }
 0x189   : > { %31635 = vst [vmem:[#allocation112_spill] sm:$0xff] %v24443_v41  ;;  %31636 = vst [vmem:[#allocation113_spill] sm:$0xff] %v24446_v55  ;;  %16419 = vmatmul.mubr.f32.vlgmr.msra.gmra.mrb[0].mxu1 %v31638_v51  ;;  %v251_v16 = vadd.s32 40, %v23974_v50  ;;  %v31639_v13 = vand.u32 4294901760, %v23730_v36  ;;  %v31640_v32 = vand.u32 4294901760, %v23988_v9  ;;  %v31642_v33 = vand.u32 4294901760, %v23990_v29 }
 0x18a   : > { %31634 = vst [vmem:[#allocation111_spill] sm:$0xff] %v24440_v7  ;;  %31637 = vst [vmem:[#allocation114_spill] sm:$0xff] %v24450_v27  ;;  %19685 = vmatpush3.bf16.msra.mxu1 %v31464_v35  ;;  %v31644_v36 = vld [vmem:[#allocation42_spill] sm:$0xff]  ;;  %v31648_v61 = vrot.slane %v24326_v38, 1  ;;  %v31670_v11 = vmov 0 }
 0x18b   : > { %17728 = vmatmul.mubr.f32.gmra.mrb[14].mxu0 %v31639_v13  ;;  %v24470_v2 = vsub.f32 %v23988_v9, %v31640_v32  ;;  %v24475_v26 = vsub.f32 %v23990_v29, %v31642_v33  ;;  %v24479_v13 = vpack.c.bf16 %v2236_v46, %v2229_v52  ;;  %16421 = vmatprep.mubr.f32.mxu1 %v31644_v36  ;;  %v24489_v29 = vand.u32 4294901760, %v571_v23 }
 0x18c   : > { %17762 = vmatprep.mubr.f32.mxu0 %v31644_v36  ;;  %v24487_v9 = vsub.f32 %v4687_v37, %v24450_v27  ;;  %v4678_v32 = vsel %vm30635_vm2, %v31648_v61, %v4657_v20  ;;  %v31649_v46 = vrot.slane %v24303_v63, 7  ;;  %19687 = vmatprep.subr.bf16.mxu1 %v31468_v31  ;;  %v24501_v33 = vpack.c.bf16 %v7608_v22, %v7601_v4  ;;  %v31665_v27 = vld [vmem:[#allocation44_spill] sm:$0xff] }
 0x18d   : > { %31641 = vst [vmem:[#allocation43_spill] sm:$0xff] %v24470_v2  ;;  %31643 = vst [vmem:[#allocation115_spill] sm:$0xff] %v24475_v26  ;;  %16422 = vmatmul.mubr.f32.gmra.mrb[2].mxu1 %v23257_v1  ;;  %v31651_v37 = vand.u32 4294901760, %v24413_v10  ;;  %v301_v24 = vand.u32 15, %v251_v16  ;;  %v31654_v4 = vand.u32 4294901760, %v24425_v45  ;;  %v31655_v61 = vand.u32 4294901760, %v24443_v41 }
 0x18e   : > { %31645 = vst [vmem:[#allocation42_spill] sm:$0xff] %v24479_v13  ;;  %31646 = vst [vmem:[#allocation116_spill] sm:$0xff] %v24487_v9  ;;  %v529_v52 = vsel %vm30626_vm0, %v506_v3, %v31649_v46  ;;  %19689 = vmatpush3.bf16.msra.mxu1 %v31468_v31  ;;  %v31652_v3 = vand.u32 4294901760, %v24420_v14  ;;  %v24528_v47 = vand.u32 4294901760, %v4678_v32  ;;  %16424 = vmatprep.mubr.f32.mxu1 %v31457_v0  ;;  %v31666_v12 = vand.u32 4294901760, %v31665_v27 }
 0x18f   : > { %31647 = vst [vmem:[#allocation117_spill] sm:$0xff] %v24489_v29  ;;  %31650 = vst [vmem:[#allocation118_spill] sm:$0xff] %v24501_v33  ;;  %v2242_v35 = vsub.f32 %v24413_v10, %v31651_v37  ;;  %17763 = vmatmul.mubr.f32.vlgmr.msra.gmra.mrb[0].mxu0 %v23257_v1  ;;  %v2249_v22 = vsub.f32 %v24425_v45, %v31654_v4  ;;  %v24526_v31 = vsub.f32 %v24443_v41, %v31655_v61  ;;  %v31661_v37 = vld [vmem:[#allocation31_spill] sm:$0xff]  ;;  %v31732_v33 = vmov 0 }
 0x190   : > { %v24514_v46 = vsub.f32 %v24420_v14, %v31652_v3  ;;  %20453 = vmatpush3.bf16.msra.mxu0 %v31466_v18  ;;  %17765 = vmatprep.mubr.f32.mxu0 %v31457_v0  ;;  %31657 = vst [vmem:[#allocation121_spill] sm:$0xff] %v24528_v47  ;;  %v24530_v3 = vand.u32 4294901760, %v529_v52  ;;  %v31659_v14 = vand.u32 4294901760, %v23999_v60  ;;  %v31662_v18 = vand.u32 4294901760, %v24446_v55 }
 0x191   : > { %31656 = vst [vmem:[#allocation120_spill] sm:$0xff] %v24526_v31  ;;  %20455 = vmatprep.subr.bf16.mxu0 %v31661_v37  ;;  %v24546_v41 = vsub.f32 %v571_v23, %v24489_v29  ;;  %v24551_v6 = vsub.f32 %v31665_v27, %v31666_v12  ;;  %vm24555_vm7 = vcmp.lt.s32.totalorder %v301_v24, 15  ;;  %v31674_v23 = vld [vmem:[#allocation46_spill] sm:$0xff]  ;;  %v31677_v12 = vld [vmem:[#allocation28_spill] sm:$0xff]  ;;  %v2243_v24 = vand.u32 4294901760, %v2242_v35 }
 0x192   : > { %31653 = vst [vmem:[#allocation119_spill] sm:$0xff] %v24514_v46  ;;  %31658 = vst [vmem:[#allocation122_spill] sm:$0xff] %v24530_v3  ;;  %v24535_v4 = vsub.f32 %v23999_v60, %v31659_v14  ;;  %v24542_v16 = vsub.f32 %v24446_v55, %v31662_v18  ;;  %v31668_v60 = vld [vmem:[#allocation53_spill] sm:$0xff]  ;;  %v31669_v14 = vld [vmem:[#allocation32_spill] sm:$0xff]  ;;  %v31671_v11 = vsel %vm24555_vm7, 4294967295, %v31670_v11  ;;  %v31673_v18 = vrot.slane %v24506_v59, 1 }
 0x193   : > { %31664 = vst [vmem:[#allocation124_spill] sm:$0xff] %v24546_v41  ;;  %31667 = vst [vmem:[#allocation44_spill] sm:$0xff] %v24551_v6  ;;  %16425 = vmatmul.mubr.f32.gmra.mrb[4].mxu1 %v31668_v60  ;;  %19691 = vmatprep.subr.bf16.mxu1 %v31669_v14  ;;  %v31675_v55 = vand.u32 4294901760, %v31674_v23  ;;  %v31678_v27 = vand.u32 4294901760, %v31677_v12  ;;  %v2250_v10 = vand.u32 4294901760, %v2249_v22  ;;  %v31680_v43 = vand.u32 4294901760, %v24470_v2 }
 0x194   : > { %31660 = vst [vmem:[#allocation123_spill] sm:$0xff] %v24535_v4  ;;  %31663 = vst [vmem:[#allocation31_spill] sm:$0xff] %v24542_v16  ;;  %v4677_v61 = vsel %vm30635_vm2, %v4657_v20, %v31673_v18  ;;  %17766 = vmatmul.mubr.f32.gmra.mrb[2].mxu0 %v31668_v60  ;;  %19693 = vmatpush3.bf16.msra.mxu1 %v31669_v14  ;;  %v31681_v18 = vand.u32 4294901760, %v24475_v26  ;;  %v24588_v35 = vsub.f32 %v529_v52, %v24530_v3  ;;  %v31685_v14 = vld [vmem:[#allocation33_spill] sm:$0xff]  ;;  %v31697_v22 = vld [vmem:[#allocation64_spill] sm:$0xff] }
 0x195   : > { %31672 = vst [vmem:[#allocation53_spill] sm:$0xff] %v31671_v11  ;;  %v24566_v29 = vsub.f32 %v31674_v23, %v31675_v55  ;;  %v24571_v45 = vsub.f32 %v31677_v12, %v31678_v27  ;;  %v7614_v20 = vsub.f32 %v24470_v2, %v31680_v43  ;;  %20457 = vmatpush3.bf16.msra.mxu0 %v31661_v37  ;;  %v31682_v23 = vld [vmem:[#allocation55_spill] sm:$0xff]  ;;  %v31686_v37 = vand.u32 4294901760, %v24487_v9  ;;  %v31688_v52 = vld [vmem:[#allocation61_spill] sm:$0xff] }
 0x196   : > { %v7621_v55 = vsub.f32 %v24475_v26, %v31681_v18  ;;  %17768 = vmatprep.mubr.f32.mxu0 %v31682_v23  ;;  %v24585_v27 = vsub.f32 %v4678_v32, %v24528_v47  ;;  %31684 = vst [vmem:[#allocation55_spill] sm:$0xff] %v24588_v35  ;;  %20459 = vmatprep.subr.bf16.mxu0 %v31685_v14  ;;  %v4689_v32 = vsel %vm24555_vm7, %v4677_v61, 0.0  ;;  %v31689_v47 = vld [vmem:[#allocation34_spill] sm:$0xff]  ;;  %v252_v11 = vadd.s32 48, %v23974_v50  ;;  %v31719_v46 = vld [vmem:[#allocation39_spill] sm:$0xff] }
 0x197   : > { %31676 = vst [vmem:[#allocation32_spill] sm:$0xff] %v24566_v29  ;;  %31679 = vst [vmem:[#allocation46_spill] sm:$0xff] %v24571_v45  ;;  %16427 = vmatprep.mubr.f32.mxu1 %v31682_v23  ;;  %v24597_v18 = vsub.f32 %v24487_v9, %v31686_v37  ;;  %19695 = vmatprep.subr.bf16.mxu1 %v31689_v47  ;;  %v24610_v37 = vpack.c.bf16 %v2250_v10, %v2243_v24  ;;  %v7615_v12 = vand.u32 4294901760, %v7614_v20  ;;  %v31691_v9 = vld [vmem:[#allocation63_spill] sm:$0xff] }
 0x198   : > { %31683 = vst [vmem:[#allocation28_spill] sm:$0xff] %v24585_v27  ;;  %16428 = vmatmul.mubr.f32.gmra.mrb[6].mxu1 %v31688_v52  ;;  %17769 = vmatmul.mubr.f32.gmra.mrb[4].mxu0 %v31688_v52  ;;  %v7622_v61 = vand.u32 4294901760, %v7621_v55  ;;  %v31692_v26 = vand.u32 4294901760, %v24535_v4  ;;  %v31694_v10 = vld [vmem:[#allocation35_spill] sm:$0xff]  ;;  %v31695_v20 = vand.u32 4294901760, %v24546_v41  ;;  %v31699_v2 = vand.u32 4294901760, %v24551_v6 }
 0x199   : > { %31687 = vst [vmem:[#allocation33_spill] sm:$0xff] %v24597_v18  ;;  %19697 = vmatpush3.bf16.msra.mxu1 %v31689_v47  ;;  %31690 = vst [vmem:[#allocation61_spill] sm:$0xff] %v24610_v37  ;;  %20461 = vmatpush3.bf16.msra.mxu0 %v31685_v14  ;;  %v24622_v47 = vand.u32 4294901760, %v4689_v32  ;;  %v24632_v14 = vld [vmem:[#allocation2 + $0x48] sm:$0xff]  ;;  %v31700_v24 = vand.u32 4294901760, %v24566_v29  ;;  %v508_v31 = vrot.slane %v24326_v38, 7 }
 0x19a   : > { %17771 = vmatprep.mubr.f32.mxu0 %v31691_v9  ;;  %v24620_v3 = vsub.f32 %v24535_v4, %v31692_v26  ;;  %20463 = vmatprep.subr.bf16.mxu0 %v31694_v10  ;;  %v24630_v55 = vsub.f32 %v24546_v41, %v31695_v20  ;;  %v4659_v43 = vrot.slane %v24632_v14, 1  ;;  %v253_v26 = vadd.s32 56, %v23974_v50  ;;  %v31698_v4 = vld [vmem:[#allocation36_spill] sm:$0xff] }
 0x19b   : > { %31693 = vst [vmem:[#allocation34_spill] sm:$0xff] %v24622_v47  ;;  %16430 = vmatprep.mubr.f32.mxu1 %v31691_v9  ;;  %19699 = vmatprep.subr.bf16.mxu1 %v31698_v4  ;;  %v2263_v15 = vsub.f32 %v24551_v6, %v31699_v2  ;;  %v7628_v18 = vsub.f32 %v24566_v29, %v31700_v24  ;;  %v31701_v20 = vand.u32 4294901760, %v24571_v45  ;;  %v308_v37 = vand.u32 15, %v252_v11  ;;  %v31703_v24 = vld [vmem:[#allocation70_spill] sm:$0xff] }
 0x19c   : > { %31696 = vst [vmem:[#allocation63_spill] sm:$0xff] %v24630_v55  ;;  %16431 = vmatmul.mubr.f32.gmra.mrb[8].mxu1 %v31697_v22  ;;  %17772 = vmatmul.mubr.f32.gmra.mrb[6].mxu0 %v31697_v22  ;;  %v24650_v7 = vpack.c.bf16 %v7622_v61, %v7615_v12  ;;  %v509_v16 = vrot.slane %v24452_v54, 7  ;;  %v254_v2 = vadd.s32 64, %v23974_v50  ;;  %v31704_v29 = vand.u32 4294901760, %v24585_v27  ;;  %v31709_v12 = vld [vmem:[#allocation37_spill] sm:$0xff] }
 0x19d   : > { %v7635_v41 = vsub.f32 %v24571_v45, %v31701_v20  ;;  %19701 = vmatpush3.bf16.msra.mxu1 %v31698_v4  ;;  %20465 = vmatpush3.bf16.msra.mxu0 %v31694_v10  ;;  %v31706_v38 = vand.u32 4294901760, %v24588_v35  ;;  %v2257_v11 = vand.u32 4294901760, %v24620_v3  ;;  %v24668_v54 = vsub.f32 %v4689_v32, %v24622_v47  ;;  %v24677_v45 = vld [vmem:[#allocation2 + $0x50] sm:$0xff]  ;;  %v31711_v3 = vld [vmem:[#allocation72_spill] sm:$0xff] }
 0x19e   : > { %31702 = vst [vmem:[#allocation35_spill] sm:$0xff] %v24650_v7  ;;  %17774 = vmatprep.mubr.f32.mxu0 %v31703_v24  ;;  %v24659_v20 = vsub.f32 %v24585_v27, %v31704_v29  ;;  %20467 = vmatprep.subr.bf16.mxu0 %v31709_v12  ;;  %v31710_v10 = vrot.slane %v24506_v59, 1  ;;  %v315_v27 = vand.u32 15, %v253_v26  ;;  %v31712_v32 = vld [vmem:[#allocation38_spill] sm:$0xff]  ;;  %v7629_v47 = vand.u32 4294901760, %v7628_v18 }
 0x19f   : > { %v24664_v4 = vsub.f32 %v24588_v35, %v31706_v38  ;;  %31708 = vst [vmem:[#allocation70_spill] sm:$0xff] %v24668_v54  ;;  %16433 = vmatprep.mubr.f32.mxu1 %v31703_v24  ;;  %v4660_v38 = vrot.slane %v24677_v45, 1  ;;  %19703 = vmatprep.subr.bf16.mxu1 %v31712_v32  ;;  %v2264_v35 = vand.u32 4294901760, %v2263_v15  ;;  %v7636_v6 = vand.u32 4294901760, %v7635_v41 }
 0x1a0   : > { %31705 = vst [vmem:[#allocation64_spill] sm:$0xff] %v24659_v20  ;;  %v4676_v29 = vsel %vm30635_vm2, %v31710_v10, %v4659_v43  ;;  %16434 = vmatmul.mubr.f32.gmra.mrb[10].mxu1 %v31711_v3  ;;  %v31713_v7 = vrot.slane %v24303_v63, 7  ;;  %17775 = vmatmul.mubr.f32.gmra.mrb[8].mxu0 %v31711_v3  ;;  %vm24688_vm8 = vcmp.gt.s32.totalorder %v308_v37, 0  ;;  %v31714_v26 = vmov 0  ;;  %v31717_v63 = vld [vmem:[#allocation76_spill] sm:$0xff]  ;;  %v24701_v37 = vld [vmem:[#allocation2 + $0x58] sm:$0xff] }
 0x1a1   : > { %31707 = vst [vmem:[#allocation36_spill] sm:$0xff] %v24664_v4  ;;  %19705 = vmatpush3.bf16.msra.mxu1 %v31712_v32  ;;  %v31715_v26 = vsel %vm24688_vm8, 4294967295, %v31714_v26  ;;  %v527_v10 = vsel %vm30626_vm0, %v508_v31, %v509_v16  ;;  %v322_v55 = vand.u32 15, %v254_v2  ;;  %v510_v15 = vrot.slane %v24506_v59, 7  ;;  %20469 = vmatpush3.bf16.msra.mxu0 %v31709_v12  ;;  %v31725_v20 = vld [vmem:[#allocation78_spill] sm:$0xff]  ;;  %v31726_v32 = vld [vmem:[#allocation40_spill] sm:$0xff] }
 0x1a2   : > { %v528_v61 = vsel %vm30626_vm0, %v31713_v7, %v508_v31  ;;  %31716 = vst [vmem:[#allocation37_spill] sm:$0xff] %v31715_v26  ;;  %17777 = vmatprep.mubr.f32.mxu0 %v31717_v63  ;;  %v24699_v18 = vand.u32 4294901760, %v4676_v29  ;;  %20471 = vmatprep.subr.bf16.mxu0 %v31719_v46  ;;  %v31720_v31 = vld [vmem:[#allocation45_spill] sm:$0xff]  ;;  %vm24711_vm9 = vcmp.lt.s32.totalorder %v315_v27, 15  ;;  %v31722_v12 = vmov 0 }
 0x1a3   : > { %16436 = vmatprep.mubr.f32.mxu1 %v31717_v63  ;;  %v31721_v59 = vand.u32 4294901760, %v31720_v31  ;;  %v31723_v12 = vsel %vm24711_vm9, 4294967295, %v31722_v12  ;;  %v4675_v7 = vsel %vm30635_vm2, %v4659_v43, %v4660_v38  ;;  %19707 = vmatprep.subr.bf16.mxu1 %v31726_v32  ;;  %v573_v58 = vsel %vm24688_vm8, %v528_v61, 0.0  ;;  %v31728_v27 = vld [vmem:[#allocation29_spill] sm:$0xff] }
 0x1a4   : > { %31718 = vst [vmem:[#allocation72_spill] sm:$0xff] %v24699_v18  ;;  %31724 = vst [vmem:[#allocation38_spill] sm:$0xff] %v31723_v12  ;;  %16437 = vmatmul.mubr.f32.gmra.mrb[12].mxu1 %v31725_v20  ;;  %17778 = vmatmul.mubr.f32.gmra.mrb[10].mxu0 %v31725_v20  ;;  %v24732_v43 = vpack.c.bf16 %v2264_v35, %v2257_v11  ;;  %v24734_v41 = vpack.c.bf16 %v7636_v6, %v7629_v47  ;;  %vm24736_vm10 = vcmp.gt.s32.totalorder %v322_v55, 0  ;;  %v31735_v26 = vld [vmem:[#allocation81_spill] sm:$0xff]  ;;  %v31742_v12 = vld [vmem:[#allocation86_spill] sm:$0xff] }
 0x1a5   : > { %v24709_v2 = vsub.f32 %v31720_v31, %v31721_v59  ;;  %v24723_v31 = vand.u32 4294901760, %v527_v10  ;;  %v31729_v59 = vand.u32 4294901760, %v31728_v27  ;;  %19709 = vmatpush3.bf16.msra.mxu1 %v31726_v32  ;;  %v31733_v33 = vsel %vm24736_vm10, 4294967295, %v31732_v33  ;;  %20473 = vmatpush3.bf16.msra.mxu0 %v31719_v46 }
 0x1a6   : > { %31730 = vst [vmem:[#allocation39_spill] sm:$0xff] %v24732_v43  ;;  %31731 = vst [vmem:[#allocation45_spill] sm:$0xff] %v24734_v41  ;;  %v526_v61 = vsel %vm30626_vm0, %v509_v16, %v510_v15  ;;  %17780 = vmatprep.mubr.f32.mxu0 %v31735_v26  ;;  %v4691_v6 = vsel %vm24711_vm9, %v4675_v7, 0.0  ;;  %v31737_v35 = vrot.slane %v24701_v37, 1  ;;  %v255_v55 = vadd.s32 72, %v23974_v50  ;;  %v31738_v16 = vld [vmem:[#allocation41_spill] sm:$0xff]  ;;  %16439 = vmatprep.mubr.f32.mxu1 %v31735_v26 }
 0x1a7   : > { %31727 = vst [vmem:[#allocation76_spill] sm:$0xff] %v24723_v31  ;;  %v24728_v13 = vsub.f32 %v31728_v27, %v31729_v59  ;;  %31734 = vst [vmem:[#allocation78_spill] sm:$0xff] %v31733_v33  ;;  %v31736_v27 = vand.u32 4294901760, %v24668_v54  ;;  %20475 = vmatprep.subr.bf16.mxu0 %v31738_v16  ;;  %v24758_v46 = vand.u32 4294901760, %v573_v58  ;;  %v24761_v11 = vsub.f32 %v4676_v29, %v24699_v18  ;;  %v31745_v41 = vld [vmem:[#allocation48_spill] sm:$0xff] }
 0x1a8   : > { %v4674_v47 = vsel %vm30635_vm2, %v4660_v38, %v31737_v35  ;;  %v31741_v7 = vrot.slane %v24632_v14, 7  ;;  %16440 = vmatmul.mubr.f32.gmra.mrb[14].mxu1 %v31742_v12  ;;  %v31743_v38 = vld [vmem:[#allocation50_spill] sm:$0xff]  ;;  %v24771_v35 = vsub.f32 %v527_v10, %v24723_v31  ;;  %v31746_v43 = vand.u32 4294901760, %v31745_v41  ;;  %17781 = vmatmul.mubr.f32.gmra.mrb[12].mxu0 %v31742_v12 }
 0x1a9   : > { %v24747_v59 = vsub.f32 %v24668_v54, %v31736_v27  ;;  %31739 = vst [vmem:[#allocation40_spill] sm:$0xff] %v24758_v46  ;;  %31740 = vst [vmem:[#allocation29_spill] sm:$0xff] %v24761_v11  ;;  %19711 = vmatprep.subr.bf16.mxu1 %v31743_v38  ;;  %v575_v32 = vsel %vm24736_vm10, %v526_v61, 0.0  ;;  %v24790_v54 = vand.u32 4294901760, %v4674_v47  ;;  %v31751_v31 = vand.u32 4294901760, %v24080_v62  ;;  %20477 = vmatpush3.bf16.msra.mxu0 %v31738_v16  ;;  %v31763_v16 = vld [vmem:[#allocation91_spill] sm:$0xff] }
 0x1aa   : > { %v525_v27 = vsel %vm30626_vm0, %v510_v15, %v31741_v7  ;;  %31744 = vst [vmem:[#allocation81_spill] sm:$0xff] %v24771_v35  ;;  %v24777_v29 = vsub.f32 %v31745_v41, %v31746_v43  ;;  %19713 = vmatpush3.bf16.msra.mxu1 %v31743_v38  ;;  %v24783_v15 = vand.u32 4294901760, %v4691_v6  ;;  %v31748_v7 = vld [vmem:[#allocation30_spill] sm:$0xff]  ;;  %v31753_v43 = vld [vmem:[#allocation88_spill] sm:$0xff]  ;;  %v31755_v38 = vand.u32 4294901760, %v24082_v39  ;;  %20479 = vmatprep.subr.bf16.mxu0 %v31757_v40 }
 0x1ab   : > { %v31749_v18 = vand.u32 4294901760, %v31748_v7  ;;  %31750 = vst [vmem:[#allocation86_spill] sm:$0xff] %v24790_v54  ;;  %v24795_v41 = vsub.f32 %v24080_v62, %v31751_v31  ;;  %17783 = vmatprep.mubr.f32.mxu0 %v31753_v43  ;;  %v24799_v61 = vand.u32 4294901760, %v525_v27  ;;  %16474 = vmatprep.mubr.f32.mxu1 %v23220_v53  ;;  %v24813_v31 = vsub.f32 %v573_v58, %v24758_v46 }
 0x1ac   : > { %31747 = vst [vmem:[#allocation41_spill] sm:$0xff] %v24783_v15  ;;  %v24804_v33 = vsub.f32 %v24082_v39, %v31755_v38  ;;  %v24816_v19 = vand.u32 4294901760, %v575_v32  ;;  %v31760_v39 = vld [vmem:[#allocation58_spill] sm:$0xff]  ;;  %v31761_v38 = vand.u32 4294901760, %v24709_v2  ;;  %v31762_v53 = vand.u32 4294901760, %v24728_v13  ;;  %17784 = vmatmul.mubr.f32.gmra.mrb[14].mxu0 %v31763_v16 }
 0x1ad   : > { %v24788_v10 = vsub.f32 %v31748_v7, %v31749_v18  ;;  %31752 = vst [vmem:[#allocation50_spill] sm:$0xff] %v24795_v41  ;;  %31754 = vst [vmem:[#allocation48_spill] sm:$0xff] %v24799_v61  ;;  %v329_v18 = vand.u32 15, %v255_v55  ;;  %v24806_v7 = vld [vmem:[#allocation2 + $0x60] sm:$0xff]  ;;  %16475 = vmatmul.mubr.f32.vlgmr.msra.gmra.mrb[0].mxu1 %v31638_v51  ;;  %19715 = vmatprep.subr.bf16.mxu1 %v31760_v39  ;;  %v24835_v51 = vsub.f32 %v4691_v6, %v24783_v15  ;;  %v31772_v55 = vld [vmem:[#allocation62_spill] sm:$0xff] }
 0x1ae   : > { %31756 = vst [vmem:[#allocation30_spill] sm:$0xff] %v24804_v33  ;;  %31758 = vst [vmem:[#allocation88_spill] sm:$0xff] %v24813_v31  ;;  %v24824_v4 = vsub.f32 %v24709_v2, %v31761_v38  ;;  %v24829_v58 = vsub.f32 %v24728_v13, %v31762_v53  ;;  %19717 = vmatpush3.bf16.msra.mxu1 %v31760_v39  ;;  %v24839_v46 = vsub.f32 %v4674_v47, %v24790_v54  ;;  %v31767_v39 = vmov 0 }
 0x1af   : > { %31759 = vst [vmem:[#allocation51_spill] sm:$0xff] %v24816_v19  ;;  %31764 = vst [vmem:[#allocation91_spill] sm:$0xff] %v24835_v51  ;;  %20481 = vmatpush3.bf16.msra.mxu0 %v31757_v40  ;;  %17818 = vmatprep.mubr.f32.mxu0 %v31644_v36  ;;  %v24845_v53 = vsub.f32 %v525_v27, %v24799_v61  ;;  %vm24848_vm11 = vcmp.lt.s32.totalorder %v329_v18, 15  ;;  %v31770_v6 = vrot.slane %v24806_v7, 1  ;;  %v31771_v47 = vrot.slane %v24701_v37, 1 }
 0x1b0   : > { %31765 = vst [vmem:[#allocation125_spill] sm:$0xff] %v24839_v46  ;;  %v31768_v39 = vsel %vm24848_vm11, 4294967295, %v31767_v39  ;;  %20483 = vmatprep.subr.bf16.mxu0 %v31772_v55  ;;  %16477 = vmatprep.mubr.f32.mxu1 %v31644_v36  ;;  %v31773_v27 = vand.u32 4294901760, %v24761_v11  ;;  %v24867_v62 = vsub.f32 %v575_v32, %v24816_v19  ;;  %v31775_v54 = vand.u32 4294901760, %v24105_v30 }
 0x1b1   : > { %31766 = vst [vmem:[#allocation126_spill] sm:$0xff] %v24845_v53  ;;  %31769 = vst [vmem:[#allocation127_spill] sm:$0xff] %v31768_v39  ;;  %v4673_v38 = vsel %vm30635_vm2, %v31771_v47, %v31770_v6  ;;  %16478 = vmatmul.mubr.f32.gmra.mrb[2].mxu1 %v23257_v1  ;;  %v31776_v6 = vld [vmem:[#allocation66_spill] sm:$0xff]  ;;  %v31777_v36 = vand.u32 4294901760, %v24771_v35  ;;  %v31778_v40 = vand.u32 4294901760, %v24777_v29 }
 0x1b2   : > { %v24864_v18 = vsub.f32 %v24761_v11, %v31773_v27  ;;  %31774 = vst [vmem:[#allocation128_spill] sm:$0xff] %v24867_v62  ;;  %v24872_v15 = vsub.f32 %v24105_v30, %v31775_v54  ;;  %19719 = vmatprep.subr.bf16.mxu1 %v31776_v6  ;;  %v2271_v27 = vand.u32 4294901760, %v24824_v4  ;;  %v31779_v11 = vand.u32 4294901760, %v24107_v5  ;;  %17819 = vmatmul.mubr.f32.vlgmr.msra.gmra.mrb[0].mxu0 %v23257_v1  ;;  %v31783_v4 = vld [vmem:[#allocation67_spill] sm:$0xff] }
 0x1b3   : > { %v24879_v47 = vsub.f32 %v24771_v35, %v31777_v36  ;;  %v7642_v32 = vsub.f32 %v24777_v29, %v31778_v40  ;;  %19721 = vmatpush3.bf16.msra.mxu1 %v31776_v6  ;;  %v31780_v36 = vand.u32 4294901760, %v24788_v10  ;;  %v4693_v40 = vsel %vm24848_vm11, %v4673_v38, 0.0  ;;  %20485 = vmatpush3.bf16.msra.mxu0 %v31772_v55 }
 0x1b4   : > { %v24888_v30 = vsub.f32 %v24107_v5, %v31779_v11  ;;  %17821 = vmatprep.mubr.f32.mxu0 %v31457_v0  ;;  %v2278_v5 = vand.u32 4294901760, %v24829_v58  ;;  %v31781_v11 = vand.u32 4294901760, %v24795_v41  ;;  %v31782_v6 = vand.u32 4294901760, %v24804_v33  ;;  %20487 = vmatprep.subr.bf16.mxu0 %v31783_v4 }
 0x1b5   : > { %v7649_v35 = vsub.f32 %v24788_v10, %v31780_v36  ;;  %16480 = vmatprep.mubr.f32.mxu1 %v31457_v0  ;;  %v31784_v38 = vand.u32 4294901760, %v24813_v31  ;;  %v7643_v61 = vand.u32 4294901760, %v7642_v32  ;;  %v24922_v19 = vand.u32 4294901760, %v4693_v40 }
 0x1b6   : > { %v2284_v54 = vsub.f32 %v24795_v41, %v31781_v11  ;;  %v2291_v36 = vsub.f32 %v24804_v33, %v31782_v6  ;;  %16481 = vmatmul.mubr.f32.gmra.mrb[4].mxu1 %v31668_v60  ;;  %v31785_v11 = vld [vmem:[#allocation71_spill] sm:$0xff]  ;;  %17822 = vmatmul.mubr.f32.gmra.mrb[2].mxu0 %v31668_v60  ;;  %v31788_v1 = vand.u32 4294901760, %v24839_v46  ;;  %v256_v32 = vadd.s32 80, %v23974_v50 }
 0x1b7   : > { %v24914_v39 = vsub.f32 %v24813_v31, %v31784_v38  ;;  %19723 = vmatprep.subr.bf16.mxu1 %v31785_v11  ;;  %31786 = vst [vmem:[#allocation129_spill] sm:$0xff] %v24922_v19  ;;  %v31787_v38 = vand.u32 4294901760, %v24835_v51  ;;  %v7650_v55 = vand.u32 4294901760, %v7649_v35  ;;  %20489 = vmatpush3.bf16.msra.mxu0 %v31783_v4  ;;  %v31789_v60 = vand.u32 4294901760, %v24845_v53  ;;  %v31793_v35 = vld [vmem:[#allocation77_spill] sm:$0xff] }
 0x1b8   : > { %19725 = vmatpush3.bf16.msra.mxu1 %v31785_v11  ;;  %v24935_v31 = vsub.f32 %v24839_v46, %v31788_v1  ;;  %17824 = vmatprep.mubr.f32.mxu0 %v31682_v23  ;;  %v2285_v0 = vand.u32 4294901760, %v2284_v54  ;;  %v31790_v11 = vld [vmem:[#allocation74_spill] sm:$0xff]  ;;  %v24950_v1 = vpack.c.bf16 %v2278_v5, %v2271_v27  ;;  %v31791_v46 = vand.u32 4294901760, %v24867_v62 }
 0x1b9   : > { %v24930_v58 = vsub.f32 %v24835_v51, %v31787_v38  ;;  %v24943_v6 = vsub.f32 %v24845_v53, %v31789_v60  ;;  %v2292_v38 = vand.u32 4294901760, %v2291_v36  ;;  %v24945_v51 = vld [vmem:[#allocation2 + $0x68] sm:$0xff]  ;;  %20491 = vmatprep.subr.bf16.mxu0 %v31790_v11  ;;  %16483 = vmatprep.mubr.f32.mxu1 %v31682_v23  ;;  %v31792_v60 = vand.u32 4294901760, %v24872_v15 }
 0x1ba   : > { %v24955_v4 = vsub.f32 %v24867_v62, %v31791_v46  ;;  %16484 = vmatmul.mubr.f32.gmra.mrb[6].mxu1 %v31688_v52  ;;  %19727 = vmatprep.subr.bf16.mxu1 %v31793_v35  ;;  %v24965_v23 = vsub.f32 %v4693_v40, %v24922_v19  ;;  %v31795_v27 = vand.u32 4294901760, %v24888_v30  ;;  %v512_v5 = vrot.slane %v24677_v45, 7 }
 0x1bb   : > { %v7656_v54 = vsub.f32 %v24872_v15, %v31792_v60  ;;  %17825 = vmatmul.mubr.f32.gmra.mrb[4].mxu0 %v31688_v52  ;;  %v24974_v36 = vpack.c.bf16 %v7650_v55, %v7643_v61  ;;  %v336_v53 = vand.u32 15, %v256_v32  ;;  %v31796_v45 = vrot.slane %v24945_v51, 1  ;;  %v31798_v55 = vld [vmem:[#allocation80_spill] sm:$0xff]  ;;  %16486 = vmatprep.mubr.f32.mxu1 %v31691_v9 }
 0x1bc   : > { %31794 = vst [vmem:[#allocation130_spill] sm:$0xff] %v24965_v23  ;;  %v7663_v46 = vsub.f32 %v24888_v30, %v31795_v27  ;;  %19729 = vmatpush3.bf16.msra.mxu1 %v31793_v35  ;;  %20493 = vmatpush3.bf16.msra.mxu0 %v31790_v11  ;;  %v24980_v27 = vpack.c.bf16 %v2292_v38, %v2285_v0  ;;  %v31797_v52 = vrot.slane %v24806_v7, 1  ;;  %v257_v61 = vadd.s32 88, %v23974_v50  ;;  %v31803_v11 = vld [vmem:[#allocation83_spill] sm:$0xff] }
 0x1bd   : > { %17827 = vmatprep.mubr.f32.mxu0 %v31691_v9  ;;  %20495 = vmatprep.subr.bf16.mxu0 %v31798_v55  ;;  %v7657_v62 = vand.u32 4294901760, %v7656_v54  ;;  %v31799_v0 = vrot.slane %v24701_v37, 7  ;;  %v31800_v40 = vand.u32 4294901760, %v24109_v56  ;;  %v31802_v54 = vrot.slane %v24632_v14, 7 }
 0x1be   : > { %v24988_v60 = vsel %vm30635_vm2, %v31797_v52, %v31796_v45  ;;  %16487 = vmatmul.mubr.f32.gmra.mrb[8].mxu1 %v31697_v22  ;;  %v31801_v52 = vld [vmem:[#allocation49_spill] sm:$0xff]  ;;  %v7664_v35 = vand.u32 4294901760, %v7663_v46  ;;  %vm25019_vm12 = vcmp.gt.s32.totalorder %v336_v53, 0  ;;  %v31809_v14 = vand.u32 4294901760, %v24138_v49 }
 0x1bf   : > { %v24998_v38 = vsel %vm30626_vm0, %v512_v5, %v31799_v0  ;;  %v25003_v45 = vsub.f32 %v24109_v56, %v31800_v40  ;;  %19731 = vmatprep.subr.bf16.mxu1 %v31801_v52  ;;  %v524_v32 = vsel %vm30626_vm0, %v31802_v54, %v512_v5  ;;  %v31804_v0 = vand.u32 4294901760, %v31803_v11  ;;  %17828 = vmatmul.mubr.f32.gmra.mrb[6].mxu0 %v31697_v22  ;;  %v25041_v54 = vld [vmem:[#allocation2 + $0x70] sm:$0xff] }
 0x1c0   : > { %19733 = vmatpush3.bf16.msra.mxu1 %v31801_v52  ;;  %v31805_v56 = vmov 0  ;;  %v25024_v46 = vand.u32 4294901760, %v24988_v60  ;;  %v25029_v5 = vsub.f32 %v24138_v49, %v31809_v14  ;;  %v31810_v40 = vand.u32 4294901760, %v24144_v34  ;;  %20497 = vmatpush3.bf16.msra.mxu0 %v31798_v55 }
 0x1c1   : > { %v25015_v19 = vsub.f32 %v31803_v11, %v31804_v0  ;;  %v31806_v56 = vsel %vm25019_vm12, 4294967295, %v31805_v56  ;;  %17830 = vmatprep.mubr.f32.mxu0 %v31703_v24  ;;  %v25039_v22 = vand.u32 4294901760, %v24998_v38  ;;  %v343_v53 = vand.u32 15, %v257_v61  ;;  %16489 = vmatprep.mubr.f32.mxu1 %v31703_v24 }
 0x1c2   : > { %31807 = vst [vmem:[#allocation83_spill] sm:$0xff] %v31806_v56  ;;  %31808 = vst [vmem:[#allocation131_spill] sm:$0xff] %v25024_v46  ;;  %v25034_v11 = vsub.f32 %v24144_v34, %v31810_v40  ;;  %v31812_v49 = vand.u32 4294901760, %v24795_v41  ;;  %v31813_v14 = vand.u32 4294901760, %v24804_v33  ;;  %v31815_v34 = vld [vmem:[#allocation57_spill] sm:$0xff]  ;;  %v258_v52 = vadd.s32 96, %v23974_v50  ;;  %16490 = vmatmul.mubr.f32.gmra.mrb[10].mxu1 %v31711_v3 }
 0x1c3   : > { %31811 = vst [vmem:[#allocation132_spill] sm:$0xff] %v25039_v22  ;;  %20499 = vmatprep.subr.bf16.mxu0 %v31815_v34  ;;  %v31816_v61 = vand.u32 4294901760, %v24146_v17  ;;  %v31817_v0 = vand.u32 4294901760, %v24872_v15  ;;  %v31818_v41 = vand.u32 4294901760, %v24888_v30  ;;  %v31821_v24 = vand.u32 4294901760, %v24965_v23  ;;  %17831 = vmatmul.mubr.f32.gmra.mrb[8].mxu0 %v31711_v3 }
 0x1c4   : > { %v25048_v9 = vpack.c.bf16 %v31813_v14, %v31812_v49  ;;  %v31820_v49 = vld [vmem:[#allocation68_spill] sm:$0xff]  ;;  %v25072_v40 = vpack.c.bf16 %v7664_v35, %v7657_v62  ;;  %v31824_v35 = vand.u32 4294901760, %v24163_v57  ;;  %20501 = vmatpush3.bf16.msra.mxu0 %v31815_v34  ;;  %17833 = vmatprep.mubr.f32.mxu0 %v31717_v63  ;;  %vm25100_vm13 = vcmp.lt.s32.totalorder %v343_v53, 15  ;;  %v31886_v34 = vld [vmem:[#allocation31_spill] sm:$0xff] }
 0x1c5   : > { %v25057_v55 = vsub.f32 %v24146_v17, %v31816_v61  ;;  %v25063_v33 = vpack.c.bf16 %v31818_v41, %v31817_v0  ;;  %19735 = vmatprep.subr.bf16.mxu1 %v31820_v49  ;;  %v25070_v14 = vsub.f32 %v24965_v23, %v31821_v24  ;;  %v31822_v61 = vand.u32 4294901760, %v24148_v8  ;;  %20503 = vmatprep.subr.bf16.mxu0 %v24244_v28  ;;  %v31865_v23 = vld [vmem:[#allocation85_spill] sm:$0xff] }
 0x1c6   : > { %31814 = vst [vmem:[#allocation133_spill] sm:$0xff] %v25048_v9  ;;  %19737 = vmatpush3.bf16.msra.mxu1 %v31820_v49  ;;  %v31823_v24 = vand.u32 4294901760, %v24161_v21  ;;  %v25092_v17 = vsub.f32 %v24163_v57, %v31824_v35  ;;  %v31825_v3 = vmov 0  ;;  %v31831_v35 = vand.u32 4294901760, %v25015_v19  ;;  %16492 = vmatprep.mubr.f32.mxu1 %v31717_v63  ;;  %v31836_v63 = vld [vmem:[#allocation59_spill] sm:$0xff] }
 0x1c7   : > { %31819 = vst [vmem:[#allocation134_spill] sm:$0xff] %v25063_v33  ;;  %v25078_v9 = vsub.f32 %v24148_v8, %v31822_v61  ;;  %v25098_v8 = vsel %vm25019_vm12, %v524_v32, 0.0  ;;  %v31826_v3 = vsel %vm25100_vm13, 4294967295, %v31825_v3  ;;  %v31829_v61 = vrot.slane %v24945_v51, 1  ;;  %16493 = vmatmul.mubr.f32.gmra.mrb[12].mxu1 %v31725_v20  ;;  %19739 = vmatprep.subr.bf16.mxu1 %v24250_v44 }
 0x1c8   : > { %v25087_v62 = vsub.f32 %v24161_v21, %v31823_v24  ;;  %31827 = vst [vmem:[#allocation135_spill] sm:$0xff] %v31826_v3  ;;  %v31828_v21 = vrot.slane %v25041_v54, 1  ;;  %v31830_v24 = vand.u32 4294901760, %v25003_v45  ;;  %v350_v32 = vand.u32 15, %v258_v52  ;;  %17834 = vmatmul.mubr.f32.gmra.mrb[10].mxu0 %v31725_v20  ;;  %16495 = vmatprep.mubr.f32.mxu1 %v31735_v26 }
 0x1c9   : > { %v514_v53 = vrot.slane %v24806_v7, 7  ;;  %v31833_v56 = vand.u32 4294901760, %v25029_v5  ;;  %v31834_v33 = vand.u32 4294901760, %v25034_v11  ;;  %v31837_v52 = vand.u32 4294901760, %v31836_v63  ;;  %20505 = vmatpush3.bf16.msra.mxu0 %v24244_v28  ;;  %17836 = vmatprep.mubr.f32.mxu0 %v31735_v26 }
 0x1ca   : > { %v4671_v57 = vsel %vm30635_vm2, %v31829_v61, %v31828_v21  ;;  %v25114_v0 = vpack.c.bf16 %v31831_v35, %v31830_v24  ;;  %v260_v24 = vadd.s32 112, %v23974_v50  ;;  %v31838_v35 = vld [vmem:[#allocation60_spill] sm:$0xff]  ;;  %19741 = vmatpush3.bf16.msra.mxu1 %v24250_v44  ;;  %v31840_v61 = vand.u32 4294901760, %v24230_v42 }
 0x1cb   : > { %v25124_v21 = vpack.c.bf16 %v31834_v33, %v31833_v56  ;;  %v25133_v7 = vsub.f32 %v31836_v63, %v31837_v52  ;;  %v31839_v41 = vand.u32 4294901760, %v31838_v35  ;;  %v31841_v63 = vand.u32 4294901760, %v24274_v25  ;;  %16496 = vmatmul.mubr.f32.gmra.mrb[14].mxu1 %v31742_v12  ;;  %19743 = vmatprep.subr.bf16.mxu1 %v24313_v48 }
 0x1cc   : > { %31832 = vst [vmem:[#allocation136_spill] sm:$0xff] %v25114_v0  ;;  %v25157_v20 = vand.u32 4294901760, %v25098_v8  ;;  %vm25172_vm14 = vcmp.gt.s32.totalorder %v350_v32, 0  ;;  %v31851_v33 = vrot.slane %v24701_v37, 7  ;;  %v31852_v44 = vand.u32 4294901760, %v25087_v62  ;;  %17837 = vmatmul.mubr.f32.gmra.mrb[12].mxu0 %v31742_v12  ;;  %v22486_v32 = vld [vmem:[#allocation2 + $0x78] sm:$0xff] }
 0x1cd   : > { %31835 = vst [vmem:[#allocation137_spill] sm:$0xff] %v25124_v21  ;;  %v25138_v0 = vsub.f32 %v31838_v35, %v31839_v41  ;;  %v25147_v21 = vsub.f32 %v24230_v42, %v31840_v61  ;;  %v25152_v52 = vsub.f32 %v24274_v25, %v31841_v63  ;;  %v25161_v41 = vsub.f32 %v24988_v60, %v25024_v46  ;;  %v31847_v25 = vld [vmem:[#allocation69_spill] sm:$0xff] }
 0x1ce   : > { %31842 = vst [vmem:[#allocation59_spill] sm:$0xff] %v25157_v20  ;;  %v515_v35 = vrot.slane %v24945_v51, 7  ;;  %v31844_v42 = vand.u32 4294901760, %v25057_v55  ;;  %v31845_v61 = vand.u32 4294901760, %v25078_v9  ;;  %20507 = vmatprep.subr.bf16.mxu0 %v31847_v25  ;;  %v31848_v63 = vmov 0  ;;  %19745 = vmatpush3.bf16.msra.mxu1 %v24313_v48 }
 0x1cf   : > { %31843 = vst [vmem:[#allocation60_spill] sm:$0xff] %v25161_v41  ;;  %v31849_v63 = vsel %vm25172_vm14, 4294967295, %v31848_v63  ;;  %v522_v60 = vsel %vm30626_vm0, %v31851_v33, %v514_v53  ;;  %v259_v51 = vadd.s32 104, %v23974_v50  ;;  %v25191_v26 = vsub.f32 %v24998_v38, %v25039_v22  ;;  %20509 = vmatpush3.bf16.msra.mxu0 %v31847_v25  ;;  %17839 = vmatprep.mubr.f32.mxu0 %v31753_v43  ;;  %v31860_v38 = vld [vmem:[#allocation79_spill] sm:$0xff]  ;;  %v22487_v25 = vld [vmem:[#allocation2 + $0x80] sm:$0xff] }
 0x1d0   : > { %v25168_v56 = vpack.c.bf16 %v31845_v61, %v31844_v42  ;;  %31850 = vst [vmem:[#allocation139_spill] sm:$0xff] %v31849_v63  ;;  %v31853_v42 = vand.u32 4294901760, %v25092_v17  ;;  %v25195_v37 = vsel %vm25100_vm13, %v4671_v57, 0.0  ;;  %v579_v57 = vsel %vm25172_vm14, %v522_v60, 0.0  ;;  %17840 = vmatmul.mubr.f32.gmra.mrb[14].mxu0 %v31763_v16  ;;  %v31894_v22 = vld [vmem:[#allocation84_spill] sm:$0xff] }
 0x1d1   : > { %31855 = vst [vmem:[#allocation141_spill] sm:$0xff] %v25191_v26  ;;  %v4665_v33 = vrot.slane %v22486_v32, 1  ;;  %v521_v12 = vsel %vm30626_vm0, %v514_v53, %v515_v35  ;;  %v31857_v3 = vand.u32 4294901760, %v25138_v0  ;;  %v31861_v48 = vand.u32 4294901760, %v31860_v38 }
 0x1d2   : > { %31846 = vst [vmem:[#allocation138_spill] sm:$0xff] %v25168_v56  ;;  %v25185_v61 = vpack.c.bf16 %v31853_v42, %v31852_v44  ;;  %v364_v44 = vand.u32 15, %v260_v24  ;;  %v516_v42 = vrot.slane %v25041_v54, 7  ;;  %v31856_v24 = vand.u32 4294901760, %v25133_v7 }
 0x1d3   : > { %16530 = vmatprep.mubr.f32.mxu1 %v31861_v48  ;;  %v357_v43 = vand.u32 15, %v259_v51  ;;  %v4666_v63 = vrot.slane %v22487_v25, 1  ;;  %v261_v60 = vadd.s32 120, %v23974_v50  ;;  %v31862_v32 = vand.u32 4294901760, %v25147_v21 }
 0x1d4   : > { %31854 = vst [vmem:[#allocation140_spill] sm:$0xff] %v25185_v61  ;;  %v25214_v56 = vpack.c.bf16 %v31857_v3, %v31856_v24  ;;  %v31859_v61 = vld [vmem:[#allocation82_spill] sm:$0xff]  ;;  %v31863_v53 = vand.u32 4294901760, %v25152_v52  ;;  %v31866_v49 = vand.u32 4294901760, %v31865_v23  ;;  %v25232_v48 = vsub.f32 %v25098_v8, %v25157_v20  ;;  %v31890_v20 = vld [vmem:[#allocation111_spill] sm:$0xff] }
 0x1d5   : > { %20511 = vmatprep.subr.bf16.mxu0 %v31859_v61  ;;  %v31867_v3 = vld [vmem:[#allocation42_spill] sm:$0xff]  ;;  %v31869_v51 = vand.u32 4294901760, %v25003_v45  ;;  %vm25245_vm15 = vcmp.gt.s32.totalorder %v364_v44, 0  ;;  %v520_v8 = vsel %vm30626_vm0, %v515_v35, %v516_v42  ;;  %v31876_v16 = vand.u32 4294901760, %v25015_v19 }
 0x1d6   : > { %31858 = vst [vmem:[#allocation142_spill] sm:$0xff] %v25214_v56  ;;  %v25224_v28 = vpack.c.bf16 %v31863_v53, %v31862_v32  ;;  %16531 = vmatmul.mubr.f32.vlgmr.msra.gmra.mrb[0].mxu1 %v31866_v49  ;;  %19747 = vmatprep.subr.bf16.mxu1 %v31867_v3  ;;  %31868 = vst [vmem:[#allocation85_spill] sm:$0xff] %v25232_v48  ;;  %v25243_v49 = vand.u32 4294901760, %v579_v57  ;;  %v31871_v32 = vmov 0  ;;  %v31874_v53 = vld [vmem:[#allocation103_spill] sm:$0xff]  ;;  %v25258_v24 = vand.u32 4294901760, %v25195_v37 }
 0x1d7   : > { %v25238_v38 = vsub.f32 %v25003_v45, %v31869_v51  ;;  %19749 = vmatpush3.bf16.msra.mxu1 %v31867_v3  ;;  %v31872_v32 = vsel %vm25245_vm15, 4294967295, %v31871_v32  ;;  %20513 = vmatpush3.bf16.msra.mxu0 %v31859_v61  ;;  %v31875_v51 = vand.u32 4294901760, %v31874_v53  ;;  %v2305_v3 = vsub.f32 %v25015_v19, %v31876_v16  ;;  %v31880_v35 = vld [vmem:[#allocation118_spill] sm:$0xff]  ;;  %v22488_v16 = vld [vmem:[#allocation2 + $0x88] sm:$0xff] }
 0x1d8   : > { %31864 = vst [vmem:[#allocation79_spill] sm:$0xff] %v25224_v28  ;;  %31870 = vst [vmem:[#allocation42_spill] sm:$0xff] %v25243_v49  ;;  %v31878_v44 = vrot.slane %v25041_v54, 1  ;;  %v25264_v25 = vand.u32 4294901760, %v521_v12  ;;  %20515 = vmatprep.subr.bf16.mxu0 %v31880_v35  ;;  %v31881_v28 = vld [vmem:[#allocation119_spill] sm:$0xff]  ;;  %vm25269_vm0 = vcmp.lt.s32.totalorder %v357_v43, 15 }
 0x1d9   : > { %31873 = vst [vmem:[#allocation143_spill] sm:$0xff] %v31872_v32  ;;  %17874 = vmatprep.mubr.f32.mxu0 %v31875_v51  ;;  %31877 = vst [vmem:[#allocation103_spill] sm:$0xff] %v25258_v24  ;;  %v31882_v56 = vand.u32 4294901760, %v31881_v28  ;;  %v31883_v53 = vmov 0  ;;  %v4669_v51 = vsel %vm30635_vm2, %v4665_v33, %v4666_v63  ;;  %v4667_v61 = vrot.slane %v22488_v16, 1 }
 0x1da   : > { %v4670_v23 = vsel %vm30635_vm2, %v31878_v44, %v4665_v33  ;;  %31879 = vst [vmem:[#allocation144_spill] sm:$0xff] %v25264_v25  ;;  %v31884_v53 = vsel %vm25269_vm0, 4294967295, %v31883_v53  ;;  %v371_v54 = vand.u32 15, %v261_v60  ;;  %v31887_v46 = vand.u32 4294901760, %v31886_v34  ;;  %v31888_v44 = vld [vmem:[#allocation61_spill] sm:$0xff] }
 0x1db   : > { %16533 = vmatprep.mubr.f32.mxu1 %v31882_v56  ;;  %31885 = vst [vmem:[#allocation118_spill] sm:$0xff] %v31884_v53  ;;  %19751 = vmatprep.subr.bf16.mxu1 %v31888_v44  ;;  %v31889_v28 = vand.u32 4294901760, %v25161_v41  ;;  %v2299_v43 = vand.u32 4294901760, %v25238_v38  ;;  %v581_v33 = vsel %vm25245_vm15, %v520_v8, 0.0  ;;  %v31891_v16 = vand.u32 4294901760, %v31890_v20  ;;  %v31897_v20 = vld [vmem:[#allocation120_spill] sm:$0xff] }
 0x1dc   : > { %16534 = vmatmul.mubr.f32.gmra.mrb[2].mxu1 %v31887_v46  ;;  %v31892_v46 = vand.u32 4294901760, %v25191_v26  ;;  %v25296_v60 = vsub.f32 %v579_v57, %v25243_v49  ;;  %v31895_v38 = vrot.slane %v31894_v22, 7  ;;  %vm31896_vm2 = vcmp.lt.s32.totalorder %v23974_v50, 1  ;;  %v31899_v22 = vld [vmem:[#allocation35_spill] sm:$0xff] }
 0x1dd   : > { %v25282_v56 = vsub.f32 %v25161_v41, %v31889_v28  ;;  %17875 = vmatmul.mubr.f32.vlgmr.msra.gmra.mrb[0].mxu0 %v31891_v16  ;;  %19753 = vmatpush3.bf16.msra.mxu1 %v31888_v44  ;;  %v25298_v28 = vand.u32 4294901760, %v4670_v23  ;;  %v31898_v16 = vand.u32 4294901760, %v31897_v20  ;;  %v2306_v44 = vand.u32 4294901760, %v2305_v3  ;;  %v31900_v41 = vld [vmem:[#allocation63_spill] sm:$0xff] }
 0x1de   : > { %v25293_v34 = vsub.f32 %v25191_v26, %v31892_v46  ;;  %v519_v8 = vsel %vm31896_vm2, %v516_v42, %v31895_v38  ;;  %20517 = vmatpush3.bf16.msra.mxu0 %v31880_v35  ;;  %v25309_v46 = vsub.f32 %v25195_v37, %v25258_v24  ;;  %v25312_v57 = vsub.f32 %v521_v12, %v25264_v25  ;;  %v31907_v37 = vld [vmem:[#allocation56_spill] sm:$0xff]  ;;  %v31912_v53 = vld [vmem:[#allocation39_spill] sm:$0xff] }
 0x1df   : > { %31893 = vst [vmem:[#allocation119_spill] sm:$0xff] %v25298_v28  ;;  %17877 = vmatprep.mubr.f32.mxu0 %v31898_v16  ;;  %v4697_v32 = vsel %vm25269_vm0, %v4669_v51, 0.0  ;;  %20519 = vmatprep.subr.bf16.mxu0 %v31899_v22  ;;  %v31901_v42 = vand.u32 4294901760, %v31900_v41  ;;  %v25319_v35 = vand.u32 4294901760, %v581_v33  ;;  %vm31903_vm2 = vcmp.lt.s32.totalorder %v23974_v50, 7  ;;  %v31910_v51 = vld [vmem:[#allocation36_spill] sm:$0xff] }
 0x1e0   : > { %v4668_v3 = vsel %vm31903_vm2, %v4666_v63, %v4667_v61  ;;  %vm25323_vm15 = vcmp.lt.s32.totalorder %v371_v54, 15  ;;  %v31904_v38 = vmov 0  ;;  %v31908_v12 = vrot.slane %v31907_v37, 1  ;;  %vm31909_vm14 = vmmov %vm31903_vm2  ;;  %19755 = vmatprep.subr.bf16.mxu1 %v31912_v53  ;;  %v31916_v37 = vld [vmem:[#allocation33_spill] sm:$0xff] }
 0x1e1   : > { %16536 = vmatprep.mubr.f32.mxu1 %v31901_v42  ;;  %31902 = vst [vmem:[#allocation31_spill] sm:$0xff] %v25319_v35  ;;  %v31905_v38 = vsel %vm25323_vm15, 4294967295, %v31904_v38  ;;  %v31911_v16 = vand.u32 4294901760, %v31910_v51  ;;  %v31913_v42 = vand.u32 4294901760, %v25029_v5  ;;  %v31914_v54 = vand.u32 4294901760, %v25034_v11  ;;  %19757 = vmatpush3.bf16.msra.mxu1 %v31912_v53  ;;  %v31923_v51 = vld [vmem:[#allocation45_spill] sm:$0xff] }
 0x1e2   : > { %31906 = vst [vmem:[#allocation61_spill] sm:$0xff] %v31905_v38  ;;  %v4683_v20 = vsel %vm31909_vm14, %v4667_v61, %v31908_v12  ;;  %v25341_v24 = vand.u32 4294901760, %v519_v8  ;;  %v31917_v50 = vand.u32 4294901760, %v31916_v37  ;;  %v31918_v61 = vand.u32 4294901760, %v25232_v48  ;;  %20521 = vmatpush3.bf16.msra.mxu0 %v31899_v22  ;;  %19759 = vmatprep.subr.bf16.mxu1 %v24950_v1  ;;  %vm32064_vm14 = vmmov %vm31903_vm2 }
 0x1e3   : > { %16537 = vmatmul.mubr.f32.gmra.mrb[4].mxu1 %v31911_v16  ;;  %v7670_v63 = vsub.f32 %v25029_v5, %v31913_v42  ;;  %v7677_v26 = vsub.f32 %v25034_v11, %v31914_v54  ;;  %v25351_v16 = vsub.f32 %v4670_v23, %v25298_v28  ;;  %v25353_v42 = vand.u32 4294901760, %v4697_v32  ;;  %v31920_v54 = vld [vmem:[#allocation64_spill] sm:$0xff]  ;;  %20523 = vmatprep.subr.bf16.mxu0 %v31923_v51 }
 0x1e4   : > { %31915 = vst [vmem:[#allocation111_spill] sm:$0xff] %v25341_v24  ;;  %17878 = vmatmul.mubr.f32.gmra.mrb[2].mxu0 %v31917_v50  ;;  %v2167_v12 = vsub.f32 %v25232_v48, %v31918_v61  ;;  %v31921_v41 = vand.u32 4294901760, %v31920_v54  ;;  %v2178_v50 = vand.u32 4294901760, %v25293_v34  ;;  %v25360_v37 = vand.u32 4294901760, %v4668_v3 }
 0x1e5   : > { %31919 = vst [vmem:[#allocation84_spill] sm:$0xff] %v25353_v42  ;;  %v4699_v61 = vsel %vm25323_vm15, %v4683_v20, 0.0  ;;  %v31924_v23 = vand.u32 4294901760, %v24914_v39  ;;  %v19766_v48 = vpack.c.bf16 %v2306_v44, %v2299_v43  ;;  %v30656_v22 = vand.u32 4294901760, %v25309_v46  ;;  %19761 = vmatpush3.bf16.msra.mxu1 %v24950_v1 }
 0x1e6   : > { %17880 = vmatprep.mubr.f32.mxu0 %v31921_v41  ;;  %31922 = vst [vmem:[#allocation120_spill] sm:$0xff] %v25360_v37  ;;  %v31925_v54 = vand.u32 4294901760, %v25057_v55  ;;  %v25372_v34 = vsub.f32 %v581_v33, %v25319_v35  ;;  %v31926_v53 = vand.u32 4294901760, %v24879_v47  ;;  %v7671_v20 = vand.u32 4294901760, %v7670_v63  ;;  %20525 = vmatpush3.bf16.msra.mxu0 %v31923_v51 }
 0x1e7   : > { %16539 = vmatprep.mubr.f32.mxu1 %v31924_v23  ;;  %v7678_v38 = vand.u32 4294901760, %v7677_v26  ;;  %v31927_v39 = vand.u32 4294901760, %v25078_v9  ;;  %v25381_v44 = vsub.f32 %v519_v8, %v25341_v24  ;;  %v31928_v23 = vand.u32 4294901760, %v24747_v59  ;;  %20527 = vmatprep.subr.bf16.mxu0 %v24974_v36 }
 0x1e8   : > { %v2312_v41 = vsub.f32 %v25057_v55, %v31925_v54  ;;  %16540 = vmatmul.mubr.f32.gmra.mrb[6].mxu1 %v31926_v53  ;;  %v31929_v33 = vand.u32 4294901760, %v25296_v60  ;;  %v25391_v26 = vsub.f32 %v4697_v32, %v25353_v42  ;;  %v25393_v63 = vand.u32 4294901760, %v4699_v61  ;;  %19763 = vmatprep.subr.bf16.mxu1 %v24980_v27 }
 0x1e9   : > { %v2319_v43 = vsub.f32 %v25078_v9, %v31927_v39  ;;  %17881 = vmatmul.mubr.f32.gmra.mrb[4].mxu0 %v31928_v23  ;;  %v31931_v8 = vand.u32 4294901760, %v24864_v18  ;;  %v2168_v59 = vand.u32 4294901760, %v2167_v12  ;;  %v31932_v54 = vand.u32 4294901760, %v25312_v57  ;;  %19765 = vmatpush3.bf16.msra.mxu1 %v24980_v27 }
 0x1ea   : > { %v2187_v47 = vsub.f32 %v25296_v60, %v31929_v33  ;;  %31930 = vst [vmem:[#allocation35_spill] sm:$0xff] %v25393_v63  ;;  %v31933_v39 = vand.u32 4294901760, %v25087_v62  ;;  %v25405_v33 = vsub.f32 %v4668_v3, %v25360_v37  ;;  %v31934_v32 = vand.u32 4294901760, %v24955_v4  ;;  %20529 = vmatpush3.bf16.msra.mxu0 %v24974_v36  ;;  %19767 = vmatprep.subr.bf16.mxu1 %v19766_v48 }
 0x1eb   : > { %17883 = vmatprep.mubr.f32.mxu0 %v31931_v8  ;;  %v2197_v1 = vsub.f32 %v25312_v57, %v31932_v54  ;;  %v7549_v18 = vsub.f32 %v25309_v46, %v30656_v22  ;;  %v2313_v12 = vand.u32 4294901760, %v2312_v41  ;;  %v31935_v51 = vand.u32 4294901760, %v25092_v17  ;;  %20531 = vmatprep.subr.bf16.mxu0 %v25072_v40 }
 0x1ec   : > { %v7684_v23 = vsub.f32 %v25087_v62, %v31933_v39  ;;  %16542 = vmatprep.mubr.f32.mxu1 %v31934_v32  ;;  %v31936_v39 = vand.u32 4294901760, %v24943_v6  ;;  %v2320_v3 = vand.u32 4294901760, %v2319_v43  ;;  %v31937_v32 = vand.u32 4294901760, %v25133_v7 }
 0x1ed   : > { %v7691_v8 = vsub.f32 %v25092_v17, %v31935_v51  ;;  %v31938_v41 = vand.u32 4294901760, %v25138_v0  ;;  %v31939_v51 = vand.u32 4294901760, %v24930_v58  ;;  %v20534_v6 = vpack.c.bf16 %v7678_v38, %v7671_v20  ;;  %19769 = vmatpush3.bf16.msra.mxu1 %v19766_v48 }
 0x1ee   : > { %16543 = vmatmul.mubr.f32.gmra.mrb[8].mxu1 %v31936_v39  ;;  %v2326_v53 = vsub.f32 %v25133_v7, %v31937_v32  ;;  %v31940_v39 = vand.u32 4294901760, %v25351_v16  ;;  %v30658_v4 = vand.u32 4294901760, %v25391_v26  ;;  %v25435_v54 = vsub.f32 %v4699_v61, %v25393_v63  ;;  %20533 = vmatpush3.bf16.msra.mxu0 %v25072_v40 }
 0x1ef   : > { %v2333_v22 = vsub.f32 %v25138_v0, %v31938_v41  ;;  %17884 = vmatmul.mubr.f32.gmra.mrb[6].mxu0 %v31939_v51  ;;  %v31941_v32 = vand.u32 4294901760, %v24935_v31  ;;  %v2188_v41 = vand.u32 4294901760, %v2187_v47  ;;  %v2198_v58 = vand.u32 4294901760, %v2197_v1  ;;  %16545 = vmatprep.mubr.f32.mxu1 %v2168_v59 }
 0x1f0   : > { %v7559_v43 = vsub.f32 %v25351_v16, %v31940_v39  ;;  %v7685_v51 = vand.u32 4294901760, %v7684_v23  ;;  %v7692_v38 = vand.u32 4294901760, %v7691_v8  ;;  %v31942_v20 = vand.u32 4294901760, %v25372_v34  ;;  %20535 = vmatprep.subr.bf16.mxu0 %v20534_v6 }
 0x1f1   : > { %17886 = vmatprep.mubr.f32.mxu0 %v31941_v32  ;;  %v31943_v61 = vand.u32 4294901760, %v25147_v21  ;;  %v31944_v31 = vand.u32 4294901760, %v25152_v52  ;;  %v19770_v1 = vpack.c.bf16 %v2320_v3, %v2313_v12  ;;  %v31945_v23 = vand.u32 4294901760, %v25381_v44 }
 0x1f2   : > { %v2207_v39 = vsub.f32 %v25372_v34, %v31942_v20  ;;  %16546 = vmatmul.mubr.f32.gmra.mrb[10].mxu1 %v2178_v50  ;;  %v2327_v8 = vand.u32 4294901760, %v2326_v53  ;;  %v2334_v32 = vand.u32 4294901760, %v2333_v22  ;;  %v31946_v27 = vand.u32 4294901760, %v25070_v14  ;;  %20537 = vmatpush3.bf16.msra.mxu0 %v20534_v6  ;;  %v31953_v6 = vld [vmem:[#allocation101_spill] sm:$0xff] }
 0x1f3   : > { %v7698_v36 = vsub.f32 %v25147_v21, %v31943_v61  ;;  %v7705_v47 = vsub.f32 %v25152_v52, %v31944_v31  ;;  %v2217_v59 = vsub.f32 %v25381_v44, %v31945_v23  ;;  %v7550_v20 = vand.u32 4294901760, %v7549_v18  ;;  %16548 = vmatprep.mubr.f32.mxu1 %v2188_v41  ;;  %19771 = vmatprep.subr.bf16.mxu1 %v19770_v1 }
 0x1f4   : > { %17887 = vmatmul.mubr.f32.gmra.mrb[8].mxu0 %v31946_v27  ;;  %v7569_v61 = vsub.f32 %v25391_v26, %v30658_v4  ;;  %v30657_v31 = vand.u32 4294901760, %v25435_v54  ;;  %v31947_v50 = vand.u32 4294901760, %v25282_v56  ;;  %v7560_v12 = vand.u32 4294901760, %v7559_v43  ;;  %19773 = vmatpush3.bf16.msra.mxu1 %v19770_v1 }
 0x1f5   : > { %v31948_v53 = vand.u32 4294901760, %v25405_v33  ;;  %v20538_v14 = vpack.c.bf16 %v7692_v38, %v7685_v51  ;;  %v2208_v48 = vand.u32 4294901760, %v2207_v39  ;;  %v7699_v18 = vand.u32 4294901760, %v7698_v36  ;;  %v31949_v51 = vld [vmem:[#allocation93_spill] sm:$0xff]  ;;  %v31951_v36 = vld [vmem:[#allocation87_spill] sm:$0xff] }
 0x1f6   : > { %17889 = vmatprep.mubr.f32.mxu0 %v31947_v50  ;;  %v7706_v3 = vand.u32 4294901760, %v7705_v47  ;;  %16549 = vmatmul.mubr.f32.gmra.mrb[12].mxu1 %v2198_v58  ;;  %v2218_v27 = vand.u32 4294901760, %v2217_v59  ;;  %v19774_v23 = vpack.c.bf16 %v2334_v32, %v2327_v8  ;;  %v7570_v40 = vand.u32 4294901760, %v7569_v61  ;;  %v31950_v58 = vld [vmem:[#allocation97_spill] sm:$0xff]  ;;  %v31952_v47 = vld [vmem:[#allocation100_spill] sm:$0xff]  ;;  %v31957_v61 = vld [vmem:[#allocation90_spill] sm:$0xff] }
 0x1f7   : > { %v7579_v22 = vsub.f32 %v25405_v33, %v31948_v53  ;;  %v7589_v56 = vsub.f32 %v25435_v54, %v30657_v31  ;;  %20539 = vmatprep.subr.bf16.mxu0 %v20538_v14  ;;  %16551 = vmatprep.mubr.f32.mxu1 %v2208_v48  ;;  %v19778_v38 = vpack.c.bf16 %v31950_v58, %v31949_v51  ;;  %v31954_v59 = vld [vmem:[#allocation92_spill] sm:$0xff]  ;;  %v31955_v8 = vld [vmem:[#allocation89_spill] sm:$0xff]  ;;  %v31960_v53 = vld [vmem:[#allocation115_spill] sm:$0xff] }
 0x1f8   : > { %17890 = vmatmul.mubr.f32.gmra.mrb[10].mxu0 %v7550_v20  ;;  %v20542_v41 = vpack.c.bf16 %v7706_v3, %v7699_v18  ;;  %19775 = vmatprep.subr.bf16.mxu1 %v19774_v23  ;;  %v20546_v1 = vpack.c.bf16 %v31953_v6, %v31952_v47  ;;  %v31956_v32 = vld [vmem:[#allocation109_spill] sm:$0xff]  ;;  %v31958_v50 = vld [vmem:[#allocation104_spill] sm:$0xff]  ;;  %v31962_v48 = vld [vmem:[#allocation123_spill] sm:$0xff]  ;;  %v20558_v4 = vpack.c.bf16 %v24788_v10, %v24777_v29 }
 0x1f9   : > { %17892 = vmatprep.mubr.f32.mxu0 %v7560_v12  ;;  %v7580_v43 = vand.u32 4294901760, %v7579_v22  ;;  %v7590_v39 = vand.u32 4294901760, %v7589_v56  ;;  %19777 = vmatpush3.bf16.msra.mxu1 %v19774_v23  ;;  %v19782_v20 = vpack.c.bf16 %v31956_v32, %v31955_v8  ;;  %v31959_v12 = vld [vmem:[#allocation43_spill] sm:$0xff]  ;;  %v31963_v18 = vld [vmem:[#allocation44_spill] sm:$0xff]  ;;  %v31965_v23 = vld [vmem:[#allocation106_spill] sm:$0xff] }
 0x1fa   : > { %16552 = vmatmul.mubr.f32.gmra.mrb[14].mxu1 %v2218_v27  ;;  %20541 = vmatpush3.bf16.msra.mxu0 %v20538_v14  ;;  %v20550_v22 = vpack.c.bf16 %v31960_v53, %v31959_v12  ;;  %v31961_v14 = vld [vmem:[#allocation107_spill] sm:$0xff]  ;;  %v19786_v3 = vpack.c.bf16 %v31963_v18, %v31962_v48  ;;  %v31964_v27 = vld [vmem:[#allocation73_spill] sm:$0xff]  ;;  %v31967_v56 = vld [vmem:[#allocation32_spill] sm:$0xff] }
 0x1fb   : > { %20543 = vmatprep.subr.bf16.mxu0 %v20542_v41  ;;  %16586 = vmatprep.mubr.f32.mxu1 %v31951_v36  ;;  %v31970_v31 = vld [vmem:[#allocation114_spill] sm:$0xff] }
 0x1fc   : > { %17893 = vmatmul.mubr.f32.gmra.mrb[12].mxu0 %v7570_v40  ;;  %19779 = vmatprep.subr.bf16.mxu1 %v19778_v38  ;;  %v31966_v40 = vld [vmem:[#allocation117_spill] sm:$0xff] }
 0x1fd   : > { %17895 = vmatprep.mubr.f32.mxu0 %v7580_v43  ;;  %v31968_v43 = vld [vmem:[#allocation46_spill] sm:$0xff] }
 0x1fe   : > { %16587 = vmatmul.mubr.f32.vlgmr.msra.gmra.mrb[0].mxu1 %v31954_v59  ;;  %20545 = vmatpush3.bf16.msra.mxu0 %v20542_v41  ;;  %v20554_v41 = vpack.c.bf16 %v31968_v43, %v31967_v56 }
 0x1ff   : > { %19781 = vmatpush3.bf16.msra.mxu1 %v19778_v38  ;;  %20547 = vmatprep.subr.bf16.mxu0 %v20546_v1  ;;  %v31969_v38 = vld [vmem:[#allocation122_spill] sm:$0xff] }
 0x200   : > { %17896 = vmatmul.mubr.f32.gmra.mrb[14].mxu0 %v7590_v39  ;;  %16589 = vmatprep.mubr.f32.mxu1 %v31958_v50  ;;  %v19790_v39 = vpack.c.bf16 %v24728_v13, %v24709_v2 }
 0x201   : > { %17930 = vmatprep.mubr.f32.mxu0 %v31957_v61  ;;  %19783 = vmatprep.subr.bf16.mxu1 %v19782_v20 }
 0x202   : > { %16590 = vmatmul.mubr.f32.gmra.mrb[2].mxu1 %v31961_v14  ;;  %v31976_v14 = vld [vmem:[#allocation34_spill] sm:$0xff] }
 0x203   : > { %19785 = vmatpush3.bf16.msra.mxu1 %v19782_v20  ;;  %16592 = vmatprep.mubr.f32.mxu1 %v31966_v40  ;;  %v31971_v20 = vld [vmem:[#allocation121_spill] sm:$0xff]  ;;  %v31973_v40 = vld [vmem:[#allocation76_spill] sm:$0xff] }
 0x204   : > { %17931 = vmatmul.mubr.f32.vlgmr.msra.gmra.mrb[0].mxu0 %v31964_v27  ;;  %19787 = vmatprep.subr.bf16.mxu1 %v19786_v3 }
 0x205   : > { %20549 = vmatpush3.bf16.msra.mxu0 %v20546_v1  ;;  %17933 = vmatprep.mubr.f32.mxu0 %v31965_v23  ;;  %v31972_v1 = vld [vmem:[#allocation40_spill] sm:$0xff]  ;;  %v31975_v23 = vld [vmem:[#allocation30_spill] sm:$0xff] }
 0x206   : > { %20551 = vmatprep.subr.bf16.mxu0 %v20550_v22  ;;  %16593 = vmatmul.mubr.f32.gmra.mrb[4].mxu1 %v31969_v38  ;;  %v31974_v38 = vld [vmem:[#allocation50_spill] sm:$0xff] }
 0x207   : > { %19789 = vmatpush3.bf16.msra.mxu1 %v19786_v3  ;;  %16595 = vmatprep.mubr.f32.mxu1 %v31972_v1  ;;  %v19794_v27 = vpack.c.bf16 %v31975_v23, %v31974_v38  ;;  %v31977_v3 = vld [vmem:[#allocation72_spill] sm:$0xff]  ;;  %v20562_v1 = vpack.c.bf16 %v24888_v30, %v24872_v15  ;;  %v31981_v23 = vld [vmem:[#allocation86_spill] sm:$0xff]  ;;  %v20566_v38 = vpack.c.bf16 %v25034_v11, %v25029_v5  ;;  %v31984_v30 = vld [vmem:[#allocation129_spill] sm:$0xff] }
 0x208   : > { %17934 = vmatmul.mubr.f32.gmra.mrb[2].mxu0 %v31970_v31  ;;  %19791 = vmatprep.subr.bf16.mxu1 %v19790_v39  ;;  %v31980_v31 = vld [vmem:[#allocation41_spill] sm:$0xff]  ;;  %v19802_v15 = vpack.c.bf16 %v25078_v9, %v25057_v55  ;;  %v19806_v5 = vpack.c.bf16 %v25138_v0, %v25133_v7  ;;  %v31986_v11 = vld [vmem:[#allocation103_spill] sm:$0xff]  ;;  %v20574_v55 = vpack.c.bf16 %v25152_v52, %v25147_v21  ;;  %v31989_v0 = vld [vmem:[#allocation58_spill] sm:$0xff] }
 0x209   : > { %20553 = vmatpush3.bf16.msra.mxu0 %v20550_v22  ;;  %17936 = vmatprep.mubr.f32.mxu0 %v31971_v20  ;;  %v31978_v22 = vld [vmem:[#allocation51_spill] sm:$0xff]  ;;  %v31979_v20 = vld [vmem:[#allocation48_spill] sm:$0xff]  ;;  %v31987_v9 = vld [vmem:[#allocation65_spill] sm:$0xff] }
 0x20a   : > { %20555 = vmatprep.subr.bf16.mxu0 %v20554_v41  ;;  %16596 = vmatmul.mubr.f32.gmra.mrb[6].mxu1 %v31973_v40  ;;  %v19798_v40 = vpack.c.bf16 %v25015_v19, %v25003_v45  ;;  %v31985_v19 = vld [vmem:[#allocation131_spill] sm:$0xff]  ;;  %v20570_v45 = vpack.c.bf16 %v25092_v17, %v25087_v62  ;;  %v31988_v17 = vld [vmem:[#allocation98_spill] sm:$0xff]  ;;  %v31990_v62 = vld [vmem:[#allocation96_spill] sm:$0xff] }
 0x20b   : > { %19793 = vmatpush3.bf16.msra.mxu1 %v19790_v39  ;;  %16598 = vmatprep.mubr.f32.mxu1 %v31978_v22  ;;  %v31983_v39 = vld [vmem:[#allocation132_spill] sm:$0xff]  ;;  %v31991_v21 = vld [vmem:[#allocation62_spill] sm:$0xff]  ;;  %v31993_v52 = vld [vmem:[#allocation113_spill] sm:$0xff] }
 0x20c   : > { %17937 = vmatmul.mubr.f32.gmra.mrb[4].mxu0 %v31976_v14  ;;  %19795 = vmatprep.subr.bf16.mxu1 %v19794_v27  ;;  %v31992_v7 = vld [vmem:[#allocation108_spill] sm:$0xff]  ;;  %v32019_v22 = vld [vmem:[#allocation130_spill] sm:$0xff]  ;;  %v32025_v14 = vand.u32 4294901760, %v31949_v51  ;;  %v32030_v51 = vand.u32 4294901760, %v31953_v6  ;;  %v32036_v6 = vand.u32 4294901760, %v31959_v12 }
 0x20d   : > { %20557 = vmatpush3.bf16.msra.mxu0 %v20554_v41  ;;  %17939 = vmatprep.mubr.f32.mxu0 %v31977_v3  ;;  %v31982_v41 = vld [vmem:[#allocation59_spill] sm:$0xff]  ;;  %v32020_v3 = vld [vmem:[#allocation60_spill] sm:$0xff] }
 0x20e   : > { %20559 = vmatprep.subr.bf16.mxu0 %v20558_v4  ;;  %16599 = vmatmul.mubr.f32.gmra.mrb[8].mxu1 %v31979_v20  ;;  %v32018_v20 = vld [vmem:[#allocation68_spill] sm:$0xff] }
 0x20f   : > { %19797 = vmatpush3.bf16.msra.mxu1 %v19794_v27  ;;  %16601 = vmatprep.mubr.f32.mxu1 %v31982_v41  ;;  %v31995_v27 = vld [vmem:[#allocation102_spill] sm:$0xff]  ;;  %v32015_v41 = vld [vmem:[#allocation57_spill] sm:$0xff]  ;;  %v25631_v12 = vld [vmem:[#allocation4 + $0x100] sm:$0xff] }
 0x210   : > { %17940 = vmatmul.mubr.f32.gmra.mrb[6].mxu0 %v31980_v31  ;;  %19799 = vmatprep.subr.bf16.mxu1 %v19798_v40  ;;  %v32017_v31 = vld [vmem:[#allocation141_spill] sm:$0xff] }
 0x211   : > { %20561 = vmatpush3.bf16.msra.mxu0 %v20558_v4  ;;  %17942 = vmatprep.mubr.f32.mxu0 %v31981_v23  ;;  %v31994_v4 = vld [vmem:[#allocation66_spill] sm:$0xff]  ;;  %v32016_v23 = vld [vmem:[#allocation85_spill] sm:$0xff] }
 0x212   : > { %20563 = vmatprep.subr.bf16.mxu0 %v20562_v1  ;;  %16602 = vmatmul.mubr.f32.gmra.mrb[10].mxu1 %v31983_v39  ;;  %v32014_v39 = vld [vmem:[#allocation125_spill] sm:$0xff] }
 0x213   : > { %19801 = vmatpush3.bf16.msra.mxu1 %v19798_v40  ;;  %16604 = vmatprep.mubr.f32.mxu1 %v25243_v49  ;;  %v31996_v40 = vld [vmem:[#allocation112_spill] sm:$0xff]  ;;  %v32011_v49 = vld [vmem:[#allocation126_spill] sm:$0xff] }
 0x214   : > { %17943 = vmatmul.mubr.f32.gmra.mrb[8].mxu0 %v31984_v30  ;;  %19803 = vmatprep.subr.bf16.mxu1 %v19802_v15  ;;  %v32013_v30 = vld [vmem:[#allocation91_spill] sm:$0xff] }
 0x215   : > { %20565 = vmatpush3.bf16.msra.mxu0 %v20562_v1  ;;  %17945 = vmatprep.mubr.f32.mxu0 %v31985_v19  ;;  %v31997_v1 = vld [vmem:[#allocation67_spill] sm:$0xff]  ;;  %v32012_v19 = vld [vmem:[#allocation49_spill] sm:$0xff] }
 0x216   : > { %20567 = vmatprep.subr.bf16.mxu0 %v20566_v38  ;;  %16605 = vmatmul.mubr.f32.gmra.mrb[12].mxu1 %v25264_v25  ;;  %v32010_v25 = vld [vmem:[#allocation128_spill] sm:$0xff] }
 0x217   : > { %19805 = vmatpush3.bf16.msra.mxu1 %v19802_v15  ;;  %16607 = vmatprep.mubr.f32.mxu1 %v25319_v35  ;;  %v31999_v15 = vld [vmem:[#allocation55_spill] sm:$0xff]  ;;  %v32007_v35 = vld [vmem:[#allocation70_spill] sm:$0xff] }
 0x218   : > { %17946 = vmatmul.mubr.f32.gmra.mrb[10].mxu0 %v31986_v11  ;;  %19807 = vmatprep.subr.bf16.mxu1 %v19806_v5  ;;  %v32009_v11 = vld [vmem:[#allocation80_spill] sm:$0xff] }
 0x219   : > { %20569 = vmatpush3.bf16.msra.mxu0 %v20566_v38  ;;  %17948 = vmatprep.mubr.f32.mxu0 %v25298_v28  ;;  %v31998_v38 = vld [vmem:[#allocation124_spill] sm:$0xff]  ;;  %v32008_v28 = vld [vmem:[#allocation29_spill] sm:$0xff] }
 0x21a   : > { %20571 = vmatprep.subr.bf16.mxu0 %v20570_v45  ;;  %16608 = vmatmul.mubr.f32.gmra.mrb[14].mxu1 %v25341_v24  ;;  %v32006_v24 = vld [vmem:[#allocation77_spill] sm:$0xff] }
 0x21b   : > { %19809 = vmatpush3.bf16.msra.mxu1 %v19806_v5  ;;  %16642 = vmatprep.mubr.f32.mxu1 %v31987_v9  ;;  %v32001_v5 = vld [vmem:[#allocation116_spill] sm:$0xff] }
 0x21c   : > { %17949 = vmatmul.mubr.f32.gmra.mrb[12].mxu0 %v25353_v42  ;;  %19811 = vmatprep.subr.bf16.mxu1 %v31989_v0  ;;  %v32005_v42 = vld [vmem:[#allocation81_spill] sm:$0xff] }
 0x21d   : > { %20573 = vmatpush3.bf16.msra.mxu0 %v20570_v45  ;;  %17951 = vmatprep.mubr.f32.mxu0 %v25360_v37  ;;  %v32000_v45 = vld [vmem:[#allocation71_spill] sm:$0xff]  ;;  %v32004_v37 = vld [vmem:[#allocation88_spill] sm:$0xff] }
 0x21e   : > { %20575 = vmatprep.subr.bf16.mxu0 %v20574_v55  ;;  %16643 = vmatmul.mubr.f32.vlgmr.msra.gmra.mrb[0].mxu1 %v31988_v17 }
 0x21f   : > { %19813 = vmatpush3.bf16.msra.mxu1 %v31989_v0  ;;  %16645 = vmatprep.mubr.f32.mxu1 %v31992_v7 }
 0x220   : > { %17952 = vmatmul.mubr.f32.gmra.mrb[14].mxu0 %v25393_v63  ;;  %19815 = vmatprep.subr.bf16.mxu1 %v31994_v4  ;;  %v32003_v63 = vld [vmem:[#allocation74_spill] sm:$0xff] }
 0x221   : > { %20577 = vmatpush3.bf16.msra.mxu0 %v20574_v55  ;;  %17986 = vmatprep.mubr.f32.mxu0 %v31990_v62  ;;  %v32002_v55 = vld [vmem:[#allocation28_spill] sm:$0xff] }
 0x222   : > { %20579 = vmatprep.subr.bf16.mxu0 %v31991_v21  ;;  %16646 = vmatmul.mubr.f32.gmra.mrb[2].mxu1 %v31993_v52 }
 0x223   : > { %19817 = vmatpush3.bf16.msra.mxu1 %v31994_v4  ;;  %16648 = vmatprep.mubr.f32.mxu1 %v31998_v38 }
 0x224   : > { %17987 = vmatmul.mubr.f32.vlgmr.msra.gmra.mrb[0].mxu0 %v31995_v27  ;;  %19819 = vmatprep.subr.bf16.mxu1 %v32000_v45 }
 0x225   : > { %20581 = vmatpush3.bf16.msra.mxu0 %v31991_v21  ;;  %17989 = vmatprep.mubr.f32.mxu0 %v31996_v40 }
 0x226   : > { %20583 = vmatprep.subr.bf16.mxu0 %v31997_v1  ;;  %16649 = vmatmul.mubr.f32.gmra.mrb[4].mxu1 %v31999_v15 }
 0x227   : > { %19821 = vmatpush3.bf16.msra.mxu1 %v32000_v45  ;;  %16651 = vmatprep.mubr.f32.mxu1 %v32004_v37  ;;  %v32029_v45 = vand.u32 4294901760, %v31952_v47  ;;  %v32035_v47 = vand.u32 4294901760, %v31992_v7  ;;  %v32042_v7 = vand.u32 4294901760, %v31996_v40  ;;  %v32046_v40 = vand.u32 4294901760, %v31999_v15  ;;  %v25662_v15 = vld [vmem:[#allocation4 + $0x318] sm:$0xff] }
 0x228   : > { %17990 = vmatmul.mubr.f32.gmra.mrb[2].mxu0 %v32001_v5  ;;  %19823 = vmatprep.subr.bf16.mxu1 %v32006_v24 }
 0x229   : > { %20585 = vmatpush3.bf16.msra.mxu0 %v31997_v1  ;;  %17992 = vmatprep.mubr.f32.mxu0 %v32002_v55  ;;  %v20610_v1 = vpack.c.bf16 %v32030_v51, %v32029_v45  ;;  %v25639_v51 = vld [vmem:[#allocation4 + $0x108] sm:$0xff] }
 0x22a   : > { %20587 = vmatprep.subr.bf16.mxu0 %v32003_v63  ;;  %16652 = vmatmul.mubr.f32.gmra.mrb[6].mxu1 %v32005_v42 }
 0x22b   : > { %19825 = vmatpush3.bf16.msra.mxu1 %v32006_v24  ;;  %16654 = vmatprep.mubr.f32.mxu1 %v32010_v25  ;;  %v32026_v24 = vand.u32 4294901760, %v31950_v58  ;;  %v32032_v58 = vand.u32 4294901760, %v31955_v8 }
 0x22c   : > { %17993 = vmatmul.mubr.f32.gmra.mrb[4].mxu0 %v32007_v35  ;;  %19827 = vmatprep.subr.bf16.mxu1 %v32012_v19 }
 0x22d   : > { %20589 = vmatpush3.bf16.msra.mxu0 %v32003_v63  ;;  %17995 = vmatprep.mubr.f32.mxu0 %v32008_v28  ;;  %v19842_v63 = vpack.c.bf16 %v32026_v24, %v32025_v14  ;;  %v32031_v24 = vand.u32 4294901760, %v31988_v17  ;;  %v32033_v14 = vand.u32 4294901760, %v31956_v32  ;;  %v32038_v32 = vand.u32 4294901760, %v31993_v52 }
 0x22e   : > { %20591 = vmatprep.subr.bf16.mxu0 %v32009_v11  ;;  %16655 = vmatmul.mubr.f32.gmra.mrb[8].mxu1 %v32011_v49  ;;  %v32040_v17 = vand.u32 4294901760, %v31963_v18  ;;  %v32044_v52 = vand.u32 4294901760, %v31967_v56  ;;  %v25653_v56 = vld [vmem:[#allocation4 + $0x118] sm:$0xff] }
 0x22f   : > { %19829 = vmatpush3.bf16.msra.mxu1 %v32012_v19  ;;  %16657 = vmatprep.mubr.f32.mxu1 %v32016_v23  ;;  %v32021_v19 = vld [vmem:[#allocation94_spill] sm:$0xff] }
 0x230   : > { %17996 = vmatmul.mubr.f32.gmra.mrb[6].mxu0 %v32013_v30  ;;  %19831 = vmatprep.subr.bf16.mxu1 %v32018_v20 }
 0x231   : > { %20593 = vmatpush3.bf16.msra.mxu0 %v32009_v11  ;;  %17998 = vmatprep.mubr.f32.mxu0 %v32014_v39  ;;  %v32022_v11 = vld [vmem:[#allocation95_spill] sm:$0xff] }
 0x232   : > { %20595 = vmatprep.subr.bf16.mxu0 %v32015_v41  ;;  %16658 = vmatmul.mubr.f32.gmra.mrb[10].mxu1 %v32017_v31 }
 0x233   : > { %19833 = vmatpush3.bf16.msra.mxu1 %v32018_v20  ;;  %16660 = vmatprep.mubr.f32.mxu1 %v25296_v60  ;;  %v32023_v20 = vld [vmem:[#allocation69_spill] sm:$0xff] }
 0x234   : > { %17999 = vmatmul.mubr.f32.gmra.mrb[8].mxu0 %v32019_v22  ;;  %19835 = vmatprep.subr.bf16.mxu1 %v32022_v11 }
 0x235   : > { %20597 = vmatpush3.bf16.msra.mxu0 %v32015_v41  ;;  %18001 = vmatprep.mubr.f32.mxu0 %v32020_v3  ;;  %v32024_v41 = vld [vmem:[#allocation75_spill] sm:$0xff] }
 0x236   : > { %20599 = vmatprep.subr.bf16.mxu0 %v32021_v19  ;;  %16661 = vmatmul.mubr.f32.gmra.mrb[12].mxu1 %v25312_v57 }
 0x237   : > { %19837 = vmatpush3.bf16.msra.mxu1 %v32022_v11  ;;  %16663 = vmatprep.mubr.f32.mxu1 %v25372_v34  ;;  %v32027_v11 = vld [vmem:[#allocation82_spill] sm:$0xff] }
 0x238   : > { %18002 = vmatmul.mubr.f32.gmra.mrb[10].mxu0 %v25309_v46  ;;  %19839 = vmatprep.subr.bf16.mxu1 %v32024_v41 }
 0x239   : > { %20601 = vmatpush3.bf16.msra.mxu0 %v32021_v19  ;;  %18004 = vmatprep.mubr.f32.mxu0 %v25351_v16  ;;  %v32028_v19 = vand.u32 4294901760, %v31987_v9  ;;  %v32037_v9 = vand.u32 4294901760, %v31960_v53  ;;  %v32043_v53 = vand.u32 4294901760, %v31998_v38  ;;  %v32048_v38 = vand.u32 4294901760, %v24728_v13  ;;  %v25666_v13 = vld [vmem:[#allocation2 + $0x98] sm:$0xff] }
 0x23a   : > { %20603 = vmatprep.subr.bf16.mxu0 %v32023_v20  ;;  %16664 = vmatmul.mubr.f32.gmra.mrb[14].mxu1 %v25381_v44  ;;  %32051 = vst [vmem:[#allocation56_spill] sm:$0xff] %v25666_v13 }
 0x23b   : > { %19841 = vmatpush3.bf16.msra.mxu1 %v32024_v41  ;;  %16698 = vmatprep.mubr.f32.mxu1 %v32028_v19  ;;  %v19846_v41 = vpack.c.bf16 %v32033_v14, %v32032_v58  ;;  %v32034_v19 = vand.u32 4294901760, %v31990_v62  ;;  %v20614_v8 = vpack.c.bf16 %v32037_v9, %v32036_v6  ;;  %v32041_v62 = vand.u32 4294901760, %v31995_v27  ;;  %v25641_v27 = vld [vmem:[#allocation4 + $0x300] sm:$0xff]  ;;  %v25651_v58 = vld [vmem:[#allocation4 + $0x110] sm:$0xff] }
 0x23c   : > { %18005 = vmatmul.mubr.f32.gmra.mrb[12].mxu0 %v25391_v26  ;;  %19843 = vmatprep.subr.bf16.mxu1 %v19842_v63  ;;  %v25657_v14 = vld [vmem:[#allocation2] sm:$0xff]  ;;  %v32052_v6 = vand.u32 4294901760, %v32002_v55  ;;  %v32053_v9 = vand.u32 4294901760, %v24777_v29  ;;  %v30692_v29 = vand.u32 4294901760, %v25651_v58 }
 0x23d   : > { %20605 = vmatpush3.bf16.msra.mxu0 %v32023_v20  ;;  %18007 = vmatprep.mubr.f32.mxu0 %v25405_v33  ;;  %32049 = vst [vmem:[#allocation63_spill] sm:$0xff] %v25657_v14  ;;  %v25819_v20 = vld [vmem:[#allocation2 + $0x30] sm:$0xff] }
 0x23e   : > { %20607 = vmatprep.subr.bf16.mxu0 %v32027_v11  ;;  %16699 = vmatmul.mubr.f32.vlgmr.msra.gmra.mrb[0].mxu1 %v32031_v24 }
 0x23f   : > { %19845 = vmatpush3.bf16.msra.mxu1 %v19842_v63  ;;  %16701 = vmatprep.mubr.f32.mxu1 %v32035_v47  ;;  %v32039_v63 = vand.u32 4294901760, %v31962_v48  ;;  %v32045_v48 = vand.u32 4294901760, %v31968_v43  ;;  %v25655_v43 = vld [vmem:[#allocation4 + $0x310] sm:$0xff]  ;;  %v32050_v47 = vand.u32 4294901760, %v32001_v5  ;;  %v30686_v5 = vand.u32 4294901760, %v25639_v51 }
 0x240   : > { %18008 = vmatmul.mubr.f32.gmra.mrb[14].mxu0 %v25435_v54  ;;  %19847 = vmatprep.subr.bf16.mxu1 %v19846_v41 }
 0x241   : > { %20609 = vmatpush3.bf16.msra.mxu0 %v32027_v11  ;;  %18042 = vmatprep.mubr.f32.mxu0 %v32034_v19  ;;  %v19850_v45 = vpack.c.bf16 %v32040_v17, %v32039_v63  ;;  %v20618_v18 = vpack.c.bf16 %v32045_v48, %v32044_v52  ;;  %v30690_v19 = vrot.slane %v25657_v14, 1  ;;  %v30689_v17 = vand.u32 4294901760, %v25631_v12  ;;  %v25688_v52 = vld [vmem:[#allocation4 + $0x328] sm:$0xff]  ;;  %v32089_v11 = vld [vmem:[#allocation136_spill] sm:$0xff] }
 0x242   : > { %20611 = vmatprep.subr.bf16.mxu0 %v20610_v1  ;;  %16702 = vmatmul.mubr.f32.gmra.mrb[2].mxu1 %v32038_v32  ;;  %v32054_v32 = vand.u32 4294901760, %v24788_v10  ;;  %v30691_v10 = vand.u32 4294901760, %v25653_v56  ;;  %32056 = vst [vmem:[#allocation36_spill] sm:$0xff] %v25688_v52  ;;  %v22490_v48 = vld [vmem:[#allocation2 + $0x8] sm:$0xff]  ;;  %v32108_v14 = vand.u32 4294901760, %v25312_v57 }
 0x243   : > { %19849 = vmatpush3.bf16.msra.mxu1 %v19846_v41  ;;  %16704 = vmatprep.mubr.f32.mxu1 %v32043_v53  ;;  %v25643_v41 = vld [vmem:[#allocation4 + $0x308] sm:$0xff]  ;;  %v25686_v53 = vld [vmem:[#allocation4 + $0x320] sm:$0xff] }
 0x244   : > { %18043 = vmatmul.mubr.f32.vlgmr.msra.gmra.mrb[0].mxu0 %v32041_v62  ;;  %19851 = vmatprep.subr.bf16.mxu1 %v19850_v45  ;;  %v20622_v63 = vpack.c.bf16 %v32054_v32, %v32053_v9  ;;  %v25677_v62 = vld [vmem:[#allocation4 + $0x120] sm:$0xff]  ;;  %v30687_v55 = vand.u32 4294901760, %v25643_v41  ;;  %v25696_v9 = vld [vmem:[#allocation2 + $0x10] sm:$0xff]  ;;  %v32073_v32 = vrot.slane %v25666_v13, 7 }
 0x245   : > { %20613 = vmatpush3.bf16.msra.mxu0 %v20610_v1  ;;  %18045 = vmatprep.mubr.f32.mxu0 %v32042_v7  ;;  %v32047_v1 = vand.u32 4294901760, %v24709_v2  ;;  %v25664_v2 = vld [vmem:[#allocation2 + $0x20] sm:$0xff]  ;;  %v25679_v7 = vld [vmem:[#allocation4 + $0x128] sm:$0xff]  ;;  %v25773_v13 = vld [vmem:[#allocation4 + $0x150] sm:$0xff] }
 0x246   : > { %20615 = vmatprep.subr.bf16.mxu0 %v20614_v8  ;;  %16705 = vmatmul.mubr.f32.gmra.mrb[4].mxu1 %v32046_v40  ;;  %v584_v40 = vrot.slane %v22490_v48, 1  ;;  %v30696_v48 = vand.u32 4294901760, %v25679_v7 }
 0x247   : > { %v19854_v24 = vpack.c.bf16 %v32048_v38, %v32047_v1  ;;  %19853 = vmatpush3.bf16.msra.mxu1 %v19850_v45  ;;  %v30688_v45 = vand.u32 4294901760, %v25641_v27  ;;  %v32057_v1 = vand.u32 4294901760, %v32005_v42  ;;  %v30697_v42 = vand.u32 4294901760, %v25677_v62  ;;  %v25709_v38 = vld [vmem:[#allocation4 + $0x138] sm:$0xff] }
 0x248   : > { %18046 = vmatmul.mubr.f32.gmra.mrb[2].mxu0 %v32050_v47  ;;  %v25748_v47 = vld [vmem:[#allocation4 + $0x140] sm:$0xff] }
 0x249   : > { %20617 = vmatpush3.bf16.msra.mxu0 %v20614_v8  ;;  %18048 = vmatprep.mubr.f32.mxu0 %v32052_v6  ;;  %v32055_v8 = vand.u32 4294901760, %v32004_v37  ;;  %v25707_v37 = vld [vmem:[#allocation4 + $0x130] sm:$0xff]  ;;  %32071 = vst [vmem:[#allocation93_spill] sm:$0xff] %v25748_v47 }
 0x24a   : > { %20619 = vmatprep.subr.bf16.mxu0 %v20618_v18  ;;  %19855 = vmatprep.subr.bf16.mxu1 %v19854_v24 }
 0x24b   : > { %16707 = vmatprep.mubr.f32.mxu1 %v32055_v8  ;;  %v32058_v8 = vand.u32 4294901760, %v32007_v35  ;;  %19857 = vmatpush3.bf16.msra.mxu1 %v19854_v24  ;;  %v32060_v35 = vand.u32 4294901760, %v32010_v25  ;;  %v25725_v24 = vld [vmem:[#allocation4 + $0x330] sm:$0xff]  ;;  %v32063_v25 = vld [vmem:[#allocation52_spill] sm:$0xff] }
 0x24c   : > { %16708 = vmatmul.mubr.f32.gmra.mrb[6].mxu1 %v32057_v1  ;;  %v32059_v1 = vand.u32 4294901760, %v32008_v28  ;;  %v25723_v28 = vpack.c.bf16 %v30687_v55, %v30688_v45  ;;  %v25740_v55 = vpack.c.bf16 %v30691_v10, %v30692_v29  ;;  %v32068_v45 = vand.u32 4294901760, %v25655_v43 }
 0x24d   : > { %18049 = vmatmul.mubr.f32.gmra.mrb[4].mxu0 %v32058_v8  ;;  %16710 = vmatprep.mubr.f32.mxu1 %v32060_v35  ;;  %v25727_v8 = vld [vmem:[#allocation4 + $0x338] sm:$0xff]  ;;  %v32065_v35 = vand.u32 4294901760, %v32011_v49  ;;  %v25752_v49 = vld [vmem:[#allocation4 + $0x340] sm:$0xff]  ;;  %vm32074_vm2 = vcmp.lt.s32.totalorder %v32063_v25, 1  ;;  %v32075_v29 = vand.u32 4294901760, %v32013_v30  ;;  %v32077_v30 = vrot.slane %v25696_v9, 1 }
 0x24e   : > { %20621 = vmatpush3.bf16.msra.mxu0 %v20618_v18  ;;  %18051 = vmatprep.mubr.f32.mxu0 %v32059_v1  ;;  %v25717_v18 = vpack.c.bf16 %v30686_v5, %v30689_v17  ;;  %32062 = vst [vmem:[#allocation33_spill] sm:$0xff] %v25723_v28  ;;  %v614_v1 = vsel %vm32064_vm14, %v30690_v19, %v584_v40  ;;  %v32066_v5 = vld [vmem:[#allocation133_spill] sm:$0xff]  ;;  %32067 = vst [vmem:[#allocation64_spill] sm:$0xff] %v25740_v55  ;;  %v32069_v17 = vand.u32 4294901760, %v25662_v15  ;;  %v25793_v55 = vld [vmem:[#allocation4 + $0x358] sm:$0xff] }
 0x24f   : > { %20623 = vmatprep.subr.bf16.mxu0 %v20622_v63  ;;  %19859 = vmatprep.subr.bf16.mxu1 %v32066_v5  ;;  %v25750_v19 = vld [vmem:[#allocation4 + $0x148] sm:$0xff]  ;;  %v25795_v28 = vand.u32 4294901760, %v614_v1 }
 0x250   : > { %32061 = vst [vmem:[#allocation39_spill] sm:$0xff] %v25717_v18  ;;  %16711 = vmatmul.mubr.f32.gmra.mrb[8].mxu1 %v32065_v35  ;;  %v25746_v6 = vpack.c.bf16 %v32069_v17, %v32068_v45  ;;  %v32072_v35 = vrot.slane %v25664_v2, 7  ;;  %v25767_v17 = vpack.c.bf16 %v30696_v48, %v30697_v42  ;;  %v32080_v48 = vand.u32 4294901760, %v25688_v52  ;;  %v25807_v45 = vld [vmem:[#allocation4 + $0x168] sm:$0xff] }
 0x251   : > { %18052 = vmatmul.mubr.f32.gmra.mrb[6].mxu0 %v32075_v29  ;;  %19861 = vmatpush3.bf16.msra.mxu1 %v32066_v5  ;;  %v613_v5 = vsel %vm32064_vm14, %v584_v40, %v32077_v30  ;;  %v32078_v29 = vand.u32 4294901760, %v32014_v39  ;;  %32082 = vst [vmem:[#allocation100_spill] sm:$0xff] %v25795_v28  ;;  %v32083_v39 = vld [vmem:[#allocation134_spill] sm:$0xff]  ;;  %v32084_v40 = vand.u32 4294901760, %v32016_v23  ;;  %32086 = vst [vmem:[#allocation92_spill] sm:$0xff] %v25807_v45  ;;  %v32088_v18 = vand.u32 4294901760, %v32017_v31 }
 0x252   : > { %32070 = vst [vmem:[#allocation45_spill] sm:$0xff] %v25746_v6  ;;  %v8704_v10 = vsel %vm32074_vm2, %v32073_v32, %v32072_v35  ;;  %32076 = vst [vmem:[#allocation97_spill] sm:$0xff] %v25767_v17  ;;  %v25771_v6 = vld [vmem:[#allocation4 + $0x348] sm:$0xff]  ;;  %v25775_v32 = vld [vmem:[#allocation4 + $0x158] sm:$0xff]  ;;  %20625 = vmatpush3.bf16.msra.mxu0 %v20622_v63  ;;  %v32079_v35 = vand.u32 4294901760, %v25686_v53  ;;  %19863 = vmatprep.subr.bf16.mxu1 %v32089_v11  ;;  %v32091_v52 = vand.u32 4294901760, %v32019_v22 }
 0x253   : > { %18054 = vmatprep.mubr.f32.mxu0 %v32078_v29  ;;  %v25791_v17 = vld [vmem:[#allocation4 + $0x350] sm:$0xff]  ;;  %v25797_v63 = vld [vmem:[#allocation2 + $0x28] sm:$0xff]  ;;  %20627 = vmatprep.subr.bf16.mxu0 %v32083_v39  ;;  %v649_v29 = vsel %vm24189_vm3, %v613_v5, 0.0  ;;  %v32092_v31 = vand.u32 4294901760, %v25707_v37  ;;  %v32095_v5 = vand.u32 4294901760, %v32020_v3  ;;  %v32102_v3 = vand.u32 4294901760, %v25725_v24  ;;  %vm32139_vm14 = vmmov %vm32074_vm2 }
 0x254   : > { %v25787_v42 = vpack.c.bf16 %v32080_v48, %v32079_v35  ;;  %16713 = vmatprep.mubr.f32.mxu1 %v32084_v40  ;;  %v25805_v35 = vld [vmem:[#allocation4 + $0x160] sm:$0xff]  ;;  %v8674_v23 = vrot.slane %v25797_v63, 7  ;;  %v25840_v48 = vld [vmem:[#allocation4 + $0x368] sm:$0xff]  ;;  %v32101_v63 = vand.u32 4294901760, %v25296_v60  ;;  %v32106_v22 = vand.u32 4294901760, %v25631_v12  ;;  %v32109_v60 = vld [vmem:[#allocation138_spill] sm:$0xff] }
 0x255   : > { %32085 = vst [vmem:[#allocation101_spill] sm:$0xff] %v25805_v35  ;;  %16714 = vmatmul.mubr.f32.gmra.mrb[10].mxu1 %v32088_v18  ;;  %18055 = vmatmul.mubr.f32.gmra.mrb[8].mxu0 %v32091_v52  ;;  %v25838_v52 = vld [vmem:[#allocation4 + $0x360] sm:$0xff]  ;;  %32097 = vst [vmem:[#allocation90_spill] sm:$0xff] %v25840_v48  ;;  %v32100_v30 = vld [vmem:[#allocation137_spill] sm:$0xff] }
 0x256   : > { %32081 = vst [vmem:[#allocation87_spill] sm:$0xff] %v25787_v42  ;;  %v8705_v42 = vsel %vm24044_vm1, %v8704_v10, 0.0  ;;  %19865 = vmatpush3.bf16.msra.mxu1 %v32089_v11  ;;  %v32093_v10 = vand.u32 4294901760, %v25709_v38  ;;  %20629 = vmatpush3.bf16.msra.mxu0 %v32083_v39  ;;  %32096 = vst [vmem:[#allocation109_spill] sm:$0xff] %v25838_v52  ;;  %v32103_v39 = vand.u32 4294901760, %v25727_v8  ;;  %v25856_v11 = vand.u32 4294901760, %v649_v29 }
 0x257   : > { %18057 = vmatprep.mubr.f32.mxu0 %v32095_v5  ;;  %20631 = vmatprep.subr.bf16.mxu0 %v32100_v30 }
 0x258   : > { %v25828_v18 = vpack.c.bf16 %v32093_v10, %v32092_v31  ;;  %v25843_v31 = vsub.f32 %v614_v1, %v25795_v28  ;;  %v25845_v10 = vand.u32 4294901760, %v8705_v42  ;;  %16716 = vmatprep.mubr.f32.mxu1 %v32101_v63  ;;  %v25854_v5 = vpack.c.bf16 %v32103_v39, %v32102_v3  ;;  %32105 = vst [vmem:[#allocation123_spill] sm:$0xff] %v25856_v11 }
 0x259   : > { %v25861_v1 = vsub.f32 %v25631_v12, %v32106_v22  ;;  %16717 = vmatmul.mubr.f32.gmra.mrb[12].mxu1 %v32108_v14  ;;  %19867 = vmatprep.subr.bf16.mxu1 %v32109_v60  ;;  %v32110_v63 = vand.u32 4294901760, %v25748_v47  ;;  %v32111_v28 = vand.u32 4294901760, %v25750_v19  ;;  %v32113_v39 = vand.u32 4294901760, %v25752_v49  ;;  %v22492_v14 = vld [vmem:[#allocation2 + $0x18] sm:$0xff] }
 0x25a   : > { %32094 = vst [vmem:[#allocation89_spill] sm:$0xff] %v25828_v18  ;;  %32098 = vst [vmem:[#allocation104_spill] sm:$0xff] %v25843_v31  ;;  %v32116_v12 = vand.u32 4294901760, %v25773_v13  ;;  %v32117_v22 = vand.u32 4294901760, %v25775_v32  ;;  %v586_v40 = vrot.slane %v22492_v14, 1  ;;  %v32119_v47 = vand.u32 4294901760, %v25309_v46  ;;  %19869 = vmatpush3.bf16.msra.mxu1 %v32109_v60  ;;  %20633 = vmatpush3.bf16.msra.mxu0 %v32100_v30 }
 0x25b   : > { %32099 = vst [vmem:[#allocation43_spill] sm:$0xff] %v25845_v10  ;;  %32104 = vst [vmem:[#allocation115_spill] sm:$0xff] %v25854_v5  ;;  %v25871_v3 = vpack.c.bf16 %v32111_v28, %v32110_v63  ;;  %v32114_v5 = vand.u32 4294901760, %v25771_v6  ;;  %v32120_v28 = vand.u32 4294901760, %v25791_v17  ;;  %v32121_v63 = vand.u32 4294901760, %v25793_v55 }
 0x25c   : > { %32107 = vst [vmem:[#allocation44_spill] sm:$0xff] %v25861_v1  ;;  %v25883_v57 = vpack.c.bf16 %v32117_v22, %v32116_v12  ;;  %18058 = vmatmul.mubr.f32.gmra.mrb[10].mxu0 %v32119_v47  ;;  %v32124_v12 = vrot.slane %v25664_v2, 7  ;;  %v32125_v47 = vand.u32 4294901760, %v25351_v16  ;;  %v32126_v60 = vand.u32 4294901760, %v25805_v35  ;;  %v32252_v35 = vld [vmem:[#allocation68_spill] sm:$0xff] }
 0x25d   : > { %32112 = vst [vmem:[#allocation32_spill] sm:$0xff] %v25871_v3  ;;  %v25877_v18 = vpack.c.bf16 %v32114_v5, %v32113_v39  ;;  %v25892_v3 = vpack.c.bf16 %v32121_v63, %v32120_v28  ;;  %v32127_v22 = vand.u32 4294901760, %v25807_v45  ;;  %v25911_v28 = vld [vmem:[#allocation4 + $0x178] sm:$0xff]  ;;  %v25913_v63 = vld [vmem:[#allocation4 + $0x370] sm:$0xff]  ;;  %v32133_v16 = vand.u32 4294901760, %v25639_v51  ;;  %v32251_v45 = vld [vmem:[#allocation132_spill] sm:$0xff] }
 0x25e   : > { %32118 = vst [vmem:[#allocation50_spill] sm:$0xff] %v25883_v57  ;;  %v8703_v46 = vsel %vm32074_vm2, %v32124_v12, %v8674_v23  ;;  %18060 = vmatprep.mubr.f32.mxu0 %v32125_v47  ;;  %32129 = vst [vmem:[#allocation58_spill] sm:$0xff] %v25911_v28  ;;  %v25915_v39 = vld [vmem:[#allocation4 + $0x378] sm:$0xff]  ;;  %v25919_v12 = vsub.f32 %v8705_v42, %v25845_v10  ;;  %v32135_v47 = vld [vmem:[#allocation140_spill] sm:$0xff]  ;;  %v32138_v2 = vrot.slane %v25819_v20, 7  ;;  %v32145_v5 = vand.u32 4294901760, %v25643_v41 }
 0x25f   : > { %32115 = vst [vmem:[#allocation46_spill] sm:$0xff] %v25877_v18  ;;  %32122 = vst [vmem:[#allocation30_spill] sm:$0xff] %v25892_v3  ;;  %v25896_v18 = vld [vmem:[#allocation4 + $0x170] sm:$0xff]  ;;  %v25909_v14 = vpack.c.bf16 %v32127_v22, %v32126_v60  ;;  %v25924_v30 = vsub.f32 %v25639_v51, %v32133_v16  ;;  %20635 = vmatprep.subr.bf16.mxu0 %v32135_v47  ;;  %v32136_v60 = vand.u32 4294901760, %v25372_v34  ;;  %v25937_v10 = vld [vmem:[#allocation2 + $0x20] sm:$0xff]  ;;  %v32140_v16 = vand.u32 4294901760, %v25381_v44 }
 0x260   : > { %32123 = vst [vmem:[#allocation65_spill] sm:$0xff] %v25896_v18  ;;  %32130 = vst [vmem:[#allocation96_spill] sm:$0xff] %v25913_v63  ;;  %v25930_v22 = vsub.f32 %v649_v29, %v25856_v11  ;;  %v8702_v42 = vsel %vm32139_vm14, %v8674_v23, %v32138_v2  ;;  %v25943_v34 = vand.u32 4294901760, %v8703_v46  ;;  %v32143_v29 = vand.u32 4294901760, %v25641_v27  ;;  %20637 = vmatpush3.bf16.msra.mxu0 %v32135_v47  ;;  %v32155_v11 = vld [vmem:[#allocation79_spill] sm:$0xff] }
 0x261   : > { %32128 = vst [vmem:[#allocation98_spill] sm:$0xff] %v25909_v14  ;;  %32131 = vst [vmem:[#allocation62_spill] sm:$0xff] %v25915_v39  ;;  %16719 = vmatprep.mubr.f32.mxu1 %v32136_v60  ;;  %v32141_v14 = vld [vmem:[#allocation142_spill] sm:$0xff]  ;;  %v25953_v23 = vsub.f32 %v25643_v41, %v32145_v5  ;;  %v32147_v2 = vrot.slane %v25696_v9, 1  ;;  %vm32148_vm2 = vcmp.lt.s32.totalorder %v32063_v25, 7  ;;  %v32150_v41 = vand.u32 4294901760, %v25405_v33  ;;  %20639 = vmatprep.subr.bf16.mxu0 %v32155_v11 }
 0x262   : > { %32132 = vst [vmem:[#allocation108_spill] sm:$0xff] %v25919_v12  ;;  %32134 = vst [vmem:[#allocation113_spill] sm:$0xff] %v25924_v30  ;;  %16720 = vmatmul.mubr.f32.gmra.mrb[14].mxu1 %v32140_v16  ;;  %19871 = vmatprep.subr.bf16.mxu1 %v32141_v14  ;;  %v25948_v60 = vsub.f32 %v25641_v27, %v32143_v29  ;;  %v32149_v16 = vand.u32 4294901760, %v25391_v26  ;;  %v32151_v9 = vand.u32 4294901760, %v25838_v52  ;;  %v32152_v26 = vand.u32 4294901760, %v25840_v48  ;;  %v25979_v27 = vld [vmem:[#allocation2 + $0x38] sm:$0xff] }
 0x263   : > { %32137 = vst [vmem:[#allocation66_spill] sm:$0xff] %v25930_v22  ;;  %32142 = vst [vmem:[#allocation102_spill] sm:$0xff] %v25943_v34  ;;  %v612_v44 = vsel %vm32148_vm2, %v32147_v2, %v586_v40  ;;  %19873 = vmatpush3.bf16.msra.mxu1 %v32141_v14  ;;  %v8707_v29 = vsel %vm24287_vm4, %v8702_v42, 0.0  ;;  %16754 = vmatprep.mubr.f32.mxu1 %v31951_v36  ;;  %v32156_v33 = vand.u32 4294901760, %v25843_v31  ;;  %v32161_v2 = vand.u32 4294901760, %v25861_v1  ;;  %v26246_v52 = vld [vmem:[#allocation2 + $0x40] sm:$0xff] }
 0x264   : > { %32144 = vst [vmem:[#allocation112_spill] sm:$0xff] %v25948_v60  ;;  %32146 = vst [vmem:[#allocation124_spill] sm:$0xff] %v25953_v23  ;;  %18061 = vmatmul.mubr.f32.gmra.mrb[12].mxu0 %v32149_v16  ;;  %v25973_v5 = vpack.c.bf16 %v32152_v26, %v32151_v9  ;;  %v25989_v9 = vand.u32 4294901760, %v612_v44  ;;  %v32159_v26 = vrot.slane %v25937_v10, 1  ;;  %19875 = vmatprep.subr.bf16.mxu1 %v31989_v0  ;;  %v32163_v16 = vand.u32 4294901760, %v25435_v54 }
 0x265   : > { %18063 = vmatprep.mubr.f32.mxu0 %v32150_v41  ;;  %v25986_v47 = vsub.f32 %v25843_v31, %v32156_v33  ;;  %vm32160_vm14 = vmmov %vm32148_vm2  ;;  %v26000_v14 = vsub.f32 %v25861_v1, %v32161_v2  ;;  %v26003_v33 = vsub.f32 %v8703_v46, %v25943_v34  ;;  %v32167_v2 = vand.u32 4294901760, %v25913_v63  ;;  %20641 = vmatpush3.bf16.msra.mxu0 %v32155_v11 }
 0x266   : > { %32153 = vst [vmem:[#allocation55_spill] sm:$0xff] %v25973_v5  ;;  %32158 = vst [vmem:[#allocation28_spill] sm:$0xff] %v25989_v9  ;;  %v611_v42 = vsel %vm32160_vm14, %v586_v40, %v32159_v26  ;;  %16755 = vmatmul.mubr.f32.vlgmr.msra.gmra.mrb[0].mxu1 %v31954_v59  ;;  %v32164_v40 = vand.u32 4294901760, %v25896_v18  ;;  %v32165_v26 = vand.u32 4294901760, %v25911_v28  ;;  %v32168_v46 = vand.u32 4294901760, %v25915_v39  ;;  %20643 = vmatprep.subr.bf16.mxu0 %v31991_v21 }
 0x267   : > { %32157 = vst [vmem:[#allocation116_spill] sm:$0xff] %v25986_v47  ;;  %32162 = vst [vmem:[#allocation88_spill] sm:$0xff] %v26003_v33  ;;  %19877 = vmatpush3.bf16.msra.mxu1 %v31989_v0  ;;  %v26022_v41 = vand.u32 4294901760, %v8707_v29  ;;  %v8676_v51 = vrot.slane %v25979_v27, 7  ;;  %v32171_v54 = vand.u32 4294901760, %v25919_v12  ;;  %16757 = vmatprep.mubr.f32.mxu1 %v31958_v50  ;;  %v3532_v11 = vand.u32 4294901760, %v26000_v14 }
 0x268   : > { %18064 = vmatmul.mubr.f32.gmra.mrb[14].mxu0 %v32163_v16  ;;  %v26014_v31 = vpack.c.bf16 %v32165_v26, %v32164_v40  ;;  %v26020_v34 = vpack.c.bf16 %v32168_v46, %v32167_v2  ;;  %v32173_v16 = vand.u32 4294901760, %v25924_v30  ;;  %v651_v2 = vsel %vm24376_vm5, %v611_v42, 0.0  ;;  %19879 = vmatprep.subr.bf16.mxu1 %v31994_v4  ;;  %v22494_v47 = vld [vmem:[#allocation2 + $0x28] sm:$0xff] }
 0x269   : > { %32170 = vst [vmem:[#allocation29_spill] sm:$0xff] %v26022_v41  ;;  %18098 = vmatprep.mubr.f32.mxu0 %v31957_v61  ;;  %v26030_v0 = vsub.f32 %v25919_v12, %v32171_v54  ;;  %v32175_v46 = vand.u32 4294901760, %v25651_v58  ;;  %v32177_v54 = vand.u32 4294901760, %v25930_v22  ;;  %v32180_v42 = vand.u32 4294901760, %v25653_v56 }
 0x26a   : > { %32166 = vst [vmem:[#allocation81_spill] sm:$0xff] %v26014_v31  ;;  %32169 = vst [vmem:[#allocation70_spill] sm:$0xff] %v26020_v34  ;;  %v3538_v40 = vsub.f32 %v25924_v30, %v32173_v16  ;;  %v26051_v16 = vsub.f32 %v612_v44, %v25989_v9  ;;  %v26075_v1 = vand.u32 4294901760, %v651_v2  ;;  %v32188_v14 = vrot.slane %v25819_v20, 7  ;;  %v32193_v20 = vld [vmem:[#allocation67_spill] sm:$0xff]  ;;  %v32194_v34 = vld [vmem:[#allocation117_spill] sm:$0xff] }
 0x26b   : > { %32172 = vst [vmem:[#allocation128_spill] sm:$0xff] %v26030_v0  ;;  %v26040_v27 = vsub.f32 %v25651_v58, %v32175_v46  ;;  %v26048_v12 = vsub.f32 %v25930_v22, %v32177_v54  ;;  %v26056_v26 = vsub.f32 %v25653_v56, %v32180_v42  ;;  %v26058_v58 = vld [vmem:[#allocation2 + $0x40] sm:$0xff]  ;;  %v32182_v46 = vld [vmem:[#allocation107_spill] sm:$0xff]  ;;  %v32183_v54 = vand.u32 4294901760, %v25948_v60  ;;  %v32185_v56 = vld [vmem:[#allocation73_spill] sm:$0xff]  ;;  %19881 = vmatpush3.bf16.msra.mxu1 %v31994_v4 }
 0x26c   : > { %32179 = vst [vmem:[#allocation125_spill] sm:$0xff] %v26051_v16  ;;  %16758 = vmatmul.mubr.f32.gmra.mrb[2].mxu1 %v32182_v46  ;;  %v32184_v22 = vand.u32 4294901760, %v25953_v23  ;;  %18099 = vmatmul.mubr.f32.vlgmr.msra.gmra.mrb[0].mxu0 %v32185_v56  ;;  %v26073_v42 = vsub.f32 %v8707_v29, %v26022_v41  ;;  %32187 = vst [vmem:[#allocation130_spill] sm:$0xff] %v26075_v1  ;;  %vm32189_vm2 = vcmp.lt.s32.totalorder %v32063_v25, 1  ;;  %v32191_v4 = vand.u32 4294901760, %v25655_v43  ;;  %v32195_v31 = vld [vmem:[#allocation122_spill] sm:$0xff] }
 0x26d   : > { %32176 = vst [vmem:[#allocation126_spill] sm:$0xff] %v26040_v27  ;;  %32178 = vst [vmem:[#allocation91_spill] sm:$0xff] %v26048_v12  ;;  %v9031_v44 = vsub.f32 %v25948_v60, %v32183_v54  ;;  %v8701_v30 = vsel %vm32189_vm2, %v32188_v14, %v8676_v51  ;;  %v588_v54 = vrot.slane %v22494_v47, 1  ;;  %20645 = vmatpush3.bf16.msra.mxu0 %v31991_v21  ;;  %v32190_v60 = vld [vmem:[#allocation106_spill] sm:$0xff]  ;;  %16760 = vmatprep.mubr.f32.mxu1 %v32194_v34 }
 0x26e   : > { %32181 = vst [vmem:[#allocation85_spill] sm:$0xff] %v26056_v26  ;;  %v9038_v9 = vsub.f32 %v25953_v23, %v32184_v22  ;;  %32186 = vst [vmem:[#allocation141_spill] sm:$0xff] %v26073_v42  ;;  %18101 = vmatprep.mubr.f32.mxu0 %v32190_v60  ;;  %v3539_v22 = vand.u32 4294901760, %v3538_v40  ;;  %v26087_v29 = vsub.f32 %v25655_v43, %v32191_v4  ;;  %20647 = vmatprep.subr.bf16.mxu0 %v32193_v20  ;;  %v26095_v40 = vld [vmem:[#allocation2 + $0x30] sm:$0xff]  ;;  %v32196_v43 = vld [vmem:[#allocation71_spill] sm:$0xff] }
 0x26f   : > { %19883 = vmatprep.subr.bf16.mxu1 %v32196_v43  ;;  %v32197_v4 = vand.u32 4294901760, %v26003_v33  ;;  %v9032_v5 = vand.u32 4294901760, %v9031_v44  ;;  %v26105_v39 = vand.u32 4294901760, %v8701_v30  ;;  %v32200_v47 = vand.u32 4294901760, %v25662_v15  ;;  %v32202_v21 = vld [vmem:[#allocation114_spill] sm:$0xff] }
 0x270   : > { %32192 = vst [vmem:[#allocation60_spill] sm:$0xff] %v26087_v29  ;;  %16761 = vmatmul.mubr.f32.gmra.mrb[4].mxu1 %v32195_v31  ;;  %18102 = vmatmul.mubr.f32.gmra.mrb[2].mxu0 %v32202_v21  ;;  %v9039_v23 = vand.u32 4294901760, %v9038_v9  ;;  %v26116_v63 = vsub.f32 %v651_v2, %v26075_v1  ;;  %v32208_v2 = vrot.slane %v26058_v58, 7  ;;  %v32209_v0 = vld [vmem:[#allocation74_spill] sm:$0xff]  ;;  %v32214_v1 = vrot.slane %v26095_v40, 1 }
 0x271   : > { %v26103_v41 = vsub.f32 %v26003_v33, %v32197_v4  ;;  %32199 = vst [vmem:[#allocation134_spill] sm:$0xff] %v26105_v39  ;;  %v26110_v14 = vsub.f32 %v25662_v15, %v32200_v47  ;;  %19885 = vmatpush3.bf16.msra.mxu1 %v32196_v43  ;;  %v32204_v4 = vrot.slane %v25937_v10, 1  ;;  %20649 = vmatpush3.bf16.msra.mxu0 %v32193_v20  ;;  %v32205_v33 = vld [vmem:[#allocation121_spill] sm:$0xff]  ;;  %v32207_v47 = vand.u32 4294901760, %v26040_v27  ;;  %v32232_v20 = vld [vmem:[#allocation51_spill] sm:$0xff] }
 0x272   : > { %32203 = vst [vmem:[#allocation137_spill] sm:$0xff] %v26116_v63  ;;  %18104 = vmatprep.mubr.f32.mxu0 %v32205_v33  ;;  %v26124_v15 = vpack.c.bf16 %v3539_v22, %v3532_v11  ;;  %v8700_v10 = vsel %vm32189_vm2, %v8676_v51, %v32208_v2  ;;  %20651 = vmatprep.subr.bf16.mxu0 %v32209_v0  ;;  %v32211_v11 = vand.u32 4294901760, %v26051_v16  ;;  %v32215_v2 = vld [vmem:[#allocation76_spill] sm:$0xff]  ;;  %v32247_v3 = vrot.slane %v26058_v58, 7 }
 0x273   : > { %32198 = vst [vmem:[#allocation133_spill] sm:$0xff] %v26103_v41  ;;  %32201 = vst [vmem:[#allocation136_spill] sm:$0xff] %v26110_v14  ;;  %v610_v44 = vsel %vm32160_vm14, %v32204_v4, %v588_v54  ;;  %v26129_v9 = vsub.f32 %v26040_v27, %v32207_v47  ;;  %v32210_v4 = vld [vmem:[#allocation40_spill] sm:$0xff]  ;;  %v32213_v47 = vand.u32 4294901760, %v26056_v26  ;;  %v609_v51 = vsel %vm32160_vm14, %v588_v54, %v32214_v1  ;;  %v32216_v27 = vld [vmem:[#allocation77_spill] sm:$0xff] }
 0x274   : > { %32206 = vst [vmem:[#allocation138_spill] sm:$0xff] %v26124_v15  ;;  %16763 = vmatprep.mubr.f32.mxu1 %v32210_v4  ;;  %v26142_v22 = vsub.f32 %v26051_v16, %v32211_v11  ;;  %19887 = vmatprep.subr.bf16.mxu1 %v32216_v27  ;;  %v26157_v15 = vsub.f32 %v8701_v30, %v26105_v39  ;;  %v26160_v16 = vand.u32 4294901760, %v610_v44  ;;  %v32221_v54 = vand.u32 4294901760, %v26073_v42  ;;  %v32224_v39 = vld [vmem:[#allocation72_spill] sm:$0xff]  ;;  %vm32262_vm14 = vmmov %vm32189_vm2 }
 0x275   : > { %v26147_v43 = vsub.f32 %v26056_v26, %v32213_v47  ;;  %16764 = vmatmul.mubr.f32.gmra.mrb[6].mxu1 %v32215_v2  ;;  %v26162_v47 = vld [vmem:[#allocation2 + $0x48] sm:$0xff]  ;;  %v32219_v26 = vld [vmem:[#allocation34_spill] sm:$0xff]  ;;  %v26166_v1 = vpack.c.bf16 %v9039_v23, %v9032_v5  ;;  %v8709_v11 = vsel %vm24427_vm6, %v8700_v10, 0.0  ;;  %20653 = vmatpush3.bf16.msra.mxu0 %v32209_v0  ;;  %v32225_v41 = vand.u32 4294901760, %v26087_v29  ;;  %v32231_v0 = vld [vmem:[#allocation80_spill] sm:$0xff] }
 0x276   : > { %32212 = vst [vmem:[#allocation140_spill] sm:$0xff] %v26142_v22  ;;  %32217 = vst [vmem:[#allocation142_spill] sm:$0xff] %v26157_v15  ;;  %18105 = vmatmul.mubr.f32.gmra.mrb[4].mxu0 %v32219_v26  ;;  %19889 = vmatpush3.bf16.msra.mxu1 %v32216_v27  ;;  %v26171_v12 = vsub.f32 %v26073_v42, %v32221_v54  ;;  %v653_v5 = vsel %vm24555_vm7, %v609_v51, 0.0  ;;  %v32227_v54 = vand.u32 4294901760, %v25677_v62  ;;  %v32229_v30 = vand.u32 4294901760, %v25679_v7 }
 0x277   : > { %32218 = vst [vmem:[#allocation79_spill] sm:$0xff] %v26160_v16  ;;  %32220 = vst [vmem:[#allocation107_spill] sm:$0xff] %v26166_v1  ;;  %18107 = vmatprep.mubr.f32.mxu0 %v32224_v39  ;;  %v26181_v27 = vsub.f32 %v26087_v29, %v32225_v41  ;;  %20655 = vmatprep.subr.bf16.mxu0 %v32231_v0  ;;  %v3546_v29 = vand.u32 4294901760, %v26129_v9  ;;  %v3553_v51 = vand.u32 4294901760, %v26147_v43  ;;  %v8678_v23 = vrot.slane %v26162_v47, 7  ;;  %v26201_v1 = vld [vmem:[#allocation2 + $0x50] sm:$0xff] }
 0x278   : > { %32222 = vst [vmem:[#allocation73_spill] sm:$0xff] %v26171_v12  ;;  %v26188_v42 = vsub.f32 %v25677_v62, %v32227_v54  ;;  %v26193_v10 = vsub.f32 %v25679_v7, %v32229_v30  ;;  %16766 = vmatprep.mubr.f32.mxu1 %v32232_v20  ;;  %v32233_v62 = vld [vmem:[#allocation48_spill] sm:$0xff]  ;;  %v32234_v54 = vld [vmem:[#allocation49_spill] sm:$0xff]  ;;  %v32235_v30 = vand.u32 4294901760, %v26110_v14  ;;  %v26210_v41 = vsub.f32 %v610_v44, %v26160_v16  ;;  %v32244_v16 = vld [vmem:[#allocation86_spill] sm:$0xff] }
 0x279   : > { %16767 = vmatmul.mubr.f32.gmra.mrb[8].mxu1 %v32233_v62  ;;  %19891 = vmatprep.subr.bf16.mxu1 %v32234_v54  ;;  %v26212_v9 = vand.u32 4294901760, %v8709_v11  ;;  %v32238_v43 = vld [vmem:[#allocation41_spill] sm:$0xff]  ;;  %v32239_v22 = vand.u32 4294901760, %v26116_v63  ;;  %v26222_v7 = vand.u32 4294901760, %v653_v5  ;;  %v32246_v12 = vld [vmem:[#allocation59_spill] sm:$0xff]  ;;  %v32253_v58 = vand.u32 4294901760, %v26157_v15 }
 0x27a   : > { %32228 = vst [vmem:[#allocation106_spill] sm:$0xff] %v26188_v42  ;;  %32230 = vst [vmem:[#allocation67_spill] sm:$0xff] %v26193_v10  ;;  %v9052_v28 = vsub.f32 %v26110_v14, %v32235_v30  ;;  %18108 = vmatmul.mubr.f32.gmra.mrb[6].mxu0 %v32238_v43  ;;  %19893 = vmatpush3.bf16.msra.mxu1 %v32234_v54  ;;  %v32242_v30 = vand.u32 4294901760, %v25686_v53  ;;  %v9046_v54 = vand.u32 4294901760, %v26181_v27  ;;  %v22496_v27 = vld [vmem:[#allocation2 + $0x38] sm:$0xff] }
 0x27b   : > { %32236 = vst [vmem:[#allocation117_spill] sm:$0xff] %v26210_v41  ;;  %32237 = vst [vmem:[#allocation122_spill] sm:$0xff] %v26212_v9  ;;  %v26220_v18 = vsub.f32 %v26116_v63, %v32239_v22  ;;  %20657 = vmatpush3.bf16.msra.mxu0 %v32231_v0  ;;  %18110 = vmatprep.mubr.f32.mxu0 %v32244_v16  ;;  %v8679_v22 = vrot.slane %v26201_v1, 7  ;;  %v32245_v63 = vld [vmem:[#allocation57_spill] sm:$0xff]  ;;  %v32248_v0 = vld [vmem:[#allocation36_spill] sm:$0xff]  ;;  %v590_v47 = vrot.slane %v22496_v27, 1 }
 0x27c   : > { %32241 = vst [vmem:[#allocation114_spill] sm:$0xff] %v26222_v7  ;;  %v26227_v44 = vsub.f32 %v25686_v53, %v32242_v30  ;;  %20659 = vmatprep.subr.bf16.mxu0 %v32245_v63  ;;  %16769 = vmatprep.mubr.f32.mxu1 %v32246_v12  ;;  %v8699_v53 = vsel %vm32189_vm2, %v32247_v3, %v8678_v23  ;;  %v32249_v30 = vand.u32 4294901760, %v32248_v0  ;;  %v26249_v14 = vld [vmem:[#allocation2 + $0x58] sm:$0xff]  ;;  %v9053_v57 = vand.u32 4294901760, %v9052_v28  ;;  %v32256_v27 = vld [vmem:[#allocation129_spill] sm:$0xff]  ;;  %v32264_v1 = vld [vmem:[#allocation42_spill] sm:$0xff] }
 0x27d   : > { %32240 = vst [vmem:[#allocation71_spill] sm:$0xff] %v26220_v18  ;;  %16770 = vmatmul.mubr.f32.gmra.mrb[10].mxu1 %v32251_v45  ;;  %19895 = vmatprep.subr.bf16.mxu1 %v32252_v35  ;;  %v26256_v3 = vsub.f32 %v26157_v15, %v32253_v58  ;;  %v26265_v45 = vpack.c.bf16 %v3553_v51, %v3546_v29  ;;  %v32259_v28 = vld [vmem:[#allocation131_spill] sm:$0xff]  ;;  %v26278_v15 = vand.u32 4294901760, %v8699_v53  ;;  %v8680_v29 = vrot.slane %v26249_v14, 7  ;;  %v32263_v51 = vld [vmem:[#allocation94_spill] sm:$0xff] }
 0x27e   : > { %32243 = vst [vmem:[#allocation121_spill] sm:$0xff] %v26227_v44  ;;  %v26244_v48 = vsub.f32 %v32248_v0, %v32249_v30  ;;  %v26260_v30 = vsub.f32 %v8709_v11, %v26212_v9  ;;  %18111 = vmatmul.mubr.f32.gmra.mrb[8].mxu0 %v32256_v27  ;;  %19897 = vmatpush3.bf16.msra.mxu1 %v32252_v35  ;;  %v32260_v11 = vand.u32 4294901760, %v26188_v42  ;;  %v32266_v9 = vrot.slane %v26095_v40, 1 }
 0x27f   : > { %32254 = vst [vmem:[#allocation40_spill] sm:$0xff] %v26256_v3  ;;  %32257 = vst [vmem:[#allocation77_spill] sm:$0xff] %v26265_v45  ;;  %v26268_v12 = vsub.f32 %v653_v5, %v26222_v7  ;;  %20661 = vmatpush3.bf16.msra.mxu0 %v32245_v63  ;;  %18113 = vmatprep.mubr.f32.mxu0 %v32259_v28  ;;  %v8698_v35 = vsel %vm32262_vm14, %v8678_v23, %v8679_v22  ;;  %v26283_v5 = vld [vmem:[#allocation2 + $0x60] sm:$0xff]  ;;  %v32265_v63 = vand.u32 4294901760, %v26193_v10  ;;  %v32271_v45 = vld [vmem:[#allocation95_spill] sm:$0xff] }
 0x280   : > { %32250 = vst [vmem:[#allocation74_spill] sm:$0xff] %v26244_v48  ;;  %32255 = vst [vmem:[#allocation76_spill] sm:$0xff] %v26260_v30  ;;  %v26276_v0 = vsub.f32 %v26188_v42, %v32260_v11  ;;  %20663 = vmatprep.subr.bf16.mxu0 %v32263_v51  ;;  %16772 = vmatprep.mubr.f32.mxu1 %v32264_v1  ;;  %vm32267_vm2 = vcmp.lt.s32.totalorder %v32063_v25, 7  ;;  %v32268_v14 = vrot.slane %v26246_v52, 1  ;;  %v32270_v42 = vld [vmem:[#allocation144_spill] sm:$0xff]  ;;  %v32273_v11 = vand.u32 4294901760, %v26210_v41 }
 0x281   : > { %32258 = vst [vmem:[#allocation34_spill] sm:$0xff] %v26268_v12  ;;  %32261 = vst [vmem:[#allocation72_spill] sm:$0xff] %v26278_v15  ;;  %v26290_v58 = vsub.f32 %v26193_v10, %v32265_v63  ;;  %v608_v23 = vsel %vm32267_vm2, %v32266_v9, %v590_v47  ;;  %16773 = vmatmul.mubr.f32.gmra.mrb[12].mxu1 %v32270_v42  ;;  %19899 = vmatprep.subr.bf16.mxu1 %v32271_v45  ;;  %v32274_v10 = vld [vmem:[#allocation103_spill] sm:$0xff] }
 0x282   : > { %vm32269_vm14 = vmmov %vm32267_vm2  ;;  %v26304_v63 = vpack.c.bf16 %v9053_v57, %v9046_v54  ;;  %v26309_v40 = vsub.f32 %v26210_v41, %v32273_v11  ;;  %18114 = vmatmul.mubr.f32.gmra.mrb[10].mxu0 %v32274_v10  ;;  %19901 = vmatpush3.bf16.msra.mxu1 %v32271_v45  ;;  %v8711_v54 = vsel %vm24688_vm8, %v8698_v35, 0.0  ;;  %v32277_v11 = vld [vmem:[#allocation119_spill] sm:$0xff]  ;;  %v26326_v9 = vsub.f32 %v8699_v53, %v26278_v15  ;;  %v22498_v15 = vld [vmem:[#allocation2 + $0x48] sm:$0xff] }
 0x283   : > { %v607_v7 = vsel %vm32269_vm14, %v590_v47, %v32268_v14  ;;  %v32275_v14 = vand.u32 4294901760, %v26227_v44  ;;  %20665 = vmatpush3.bf16.msra.mxu0 %v32263_v51  ;;  %18116 = vmatprep.mubr.f32.mxu0 %v32277_v11  ;;  %v26328_v45 = vand.u32 4294901760, %v608_v23  ;;  %vm32281_vm2 = vcmp.lt.s32.totalorder %v32063_v25, 1  ;;  %v32283_v35 = vld [vmem:[#allocation31_spill] sm:$0xff]  ;;  %v32299_v10 = vld [vmem:[#allocation82_spill] sm:$0xff] }
 0x284   : > { %32272 = vst [vmem:[#allocation80_spill] sm:$0xff] %v26304_v63  ;;  %32278 = vst [vmem:[#allocation51_spill] sm:$0xff] %v26326_v9  ;;  %v655_v41 = vsel %vm24711_vm9, %v607_v7, 0.0  ;;  %16775 = vmatprep.mubr.f32.mxu1 %v32283_v35  ;;  %v3560_v18 = vand.u32 4294901760, %v26276_v0  ;;  %v3567_v51 = vand.u32 4294901760, %v26290_v58  ;;  %v32284_v57 = vand.u32 4294901760, %v26244_v48 }
 0x285   : > { %v26318_v42 = vsub.f32 %v26227_v44, %v32275_v14  ;;  %32279 = vst [vmem:[#allocation48_spill] sm:$0xff] %v26328_v45  ;;  %v8697_v14 = vsel %vm32281_vm2, %v8679_v22, %v8680_v29  ;;  %v32282_v44 = vld [vmem:[#allocation69_spill] sm:$0xff]  ;;  %v592_v3 = vrot.slane %v22498_v15, 1  ;;  %v32285_v63 = vld [vmem:[#allocation111_spill] sm:$0xff]  ;;  %v32287_v22 = vand.u32 4294901760, %v26260_v30  ;;  %vm32296_vm14 = vmmov %vm32281_vm2 }
 0x286   : > { %20667 = vmatprep.subr.bf16.mxu0 %v32282_v44  ;;  %v9066_v53 = vsub.f32 %v26244_v48, %v32284_v57  ;;  %16776 = vmatmul.mubr.f32.gmra.mrb[14].mxu1 %v32285_v63  ;;  %v32286_v7 = vld [vmem:[#allocation75_spill] sm:$0xff]  ;;  %v26348_v35 = vand.u32 4294901760, %v8711_v54  ;;  %v32289_v0 = vand.u32 4294901760, %v25707_v37  ;;  %v32290_v57 = vand.u32 4294901760, %v25709_v38  ;;  %v32291_v48 = vld [vmem:[#allocation84_spill] sm:$0xff] }
 0x287   : > { %19903 = vmatprep.subr.bf16.mxu1 %v32286_v7  ;;  %v26346_v47 = vsub.f32 %v26260_v30, %v32287_v22  ;;  %18117 = vmatmul.mubr.f32.gmra.mrb[12].mxu0 %v32291_v48  ;;  %v32292_v63 = vand.u32 4294901760, %v26268_v12  ;;  %v26367_v30 = vand.u32 4294901760, %v655_v41  ;;  %v26369_v11 = vand.u32 4294901760, %v8697_v14 }
 0x288   : > { %32288 = vst [vmem:[#allocation49_spill] sm:$0xff] %v26348_v35  ;;  %v26353_v58 = vsub.f32 %v25707_v37, %v32289_v0  ;;  %v26358_v15 = vsub.f32 %v25709_v38, %v32290_v57  ;;  %19905 = vmatpush3.bf16.msra.mxu1 %v32286_v7  ;;  %v32295_v37 = vrot.slane %v26283_v5, 7  ;;  %20669 = vmatpush3.bf16.msra.mxu0 %v32282_v44  ;;  %v32297_v38 = vld [vmem:[#allocation120_spill] sm:$0xff]  ;;  %v9060_v57 = vand.u32 4294901760, %v26318_v42 }
 0x289   : > { %v26365_v22 = vsub.f32 %v26268_v12, %v32292_v63  ;;  %32293 = vst [vmem:[#allocation41_spill] sm:$0xff] %v26367_v30  ;;  %32294 = vst [vmem:[#allocation86_spill] sm:$0xff] %v26369_v11  ;;  %18119 = vmatprep.mubr.f32.mxu0 %v32297_v38  ;;  %v26380_v63 = vsub.f32 %v608_v23, %v26328_v45  ;;  %v26382_v12 = vld [vmem:[#allocation2 + $0x50] sm:$0xff]  ;;  %20671 = vmatprep.subr.bf16.mxu0 %v32299_v10  ;;  %v32300_v44 = vand.u32 4294901760, %v25725_v24  ;;  %v32304_v45 = vld [vmem:[#allocation39_spill] sm:$0xff] }
 0x28a   : > { %v8696_v0 = vsel %vm32296_vm14, %v8680_v29, %v32295_v37  ;;  %16810 = vmatprep.mubr.f32.mxu1 %v31951_v36  ;;  %v9067_v29 = vand.u32 4294901760, %v9066_v53  ;;  %v32301_v7 = vand.u32 4294901760, %v25727_v8  ;;  %v32302_v23 = vrot.slane %v26246_v52, 1  ;;  %19907 = vmatprep.subr.bf16.mxu1 %v32304_v45  ;;  %v32316_v53 = vld [vmem:[#allocation64_spill] sm:$0xff] }
 0x28b   : > { %32298 = vst [vmem:[#allocation57_spill] sm:$0xff] %v26380_v63  ;;  %v26390_v37 = vsub.f32 %v25725_v24, %v32300_v44  ;;  %vm32303_vm2 = vcmp.lt.s32.totalorder %v32063_v25, 7  ;;  %16811 = vmatmul.mubr.f32.vlgmr.msra.gmra.mrb[0].mxu1 %v31954_v59  ;;  %v26404_v36 = vsub.f32 %v8711_v54, %v26348_v35  ;;  %v26416_v59 = vsub.f32 %v655_v41, %v26367_v30  ;;  %v32313_v41 = vld [vmem:[#allocation33_spill] sm:$0xff] }
 0x28c   : > { %v26395_v42 = vsub.f32 %v25727_v8, %v32301_v7  ;;  %v606_v48 = vsel %vm32303_vm2, %v32302_v23, %v592_v3  ;;  %v8713_v8 = vsel %vm24736_vm10, %v8696_v0, 0.0  ;;  %v32307_v7 = vld [vmem:[#allocation35_spill] sm:$0xff]  ;;  %19909 = vmatpush3.bf16.msra.mxu1 %v32304_v45  ;;  %v26413_v23 = vpack.c.bf16 %v3567_v51, %v3560_v18  ;;  %20673 = vmatpush3.bf16.msra.mxu0 %v32299_v10  ;;  %vm32312_vm14 = vmmov %vm32303_vm2  ;;  %v32320_v51 = vld [vmem:[#allocation93_spill] sm:$0xff] }
 0x28d   : > { %32305 = vst [vmem:[#allocation36_spill] sm:$0xff] %v26404_v36  ;;  %18120 = vmatmul.mubr.f32.gmra.mrb[14].mxu0 %v32307_v7  ;;  %32308 = vst [vmem:[#allocation68_spill] sm:$0xff] %v26416_v59  ;;  %v26419_v54 = vsub.f32 %v8697_v14, %v26369_v11  ;;  %v26425_v24 = vand.u32 4294901760, %v606_v48  ;;  %v32311_v52 = vrot.slane %v26382_v12, 1  ;;  %20675 = vmatprep.subr.bf16.mxu0 %v32313_v41  ;;  %v32314_v14 = vand.u32 4294901760, %v26326_v9 }
 0x28e   : > { %18154 = vmatprep.mubr.f32.mxu0 %v31957_v61  ;;  %16813 = vmatprep.mubr.f32.mxu1 %v31958_v50  ;;  %v26440_v0 = vand.u32 4294901760, %v8713_v8  ;;  %v32317_v50 = vand.u32 4294901760, %v26353_v58  ;;  %v32321_v45 = vand.u32 4294901760, %v32320_v51  ;;  %vm32341_vm2 = vcmp.lt.s32.totalorder %v32063_v25, 1 }
 0x28f   : > { %32309 = vst [vmem:[#allocation129_spill] sm:$0xff] %v26419_v54  ;;  %32310 = vst [vmem:[#allocation131_spill] sm:$0xff] %v26425_v24  ;;  %v605_v18 = vsel %vm32312_vm14, %v592_v3, %v32311_v52  ;;  %v26436_v10 = vsub.f32 %v26326_v9, %v32314_v14  ;;  %16814 = vmatmul.mubr.f32.gmra.mrb[2].mxu1 %v32182_v46  ;;  %19911 = vmatprep.subr.bf16.mxu1 %v32316_v53  ;;  %v32318_v14 = vand.u32 4294901760, %v26358_v15  ;;  %v26453_v9 = vld [vmem:[#allocation2 + $0x68] sm:$0xff] }
 0x290   : > { %32315 = vst [vmem:[#allocation94_spill] sm:$0xff] %v26440_v0  ;;  %v26444_v3 = vpack.c.bf16 %v9067_v29, %v9060_v57  ;;  %v3573_v44 = vsub.f32 %v26353_v58, %v32317_v50  ;;  %19913 = vmatpush3.bf16.msra.mxu1 %v32316_v53  ;;  %v657_v52 = vsel %vm24848_vm11, %v605_v18, 0.0  ;;  %v26464_v50 = vsub.f32 %v32320_v51, %v32321_v45  ;;  %v32327_v45 = vld [vmem:[#allocation45_spill] sm:$0xff] }
 0x291   : > { %v3580_v61 = vsub.f32 %v26358_v15, %v32318_v14  ;;  %18155 = vmatmul.mubr.f32.vlgmr.msra.gmra.mrb[0].mxu0 %v32185_v56  ;;  %v32323_v14 = vand.u32 4294901760, %v26380_v63  ;;  %v26475_v57 = vsub.f32 %v606_v48, %v26425_v24  ;;  %v32325_v18 = vand.u32 4294901760, %v25750_v19  ;;  %16816 = vmatprep.mubr.f32.mxu1 %v32194_v34  ;;  %v32413_v24 = vld [vmem:[#allocation84_spill] sm:$0xff] }
 0x292   : > { %32322 = vst [vmem:[#allocation42_spill] sm:$0xff] %v26464_v50  ;;  %20677 = vmatpush3.bf16.msra.mxu0 %v32313_v41  ;;  %18157 = vmatprep.mubr.f32.mxu0 %v32190_v60  ;;  %v32328_v60 = vand.u32 4294901760, %v26390_v37  ;;  %v32329_v56 = vand.u32 4294901760, %v26395_v42  ;;  %v26491_v48 = vsub.f32 %v8713_v8, %v26440_v0  ;;  %v3574_v53 = vand.u32 4294901760, %v3573_v44 }
 0x293   : > { %v26472_v46 = vsub.f32 %v26380_v63, %v32323_v14  ;;  %32324 = vst [vmem:[#allocation95_spill] sm:$0xff] %v26475_v57  ;;  %v26480_v29 = vsub.f32 %v25750_v19, %v32325_v18  ;;  %20679 = vmatprep.subr.bf16.mxu0 %v32327_v45  ;;  %16817 = vmatmul.mubr.f32.gmra.mrb[4].mxu1 %v32195_v31  ;;  %v32331_v19 = vld [vmem:[#allocation97_spill] sm:$0xff]  ;;  %v32332_v18 = vand.u32 4294901760, %v26404_v36  ;;  %v26501_v41 = vand.u32 4294901760, %v657_v52 }
 0x294   : > { %v9073_v51 = vsub.f32 %v26390_v37, %v32328_v60  ;;  %v9080_v14 = vsub.f32 %v26395_v42, %v32329_v56  ;;  %32330 = vst [vmem:[#allocation75_spill] sm:$0xff] %v26491_v48  ;;  %19915 = vmatprep.subr.bf16.mxu1 %v32331_v19  ;;  %v3581_v60 = vand.u32 4294901760, %v3580_v61  ;;  %v32334_v56 = vand.u32 4294901760, %v26416_v59  ;;  %16819 = vmatprep.mubr.f32.mxu1 %v32210_v4  ;;  %v32342_v61 = vld [vmem:[#allocation89_spill] sm:$0xff] }
 0x295   : > { %32326 = vst [vmem:[#allocation69_spill] sm:$0xff] %v26480_v29  ;;  %v26499_v34 = vsub.f32 %v26404_v36, %v32332_v18  ;;  %32333 = vst [vmem:[#allocation120_spill] sm:$0xff] %v26501_v41  ;;  %18158 = vmatmul.mubr.f32.gmra.mrb[2].mxu0 %v32202_v21  ;;  %19917 = vmatpush3.bf16.msra.mxu1 %v32331_v19  ;;  %v32335_v63 = vand.u32 4294901760, %v26419_v54  ;;  %v32340_v21 = vrot.slane %v26283_v5, 7  ;;  %v32356_v5 = vand.u32 4294901760, %v25775_v32 }
 0x296   : > { %v26509_v31 = vsub.f32 %v26416_v59, %v32334_v56  ;;  %20681 = vmatpush3.bf16.msra.mxu0 %v32327_v45  ;;  %18160 = vmatprep.mubr.f32.mxu0 %v32205_v33  ;;  %v32336_v56 = vand.u32 4294901760, %v25752_v49  ;;  %v32338_v59 = vld [vmem:[#allocation87_spill] sm:$0xff]  ;;  %v9081_v44 = vand.u32 4294901760, %v9080_v14  ;;  %v32339_v33 = vrot.slane %v26453_v9, 7  ;;  %v32370_v45 = vld [vmem:[#allocation101_spill] sm:$0xff] }
 0x297   : > { %v26514_v18 = vsub.f32 %v26419_v54, %v32335_v63  ;;  %20683 = vmatprep.subr.bf16.mxu0 %v32338_v59  ;;  %v9074_v63 = vand.u32 4294901760, %v9073_v51  ;;  %16820 = vmatmul.mubr.f32.gmra.mrb[6].mxu1 %v32215_v2  ;;  %v26542_v4 = vsub.f32 %v657_v52, %v26501_v41  ;;  %v22500_v51 = vld [vmem:[#allocation2 + $0x58] sm:$0xff]  ;;  %v26544_v54 = vld [vmem:[#allocation2 + $0x70] sm:$0xff]  ;;  %v32345_v52 = vand.u32 4294901760, %v25771_v6 }
 0x298   : > { %v26525_v36 = vsub.f32 %v25752_v49, %v32336_v56  ;;  %v8695_v8 = vsel %vm32341_vm2, %v32340_v21, %v32339_v33  ;;  %19919 = vmatprep.subr.bf16.mxu1 %v32342_v61  ;;  %v26539_v56 = vpack.c.bf16 %v3581_v60, %v3574_v53  ;;  %v594_v14 = vrot.slane %v22500_v51, 1  ;;  %16822 = vmatprep.mubr.f32.mxu1 %v32232_v20 }
 0x299   : > { %32343 = vst [vmem:[#allocation35_spill] sm:$0xff] %v26542_v4  ;;  %18161 = vmatmul.mubr.f32.gmra.mrb[4].mxu0 %v32219_v26  ;;  %19921 = vmatpush3.bf16.msra.mxu1 %v32342_v61  ;;  %v32344_v21 = vand.u32 4294901760, %v26464_v50  ;;  %v26558_v60 = vsub.f32 %v25771_v6, %v32345_v52  ;;  %v32347_v26 = vand.u32 4294901760, %v26475_v57  ;;  %v32348_v51 = vand.u32 4294901760, %v26480_v29  ;;  %v32350_v6 = vld [vmem:[#allocation115_spill] sm:$0xff]  ;;  %v32352_v61 = vld [vmem:[#allocation32_spill] sm:$0xff] }
 0x29a   : > { %32337 = vst [vmem:[#allocation82_spill] sm:$0xff] %v26525_v36  ;;  %20685 = vmatpush3.bf16.msra.mxu0 %v32338_v59  ;;  %18163 = vmatprep.mubr.f32.mxu0 %v32224_v39  ;;  %v9086_v49 = vand.u32 4294901760, %v26525_v36  ;;  %v26577_v52 = vpack.c.bf16 %v9081_v44, %v9074_v63  ;;  %v32351_v39 = vand.u32 4294901760, %v26491_v48  ;;  %v32353_v20 = vrot.slane %v26382_v12, 1 }
 0x29b   : > { %v26553_v53 = vsub.f32 %v26464_v50, %v32344_v21  ;;  %32346 = vst [vmem:[#allocation93_spill] sm:$0xff] %v26558_v60  ;;  %v26565_v33 = vsub.f32 %v26475_v57, %v32347_v26  ;;  %v26570_v2 = vsub.f32 %v26480_v29, %v32348_v51  ;;  %v26572_v21 = vand.u32 4294901760, %v8695_v8  ;;  %20687 = vmatprep.subr.bf16.mxu0 %v32350_v6  ;;  %v26585_v57 = vld [vmem:[#allocation2 + $0x60] sm:$0xff] }
 0x29c   : > { %v26582_v26 = vsub.f32 %v26491_v48, %v32351_v39  ;;  %16823 = vmatmul.mubr.f32.gmra.mrb[8].mxu1 %v32233_v62  ;;  %19923 = vmatprep.subr.bf16.mxu1 %v32352_v61  ;;  %v604_v44 = vsel %vm32312_vm14, %v32353_v20, %v594_v14  ;;  %v32354_v63 = vand.u32 4294901760, %v25773_v13  ;;  %v26603_v51 = vsub.f32 %v25775_v32, %v32356_v5 }
 0x29d   : > { %32349 = vst [vmem:[#allocation145_spill] sm:$0xff] %v26572_v21  ;;  %18164 = vmatmul.mubr.f32.gmra.mrb[6].mxu0 %v32238_v43  ;;  %19925 = vmatpush3.bf16.msra.mxu1 %v32352_v61  ;;  %v3588_v62 = vand.u32 4294901760, %v26553_v53  ;;  %v9093_v12 = vand.u32 4294901760, %v26558_v60  ;;  %v32358_v20 = vand.u32 4294901760, %v25791_v17  ;;  %v3595_v43 = vand.u32 4294901760, %v26570_v2  ;;  %v32368_v61 = vld [vmem:[#allocation132_spill] sm:$0xff] }
 0x29e   : > { %v26598_v39 = vsub.f32 %v25773_v13, %v32354_v63  ;;  %32357 = vst [vmem:[#allocation147_spill] sm:$0xff] %v26603_v51  ;;  %v32359_v13 = vand.u32 4294901760, %v25793_v55  ;;  %20689 = vmatpush3.bf16.msra.mxu0 %v32350_v6  ;;  %18166 = vmatprep.mubr.f32.mxu0 %v32244_v16  ;;  %v26624_v5 = vsub.f32 %v8695_v8, %v26572_v21  ;;  %v32365_v16 = vrot.slane %v26453_v9, 7  ;;  %v32369_v6 = vld [vmem:[#allocation50_spill] sm:$0xff] }
 0x29f   : > { %v26612_v59 = vsub.f32 %v25791_v17, %v32358_v20  ;;  %v26627_v53 = vsub.f32 %v26525_v36, %v9086_v49  ;;  %v32361_v17 = vld [vmem:[#allocation46_spill] sm:$0xff]  ;;  %v32362_v20 = vld [vmem:[#allocation59_spill] sm:$0xff]  ;;  %v32366_v2 = vrot.slane %v26585_v57, 1  ;;  %v26643_v48 = vpack.c.bf16 %v9093_v12, %v9086_v49  ;;  %19927 = vmatprep.subr.bf16.mxu1 %v32369_v6 }
 0x2a0   : > { %32355 = vst [vmem:[#allocation146_spill] sm:$0xff] %v26598_v39  ;;  %v26617_v63 = vsub.f32 %v25793_v55, %v32359_v13  ;;  %32360 = vst [vmem:[#allocation148_spill] sm:$0xff] %v26624_v5  ;;  %20691 = vmatprep.subr.bf16.mxu0 %v32361_v17  ;;  %16825 = vmatprep.mubr.f32.mxu1 %v32362_v20  ;;  %v26631_v55 = vand.u32 4294901760, %v604_v44  ;;  %v32364_v13 = vrot.slane %v26544_v54, 7  ;;  %v32371_v9 = vand.u32 4294901760, %v32370_v45  ;;  %v32410_v36 = vld [vmem:[#allocation111_spill] sm:$0xff] }
 0x2a1   : > { %v603_v8 = vsel %vm32312_vm14, %v594_v14, %v32366_v2  ;;  %32367 = vst [vmem:[#allocation149_spill] sm:$0xff] %v26643_v48  ;;  %16826 = vmatmul.mubr.f32.gmra.mrb[10].mxu1 %v32368_v61  ;;  %18167 = vmatmul.mubr.f32.gmra.mrb[8].mxu0 %v32256_v27  ;;  %v32374_v14 = vld [vmem:[#allocation109_spill] sm:$0xff]  ;;  %v26682_v49 = vsub.f32 %v26558_v60, %v9093_v12  ;;  %v32386_v48 = vand.u32 4294901760, %v26612_v59  ;;  %v32393_v61 = vld [vmem:[#allocation58_spill] sm:$0xff]  ;;  %v32396_v27 = vld [vmem:[#allocation96_spill] sm:$0xff] }
 0x2a2   : > { %32363 = vst [vmem:[#allocation59_spill] sm:$0xff] %v26631_v55  ;;  %v8694_v32 = vsel %vm32341_vm2, %v32365_v16, %v32364_v13  ;;  %v26652_v21 = vsub.f32 %v32370_v45, %v32371_v9  ;;  %v32372_v13 = vld [vmem:[#allocation92_spill] sm:$0xff]  ;;  %19929 = vmatpush3.bf16.msra.mxu1 %v32369_v6  ;;  %v32375_v2 = vand.u32 4294901760, %v32374_v14  ;;  %v32376_v45 = vld [vmem:[#allocation90_spill] sm:$0xff]  ;;  %20693 = vmatpush3.bf16.msra.mxu0 %v32361_v17  ;;  %v659_v12 = vsel %vm25100_vm13, %v603_v8, 0.0  ;;  %vm32415_vm2 = vmmov %vm32312_vm14 }
 0x2a3   : > { %v32373_v16 = vand.u32 4294901760, %v32372_v13  ;;  %v32377_v9 = vand.u32 4294901760, %v32376_v45  ;;  %18169 = vmatprep.mubr.f32.mxu0 %v32259_v28  ;;  %16828 = vmatprep.mubr.f32.mxu1 %v32264_v1  ;;  %v26693_v28 = vsub.f32 %v604_v44, %v26631_v55  ;;  %v32387_v6 = vand.u32 4294901760, %v26617_v63  ;;  %v26707_v1 = vld [vmem:[#allocation2 + $0x80] sm:$0xff]  ;;  %vm32417_vm14 = vmmov %vm32415_vm2 }
 0x2a4   : > { %v26666_v19 = vsub.f32 %v32374_v14, %v32375_v2  ;;  %v32379_v14 = vand.u32 4294901760, %v26598_v39  ;;  %v32380_v2 = vand.u32 4294901760, %v26603_v51  ;;  %v32397_v55 = vand.u32 4294901760, %v32396_v27 }
 0x2a5   : > { %v26657_v0 = vsub.f32 %v32372_v13, %v32373_v16  ;;  %v26671_v20 = vsub.f32 %v32376_v45, %v32377_v9  ;;  %v32378_v13 = vand.u32 4294901760, %v26542_v4  ;;  %v32382_v9 = vld [vmem:[#allocation30_spill] sm:$0xff]  ;;  %32383 = vst [vmem:[#allocation101_spill] sm:$0xff] %v26693_v28  ;;  %v26703_v17 = vpack.c.bf16 %v32387_v6, %v32386_v48  ;;  %v32395_v6 = vld [vmem:[#allocation103_spill] sm:$0xff] }
 0x2a6   : > { %v26688_v45 = vpack.c.bf16 %v32380_v2, %v32379_v14  ;;  %20695 = vmatprep.subr.bf16.mxu0 %v32382_v9  ;;  %v32389_v14 = vld [vmem:[#allocation144_spill] sm:$0xff]  ;;  %v32390_v2 = vld [vmem:[#allocation98_spill] sm:$0xff]  ;;  %18170 = vmatmul.mubr.f32.gmra.mrb[10].mxu0 %v32395_v6  ;;  %v26728_v11 = vsub.f32 %v32396_v27, %v32397_v55  ;;  %v22502_v6 = vld [vmem:[#allocation2 + $0x68] sm:$0xff]  ;;  %v32401_v55 = vand.u32 4294901760, %v26652_v21 }
 0x2a7   : > { %v26679_v16 = vsub.f32 %v26542_v4, %v32378_v13  ;;  %v8715_v13 = vsel %vm25019_vm12, %v8694_v32, 0.0  ;;  %32388 = vst [vmem:[#allocation92_spill] sm:$0xff] %v26703_v17  ;;  %16829 = vmatmul.mubr.f32.gmra.mrb[12].mxu1 %v32389_v14  ;;  %19931 = vmatprep.subr.bf16.mxu1 %v32390_v2  ;;  %v32391_v32 = vld [vmem:[#allocation65_spill] sm:$0xff]  ;;  %v32394_v4 = vand.u32 4294901760, %v32393_v61  ;;  %v8668_v14 = vld [vmem:[#allocation2 + $0x78] sm:$0xff]  ;;  %v596_v17 = vrot.slane %v22502_v6, 1 }
 0x2a8   : > { %32381 = vst [vmem:[#allocation132_spill] sm:$0xff] %v26688_v45  ;;  %v32392_v45 = vand.u32 4294901760, %v32391_v32  ;;  %19933 = vmatpush3.bf16.msra.mxu1 %v32390_v2  ;;  %20697 = vmatpush3.bf16.msra.mxu0 %v32382_v9  ;;  %v26739_v2 = vld [vmem:[#allocation2 + $0x70] sm:$0xff]  ;;  %v32402_v27 = vand.u32 4294901760, %v26657_v0  ;;  %v32407_v6 = vand.u32 4294901760, %v26666_v19  ;;  %v32408_v44 = vand.u32 4294901760, %v26671_v20 }
 0x2a9   : > { %v26719_v48 = vsub.f32 %v32393_v61, %v32394_v4  ;;  %v32400_v4 = vld [vmem:[#allocation119_spill] sm:$0xff]  ;;  %v26737_v61 = vpack.c.bf16 %v3595_v43, %v3588_v62  ;;  %v26751_v62 = vand.u32 4294901760, %v8715_v13  ;;  %v9088_v43 = vand.u32 4294901760, %v26627_v53 }
 0x2aa   : > { %v26714_v8 = vsub.f32 %v32391_v32, %v32392_v45  ;;  %v32398_v45 = vld [vmem:[#allocation62_spill] sm:$0xff]  ;;  %18172 = vmatprep.mubr.f32.mxu0 %v32400_v4  ;;  %v26746_v60 = vpack.c.bf16 %v32402_v27, %v32401_v55  ;;  %v26758_v9 = vpack.c.bf16 %v32408_v44, %v32407_v6  ;;  %v32411_v55 = vld [vmem:[#allocation81_spill] sm:$0xff]  ;;  %v26762_v27 = vand.u32 4294901760, %v659_v12  ;;  %v22504_v44 = vld [vmem:[#allocation2 + $0x78] sm:$0xff] }
 0x2ab   : > { %v32399_v32 = vand.u32 4294901760, %v32398_v45  ;;  %32406 = vst [vmem:[#allocation90_spill] sm:$0xff] %v26751_v62  ;;  %19935 = vmatprep.subr.bf16.mxu1 %v32411_v55  ;;  %18173 = vmatmul.mubr.f32.gmra.mrb[12].mxu0 %v32413_v24  ;;  %v26770_v6 = vld [vmem:[#allocation2 + $0x90] sm:$0xff]  ;;  %v32416_v4 = vrot.slane %v26739_v2, 1  ;;  %v26795_v35 = vsub.f32 %v8715_v13, %v26751_v62  ;;  %v32427_v29 = vand.u32 4294901760, %v26728_v11 }
 0x2ac   : > { %32403 = vst [vmem:[#allocation109_spill] sm:$0xff] %v26746_v60  ;;  %32409 = vst [vmem:[#allocation144_spill] sm:$0xff] %v26758_v9  ;;  %v8684_v60 = vrot.slane %v8668_v14, 7  ;;  %19937 = vmatpush3.bf16.msra.mxu1 %v32411_v55  ;;  %18175 = vmatprep.mubr.f32.mxu0 %v32297_v38  ;;  %v32414_v14 = vrot.slane %v26585_v57, 1  ;;  %v32419_v9 = vand.u32 4294901760, %v26719_v48  ;;  %v32422_v38 = vld [vmem:[#allocation116_spill] sm:$0xff]  ;;  %v26816_v62 = vsub.f32 %v659_v12, %v26762_v27 }
 0x2ad   : > { %v26733_v41 = vsub.f32 %v32398_v45, %v32399_v32  ;;  %v32404_v45 = vld [vmem:[#allocation55_spill] sm:$0xff]  ;;  %32412 = vst [vmem:[#allocation65_spill] sm:$0xff] %v26762_v27  ;;  %v601_v53 = vsel %vm32417_vm14, %v596_v17, %v32416_v4  ;;  %v32423_v57 = vand.u32 4294901760, %v32422_v38  ;;  %32424 = vst [vmem:[#allocation103_spill] sm:$0xff] %v26795_v35 }
 0x2ae   : > { %20699 = vmatprep.subr.bf16.mxu0 %v32404_v45  ;;  %v32405_v32 = vld [vmem:[#allocation31_spill] sm:$0xff]  ;;  %v602_v24 = vsel %vm32415_vm2, %v32414_v14, %v596_v17  ;;  %v9095_v14 = vand.u32 4294901760, %v26682_v49  ;;  %v32425_v17 = vrot.slane %v26707_v1, 7  ;;  %vm32426_vm2 = vcmp.lt.s32.totalorder %v32063_v25, 1  ;;  %32434 = vst [vmem:[#allocation62_spill] sm:$0xff] %v26816_v62 }
 0x2af   : > { %16831 = vmatprep.mubr.f32.mxu1 %v32405_v32  ;;  %20701 = vmatpush3.bf16.msra.mxu0 %v32404_v45  ;;  %v598_v32 = vrot.slane %v22504_v44, 1  ;;  %v32421_v45 = vld [vmem:[#allocation70_spill] sm:$0xff]  ;;  %v8670_v44 = vld [vmem:[#allocation2 + $0x88] sm:$0xff]  ;;  %v32433_v49 = vand.u32 4294901760, %v26624_v5  ;;  %vm32436_vm14 = vmmov %vm32426_vm2 }
 0x2b0   : > { %16832 = vmatmul.mubr.f32.gmra.mrb[14].mxu1 %v32410_v36  ;;  %v32418_v36 = vand.u32 4294901760, %v26714_v8  ;;  %20703 = vmatprep.subr.bf16.mxu0 %v32421_v45  ;;  %v8692_v4 = vsel %vm32426_vm2, %v8684_v60, %v32425_v17  ;;  %v32435_v17 = vrot.slane %v26544_v54, 7 }
 0x2b1   : > { %16866 = vmatprep.mubr.f32.mxu1 %v32423_v57  ;;  %v32432_v57 = vld [vmem:[#allocation138_spill] sm:$0xff]  ;;  %v26813_v13 = vsub.f32 %v26624_v5, %v32433_v49  ;;  %18176 = vmatmul.mubr.f32.gmra.mrb[14].mxu0 %v32307_v7  ;;  %v26831_v49 = vand.u32 4294901760, %v602_v24  ;;  %v32443_v7 = vand.u32 4294901760, %v26693_v28  ;;  %v8686_v5 = vrot.slane %v8670_v44, 7 }
 0x2b2   : > { %v26788_v55 = vpack.c.bf16 %v32419_v9, %v32418_v36  ;;  %v32428_v9 = vand.u32 4294901760, %v26733_v41  ;;  %19939 = vmatprep.subr.bf16.mxu1 %v32432_v57  ;;  %v8693_v50 = vsel %vm32436_vm14, %v32435_v17, %v8684_v60  ;;  %v32441_v60 = vld [vmem:[#allocation128_spill] sm:$0xff]  ;;  %v32444_v17 = vld [vmem:[#allocation139_spill] sm:$0xff]  ;;  %vm32448_vm14 = vcmp.lt.s32.totalorder %v32063_v25, 7 }
 0x2b3   : > { %32439 = vst [vmem:[#allocation119_spill] sm:$0xff] %v26831_v49  ;;  %20705 = vmatpush3.bf16.msra.mxu0 %v32421_v45  ;;  %vm32445_vm2 = vnez %v32444_v17  ;;  %v32450_v45 = vld [vmem:[#allocation140_spill] sm:$0xff] }
 0x2b4   : > { %32420 = vst [vmem:[#allocation58_spill] sm:$0xff] %v26788_v55  ;;  %v26805_v36 = vpack.c.bf16 %v32428_v9, %v32427_v29  ;;  %v32430_v55 = vld [vmem:[#allocation91_spill] sm:$0xff]  ;;  %v8687_v29 = vrot.slane %v26770_v6, 7  ;;  %v32442_v6 = vand.u32 4294901760, %v32441_v60 }
 0x2b5   : > { %v32431_v38 = vand.u32 4294901760, %v32430_v55  ;;  %v32437_v55 = vand.u32 4294901760, %v26598_v39 }
 0x2b6   : > { %32429 = vst [vmem:[#allocation96_spill] sm:$0xff] %v26805_v36  ;;  %v661_v36 = vsel %vm25269_vm0, %v601_v53, 0.0  ;;  %18210 = vmatprep.mubr.f32.mxu0 %v32442_v6  ;;  %v32449_v53 = vld [vmem:[#allocation107_spill] sm:$0xff]  ;;  %v26853_v6 = vpack.c.bf16 %v9095_v14, %v9088_v43  ;;  %vm32458_vm0 = vcmp.lt.s32.totalorder %v32063_v25, 1  ;;  %v32459_v14 = vld [vmem:[#allocation133_spill] sm:$0xff] }
 0x2b7   : > { %16867 = vmatmul.mubr.f32.vlgmr.msra.gmra.mrb[0].mxu1 %v32431_v38  ;;  %v3601_v9 = vsub.f32 %v26598_v39, %v32437_v55  ;;  %v32438_v38 = vand.u32 4294901760, %v26603_v51  ;;  %v8717_v55 = vsel %vm32445_vm2, %v8692_v4, 0.0  ;;  %20707 = vmatprep.subr.bf16.mxu0 %v32449_v53  ;;  %v32453_v4 = vld [vmem:[#allocation71_spill] sm:$0xff]  ;;  %v26862_v17 = vand.u32 4294901760, %v661_v36 }
 0x2b8   : > { %19941 = vmatpush3.bf16.msra.mxu1 %v32432_v57  ;;  %v26841_v57 = vsub.f32 %v26693_v28, %v32443_v7  ;;  %v26856_v28 = vand.u32 4294901760, %v8693_v50  ;;  %v32454_v44 = vand.u32 4294901760, %v32453_v4  ;;  %v8690_v43 = vsel %vm32458_vm0, %v8686_v5, %v8687_v29  ;;  %v32466_v4 = vld [vmem:[#allocation80_spill] sm:$0xff] }
 0x2b9   : > { %v3608_v12 = vsub.f32 %v26603_v51, %v32438_v38  ;;  %v32446_v38 = vld [vmem:[#allocation63_spill] sm:$0xff]  ;;  %v32451_v51 = vand.u32 4294901760, %v32450_v45  ;;  %32456 = vst [vmem:[#allocation111_spill] sm:$0xff] %v26862_v17  ;;  %v32457_v45 = vrot.slane %v26739_v2, 1  ;;  %v32460_v60 = vand.u32 4294901760, %v32459_v14  ;;  %v32476_v14 = vld [vmem:[#allocation40_spill] sm:$0xff] }
 0x2ba   : > { %v32447_v27 = vrot.slane %v32446_v38, 1  ;;  %32452 = vst [vmem:[#allocation31_spill] sm:$0xff] %v26856_v28  ;;  %v32455_v38 = vld [vmem:[#allocation77_spill] sm:$0xff] }
 0x2bb   : > { %16869 = vmatprep.mubr.f32.mxu1 %v32451_v51  ;;  %19943 = vmatprep.subr.bf16.mxu1 %v32455_v38  ;;  %v600_v51 = vsel %vm32448_vm14, %v32457_v45, %v598_v32  ;;  %v3609_v39 = vand.u32 4294901760, %v3608_v12  ;;  %v32470_v12 = vld [vmem:[#allocation143_spill] sm:$0xff] }
 0x2bc   : > { %v615_v54 = vsel %vm32448_vm14, %v598_v32, %v32447_v27  ;;  %16870 = vmatmul.mubr.f32.gmra.mrb[2].mxu1 %v32454_v44  ;;  %18211 = vmatmul.mubr.f32.vlgmr.msra.gmra.mrb[0].mxu0 %v32460_v60  ;;  %v26875_v44 = vsub.f32 %v602_v24, %v26831_v49  ;;  %v26877_v27 = vand.u32 4294901760, %v8717_v55  ;;  %v32463_v32 = vld [vmem:[#allocation73_spill] sm:$0xff]  ;;  %v3602_v60 = vand.u32 4294901760, %v3601_v9 }
 0x2bd   : > { %19945 = vmatpush3.bf16.msra.mxu1 %v32455_v38  ;;  %v663_v2 = vsel %vm25323_vm15, %v615_v54, 0.0  ;;  %20709 = vmatpush3.bf16.msra.mxu0 %v32449_v53  ;;  %v32464_v45 = vand.u32 4294901760, %v32463_v32  ;;  %v32465_v38 = vrot.slane %v26707_v1, 7  ;;  %v32467_v49 = vand.u32 4294901760, %v26309_v40 }
 0x2be   : > { %32461 = vst [vmem:[#allocation84_spill] sm:$0xff] %v26877_v27  ;;  %20711 = vmatprep.subr.bf16.mxu0 %v32466_v4  ;;  %v32468_v54 = vand.u32 4294901760, %v26795_v35  ;;  %v26898_v32 = vsub.f32 %v8693_v50, %v26856_v28  ;;  %v26900_v9 = vand.u32 4294901760, %v600_v51  ;;  %vm32471_vm14 = vnez %v32470_v12  ;;  %19947 = vmatprep.subr.bf16.mxu1 %v26413_v23 }
 0x2bf   : > { %18213 = vmatprep.mubr.f32.mxu0 %v32464_v45  ;;  %v8691_v24 = vsel %vm32458_vm0, %v32465_v38, %v8686_v5  ;;  %16872 = vmatprep.mubr.f32.mxu1 %v32467_v49  ;;  %v8719_v1 = vsel %vm32471_vm14, %v8690_v43, 0.0  ;;  %v32472_v5 = vand.u32 4294901760, %v26365_v22  ;;  %v32473_v40 = vand.u32 4294901760, %v26612_v59 }
 0x2c0   : > { %v26895_v53 = vsub.f32 %v26795_v35, %v32468_v54  ;;  %32469 = vst [vmem:[#allocation116_spill] sm:$0xff] %v26900_v9  ;;  %v32474_v45 = vand.u32 4294901760, %v26617_v63  ;;  %v26914_v50 = vsub.f32 %v661_v36, %v26862_v17  ;;  %v26916_v54 = vand.u32 4294901760, %v663_v2 }
 0x2c1   : > { %16873 = vmatmul.mubr.f32.gmra.mrb[4].mxu1 %v32472_v5  ;;  %v9101_v49 = vsub.f32 %v26612_v59, %v32473_v40  ;;  %v32477_v43 = vand.u32 4294901760, %v32476_v14  ;;  %v32478_v22 = vand.u32 4294901760, %v26816_v62  ;;  %v26928_v7 = vsub.f32 %v8717_v55, %v26877_v27  ;;  %20713 = vmatpush3.bf16.msra.mxu0 %v32466_v4  ;;  %v32484_v40 = vld [vmem:[#allocation56_spill] sm:$0xff] }
 0x2c2   : > { %v9108_v38 = vsub.f32 %v26617_v63, %v32474_v45  ;;  %32475 = vst [vmem:[#allocation91_spill] sm:$0xff] %v26916_v54  ;;  %19949 = vmatpush3.bf16.msra.mxu1 %v26413_v23  ;;  %v26930_v45 = vand.u32 4294901760, %v8691_v24  ;;  %v32480_v36 = vand.u32 4294901760, %v26346_v47  ;;  %v32481_v14 = vand.u32 4294901760, %v26652_v21  ;;  %20715 = vmatprep.subr.bf16.mxu0 %v26444_v3 }
 0x2c3   : > { %18214 = vmatmul.mubr.f32.gmra.mrb[2].mxu0 %v32477_v43  ;;  %v26924_v5 = vsub.f32 %v26816_v62, %v32478_v22  ;;  %v32482_v43 = vand.u32 4294901760, %v26657_v0  ;;  %v26941_v12 = vand.u32 4294901760, %v8719_v1  ;;  %v32485_v55 = vrot.slane %v32484_v40, 7  ;;  %19951 = vmatprep.subr.bf16.mxu1 %v26539_v56 }
 0x2c4   : > { %32479 = vst [vmem:[#allocation138_spill] sm:$0xff] %v26930_v45  ;;  %18216 = vmatprep.mubr.f32.mxu0 %v32480_v36  ;;  %v3615_v23 = vsub.f32 %v26652_v21, %v32481_v14  ;;  %v32486_v47 = vand.u32 4294901760, %v26472_v46  ;;  %v19958_v36 = vpack.c.bf16 %v3609_v39, %v3602_v60  ;;  %v30895_v14 = vand.u32 4294901760, %v26898_v32 }
 0x2c5   : > { %v3622_v22 = vsub.f32 %v26657_v0, %v32482_v43  ;;  %32483 = vst [vmem:[#allocation128_spill] sm:$0xff] %v26941_v12  ;;  %v8689_v35 = vsel %vm32458_vm0, %v8687_v29, %v32485_v55  ;;  %v26953_v62 = vsub.f32 %v600_v51, %v26900_v9  ;;  %v32487_v43 = vand.u32 4294901760, %v26509_v31  ;;  %20717 = vmatpush3.bf16.msra.mxu0 %v26444_v3 }
 0x2c6   : > { %16875 = vmatprep.mubr.f32.mxu1 %v32486_v47  ;;  %v9102_v40 = vand.u32 4294901760, %v9101_v49  ;;  %v9109_v29 = vand.u32 4294901760, %v9108_v38  ;;  %v30896_v55 = vand.u32 4294901760, %v26914_v50  ;;  %v26960_v46 = vsub.f32 %v663_v2, %v26916_v54  ;;  %19953 = vmatpush3.bf16.msra.mxu1 %v26539_v56 }
 0x2c7   : > { %16876 = vmatmul.mubr.f32.gmra.mrb[6].mxu1 %v32487_v43  ;;  %v32488_v47 = vand.u32 4294901760, %v26436_v10  ;;  %v32489_v39 = vand.u32 4294901760, %v26875_v44  ;;  %v30902_v31 = vand.u32 4294901760, %v26928_v7  ;;  %v26970_v60 = vsub.f32 %v8691_v24, %v26930_v45  ;;  %20719 = vmatprep.subr.bf16.mxu0 %v26577_v52 }
 0x2c8   : > { %v26972_v49 = vand.u32 4294901760, %v8689_v35  ;;  %v32491_v2 = vand.u32 4294901760, %v26499_v34  ;;  %v3616_v10 = vand.u32 4294901760, %v3615_v23  ;;  %v3623_v38 = vand.u32 4294901760, %v3622_v22  ;;  %19955 = vmatprep.subr.bf16.mxu1 %v26737_v61 }
 0x2c9   : > { %18217 = vmatmul.mubr.f32.gmra.mrb[4].mxu0 %v32488_v47  ;;  %v3490_v51 = vsub.f32 %v26875_v44, %v32489_v39  ;;  %v32492_v56 = vand.u32 4294901760, %v26666_v19  ;;  %v26981_v47 = vsub.f32 %v8719_v1, %v26941_v12  ;;  %v32493_v24 = vand.u32 4294901760, %v26565_v33 }
 0x2ca   : > { %32490 = vst [vmem:[#allocation63_spill] sm:$0xff] %v26972_v49  ;;  %18219 = vmatprep.mubr.f32.mxu0 %v32491_v2  ;;  %v3481_v39 = vand.u32 4294901760, %v26924_v5  ;;  %v8980_v3 = vsub.f32 %v26898_v32, %v30895_v14  ;;  %v32494_v34 = vand.u32 4294901760, %v26671_v20  ;;  %v30901_v22 = vand.u32 4294901760, %v26953_v62  ;;  %19957 = vmatpush3.bf16.msra.mxu1 %v26737_v61 }
 0x2cb   : > { %v9115_v43 = vsub.f32 %v26666_v19, %v32492_v56  ;;  %16878 = vmatprep.mubr.f32.mxu1 %v32493_v24  ;;  %v32495_v1 = vand.u32 4294901760, %v26679_v16  ;;  %v3500_v33 = vsub.f32 %v26914_v50, %v30896_v55  ;;  %v30900_v5 = vand.u32 4294901760, %v26960_v46  ;;  %20721 = vmatpush3.bf16.msra.mxu0 %v26577_v52 }
 0x2cc   : > { %v9122_v23 = vsub.f32 %v26671_v20, %v32494_v34  ;;  %v32496_v2 = vand.u32 4294901760, %v26714_v8  ;;  %v32497_v24 = vand.u32 4294901760, %v26719_v48  ;;  %v32498_v14 = vand.u32 4294901760, %v26514_v18  ;;  %20723 = vmatprep.subr.bf16.mxu0 %v26853_v6  ;;  %19959 = vmatprep.subr.bf16.mxu1 %v19958_v36 }
 0x2cd   : > { %16879 = vmatmul.mubr.f32.gmra.mrb[8].mxu1 %v32495_v1  ;;  %v20726_v16 = vpack.c.bf16 %v9109_v29, %v9102_v40  ;;  %v3491_v1 = vand.u32 4294901760, %v3490_v51  ;;  %v30897_v4 = vand.u32 4294901760, %v26970_v60  ;;  %v27012_v55 = vsub.f32 %v8689_v35, %v26972_v49 }
 0x2ce   : > { %v3629_v56 = vsub.f32 %v26714_v8, %v32496_v2  ;;  %v3636_v34 = vsub.f32 %v26719_v48, %v32497_v24  ;;  %18220 = vmatmul.mubr.f32.gmra.mrb[6].mxu0 %v32498_v14  ;;  %v32499_v2 = vand.u32 4294901760, %v26582_v26  ;;  %v8990_v24 = vsub.f32 %v26928_v7, %v30902_v31  ;;  %19961 = vmatpush3.bf16.msra.mxu1 %v19958_v36  ;;  %v32530_v31 = vld [vmem:[#allocation69_spill] sm:$0xff] }
 0x2cf   : > { %v19962_v18 = vpack.c.bf16 %v3623_v38, %v3616_v10  ;;  %v9116_v14 = vand.u32 4294901760, %v9115_v43  ;;  %v30899_v61 = vand.u32 4294901760, %v26981_v47  ;;  %v32500_v40 = vand.u32 4294901760, %v26841_v57  ;;  %20725 = vmatpush3.bf16.msra.mxu0 %v26853_v6 }
 0x2d0   : > { %18222 = vmatprep.mubr.f32.mxu0 %v32499_v2  ;;  %v9123_v35 = vand.u32 4294901760, %v9122_v23  ;;  %v3510_v52 = vsub.f32 %v26953_v62, %v30901_v22  ;;  %v32501_v26 = vand.u32 4294901760, %v26728_v11  ;;  %v32502_v51 = vand.u32 4294901760, %v26733_v41  ;;  %20727 = vmatprep.subr.bf16.mxu0 %v20726_v16  ;;  %v32529_v22 = vld [vmem:[#allocation42_spill] sm:$0xff] }
 0x2d1   : > { %16881 = vmatprep.mubr.f32.mxu1 %v32500_v40  ;;  %v3501_v38 = vand.u32 4294901760, %v3500_v33  ;;  %v3520_v57 = vsub.f32 %v26960_v46, %v30900_v5  ;;  %v3630_v43 = vand.u32 4294901760, %v3629_v56  ;;  %v3637_v23 = vand.u32 4294901760, %v3636_v34  ;;  %19963 = vmatprep.subr.bf16.mxu1 %v19962_v18 }
 0x2d2   : > { %v9129_v29 = vsub.f32 %v26728_v11, %v32501_v26  ;;  %v9136_v10 = vsub.f32 %v26733_v41, %v32502_v51  ;;  %16882 = vmatmul.mubr.f32.gmra.mrb[10].mxu1 %v3481_v39  ;;  %v32503_v2 = vand.u32 4294901760, %v26813_v13  ;;  %v8981_v40 = vand.u32 4294901760, %v8980_v3 }
 0x2d3   : > { %v9000_v26 = vsub.f32 %v26970_v60, %v30897_v4  ;;  %v30898_v51 = vand.u32 4294901760, %v27012_v55  ;;  %v32504_v39 = vand.u32 4294901760, %v26895_v53  ;;  %v8991_v33 = vand.u32 4294901760, %v8990_v24  ;;  %16884 = vmatprep.mubr.f32.mxu1 %v3491_v1  ;;  %19965 = vmatpush3.bf16.msra.mxu1 %v19962_v18  ;;  %v32507_v18 = vld [vmem:[#allocation100_spill] sm:$0xff] }
 0x2d4   : > { %18223 = vmatmul.mubr.f32.gmra.mrb[8].mxu0 %v32503_v2  ;;  %v9010_v56 = vsub.f32 %v26981_v47, %v30899_v61  ;;  %v20730_v13 = vpack.c.bf16 %v9123_v35, %v9116_v14  ;;  %v3511_v36 = vand.u32 4294901760, %v3510_v52  ;;  %v9130_v3 = vand.u32 4294901760, %v9129_v29  ;;  %v32505_v14 = vld [vmem:[#allocation44_spill] sm:$0xff]  ;;  %v32506_v35 = vld [vmem:[#allocation113_spill] sm:$0xff]  ;;  %v32526_v61 = vld [vmem:[#allocation134_spill] sm:$0xff] }
 0x2d5   : > { %18225 = vmatprep.mubr.f32.mxu0 %v32504_v39  ;;  %v9137_v34 = vand.u32 4294901760, %v9136_v10  ;;  %v3521_v2 = vand.u32 4294901760, %v3520_v57  ;;  %v19966_v4 = vpack.c.bf16 %v3637_v23, %v3630_v43  ;;  %v9001_v6 = vand.u32 4294901760, %v9000_v26  ;;  %20729 = vmatpush3.bf16.msra.mxu0 %v20726_v16  ;;  %v32508_v10 = vld [vmem:[#allocation112_spill] sm:$0xff]  ;;  %v32510_v57 = vld [vmem:[#allocation123_spill] sm:$0xff]  ;;  %v32511_v43 = vld [vmem:[#allocation126_spill] sm:$0xff] }
 0x2d6   : > { %16885 = vmatmul.mubr.f32.gmra.mrb[12].mxu1 %v3501_v38  ;;  %v9020_v53 = vsub.f32 %v27012_v55, %v30898_v51  ;;  %v9011_v24 = vand.u32 4294901760, %v9010_v56  ;;  %20731 = vmatprep.subr.bf16.mxu0 %v20730_v13  ;;  %v19970_v52 = vpack.c.bf16 %v32506_v35, %v32505_v14  ;;  %v32509_v16 = vld [vmem:[#allocation124_spill] sm:$0xff]  ;;  %v32512_v23 = vld [vmem:[#allocation85_spill] sm:$0xff]  ;;  %v32513_v26 = vld [vmem:[#allocation43_spill] sm:$0xff]  ;;  %v19982_v51 = vpack.c.bf16 %v26358_v15, %v26353_v58 }
 0x2d7   : > { %16887 = vmatprep.mubr.f32.mxu1 %v3511_v36  ;;  %v20734_v1 = vpack.c.bf16 %v9137_v34, %v9130_v3  ;;  %19967 = vmatprep.subr.bf16.mxu1 %v19966_v4  ;;  %v20738_v38 = vpack.c.bf16 %v32509_v16, %v32508_v10  ;;  %v32515_v39 = vld [vmem:[#allocation60_spill] sm:$0xff]  ;;  %v32518_v36 = vld [vmem:[#allocation106_spill] sm:$0xff]  ;;  %v32519_v3 = vld [vmem:[#allocation67_spill] sm:$0xff]  ;;  %v20750_v5 = vpack.c.bf16 %v26395_v42, %v26390_v37 }
 0x2d8   : > { %18226 = vmatmul.mubr.f32.gmra.mrb[10].mxu0 %v8981_v40  ;;  %v9021_v29 = vand.u32 4294901760, %v9020_v53  ;;  %19969 = vmatpush3.bf16.msra.mxu1 %v19966_v4  ;;  %v19974_v40 = vpack.c.bf16 %v32512_v23, %v32511_v43  ;;  %v32514_v4 = vld [vmem:[#allocation28_spill] sm:$0xff]  ;;  %v19978_v34 = vpack.c.bf16 %v32519_v3, %v32518_v36  ;;  %v32522_v53 = vld [vmem:[#allocation79_spill] sm:$0xff] }
 0x2d9   : > { %18228 = vmatprep.mubr.f32.mxu0 %v8991_v33  ;;  %20733 = vmatpush3.bf16.msra.mxu0 %v20730_v13  ;;  %v32516_v33 = vld [vmem:[#allocation136_spill] sm:$0xff]  ;;  %v32517_v13 = vld [vmem:[#allocation130_spill] sm:$0xff] }
 0x2da   : > { %16888 = vmatmul.mubr.f32.gmra.mrb[14].mxu1 %v3521_v2  ;;  %20735 = vmatprep.subr.bf16.mxu0 %v20734_v1  ;;  %v20742_v56 = vpack.c.bf16 %v32516_v33, %v32515_v39  ;;  %v32520_v2 = vld [vmem:[#allocation102_spill] sm:$0xff] }
 0x2db   : > { %16922 = vmatprep.mubr.f32.mxu1 %v32507_v18  ;;  %19971 = vmatprep.subr.bf16.mxu1 %v19970_v52 }
 0x2dc   : > { %18229 = vmatmul.mubr.f32.gmra.mrb[12].mxu0 %v9001_v6  ;;  %v32521_v6 = vld [vmem:[#allocation29_spill] sm:$0xff] }
 0x2dd   : > { %18231 = vmatprep.mubr.f32.mxu0 %v9011_v24  ;;  %20737 = vmatpush3.bf16.msra.mxu0 %v20734_v1  ;;  %v32523_v24 = vld [vmem:[#allocation121_spill] sm:$0xff]  ;;  %v32524_v1 = vld [vmem:[#allocation74_spill] sm:$0xff] }
 0x2de   : > { %16923 = vmatmul.mubr.f32.vlgmr.msra.gmra.mrb[0].mxu1 %v32510_v57  ;;  %20739 = vmatprep.subr.bf16.mxu0 %v20738_v38 }
 0x2df   : > { %19973 = vmatpush3.bf16.msra.mxu1 %v19970_v52  ;;  %16925 = vmatprep.mubr.f32.mxu1 %v32514_v4  ;;  %v20746_v52 = vpack.c.bf16 %v32524_v1, %v32523_v24  ;;  %v32539_v4 = vld [vmem:[#allocation86_spill] sm:$0xff] }
 0x2e0   : > { %18232 = vmatmul.mubr.f32.gmra.mrb[14].mxu0 %v9021_v29  ;;  %19975 = vmatprep.subr.bf16.mxu1 %v19974_v40  ;;  %v32525_v29 = vld [vmem:[#allocation114_spill] sm:$0xff] }
 0x2e1   : > { %18266 = vmatprep.mubr.f32.mxu0 %v32513_v26 }
 0x2e2   : > { %16926 = vmatmul.mubr.f32.gmra.mrb[2].mxu1 %v32517_v13 }
 0x2e3   : > { %19977 = vmatpush3.bf16.msra.mxu1 %v19974_v40  ;;  %16928 = vmatprep.mubr.f32.mxu1 %v32522_v53  ;;  %v32527_v40 = vld [vmem:[#allocation122_spill] sm:$0xff]  ;;  %v32531_v53 = vld [vmem:[#allocation72_spill] sm:$0xff] }
 0x2e4   : > { %18267 = vmatmul.mubr.f32.vlgmr.msra.gmra.mrb[0].mxu0 %v32520_v2  ;;  %19979 = vmatprep.subr.bf16.mxu1 %v19978_v34  ;;  %v32538_v2 = vld [vmem:[#allocation147_spill] sm:$0xff] }
 0x2e5   : > { %20741 = vmatpush3.bf16.msra.mxu0 %v20738_v38  ;;  %18269 = vmatprep.mubr.f32.mxu0 %v32521_v6  ;;  %v32528_v38 = vld [vmem:[#allocation48_spill] sm:$0xff] }
 0x2e6   : > { %20743 = vmatprep.subr.bf16.mxu0 %v20742_v56  ;;  %16929 = vmatmul.mubr.f32.gmra.mrb[4].mxu1 %v32525_v29  ;;  %v19986_v29 = vpack.c.bf16 %v32530_v31, %v32529_v22  ;;  %v32536_v6 = vld [vmem:[#allocation120_spill] sm:$0xff] }
 0x2e7   : > { %19981 = vmatpush3.bf16.msra.mxu1 %v19978_v34  ;;  %16931 = vmatprep.mubr.f32.mxu1 %v32528_v38  ;;  %v32532_v34 = vld [vmem:[#allocation49_spill] sm:$0xff] }
 0x2e8   : > { %18270 = vmatmul.mubr.f32.gmra.mrb[2].mxu0 %v32526_v61  ;;  %19983 = vmatprep.subr.bf16.mxu1 %v19982_v51  ;;  %v32535_v38 = vld [vmem:[#allocation93_spill] sm:$0xff] }
 0x2e9   : > { %20745 = vmatpush3.bf16.msra.mxu0 %v20742_v56  ;;  %18272 = vmatprep.mubr.f32.mxu0 %v32527_v40  ;;  %v32533_v56 = vld [vmem:[#allocation131_spill] sm:$0xff]  ;;  %v32534_v40 = vld [vmem:[#allocation82_spill] sm:$0xff] }
 0x2ea   : > { %20747 = vmatprep.subr.bf16.mxu0 %v20746_v52  ;;  %16932 = vmatmul.mubr.f32.gmra.mrb[6].mxu1 %v26367_v30  ;;  %v20754_v61 = vpack.c.bf16 %v32535_v38, %v32534_v40  ;;  %v32537_v30 = vld [vmem:[#allocation146_spill] sm:$0xff]  ;;  %v19994_v40 = vpack.c.bf16 %v26657_v0, %v26652_v21  ;;  %v32543_v38 = vld [vmem:[#allocation145_spill] sm:$0xff]  ;;  %v20766_v0 = vpack.c.bf16 %v26733_v41, %v26728_v11  ;;  %v32549_v11 = vld [vmem:[#allocation108_spill] sm:$0xff] }
 0x2eb   : > { %19985 = vmatpush3.bf16.msra.mxu1 %v19982_v51  ;;  %16934 = vmatprep.mubr.f32.mxu1 %v32533_v56  ;;  %v19990_v13 = vpack.c.bf16 %v32538_v2, %v32537_v30  ;;  %v32540_v51 = vld [vmem:[#allocation94_spill] sm:$0xff]  ;;  %v20758_v56 = vpack.c.bf16 %v26617_v63, %v26612_v59  ;;  %v20762_v2 = vpack.c.bf16 %v26671_v20, %v26666_v19  ;;  %v32546_v19 = vld [vmem:[#allocation104_spill] sm:$0xff]  ;;  %v32548_v63 = vld [vmem:[#allocation39_spill] sm:$0xff] }
 0x2ec   : > { %18273 = vmatmul.mubr.f32.gmra.mrb[4].mxu0 %v32531_v53  ;;  %19987 = vmatprep.subr.bf16.mxu1 %v19986_v29  ;;  %v32544_v30 = vld [vmem:[#allocation90_spill] sm:$0xff]  ;;  %v19998_v59 = vpack.c.bf16 %v26719_v48, %v26714_v8  ;;  %v32550_v41 = vld [vmem:[#allocation33_spill] sm:$0xff]  ;;  %v32553_v48 = vld [vmem:[#allocation64_spill] sm:$0xff] }
 0x2ed   : > { %20749 = vmatpush3.bf16.msra.mxu0 %v20746_v52  ;;  %18275 = vmatprep.mubr.f32.mxu0 %v32532_v34  ;;  %v32541_v52 = vld [vmem:[#allocation59_spill] sm:$0xff]  ;;  %v32542_v34 = vld [vmem:[#allocation65_spill] sm:$0xff]  ;;  %v32547_v21 = vld [vmem:[#allocation66_spill] sm:$0xff] }
 0x2ee   : > { %20751 = vmatprep.subr.bf16.mxu0 %v20750_v5  ;;  %16935 = vmatmul.mubr.f32.gmra.mrb[8].mxu1 %v32536_v6  ;;  %v32551_v20 = vld [vmem:[#allocation125_spill] sm:$0xff]  ;;  %v32577_v6 = vld [vmem:[#allocation50_spill] sm:$0xff]  ;;  %v32578_v53 = vld [vmem:[#allocation148_spill] sm:$0xff] }
 0x2ef   : > { %19989 = vmatpush3.bf16.msra.mxu1 %v19986_v29  ;;  %16937 = vmatprep.mubr.f32.mxu1 %v32541_v52  ;;  %v32552_v8 = vld [vmem:[#allocation137_spill] sm:$0xff]  ;;  %v32574_v52 = vld [vmem:[#allocation46_spill] sm:$0xff] }
 0x2f0   : > { %18276 = vmatmul.mubr.f32.gmra.mrb[6].mxu0 %v32539_v4  ;;  %19991 = vmatprep.subr.bf16.mxu1 %v19990_v13  ;;  %v32556_v29 = vld [vmem:[#allocation45_spill] sm:$0xff]  ;;  %v32576_v4 = vld [vmem:[#allocation62_spill] sm:$0xff] }
 0x2f1   : > { %20753 = vmatpush3.bf16.msra.mxu0 %v20750_v5  ;;  %18278 = vmatprep.mubr.f32.mxu0 %v32540_v51  ;;  %v32545_v5 = vld [vmem:[#allocation119_spill] sm:$0xff]  ;;  %v32575_v51 = vld [vmem:[#allocation101_spill] sm:$0xff] }
 0x2f2   : > { %20755 = vmatprep.subr.bf16.mxu0 %v20754_v61  ;;  %16938 = vmatmul.mubr.f32.gmra.mrb[10].mxu1 %v32542_v34  ;;  %v32573_v34 = vld [vmem:[#allocation75_spill] sm:$0xff] }
 0x2f3   : > { %19993 = vmatpush3.bf16.msra.mxu1 %v19990_v13  ;;  %16940 = vmatprep.mubr.f32.mxu1 %v32545_v5  ;;  %v32555_v13 = vld [vmem:[#allocation141_spill] sm:$0xff]  ;;  %v32570_v5 = vld [vmem:[#allocation35_spill] sm:$0xff] }
 0x2f4   : > { %18279 = vmatmul.mubr.f32.gmra.mrb[8].mxu0 %v32543_v38  ;;  %19995 = vmatprep.subr.bf16.mxu1 %v19994_v40  ;;  %v32572_v38 = vld [vmem:[#allocation129_spill] sm:$0xff] }
 0x2f5   : > { %20757 = vmatpush3.bf16.msra.mxu0 %v20754_v61  ;;  %18281 = vmatprep.mubr.f32.mxu0 %v32544_v30  ;;  %v32554_v61 = vld [vmem:[#allocation88_spill] sm:$0xff] }
 0x2f6   : > { %20759 = vmatprep.subr.bf16.mxu0 %v20758_v56  ;;  %16941 = vmatmul.mubr.f32.gmra.mrb[12].mxu1 %v26862_v17  ;;  %v32569_v17 = vld [vmem:[#allocation95_spill] sm:$0xff]  ;;  %v32571_v30 = vld [vmem:[#allocation32_spill] sm:$0xff] }
 0x2f7   : > { %19997 = vmatpush3.bf16.msra.mxu1 %v19994_v40  ;;  %16943 = vmatprep.mubr.f32.mxu1 %v26900_v9  ;;  %v32558_v40 = vld [vmem:[#allocation34_spill] sm:$0xff]  ;;  %v32566_v9 = vld [vmem:[#allocation51_spill] sm:$0xff] }
 0x2f8   : > { %18282 = vmatmul.mubr.f32.gmra.mrb[10].mxu0 %v26856_v28  ;;  %19999 = vmatprep.subr.bf16.mxu1 %v19998_v59  ;;  %v32568_v28 = vld [vmem:[#allocation115_spill] sm:$0xff] }
 0x2f9   : > { %20761 = vmatpush3.bf16.msra.mxu0 %v20758_v56  ;;  %18284 = vmatprep.mubr.f32.mxu0 %v26877_v27  ;;  %v32557_v56 = vld [vmem:[#allocation117_spill] sm:$0xff]  ;;  %v32567_v27 = vld [vmem:[#allocation36_spill] sm:$0xff] }
 0x2fa   : > { %20763 = vmatprep.subr.bf16.mxu0 %v20762_v2  ;;  %16944 = vmatmul.mubr.f32.gmra.mrb[14].mxu1 %v26916_v54  ;;  %v32565_v54 = vld [vmem:[#allocation89_spill] sm:$0xff] }
 0x2fb   : > { %20001 = vmatpush3.bf16.msra.mxu1 %v19998_v59  ;;  %16978 = vmatprep.mubr.f32.mxu1 %v32546_v19  ;;  %v32560_v59 = vld [vmem:[#allocation142_spill] sm:$0xff] }
 0x2fc   : > { %18285 = vmatmul.mubr.f32.gmra.mrb[12].mxu0 %v26930_v45  ;;  %20003 = vmatprep.subr.bf16.mxu1 %v32548_v63  ;;  %v32564_v45 = vld [vmem:[#allocation68_spill] sm:$0xff] }
 0x2fd   : > { %20765 = vmatpush3.bf16.msra.mxu0 %v20762_v2  ;;  %18287 = vmatprep.mubr.f32.mxu0 %v26941_v12  ;;  %v32559_v2 = vld [vmem:[#allocation97_spill] sm:$0xff] }
 0x2fe   : > { %20767 = vmatprep.subr.bf16.mxu0 %v20766_v0  ;;  %16979 = vmatmul.mubr.f32.vlgmr.msra.gmra.mrb[0].mxu1 %v32547_v21  ;;  %v32563_v12 = vld [vmem:[#allocation57_spill] sm:$0xff] }
 0x2ff   : > { %20005 = vmatpush3.bf16.msra.mxu1 %v32548_v63  ;;  %16981 = vmatprep.mubr.f32.mxu1 %v32551_v20 }
 0x300   : > { %18288 = vmatmul.mubr.f32.gmra.mrb[14].mxu0 %v26972_v49  ;;  %20007 = vmatprep.subr.bf16.mxu1 %v32553_v48  ;;  %v32562_v49 = vld [vmem:[#allocation87_spill] sm:$0xff] }
 0x301   : > { %20769 = vmatpush3.bf16.msra.mxu0 %v20766_v0  ;;  %18322 = vmatprep.mubr.f32.mxu0 %v32549_v11  ;;  %v32561_v0 = vld [vmem:[#allocation76_spill] sm:$0xff] }
 0x302   : > { %20771 = vmatprep.subr.bf16.mxu0 %v32550_v41  ;;  %16982 = vmatmul.mubr.f32.gmra.mrb[2].mxu1 %v32552_v8 }
 0x303   : > { %20009 = vmatpush3.bf16.msra.mxu1 %v32553_v48  ;;  %16984 = vmatprep.mubr.f32.mxu1 %v32557_v56  ;;  %v32588_v48 = vand.u32 4294901760, %v32508_v10  ;;  %v32594_v10 = vand.u32 4294901760, %v32551_v20  ;;  %v32601_v20 = vand.u32 4294901760, %v32555_v13 }
 0x304   : > { %18323 = vmatmul.mubr.f32.vlgmr.msra.gmra.mrb[0].mxu0 %v32554_v61  ;;  %20011 = vmatprep.subr.bf16.mxu1 %v32559_v2 }
 0x305   : > { %20773 = vmatpush3.bf16.msra.mxu0 %v32550_v41  ;;  %18325 = vmatprep.mubr.f32.mxu0 %v32555_v13  ;;  %v32608_v13 = vand.u32 4294901760, %v32560_v59 }
 0x306   : > { %20775 = vmatprep.subr.bf16.mxu0 %v32556_v29  ;;  %16985 = vmatmul.mubr.f32.gmra.mrb[4].mxu1 %v32558_v40 }
 0x307   : > { %20013 = vmatpush3.bf16.msra.mxu1 %v32559_v2  ;;  %16987 = vmatprep.mubr.f32.mxu1 %v32563_v12  ;;  %v32585_v2 = vand.u32 4294901760, %v32506_v35  ;;  %v32591_v35 = vand.u32 4294901760, %v32511_v43 }
 0x308   : > { %18326 = vmatmul.mubr.f32.gmra.mrb[2].mxu0 %v32560_v59  ;;  %20015 = vmatprep.subr.bf16.mxu1 %v32565_v54  ;;  %v32614_v59 = vand.u32 4294901760, %v32529_v22  ;;  %v27255_v22 = vld [vmem:[#allocation4 + $0x380] sm:$0xff] }
 0x309   : > { %20777 = vmatpush3.bf16.msra.mxu0 %v32556_v29  ;;  %18328 = vmatprep.mubr.f32.mxu0 %v32561_v0 }
 0x30a   : > { %20779 = vmatprep.subr.bf16.mxu0 %v32562_v49  ;;  %16988 = vmatmul.mubr.f32.gmra.mrb[6].mxu1 %v32564_v45 }
 0x30b   : > { %20017 = vmatpush3.bf16.msra.mxu1 %v32565_v54  ;;  %16990 = vmatprep.mubr.f32.mxu1 %v32569_v17  ;;  %v32579_v54 = vld [vmem:[#allocation103_spill] sm:$0xff] }
 0x30c   : > { %18329 = vmatmul.mubr.f32.gmra.mrb[4].mxu0 %v32566_v9  ;;  %20019 = vmatprep.subr.bf16.mxu1 %v32571_v30 }
 0x30d   : > { %20781 = vmatpush3.bf16.msra.mxu0 %v32562_v49  ;;  %18331 = vmatprep.mubr.f32.mxu0 %v32567_v27  ;;  %v32584_v49 = vand.u32 4294901760, %v32505_v14  ;;  %v32589_v14 = vand.u32 4294901760, %v32509_v16  ;;  %v32595_v16 = vand.u32 4294901760, %v32515_v39  ;;  %v32602_v39 = vand.u32 4294901760, %v32557_v56 }
 0x30e   : > { %20783 = vmatprep.subr.bf16.mxu0 %v32568_v28  ;;  %16991 = vmatmul.mubr.f32.gmra.mrb[8].mxu1 %v32570_v5  ;;  %v32609_v56 = vand.u32 4294901760, %v32561_v0  ;;  %v32616_v0 = vand.u32 4294901760, %v32566_v9  ;;  %v32620_v9 = vand.u32 4294901760, %v32572_v38 }
 0x30f   : > { %20021 = vmatpush3.bf16.msra.mxu1 %v32571_v30  ;;  %16993 = vmatprep.mubr.f32.mxu1 %v32575_v51  ;;  %v32580_v30 = vld [vmem:[#allocation30_spill] sm:$0xff]  ;;  %v20034_v29 = vpack.c.bf16 %v32585_v2, %v32584_v49  ;;  %v20802_v41 = vpack.c.bf16 %v32589_v14, %v32588_v48  ;;  %v32590_v49 = vand.u32 4294901760, %v32547_v21  ;;  %v32592_v2 = vand.u32 4294901760, %v32512_v23 }
 0x310   : > { %18332 = vmatmul.mubr.f32.gmra.mrb[6].mxu0 %v32572_v38  ;;  %20023 = vmatprep.subr.bf16.mxu1 %v32577_v6  ;;  %v32597_v23 = vand.u32 4294901760, %v32552_v8  ;;  %v32598_v21 = vand.u32 4294901760, %v32518_v36  ;;  %v32599_v48 = vand.u32 4294901760, %v32519_v3  ;;  %v32604_v8 = vand.u32 4294901760, %v32524_v1 }
 0x311   : > { %20785 = vmatpush3.bf16.msra.mxu0 %v32568_v28  ;;  %18334 = vmatprep.mubr.f32.mxu0 %v32573_v34  ;;  %v32581_v28 = vld [vmem:[#allocation98_spill] sm:$0xff]  ;;  %v32605_v3 = vand.u32 4294901760, %v32558_v40  ;;  %v32611_v1 = vand.u32 4294901760, %v26390_v37  ;;  %v32612_v40 = vand.u32 4294901760, %v26395_v42  ;;  %v32615_v14 = vand.u32 4294901760, %v32530_v31  ;;  %v27251_v31 = vld [vmem:[#allocation4 + $0x188] sm:$0xff] }
 0x312   : > { %20787 = vmatprep.subr.bf16.mxu0 %v32574_v52  ;;  %16994 = vmatmul.mubr.f32.gmra.mrb[10].mxu1 %v32576_v4  ;;  %v32618_v37 = vand.u32 4294901760, %v32569_v17  ;;  %v32619_v42 = vand.u32 4294901760, %v32570_v5  ;;  %v32621_v17 = vand.u32 4294901760, %v32573_v34  ;;  %v32624_v38 = vand.u32 4294901760, %v32575_v51  ;;  %v27280_v51 = vld [vmem:[#allocation4 + $0x398] sm:$0xff] }
 0x313   : > { %20025 = vmatpush3.bf16.msra.mxu1 %v32577_v6  ;;  %16996 = vmatprep.mubr.f32.mxu1 %v26875_v44  ;;  %v32582_v6 = vld [vmem:[#allocation55_spill] sm:$0xff]  ;;  %v32625_v34 = vand.u32 4294901760, %v32576_v4  ;;  %v27290_v4 = vld [vmem:[#allocation4 + $0x1a8] sm:$0xff] }
 0x314   : > { %18335 = vmatmul.mubr.f32.gmra.mrb[8].mxu0 %v32578_v53  ;;  %20027 = vmatprep.subr.bf16.mxu1 %v32581_v28 }
 0x315   : > { %20789 = vmatpush3.bf16.msra.mxu0 %v32574_v52  ;;  %18337 = vmatprep.mubr.f32.mxu0 %v32579_v54  ;;  %v32583_v52 = vld [vmem:[#allocation81_spill] sm:$0xff] }
 0x316   : > { %20791 = vmatprep.subr.bf16.mxu0 %v32580_v30  ;;  %16997 = vmatmul.mubr.f32.gmra.mrb[12].mxu1 %v26914_v50 }
 0x317   : > { %20029 = vmatpush3.bf16.msra.mxu1 %v32581_v28  ;;  %16999 = vmatprep.mubr.f32.mxu1 %v26953_v62  ;;  %v32586_v28 = vld [vmem:[#allocation70_spill] sm:$0xff] }
 0x318   : > { %18338 = vmatmul.mubr.f32.gmra.mrb[10].mxu0 %v26898_v32  ;;  %20031 = vmatprep.subr.bf16.mxu1 %v32583_v52 }
 0x319   : > { %20793 = vmatpush3.bf16.msra.mxu0 %v32580_v30  ;;  %18340 = vmatprep.mubr.f32.mxu0 %v26928_v7  ;;  %v32587_v30 = vand.u32 4294901760, %v32546_v19  ;;  %v32596_v19 = vand.u32 4294901760, %v32516_v33  ;;  %v32603_v33 = vand.u32 4294901760, %v32523_v24  ;;  %v32610_v24 = vand.u32 4294901760, %v32563_v12 }
 0x31a   : > { %20795 = vmatprep.subr.bf16.mxu0 %v32582_v6  ;;  %17000 = vmatmul.mubr.f32.gmra.mrb[14].mxu1 %v26960_v46  ;;  %v32617_v12 = vand.u32 4294901760, %v32567_v27  ;;  %v27257_v27 = vld [vmem:[#allocation4 + $0x388] sm:$0xff] }
 0x31b   : > { %20033 = vmatpush3.bf16.msra.mxu1 %v32583_v52  ;;  %17034 = vmatprep.mubr.f32.mxu1 %v32587_v30  ;;  %v20038_v52 = vpack.c.bf16 %v32592_v2, %v32591_v35  ;;  %v32593_v30 = vand.u32 4294901760, %v32549_v11  ;;  %v20806_v43 = vpack.c.bf16 %v32596_v19, %v32595_v16  ;;  %v32600_v11 = vand.u32 4294901760, %v32554_v61  ;;  %v22505_v35 = vld [vmem:[#allocation2 + $0x10] sm:$0xff]  ;;  %v27261_v2 = vld [vmem:[#allocation2 + $0x88] sm:$0xff] }
 0x31c   : > { %18341 = vmatmul.mubr.f32.gmra.mrb[12].mxu0 %v26970_v60  ;;  %20035 = vmatprep.subr.bf16.mxu1 %v20034_v29  ;;  %v20810_v36 = vpack.c.bf16 %v32604_v8, %v32603_v33  ;;  %v32606_v61 = vand.u32 4294901760, %v26353_v58  ;;  %v20814_v58 = vpack.c.bf16 %v32612_v40, %v32611_v1  ;;  %v4604_v5 = vrot.slane %v22505_v35, 7  ;;  %32622 = vst [vmem:[#allocation107_spill] sm:$0xff] %v27261_v2  ;;  %v27341_v35 = vld [vmem:[#allocation4 + $0x3c0] sm:$0xff] }
 0x31d   : > { %20797 = vmatpush3.bf16.msra.mxu0 %v32582_v6  ;;  %18343 = vmatprep.mubr.f32.mxu0 %v26981_v47  ;;  %v30942_v19 = vand.u32 4294901760, %v27251_v31  ;;  %v32627_v8 = vand.u32 4294901760, %v32578_v53  ;;  %v27303_v53 = vld [vmem:[#allocation4 + $0x1b8] sm:$0xff]  ;;  %v32630_v1 = vand.u32 4294901760, %v26875_v44  ;;  %v32632_v44 = vand.u32 4294901760, %v26914_v50  ;;  %32636 = vst [vmem:[#allocation133_spill] sm:$0xff] %v27341_v35 }
 0x31e   : > { %20799 = vmatprep.subr.bf16.mxu0 %v32586_v28  ;;  %17035 = vmatmul.mubr.f32.vlgmr.msra.gmra.mrb[0].mxu1 %v32590_v49  ;;  %v20050_v49 = vpack.c.bf16 %v32615_v14, %v32614_v59  ;;  %v27321_v59 = vld [vmem:[#allocation4 + $0x3b0] sm:$0xff]  ;;  %v27323_v14 = vld [vmem:[#allocation4 + $0x3b8] sm:$0xff]  ;;  %v27343_v50 = vld [vmem:[#allocation4 + $0x3c8] sm:$0xff] }
 0x31f   : > { %20037 = vmatpush3.bf16.msra.mxu1 %v20034_v29  ;;  %17037 = vmatprep.mubr.f32.mxu1 %v32594_v10  ;;  %v20042_v29 = vpack.c.bf16 %v32599_v48, %v32598_v21  ;;  %v32623_v10 = vld [vmem:[#allocation149_spill] sm:$0xff]  ;;  %v32626_v21 = vld [vmem:[#allocation132_spill] sm:$0xff]  ;;  %v30938_v48 = vand.u32 4294901760, %v27255_v22  ;;  %32637 = vst [vmem:[#allocation73_spill] sm:$0xff] %v27343_v50 }
 0x320   : > { %18344 = vmatmul.mubr.f32.gmra.mrb[14].mxu0 %v27012_v55  ;;  %20039 = vmatprep.subr.bf16.mxu1 %v20038_v52 }
 0x321   : > { %20801 = vmatpush3.bf16.msra.mxu0 %v32586_v28  ;;  %18378 = vmatprep.mubr.f32.mxu0 %v32593_v30  ;;  %v30934_v30 = vrot.slane %v27261_v2, 7  ;;  %v32677_v2 = vand.u32 4294901760, %v27012_v55 }
 0x322   : > { %20803 = vmatprep.subr.bf16.mxu0 %v20802_v41  ;;  %17038 = vmatmul.mubr.f32.gmra.mrb[2].mxu1 %v32597_v23  ;;  %v27271_v23 = vld [vmem:[#allocation4 + $0x198] sm:$0xff] }
 0x323   : > { %20041 = vmatpush3.bf16.msra.mxu1 %v20038_v52  ;;  %17040 = vmatprep.mubr.f32.mxu1 %v32602_v39  ;;  %v32607_v52 = vand.u32 4294901760, %v26358_v15  ;;  %v32613_v15 = vand.u32 4294901760, %v32564_v45  ;;  %v27249_v45 = vld [vmem:[#allocation4 + $0x180] sm:$0xff]  ;;  %v27284_v39 = vld [vmem:[#allocation2 + $0x18] sm:$0xff] }
 0x324   : > { %18379 = vmatmul.mubr.f32.vlgmr.msra.gmra.mrb[0].mxu0 %v32600_v11  ;;  %20043 = vmatprep.subr.bf16.mxu1 %v20042_v29  ;;  %v30943_v16 = vand.u32 4294901760, %v27249_v45  ;;  %v27278_v11 = vld [vmem:[#allocation4 + $0x390] sm:$0xff]  ;;  %v30939_v33 = vrot.slane %v27284_v39, 7 }
 0x325   : > { %20805 = vmatpush3.bf16.msra.mxu0 %v20802_v41  ;;  %18381 = vmatprep.mubr.f32.mxu0 %v32601_v20  ;;  %v20046_v41 = vpack.c.bf16 %v32607_v52, %v32606_v61  ;;  %v27282_v20 = vld [vmem:[#allocation4 + $0x1a0] sm:$0xff]  ;;  %v32628_v61 = vand.u32 4294901760, %v32579_v54  ;;  %v30941_v40 = vand.u32 4294901760, %v27278_v11 }
 0x326   : > { %20807 = vmatprep.subr.bf16.mxu0 %v20806_v43  ;;  %17041 = vmatmul.mubr.f32.gmra.mrb[4].mxu1 %v32605_v3  ;;  %v27294_v3 = vld [vmem:[#allocation4 + $0x3a8] sm:$0xff]  ;;  %v27316_v54 = vpack.c.bf16 %v30942_v19, %v30943_v16  ;;  %v22508_v19 = vld [vmem:[#allocation2 + $0x20] sm:$0xff] }
 0x327   : > { %20045 = vmatpush3.bf16.msra.mxu1 %v20042_v29  ;;  %17043 = vmatprep.mubr.f32.mxu1 %v32610_v24  ;;  %v30937_v29 = vand.u32 4294901760, %v27257_v27  ;;  %v32629_v24 = vld [vmem:[#allocation92_spill] sm:$0xff]  ;;  %v27403_v16 = vand.u32 4294901760, %v22508_v19 }
 0x328   : > { %18382 = vmatmul.mubr.f32.gmra.mrb[2].mxu0 %v32608_v13  ;;  %20047 = vmatprep.subr.bf16.mxu1 %v20046_v41  ;;  %v27301_v13 = vld [vmem:[#allocation4 + $0x1b0] sm:$0xff]  ;;  %32631 = vst [vmem:[#allocation140_spill] sm:$0xff] %v27316_v54 }
 0x329   : > { %20809 = vmatpush3.bf16.msra.mxu0 %v20806_v43  ;;  %18384 = vmatprep.mubr.f32.mxu0 %v32609_v56  ;;  %v27269_v43 = vld [vmem:[#allocation4 + $0x190] sm:$0xff]  ;;  %v4635_v56 = vsel %vm32458_vm0, %v30934_v30, %v4604_v5  ;;  %32655 = vst [vmem:[#allocation85_spill] sm:$0xff] %v27403_v16  ;;  %v27431_v30 = vld [vmem:[#allocation4 + $0x3e0] sm:$0xff] }
 0x32a   : > { %20811 = vmatprep.subr.bf16.mxu0 %v20810_v36  ;;  %17044 = vmatmul.mubr.f32.gmra.mrb[6].mxu1 %v32613_v15  ;;  %v30936_v52 = vand.u32 4294901760, %v27269_v43  ;;  %v30945_v15 = vand.u32 4294901760, %v27282_v20  ;;  %32661 = vst [vmem:[#allocation106_spill] sm:$0xff] %v27431_v30 }
 0x32b   : > { %20049 = vmatpush3.bf16.msra.mxu1 %v20046_v41  ;;  %17046 = vmatprep.mubr.f32.mxu1 %v32618_v37  ;;  %v30935_v41 = vand.u32 4294901760, %v27271_v23  ;;  %v30944_v37 = vand.u32 4294901760, %v27290_v4 }
 0x32c   : > { %18385 = vmatmul.mubr.f32.gmra.mrb[4].mxu0 %v32616_v0  ;;  %20051 = vmatprep.subr.bf16.mxu1 %v20050_v49  ;;  %v32633_v0 = vld [vmem:[#allocation109_spill] sm:$0xff] }
 0x32d   : > { %20813 = vmatpush3.bf16.msra.mxu0 %v20810_v36  ;;  %18387 = vmatprep.mubr.f32.mxu0 %v32617_v12  ;;  %v27292_v36 = vld [vmem:[#allocation4 + $0x3a0] sm:$0xff]  ;;  %v27334_v12 = vpack.c.bf16 %v30937_v29, %v30938_v48  ;;  %v27386_v29 = vld [vmem:[#allocation4 + $0x3d8] sm:$0xff] }
 0x32e   : > { %20815 = vmatprep.subr.bf16.mxu0 %v20814_v58  ;;  %17047 = vmatmul.mubr.f32.gmra.mrb[8].mxu1 %v32619_v42  ;;  %v30947_v42 = vand.u32 4294901760, %v27292_v36  ;;  %32648 = vst [vmem:[#allocation100_spill] sm:$0xff] %v27386_v29  ;;  %v27388_v48 = vld [vmem:[#allocation4 + $0x1e0] sm:$0xff] }
 0x32f   : > { %20053 = vmatpush3.bf16.msra.mxu1 %v20050_v49  ;;  %17049 = vmatprep.mubr.f32.mxu1 %v32624_v38  ;;  %v27325_v49 = vld [vmem:[#allocation4 + $0x1c0] sm:$0xff]  ;;  %32634 = vst [vmem:[#allocation71_spill] sm:$0xff] %v27334_v12  ;;  %v30949_v38 = vand.u32 4294901760, %v27301_v13  ;;  %32649 = vst [vmem:[#allocation112_spill] sm:$0xff] %v27388_v48 }
 0x330   : > { %18388 = vmatmul.mubr.f32.gmra.mrb[6].mxu0 %v32620_v9  ;;  %20055 = vmatprep.subr.bf16.mxu1 %v32626_v21  ;;  %v30946_v9 = vand.u32 4294901760, %v27294_v3 }
 0x331   : > { %20817 = vmatpush3.bf16.msra.mxu0 %v20814_v58  ;;  %18390 = vmatprep.mubr.f32.mxu0 %v32621_v17  ;;  %v30940_v58 = vand.u32 4294901760, %v27280_v51  ;;  %v27339_v17 = vld [vmem:[#allocation4 + $0x1c8] sm:$0xff] }
 0x332   : > { %20819 = vmatprep.subr.bf16.mxu0 %v32623_v10  ;;  %17050 = vmatmul.mubr.f32.gmra.mrb[10].mxu1 %v32625_v34  ;;  %32635 = vst [vmem:[#allocation77_spill] sm:$0xff] %v27339_v17  ;;  %v30948_v34 = vand.u32 4294901760, %v27303_v53 }
 0x333   : > { %20057 = vmatpush3.bf16.msra.mxu1 %v32626_v21  ;;  %17052 = vmatprep.mubr.f32.mxu1 %v32630_v1  ;;  %v32640_v1 = vand.u32 4294901760, %v26928_v7  ;;  %v32645_v7 = vld [vmem:[#allocation144_spill] sm:$0xff]  ;;  %v32646_v21 = vand.u32 4294901760, %v26953_v62  ;;  %v32651_v62 = vand.u32 4294901760, %v26960_v46  ;;  %v27414_v46 = vpack.c.bf16 %v30946_v9, %v30947_v42 }
 0x334   : > { %18391 = vmatmul.mubr.f32.gmra.mrb[8].mxu0 %v32627_v8  ;;  %20059 = vmatprep.subr.bf16.mxu1 %v32633_v0  ;;  %v4636_v8 = vsel %vm24044_vm1, %v4635_v56, 0.0  ;;  %v30950_v56 = vand.u32 4294901760, %v27323_v14  ;;  %v32667_v42 = vand.u32 4294901760, %v27341_v35  ;;  %v32668_v9 = vand.u32 4294901760, %v27343_v50  ;;  %vm32697_vm1 = vmmov %vm32458_vm0 }
 0x335   : > { %20821 = vmatpush3.bf16.msra.mxu0 %v32623_v10  ;;  %18393 = vmatprep.mubr.f32.mxu0 %v32628_v61  ;;  %v32638_v10 = vand.u32 4294901760, %v26898_v32  ;;  %v4634_v61 = vsel %vm32458_vm0, %v4604_v5, %v30939_v33  ;;  %v27363_v32 = vpack.c.bf16 %v30935_v41, %v30936_v52  ;;  %v27370_v5 = vld [vmem:[#allocation4 + $0x1d8] sm:$0xff]  ;;  %v27390_v33 = vld [vmem:[#allocation4 + $0x1e8] sm:$0xff]  ;;  %v32657_v41 = vand.u32 4294901760, %v26970_v60  ;;  %32658 = vst [vmem:[#allocation60_spill] sm:$0xff] %v27414_v46 }
 0x336   : > { %20823 = vmatprep.subr.bf16.mxu0 %v32629_v24  ;;  %17053 = vmatmul.mubr.f32.gmra.mrb[12].mxu1 %v32632_v44  ;;  %v30951_v44 = vand.u32 4294901760, %v27321_v59  ;;  %32643 = vst [vmem:[#allocation56_spill] sm:$0xff] %v27370_v5  ;;  %32650 = vst [vmem:[#allocation124_spill] sm:$0xff] %v27390_v33  ;;  %v27405_v52 = vand.u32 4294901760, %v4634_v61  ;;  %v32660_v60 = vand.u32 4294901760, %v26981_v47 }
 0x337   : > { %20061 = vmatpush3.bf16.msra.mxu1 %v32633_v0  ;;  %32641 = vst [vmem:[#allocation80_spill] sm:$0xff] %v27363_v32  ;;  %v30952_v0 = vand.u32 4294901760, %v27325_v49  ;;  %17055 = vmatprep.mubr.f32.mxu1 %v32646_v21  ;;  %v32652_v21 = vld [vmem:[#allocation58_spill] sm:$0xff] }
 0x338   : > { %18394 = vmatmul.mubr.f32.gmra.mrb[10].mxu0 %v32638_v10  ;;  %v27368_v10 = vld [vmem:[#allocation4 + $0x1d0] sm:$0xff]  ;;  %20063 = vmatprep.subr.bf16.mxu1 %v32652_v21  ;;  %32656 = vst [vmem:[#allocation43_spill] sm:$0xff] %v27405_v52  ;;  %v27441_v47 = vpack.c.bf16 %v30950_v56, %v30951_v44  ;;  %v27459_v56 = vld [vmem:[#allocation4 + $0x1f8] sm:$0xff] }
 0x339   : > { %20825 = vmatpush3.bf16.msra.mxu0 %v32629_v24  ;;  %18396 = vmatprep.mubr.f32.mxu0 %v32640_v1  ;;  %32642 = vst [vmem:[#allocation40_spill] sm:$0xff] %v27368_v10  ;;  %v27372_v24 = vld [vmem:[#allocation4 + $0x3d0] sm:$0xff]  ;;  %v27381_v1 = vpack.c.bf16 %v30940_v58, %v30941_v40  ;;  %v27399_v58 = vpack.c.bf16 %v30944_v37, %v30945_v15  ;;  %v27401_v40 = vand.u32 4294901760, %v4636_v8  ;;  %32671 = vst [vmem:[#allocation82_spill] sm:$0xff] %v27459_v56  ;;  %v27463_v15 = vld [vmem:[#allocation4 + $0x3f8] sm:$0xff] }
 0x33a   : > { %32644 = vst [vmem:[#allocation44_spill] sm:$0xff] %v27372_v24  ;;  %20827 = vmatprep.subr.bf16.mxu0 %v32645_v7  ;;  %17056 = vmatmul.mubr.f32.gmra.mrb[14].mxu1 %v32651_v62  ;;  %v27420_v62 = vpack.c.bf16 %v30948_v34, %v30949_v38  ;;  %v27433_v34 = vld [vmem:[#allocation4 + $0x3e8] sm:$0xff]  ;;  %v32663_v38 = vld [vmem:[#allocation96_spill] sm:$0xff]  ;;  %32664 = vst [vmem:[#allocation121_spill] sm:$0xff] %v27441_v47  ;;  %v32682_v55 = vand.u32 4294901760, %v27368_v10  ;;  %v32744_v10 = vand.u32 4294901760, %v27278_v11 }
 0x33b   : > { %32647 = vst [vmem:[#allocation113_spill] sm:$0xff] %v27381_v1  ;;  %32653 = vst [vmem:[#allocation123_spill] sm:$0xff] %v27399_v58  ;;  %20065 = vmatpush3.bf16.msra.mxu1 %v32652_v21  ;;  %17090 = vmatprep.mubr.f32.mxu1 %v32507_v18  ;;  %v27453_v21 = vpack.c.bf16 %v32668_v9, %v32667_v42  ;;  %v27461_v44 = vld [vmem:[#allocation4 + $0x3f0] sm:$0xff]  ;;  %v27472_v42 = vsub.f32 %v4634_v61, %v27405_v52  ;;  %v22509_v9 = vld [vmem:[#allocation2 + $0x20] sm:$0xff] }
 0x33c   : > { %32654 = vst [vmem:[#allocation126_spill] sm:$0xff] %v27401_v40  ;;  %18397 = vmatmul.mubr.f32.gmra.mrb[12].mxu0 %v32657_v41  ;;  %32659 = vst [vmem:[#allocation136_spill] sm:$0xff] %v27420_v62  ;;  %v27455_v41 = vld [vmem:[#allocation4 + $0x1f0] sm:$0xff]  ;;  %20067 = vmatprep.subr.bf16.mxu1 %v32548_v63  ;;  %v4606_v37 = vrot.slane %v22509_v9, 7  ;;  %v32685_v9 = vand.u32 4294901760, %v27372_v24  ;;  %v32693_v52 = vld [vmem:[#allocation28_spill] sm:$0xff] }
 0x33d   : > { %20829 = vmatpush3.bf16.msra.mxu0 %v32645_v7  ;;  %18399 = vmatprep.mubr.f32.mxu0 %v32660_v60  ;;  %32662 = vst [vmem:[#allocation67_spill] sm:$0xff] %v27433_v34  ;;  %v32665_v7 = vand.u32 4294901760, %v27339_v17  ;;  %32669 = vst [vmem:[#allocation42_spill] sm:$0xff] %v27453_v21  ;;  %v32688_v21 = vand.u32 4294901760, %v27388_v48  ;;  %v32696_v48 = vrot.slane %v27284_v39, 7  ;;  %v32709_v39 = vld [vmem:[#allocation79_spill] sm:$0xff] }
 0x33e   : > { %20831 = vmatprep.subr.bf16.mxu0 %v32663_v38  ;;  %32670 = vst [vmem:[#allocation69_spill] sm:$0xff] %v27455_v41  ;;  %17091 = vmatmul.mubr.f32.vlgmr.msra.gmra.mrb[0].mxu1 %v32510_v57  ;;  %32672 = vst [vmem:[#allocation93_spill] sm:$0xff] %v27461_v44  ;;  %v32718_v24 = vld [vmem:[#allocation114_spill] sm:$0xff]  ;;  %v32747_v17 = vand.u32 4294901760, %v27280_v51 }
 0x33f   : > { %v27447_v60 = vpack.c.bf16 %v32665_v7, %v30952_v0  ;;  %32673 = vst [vmem:[#allocation146_spill] sm:$0xff] %v27463_v15  ;;  %v27466_v7 = vsub.f32 %v4636_v8, %v27401_v40  ;;  %v27469_v0 = vsub.f32 %v22508_v19, %v27403_v16  ;;  %32676 = vst [vmem:[#allocation66_spill] sm:$0xff] %v27472_v42  ;;  %20069 = vmatpush3.bf16.msra.mxu1 %v32548_v63  ;;  %v32692_v16 = vld [vmem:[#allocation33_spill] sm:$0xff] }
 0x340   : > { %18400 = vmatmul.mubr.f32.gmra.mrb[14].mxu0 %v32677_v2  ;;  %v32678_v8 = vand.u32 4294901760, %v27249_v45  ;;  %v32680_v19 = vand.u32 4294901760, %v27251_v31  ;;  %v32683_v63 = vand.u32 4294901760, %v27370_v5  ;;  %17093 = vmatprep.mubr.f32.mxu1 %v32693_v52  ;;  %v32719_v5 = vld [vmem:[#allocation97_spill] sm:$0xff] }
 0x341   : > { %32666 = vst [vmem:[#allocation74_spill] sm:$0xff] %v27447_v60  ;;  %32674 = vst [vmem:[#allocation147_spill] sm:$0xff] %v27466_v7  ;;  %20833 = vmatpush3.bf16.msra.mxu0 %v32663_v38  ;;  %18434 = vmatprep.mubr.f32.mxu0 %v32513_v26  ;;  %v22510_v38 = vld [vmem:[#allocation2 + $0x28] sm:$0xff] }
 0x342   : > { %32675 = vst [vmem:[#allocation104_spill] sm:$0xff] %v27469_v0  ;;  %v27482_v40 = vsub.f32 %v27249_v45, %v32678_v8  ;;  %v27487_v61 = vsub.f32 %v27251_v31, %v32680_v19  ;;  %v27495_v2 = vpack.c.bf16 %v32683_v63, %v32682_v55  ;;  %v32686_v45 = vand.u32 4294901760, %v27386_v29  ;;  %20835 = vmatprep.subr.bf16.mxu0 %v32692_v16  ;;  %v32698_v63 = vld [vmem:[#allocation102_spill] sm:$0xff] }
 0x343   : > { %v32689_v31 = vand.u32 4294901760, %v27390_v33  ;;  %v27509_v50 = vand.u32 4294901760, %v22510_v38  ;;  %v32695_v33 = vld [vmem:[#allocation64_spill] sm:$0xff]  ;;  %v4633_v55 = vsel %vm32697_vm1, %v32696_v48, %v4606_v37  ;;  %v32702_v48 = vld [vmem:[#allocation29_spill] sm:$0xff]  ;;  %vm32776_vm1 = vmmov %vm32458_vm0 }
 0x344   : > { %32679 = vst [vmem:[#allocation39_spill] sm:$0xff] %v27482_v40  ;;  %32681 = vst [vmem:[#allocation108_spill] sm:$0xff] %v27487_v61  ;;  %v27501_v8 = vpack.c.bf16 %v32686_v45, %v32685_v9  ;;  %20071 = vmatprep.subr.bf16.mxu1 %v32695_v33  ;;  %18435 = vmatmul.mubr.f32.vlgmr.msra.gmra.mrb[0].mxu0 %v32698_v63  ;;  %v32699_v45 = vand.u32 4294901760, %v27431_v30  ;;  %v32700_v9 = vand.u32 4294901760, %v27433_v34  ;;  %v32704_v30 = vand.u32 4294901760, %v27255_v22 }
 0x345   : > { %32684 = vst [vmem:[#allocation125_spill] sm:$0xff] %v27495_v2  ;;  %v27507_v19 = vpack.c.bf16 %v32689_v31, %v32688_v21  ;;  %32691 = vst [vmem:[#allocation141_spill] sm:$0xff] %v27509_v50  ;;  %20073 = vmatpush3.bf16.msra.mxu1 %v32695_v33  ;;  %20837 = vmatpush3.bf16.msra.mxu0 %v32692_v16  ;;  %v27542_v33 = vsub.f32 %v22510_v38, %v27509_v50  ;;  %v32708_v21 = vld [vmem:[#allocation45_spill] sm:$0xff]  ;;  %v32710_v16 = vand.u32 4294901760, %v27455_v41 }
 0x346   : > { %32687 = vst [vmem:[#allocation137_spill] sm:$0xff] %v27501_v8  ;;  %v32694_v8 = vld [vmem:[#allocation130_spill] sm:$0xff]  ;;  %v27532_v2 = vpack.c.bf16 %v32700_v9, %v32699_v45  ;;  %18437 = vmatprep.mubr.f32.mxu0 %v32702_v48  ;;  %v27547_v9 = vsub.f32 %v27255_v22, %v32704_v30  ;;  %v32706_v45 = vand.u32 4294901760, %v27257_v27  ;;  %20839 = vmatprep.subr.bf16.mxu0 %v32708_v21  ;;  %v32713_v50 = vand.u32 4294901760, %v27461_v44  ;;  %v32741_v44 = vld [vmem:[#allocation41_spill] sm:$0xff] }
 0x347   : > { %32690 = vst [vmem:[#allocation88_spill] sm:$0xff] %v27507_v19  ;;  %17094 = vmatmul.mubr.f32.gmra.mrb[2].mxu1 %v32694_v8  ;;  %v27536_v19 = vld [vmem:[#allocation2 + $0x28] sm:$0xff]  ;;  %32703 = vst [vmem:[#allocation34_spill] sm:$0xff] %v27542_v33  ;;  %v32714_v22 = vand.u32 4294901760, %v27463_v15  ;;  %20075 = vmatprep.subr.bf16.mxu1 %v32719_v5  ;;  %v32724_v34 = vand.u32 4294901760, %v27472_v42  ;;  %v22513_v15 = vld [vmem:[#allocation2 + $0x38] sm:$0xff] }
 0x348   : > { %32701 = vst [vmem:[#allocation117_spill] sm:$0xff] %v27532_v2  ;;  %32705 = vst [vmem:[#allocation142_spill] sm:$0xff] %v27547_v9  ;;  %v27552_v31 = vsub.f32 %v27257_v27, %v32706_v45  ;;  %17096 = vmatprep.mubr.f32.mxu1 %v32709_v39  ;;  %v32711_v2 = vand.u32 4294901760, %v27459_v56  ;;  %v4638_v27 = vsel %vm24287_vm4, %v4633_v55, 0.0  ;;  %v22512_v45 = vld [vmem:[#allocation2 + $0x30] sm:$0xff]  ;;  %v32720_v56 = vand.u32 4294901760, %v27466_v7 }
 0x349   : > { %v27566_v30 = vpack.c.bf16 %v32714_v22, %v32713_v50  ;;  %v27570_v29 = vand.u32 4294901760, %v22512_v45  ;;  %v27587_v55 = vsub.f32 %v27472_v42, %v32724_v34  ;;  %v32726_v22 = vld [vmem:[#allocation134_spill] sm:$0xff]  ;;  %20077 = vmatpush3.bf16.msra.mxu1 %v32719_v5  ;;  %vm32730_vm4 = vmmov %vm32458_vm0  ;;  %20841 = vmatpush3.bf16.msra.mxu0 %v32708_v21  ;;  %v27623_v5 = vand.u32 4294901760, %v22513_v15  ;;  %v32742_v41 = vld [vmem:[#allocation89_spill] sm:$0xff] }
 0x34a   : > { %32707 = vst [vmem:[#allocation76_spill] sm:$0xff] %v27552_v31  ;;  %v27560_v38 = vpack.c.bf16 %v32711_v2, %v32710_v16  ;;  %v27577_v2 = vsub.f32 %v27466_v7, %v32720_v56  ;;  %v32722_v16 = vand.u32 4294901760, %v27469_v0  ;;  %18438 = vmatmul.mubr.f32.gmra.mrb[2].mxu0 %v32726_v22  ;;  %v32728_v56 = vand.u32 4294901760, %v27487_v61  ;;  %v32731_v34 = vld [vmem:[#allocation122_spill] sm:$0xff]  ;;  %20079 = vmatprep.subr.bf16.mxu1 %v32742_v41 }
 0x34b   : > { %32715 = vst [vmem:[#allocation68_spill] sm:$0xff] %v27566_v30  ;;  %32717 = vst [vmem:[#allocation51_spill] sm:$0xff] %v27570_v29  ;;  %17097 = vmatmul.mubr.f32.gmra.mrb[4].mxu1 %v32718_v24  ;;  %v32727_v30 = vand.u32 4294901760, %v27482_v40  ;;  %18440 = vmatprep.mubr.f32.mxu0 %v32731_v34 }
 0x34c   : > { %32712 = vst [vmem:[#allocation57_spill] sm:$0xff] %v27560_v38  ;;  %32721 = vst [vmem:[#allocation36_spill] sm:$0xff] %v27577_v2  ;;  %v27582_v50 = vsub.f32 %v27469_v0, %v32722_v16  ;;  %v4969_v7 = vsub.f32 %v27487_v61, %v32728_v56  ;;  %v32729_v16 = vrot.slane %v27536_v19, 7  ;;  %v32734_v56 = vld [vmem:[#allocation48_spill] sm:$0xff]  ;;  %v27611_v61 = vsub.f32 %v22512_v45, %v27570_v29  ;;  %v32749_v2 = vld [vmem:[#allocation49_spill] sm:$0xff] }
 0x34d   : > { %32725 = vst [vmem:[#allocation35_spill] sm:$0xff] %v27587_v55  ;;  %v4962_v38 = vsub.f32 %v27482_v40, %v32727_v30  ;;  %v27606_v30 = vand.u32 4294901760, %v4638_v27  ;;  %v32733_v40 = vld [vmem:[#allocation87_spill] sm:$0xff]  ;;  %17099 = vmatprep.mubr.f32.mxu1 %v32734_v56  ;;  %32740 = vst [vmem:[#allocation148_spill] sm:$0xff] %v27623_v5  ;;  %20081 = vmatpush3.bf16.msra.mxu1 %v32742_v41  ;;  %v27641_v45 = vsub.f32 %v27280_v51, %v32747_v17 }
 0x34e   : > { %32723 = vst [vmem:[#allocation95_spill] sm:$0xff] %v27582_v50  ;;  %v4632_v0 = vsel %vm32730_vm4, %v4606_v37, %v32729_v16  ;;  %20843 = vmatprep.subr.bf16.mxu0 %v32733_v40  ;;  %32735 = vst [vmem:[#allocation75_spill] sm:$0xff] %v27611_v61  ;;  %v32736_v37 = vand.u32 4294901760, %v27269_v43  ;;  %v32738_v16 = vand.u32 4294901760, %v27271_v23  ;;  %v4970_v47 = vand.u32 4294901760, %v4969_v7  ;;  %v32754_v51 = vld [vmem:[#allocation131_spill] sm:$0xff] }
 0x34f   : > { %32732 = vst [vmem:[#allocation129_spill] sm:$0xff] %v27606_v30  ;;  %17100 = vmatmul.mubr.f32.gmra.mrb[6].mxu1 %v32741_v44  ;;  %v27628_v29 = vand.u32 4294901760, %v4632_v0  ;;  %v4963_v35 = vand.u32 4294901760, %v4962_v38  ;;  %32748 = vst [vmem:[#allocation70_spill] sm:$0xff] %v27641_v45  ;;  %20845 = vmatpush3.bf16.msra.mxu0 %v32733_v40  ;;  %v32751_v41 = vand.u32 4294901760, %v27552_v31  ;;  %v27653_v7 = vsub.f32 %v4638_v27, %v27606_v30  ;;  %v22515_v17 = vld [vmem:[#allocation2 + $0x38] sm:$0xff] }
 0x350   : > { %v27616_v21 = vsub.f32 %v27269_v43, %v32736_v37  ;;  %v27621_v42 = vsub.f32 %v27271_v23, %v32738_v16  ;;  %v27633_v43 = vsub.f32 %v27278_v11, %v32744_v10  ;;  %v22514_v37 = vld [vmem:[#allocation2 + $0x30] sm:$0xff]  ;;  %v32746_v23 = vld [vmem:[#allocation72_spill] sm:$0xff]  ;;  %v32750_v10 = vand.u32 4294901760, %v27547_v9  ;;  %v32753_v16 = vld [vmem:[#allocation115_spill] sm:$0xff]  ;;  %17102 = vmatprep.mubr.f32.mxu1 %v32754_v51 }
 0x351   : > { %32743 = vst [vmem:[#allocation103_spill] sm:$0xff] %v27628_v29  ;;  %v4608_v60 = vrot.slane %v22514_v37, 7  ;;  %18441 = vmatmul.mubr.f32.gmra.mrb[4].mxu0 %v32746_v23  ;;  %v10357_v38 = vsub.f32 %v27552_v31, %v32751_v41  ;;  %32752 = vst [vmem:[#allocation149_spill] sm:$0xff] %v27653_v7  ;;  %20847 = vmatprep.subr.bf16.mxu0 %v32753_v16  ;;  %v27661_v50 = vsub.f32 %v22513_v15, %v27623_v5  ;;  %v32760_v11 = vld [vmem:[#allocation86_spill] sm:$0xff] }
 0x352   : > { %32737 = vst [vmem:[#allocation101_spill] sm:$0xff] %v27616_v21  ;;  %32739 = vst [vmem:[#allocation62_spill] sm:$0xff] %v27621_v42  ;;  %18443 = vmatprep.mubr.f32.mxu0 %v32749_v2  ;;  %v10350_v37 = vsub.f32 %v27547_v9, %v32750_v10  ;;  %v32756_v10 = vld [vmem:[#allocation120_spill] sm:$0xff]  ;;  %v27666_v27 = vsub.f32 %v4632_v0, %v27628_v29  ;;  %v32759_v30 = vrot.slane %v27536_v19, 7  ;;  %v4609_v31 = vrot.slane %v22515_v17, 7 }
 0x353   : > { %32745 = vst [vmem:[#allocation55_spill] sm:$0xff] %v27633_v43  ;;  %32755 = vst [vmem:[#allocation132_spill] sm:$0xff] %v27661_v50  ;;  %17103 = vmatmul.mubr.f32.gmra.mrb[8].mxu1 %v32756_v10  ;;  %v32757_v9 = vld [vmem:[#allocation32_spill] sm:$0xff]  ;;  %v27675_v15 = vpack.c.bf16 %v4970_v47, %v4963_v35  ;;  %v32762_v5 = vand.u32 4294901760, %v27542_v33  ;;  %20849 = vmatpush3.bf16.msra.mxu0 %v32753_v16  ;;  %v10358_v55 = vand.u32 4294901760, %v10357_v38  ;;  %v32768_v41 = vand.u32 4294901760, %v27611_v61 }
 0x354   : > { %20083 = vmatprep.subr.bf16.mxu1 %v32757_v9  ;;  %32758 = vst [vmem:[#allocation92_spill] sm:$0xff] %v27666_v27  ;;  %v4631_v40 = vsel %vm32458_vm0, %v32759_v30, %v4608_v60  ;;  %v22516_v29 = vld [vmem:[#allocation2 + $0x40] sm:$0xff]  ;;  %v32765_v30 = vld [vmem:[#allocation94_spill] sm:$0xff]  ;;  %v10351_v17 = vand.u32 4294901760, %v10350_v37  ;;  %v32770_v16 = vand.u32 4294901760, %v27616_v21  ;;  %v32771_v38 = vand.u32 4294901760, %v27621_v42  ;;  %vm32841_vm4 = vmmov %vm32458_vm0 }
 0x355   : > { %18444 = vmatmul.mubr.f32.gmra.mrb[6].mxu0 %v32760_v11  ;;  %20085 = vmatpush3.bf16.msra.mxu1 %v32757_v9  ;;  %32761 = vst [vmem:[#allocation109_spill] sm:$0xff] %v27675_v15  ;;  %v27680_v0 = vsub.f32 %v27542_v33, %v32762_v5  ;;  %v27683_v19 = vand.u32 4294901760, %v22516_v29  ;;  %v27688_v35 = vld [vmem:[#allocation2 + $0x40] sm:$0xff]  ;;  %v32766_v15 = vld [vmem:[#allocation46_spill] sm:$0xff]  ;;  %v32767_v5 = vld [vmem:[#allocation59_spill] sm:$0xff]  ;;  %v27696_v33 = vsub.f32 %v27611_v61, %v32768_v41  ;;  %v4640_v47 = vsel %vm24427_vm6, %v4631_v40, 0.0 }
 0x356   : > { %18446 = vmatprep.mubr.f32.mxu0 %v32765_v30  ;;  %20851 = vmatprep.subr.bf16.mxu0 %v32766_v15  ;;  %v4976_v37 = vsub.f32 %v27616_v21, %v32770_v16  ;;  %v4983_v9 = vsub.f32 %v27621_v42, %v32771_v38  ;;  %v32773_v11 = vld [vmem:[#allocation65_spill] sm:$0xff]  ;;  %v32774_v10 = vld [vmem:[#allocation50_spill] sm:$0xff]  ;;  %v32775_v61 = vand.u32 4294901760, %v27633_v43  ;;  %v4630_v16 = vsel %vm32776_vm1, %v4608_v60, %v4609_v31  ;;  %vm32786_vm6 = vmmov %vm32458_vm0 }
 0x357   : > { %32763 = vst [vmem:[#allocation54_spill] sm:$0xff] %v27680_v0  ;;  %32764 = vst [vmem:[#allocation144_spill] sm:$0xff] %v27683_v19  ;;  %17105 = vmatprep.mubr.f32.mxu1 %v32767_v5  ;;  %20087 = vmatprep.subr.bf16.mxu1 %v32774_v10  ;;  %v32777_v21 = vld [vmem:[#allocation145_spill] sm:$0xff]  ;;  %v32778_v30 = vand.u32 4294901760, %v27641_v45  ;;  %v27722_v5 = vsub.f32 %v22516_v29, %v27683_v19  ;;  %v32780_v41 = vand.u32 4294901760, %v27282_v20  ;;  %v32781_v60 = vld [vmem:[#allocation90_spill] sm:$0xff] }
 0x358   : > { %32769 = vst [vmem:[#allocation58_spill] sm:$0xff] %v27696_v33  ;;  %17106 = vmatmul.mubr.f32.gmra.mrb[10].mxu1 %v32773_v11  ;;  %v10364_v51 = vsub.f32 %v27633_v43, %v32775_v61  ;;  %20853 = vmatpush3.bf16.msra.mxu0 %v32766_v15  ;;  %v27731_v43 = vpack.c.bf16 %v10358_v55, %v10351_v17  ;;  %v32784_v40 = vand.u32 4294901760, %v27290_v4  ;;  %v32785_v29 = vrot.slane %v27688_v35, 7  ;;  %v32802_v33 = vld [vmem:[#allocation116_spill] sm:$0xff]  ;;  %vm32938_vm1 = vmmov %vm32458_vm0 }
 0x359   : > { %18447 = vmatmul.mubr.f32.gmra.mrb[8].mxu0 %v32777_v21  ;;  %20089 = vmatpush3.bf16.msra.mxu1 %v32774_v10  ;;  %v10371_v38 = vsub.f32 %v27641_v45, %v32778_v30  ;;  %32779 = vst [vmem:[#allocation96_spill] sm:$0xff] %v27722_v5  ;;  %v27727_v61 = vsub.f32 %v27282_v20, %v32780_v41  ;;  %v27733_v10 = vand.u32 4294901760, %v4640_v47  ;;  %v32787_v20 = vld [vmem:[#allocation30_spill] sm:$0xff]  ;;  %v32788_v41 = vld [vmem:[#allocation119_spill] sm:$0xff]  ;;  %v32789_v15 = vand.u32 4294901760, %v27653_v7 }
 0x35a   : > { %18449 = vmatprep.mubr.f32.mxu0 %v32781_v60  ;;  %32782 = vst [vmem:[#allocation33_spill] sm:$0xff] %v27731_v43  ;;  %v27738_v30 = vsub.f32 %v27290_v4, %v32784_v40  ;;  %v4629_v19 = vsel %vm32786_vm6, %v4609_v31, %v32785_v29  ;;  %20855 = vmatprep.subr.bf16.mxu0 %v32787_v20  ;;  %v4977_v17 = vand.u32 4294901760, %v4976_v37  ;;  %v4984_v45 = vand.u32 4294901760, %v4983_v9  ;;  %v32792_v4 = vld [vmem:[#allocation111_spill] sm:$0xff]  ;;  %v32793_v40 = vld [vmem:[#allocation98_spill] sm:$0xff]  ;;  %vm32960_vm6 = vmmov %vm32458_vm0 }
 0x35b   : > { %32783 = vst [vmem:[#allocation28_spill] sm:$0xff] %v27733_v10  ;;  %17108 = vmatprep.mubr.f32.mxu1 %v32788_v41  ;;  %v27749_v55 = vsub.f32 %v27653_v7, %v32789_v15  ;;  %v27751_v42 = vand.u32 4294901760, %v4630_v16  ;;  %20091 = vmatprep.subr.bf16.mxu1 %v32793_v40  ;;  %v32794_v31 = vand.u32 4294901760, %v27666_v27  ;;  %v32795_v43 = vand.u32 4294901760, %v27661_v50  ;;  %v32797_v9 = vld [vmem:[#allocation31_spill] sm:$0xff] }
 0x35c   : > { %17109 = vmatmul.mubr.f32.gmra.mrb[12].mxu1 %v32792_v4  ;;  %v10365_v37 = vand.u32 4294901760, %v10364_v51  ;;  %v10372_v7 = vand.u32 4294901760, %v10371_v38  ;;  %v4642_v41 = vsel %vm24688_vm8, %v4629_v19, 0.0  ;;  %20857 = vmatpush3.bf16.msra.mxu0 %v32787_v20  ;;  %v27780_v38 = vld [vmem:[#allocation2 + $0x48] sm:$0xff]  ;;  %v27786_v20 = vpack.c.bf16 %v4984_v45, %v4977_v17  ;;  %v32806_v4 = vld [vmem:[#allocation91_spill] sm:$0xff]  ;;  %vm32819_vm8 = vmmov %vm32458_vm0 }
 0x35d   : > { %32790 = vst [vmem:[#allocation130_spill] sm:$0xff] %v27749_v55  ;;  %32791 = vst [vmem:[#allocation64_spill] sm:$0xff] %v27751_v42  ;;  %v27759_v29 = vsub.f32 %v27666_v27, %v32794_v31  ;;  %v27764_v15 = vsub.f32 %v27661_v50, %v32795_v43  ;;  %18450 = vmatmul.mubr.f32.gmra.mrb[10].mxu0 %v32797_v9  ;;  %20093 = vmatpush3.bf16.msra.mxu1 %v32793_v40  ;;  %v32799_v31 = vld [vmem:[#allocation84_spill] sm:$0xff]  ;;  %v22518_v50 = vld [vmem:[#allocation2 + $0x48] sm:$0xff]  ;;  %v32805_v51 = vand.u32 4294901760, %v27292_v36 }
 0x35e   : > { %18452 = vmatprep.mubr.f32.mxu0 %v32799_v31  ;;  %v27775_v43 = vsub.f32 %v4640_v47, %v27733_v10  ;;  %v27778_v27 = vand.u32 4294901760, %v22518_v50  ;;  %20859 = vmatprep.subr.bf16.mxu0 %v32582_v6  ;;  %32803 = vst [vmem:[#allocation79_spill] sm:$0xff] %v27786_v20  ;;  %v27789_v47 = vsub.f32 %v4630_v16, %v27751_v42  ;;  %v32807_v10 = vld [vmem:[#allocation81_spill] sm:$0xff]  ;;  %v27804_v45 = vand.u32 4294901760, %v4642_v41  ;;  %v22520_v16 = vld [vmem:[#allocation2 + $0x50] sm:$0xff]  ;;  %v32814_v20 = vld [vmem:[#allocation128_spill] sm:$0xff] }
 0x35f   : > { %32796 = vst [vmem:[#allocation102_spill] sm:$0xff] %v27764_v15  ;;  %17111 = vmatprep.mubr.f32.mxu1 %v32802_v33  ;;  %v27794_v0 = vsub.f32 %v27292_v36, %v32805_v51  ;;  %20095 = vmatprep.subr.bf16.mxu1 %v32807_v10  ;;  %v32808_v33 = vand.u32 4294901760, %v27294_v3  ;;  %v27806_v17 = vand.u32 4294901760, %v22520_v16  ;;  %v32811_v42 = vld [vmem:[#allocation138_spill] sm:$0xff]  ;;  %v27811_v51 = vpack.c.bf16 %v10372_v7, %v10365_v37  ;;  %v22521_v55 = vld [vmem:[#allocation2 + $0x58] sm:$0xff] }
 0x360   : > { %32800 = vst [vmem:[#allocation29_spill] sm:$0xff] %v27775_v43  ;;  %32801 = vst [vmem:[#allocation45_spill] sm:$0xff] %v27778_v27  ;;  %17112 = vmatmul.mubr.f32.gmra.mrb[14].mxu1 %v32806_v4  ;;  %v32812_v40 = vand.u32 4294901760, %v27722_v5  ;;  %20861 = vmatpush3.bf16.msra.mxu0 %v32582_v6  ;;  %v27828_v37 = vsub.f32 %v22518_v50, %v27778_v27  ;;  %v32818_v36 = vrot.slane %v27688_v35, 7  ;;  %v32831_v6 = vand.u32 4294901760, %v27775_v43 }
 0x361   : > { %32804 = vst [vmem:[#allocation99_spill] sm:$0xff] %v27789_v47  ;;  %v27802_v19 = vsub.f32 %v27294_v3, %v32808_v33  ;;  %32809 = vst [vmem:[#allocation114_spill] sm:$0xff] %v27804_v45  ;;  %18453 = vmatmul.mubr.f32.gmra.mrb[12].mxu0 %v32811_v42  ;;  %20097 = vmatpush3.bf16.msra.mxu1 %v32807_v10  ;;  %v32813_v3 = vand.u32 4294901760, %v27727_v61  ;;  %v32815_v10 = vand.u32 4294901760, %v27738_v30 }
 0x362   : > { %32810 = vst [vmem:[#allocation97_spill] sm:$0xff] %v27806_v17  ;;  %v27816_v15 = vsub.f32 %v27722_v5, %v32812_v40  ;;  %18455 = vmatprep.mubr.f32.mxu0 %v32814_v20  ;;  %32816 = vst [vmem:[#allocation134_spill] sm:$0xff] %v27828_v37  ;;  %v32817_v40 = vrot.slane %v27780_v38, 7  ;;  %20863 = vmatprep.subr.bf16.mxu0 %v32586_v28  ;;  %v32822_v5 = vand.u32 4294901760, %v27303_v53 }
 0x363   : > { %v4990_v33 = vsub.f32 %v27727_v61, %v32813_v3  ;;  %v4997_v7 = vsub.f32 %v27738_v30, %v32815_v10  ;;  %17146 = vmatprep.mubr.f32.mxu1 %v32507_v18  ;;  %v32820_v10 = vand.u32 4294901760, %v27301_v13  ;;  %20099 = vmatprep.subr.bf16.mxu1 %v27316_v54 }
 0x364   : > { %v4628_v3 = vsel %vm32819_vm8, %v32818_v36, %v32817_v40  ;;  %v27848_v35 = vsub.f32 %v27303_v53, %v32822_v5  ;;  %17147 = vmatmul.mubr.f32.vlgmr.msra.gmra.mrb[0].mxu1 %v32510_v57  ;;  %v27854_v36 = vsub.f32 %v4642_v41, %v27804_v45  ;;  %v27857_v40 = vsub.f32 %v22520_v16, %v27806_v17  ;;  %v27871_v41 = vld [vmem:[#allocation2 + $0x50] sm:$0xff] }
 0x365   : > { %v27843_v50 = vsub.f32 %v27301_v13, %v32820_v10  ;;  %v27859_v13 = vand.u32 4294901760, %v22521_v55  ;;  %v32827_v10 = vld [vmem:[#allocation63_spill] sm:$0xff]  ;;  %20101 = vmatpush3.bf16.msra.mxu1 %v27316_v54  ;;  %v27864_v57 = vand.u32 4294901760, %v4628_v3  ;;  %v32829_v5 = vand.u32 4294901760, %v27321_v59  ;;  %20865 = vmatpush3.bf16.msra.mxu0 %v32586_v28 }
 0x366   : > { %32823 = vst [vmem:[#allocation87_spill] sm:$0xff] %v27848_v35  ;;  %32824 = vst [vmem:[#allocation48_spill] sm:$0xff] %v27854_v36  ;;  %18456 = vmatmul.mubr.f32.gmra.mrb[14].mxu0 %v32827_v10  ;;  %v27879_v54 = vsub.f32 %v27775_v43, %v32831_v6  ;;  %v4991_v53 = vand.u32 4294901760, %v4990_v33  ;;  %v4998_v17 = vand.u32 4294901760, %v4997_v7  ;;  %20867 = vmatprep.subr.bf16.mxu0 %v27334_v12  ;;  %v32833_v28 = vand.u32 4294901760, %v27794_v0  ;;  %v32875_v43 = vld [vmem:[#allocation56_spill] sm:$0xff] }
 0x367   : > { %32821 = vst [vmem:[#allocation122_spill] sm:$0xff] %v27843_v50  ;;  %32825 = vst [vmem:[#allocation41_spill] sm:$0xff] %v27857_v40  ;;  %v27869_v18 = vsub.f32 %v27321_v59, %v32829_v5  ;;  %18490 = vmatprep.mubr.f32.mxu0 %v32513_v26  ;;  %17149 = vmatprep.mubr.f32.mxu1 %v32693_v52  ;;  %v32832_v59 = vand.u32 4294901760, %v27789_v47  ;;  %v32834_v7 = vand.u32 4294901760, %v27802_v19  ;;  %v32837_v33 = vand.u32 4294901760, %v27323_v14 }
 0x368   : > { %32826 = vst [vmem:[#allocation89_spill] sm:$0xff] %v27859_v13  ;;  %32828 = vst [vmem:[#allocation72_spill] sm:$0xff] %v27864_v57  ;;  %v10378_v26 = vsub.f32 %v27794_v0, %v32833_v28  ;;  %17150 = vmatmul.mubr.f32.gmra.mrb[2].mxu1 %v32694_v8  ;;  %20103 = vmatprep.subr.bf16.mxu1 %v27363_v32  ;;  %v27902_v16 = vsub.f32 %v22521_v55, %v27859_v13  ;;  %v32839_v27 = vrot.slane %v27871_v41, 7 }
 0x369   : > { %32830 = vst [vmem:[#allocation49_spill] sm:$0xff] %v27869_v18  ;;  %v27887_v5 = vsub.f32 %v27789_v47, %v32832_v59  ;;  %v10385_v52 = vsub.f32 %v27802_v19, %v32834_v7  ;;  %20105 = vmatpush3.bf16.msra.mxu1 %v27363_v32  ;;  %v27907_v28 = vsub.f32 %v4628_v3, %v27864_v57  ;;  %v32840_v59 = vrot.slane %v27780_v38, 7  ;;  %v32878_v32 = vld [vmem:[#allocation44_spill] sm:$0xff] }
 0x36a   : > { %32835 = vst [vmem:[#allocation115_spill] sm:$0xff] %v27902_v16  ;;  %18491 = vmatmul.mubr.f32.vlgmr.msra.gmra.mrb[0].mxu0 %v32698_v63  ;;  %v27913_v7 = vsub.f32 %v27323_v14, %v32837_v33  ;;  %v27924_v3 = vpack.c.bf16 %v4998_v17, %v4991_v53  ;;  %v32842_v8 = vand.u32 4294901760, %v27828_v37  ;;  %v22523_v33 = vld [vmem:[#allocation2 + $0x60] sm:$0xff]  ;;  %17152 = vmatprep.mubr.f32.mxu1 %v32709_v39  ;;  %v32844_v38 = vand.u32 4294901760, %v27843_v50 }
 0x36b   : > { %32836 = vst [vmem:[#allocation32_spill] sm:$0xff] %v27907_v28  ;;  %v4627_v55 = vsel %vm32841_vm4, %v32840_v59, %v32839_v27  ;;  %20869 = vmatpush3.bf16.msra.mxu0 %v27334_v12  ;;  %18493 = vmatprep.mubr.f32.mxu0 %v32702_v48  ;;  %v27931_v6 = vand.u32 4294901760, %v22523_v33  ;;  %v10379_v27 = vand.u32 4294901760, %v10378_v26  ;;  %v32845_v17 = vand.u32 4294901760, %v27848_v35  ;;  %v22524_v59 = vld [vmem:[#allocation2 + $0x58] sm:$0xff] }
 0x36c   : > { %32838 = vst [vmem:[#allocation46_spill] sm:$0xff] %v27913_v7  ;;  %v27929_v14 = vsub.f32 %v27828_v37, %v32842_v8  ;;  %20871 = vmatprep.subr.bf16.mxu0 %v27381_v1  ;;  %v5004_v48 = vsub.f32 %v27843_v50, %v32844_v38  ;;  %v4613_v63 = vrot.slane %v22524_v59, 7  ;;  %17153 = vmatmul.mubr.f32.gmra.mrb[4].mxu1 %v32718_v24  ;;  %v10386_v8 = vand.u32 4294901760, %v10385_v52 }
 0x36d   : > { %32843 = vst [vmem:[#allocation110_spill] sm:$0xff] %v27931_v6  ;;  %v5011_v53 = vsub.f32 %v27848_v35, %v32845_v17  ;;  %20107 = vmatprep.subr.bf16.mxu1 %v27399_v58  ;;  %v32846_v37 = vand.u32 4294901760, %v27857_v40  ;;  %v4644_v38 = vsel %vm24736_vm10, %v4627_v55, 0.0  ;;  %v32848_v17 = vand.u32 4294901760, %v27854_v36  ;;  %17155 = vmatprep.mubr.f32.mxu1 %v32734_v56  ;;  %vm32855_vm10 = vmmov %vm32458_vm0 }
 0x36e   : > { %18494 = vmatmul.mubr.f32.gmra.mrb[2].mxu0 %v32726_v22  ;;  %20109 = vmatpush3.bf16.msra.mxu1 %v27399_v58  ;;  %v32849_v59 = vand.u32 4294901760, %v27869_v18  ;;  %v27970_v55 = vsub.f32 %v22523_v33, %v27931_v6  ;;  %v27987_v33 = vpack.c.bf16 %v10386_v8, %v10379_v27  ;;  %v32857_v27 = vand.u32 4294901760, %v27907_v28  ;;  %v32860_v22 = vld [vmem:[#allocation77_spill] sm:$0xff]  ;;  %v32891_v6 = vld [vmem:[#allocation112_spill] sm:$0xff] }
 0x36f   : > { %v27946_v39 = vsub.f32 %v27857_v40, %v32846_v37  ;;  %v27956_v24 = vsub.f32 %v27854_v36, %v32848_v17  ;;  %20873 = vmatpush3.bf16.msra.mxu0 %v27381_v1  ;;  %18496 = vmatprep.mubr.f32.mxu0 %v32731_v34  ;;  %v32851_v17 = vand.u32 4294901760, %v27325_v49  ;;  %v5012_v26 = vand.u32 4294901760, %v5011_v53  ;;  %v32863_v8 = vld [vmem:[#allocation121_spill] sm:$0xff] }
 0x370   : > { %v27962_v37 = vsub.f32 %v27869_v18, %v32849_v59  ;;  %32850 = vst [vmem:[#allocation65_spill] sm:$0xff] %v27970_v55  ;;  %20875 = vmatprep.subr.bf16.mxu0 %v27414_v46  ;;  %v5005_v59 = vand.u32 4294901760, %v5004_v48  ;;  %v27979_v40 = vand.u32 4294901760, %v4644_v38  ;;  %v32854_v34 = vrot.slane %v27871_v41, 7  ;;  %17156 = vmatmul.mubr.f32.gmra.mrb[6].mxu1 %v32741_v44  ;;  %v27995_v48 = vld [vmem:[#allocation2 + $0x60] sm:$0xff] }
 0x371   : > { %v27975_v52 = vsub.f32 %v27325_v49, %v32851_v17  ;;  %20111 = vmatprep.subr.bf16.mxu1 %v27420_v62  ;;  %v32856_v17 = vand.u32 4294901760, %v27902_v16  ;;  %v28004_v53 = vsub.f32 %v27907_v28, %v32857_v27  ;;  %v32861_v27 = vand.u32 4294901760, %v32860_v22  ;;  %v32867_v28 = vld [vmem:[#allocation133_spill] sm:$0xff] }
 0x372   : > { %32853 = vst [vmem:[#allocation145_spill] sm:$0xff] %v27979_v40  ;;  %v4626_v47 = vsel %vm32855_vm10, %v32854_v34, %v4613_v63  ;;  %18497 = vmatmul.mubr.f32.gmra.mrb[4].mxu0 %v32746_v23  ;;  %20113 = vmatpush3.bf16.msra.mxu1 %v27420_v62  ;;  %v32858_v34 = vand.u32 4294901760, %v27913_v7  ;;  %v28028_v62 = vsub.f32 %v4644_v38, %v27979_v40  ;;  %v32868_v36 = vand.u32 4294901760, %v32867_v28  ;;  %v32873_v38 = vld [vmem:[#allocation40_spill] sm:$0xff]  ;;  %v32916_v40 = vld [vmem:[#allocation82_spill] sm:$0xff] }
 0x373   : > { %32852 = vst [vmem:[#allocation50_spill] sm:$0xff] %v27975_v52  ;;  %v27993_v56 = vsub.f32 %v27902_v16, %v32856_v17  ;;  %20877 = vmatpush3.bf16.msra.mxu0 %v27414_v46  ;;  %18499 = vmatprep.mubr.f32.mxu0 %v32749_v2  ;;  %v28015_v49 = vand.u32 4294901760, %v4626_v47  ;;  %v28021_v41 = vsub.f32 %v32860_v22, %v32861_v27  ;;  %v32864_v16 = vld [vmem:[#allocation131_spill] sm:$0xff]  ;;  %v22526_v2 = vld [vmem:[#allocation2 + $0x68] sm:$0xff]  ;;  %v32870_v46 = vld [vmem:[#allocation120_spill] sm:$0xff]  ;;  %v32876_v1 = vand.u32 4294901760, %v32875_v43 }
 0x374   : > { %v28010_v17 = vsub.f32 %v27913_v7, %v32858_v34  ;;  %20879 = vmatprep.subr.bf16.mxu0 %v32863_v8  ;;  %17158 = vmatprep.mubr.f32.mxu1 %v32864_v16  ;;  %v28025_v34 = vpack.c.bf16 %v5012_v26, %v5005_v59  ;;  %32865 = vst [vmem:[#allocation98_spill] sm:$0xff] %v28028_v62  ;;  %v28030_v23 = vand.u32 4294901760, %v22526_v2  ;;  %v32871_v22 = vld [vmem:[#allocation74_spill] sm:$0xff]  ;;  %v32872_v16 = vrot.slane %v27995_v48, 7  ;;  %v32887_v27 = vld [vmem:[#allocation59_spill] sm:$0xff] }
 0x375   : > { %32859 = vst [vmem:[#allocation90_spill] sm:$0xff] %v28015_v49  ;;  %32862 = vst [vmem:[#allocation30_spill] sm:$0xff] %v28021_v41  ;;  %v28035_v44 = vsub.f32 %v32867_v28, %v32868_v36  ;;  %17159 = vmatmul.mubr.f32.gmra.mrb[8].mxu1 %v32870_v46  ;;  %20115 = vmatprep.subr.bf16.mxu1 %v32871_v22  ;;  %v32874_v59 = vand.u32 4294901760, %v32873_v38  ;;  %v28052_v36 = vsub.f32 %v32875_v43, %v32876_v1  ;;  %v32877_v46 = vld [vmem:[#allocation86_spill] sm:$0xff] }
 0x376   : > { %32866 = vst [vmem:[#allocation31_spill] sm:$0xff] %v28030_v23  ;;  %v4625_v26 = vsel %vm32458_vm0, %v4613_v63, %v32872_v16  ;;  %18500 = vmatmul.mubr.f32.gmra.mrb[6].mxu0 %v32877_v46  ;;  %20117 = vmatpush3.bf16.msra.mxu1 %v32871_v22  ;;  %v32879_v63 = vand.u32 4294901760, %v32878_v32  ;;  %v32882_v1 = vld [vmem:[#allocation94_spill] sm:$0xff]  ;;  %v32883_v43 = vand.u32 4294901760, %v27970_v55  ;;  %v28076_v28 = vsub.f32 %v4626_v47, %v28015_v49 }
 0x377   : > { %32869 = vst [vmem:[#allocation37_spill] sm:$0xff] %v28035_v44  ;;  %v28047_v58 = vsub.f32 %v32873_v38, %v32874_v59  ;;  %v32880_v38 = vld [vmem:[#allocation100_spill] sm:$0xff]  ;;  %20881 = vmatpush3.bf16.msra.mxu0 %v32863_v8  ;;  %18502 = vmatprep.mubr.f32.mxu0 %v32882_v1  ;;  %v28088_v22 = vsub.f32 %v22526_v2, %v28030_v23  ;;  %v32895_v47 = vld [vmem:[#allocation106_spill] sm:$0xff]  ;;  %v32917_v7 = vand.u32 4294901760, %v32916_v40 }
 0x378   : > { %v28061_v16 = vsub.f32 %v32878_v32, %v32879_v63  ;;  %v32881_v59 = vand.u32 4294901760, %v32880_v38  ;;  %v28073_v46 = vsub.f32 %v27970_v55, %v32883_v43  ;;  %32884 = vst [vmem:[#allocation84_spill] sm:$0xff] %v28076_v28  ;;  %v32885_v32 = vand.u32 4294901760, %v27975_v52  ;;  %17161 = vmatprep.mubr.f32.mxu1 %v32887_v27  ;;  %v32893_v2 = vld [vmem:[#allocation124_spill] sm:$0xff]  ;;  %v28144_v49 = vld [vmem:[#allocation2 + $0x70] sm:$0xff] }
 0x379   : > { %32888 = vst [vmem:[#allocation91_spill] sm:$0xff] %v28088_v22  ;;  %v4646_v55 = vsel %vm25019_vm12, %v4625_v26, 0.0  ;;  %17162 = vmatmul.mubr.f32.gmra.mrb[10].mxu1 %v32773_v11  ;;  %v32892_v27 = vand.u32 4294901760, %v32891_v6  ;;  %v32894_v23 = vand.u32 4294901760, %v32893_v2  ;;  %v32896_v8 = vand.u32 4294901760, %v32895_v47  ;;  %v32900_v26 = vld [vmem:[#allocation73_spill] sm:$0xff]  ;;  %vm32931_vm12 = vmmov %vm32458_vm0 }
 0x37a   : > { %v28066_v12 = vsub.f32 %v32880_v38, %v32881_v59  ;;  %v28081_v63 = vsub.f32 %v27975_v52, %v32885_v32  ;;  %v32886_v59 = vld [vmem:[#allocation42_spill] sm:$0xff]  ;;  %v32890_v32 = vld [vmem:[#allocation125_spill] sm:$0xff]  ;;  %18503 = vmatmul.mubr.f32.gmra.mrb[8].mxu0 %v32777_v21  ;;  %v32901_v11 = vand.u32 4294901760, %v32900_v26  ;;  %v28142_v21 = vand.u32 4294901760, %v4646_v55 }
 0x37b   : > { %20883 = vmatprep.subr.bf16.mxu0 %v32886_v59  ;;  %20119 = vmatprep.subr.bf16.mxu1 %v32890_v32  ;;  %v28100_v1 = vsub.f32 %v32891_v6, %v32892_v27  ;;  %v28105_v43 = vsub.f32 %v32893_v2, %v32894_v23  ;;  %v28114_v38 = vsub.f32 %v32895_v47, %v32896_v8  ;;  %v32897_v6 = vld [vmem:[#allocation67_spill] sm:$0xff]  ;;  %v32899_v23 = vand.u32 4294901760, %v28021_v41  ;;  %v32914_v52 = vld [vmem:[#allocation69_spill] sm:$0xff] }
 0x37c   : > { %20121 = vmatpush3.bf16.msra.mxu1 %v32890_v32  ;;  %v32898_v27 = vand.u32 4294901760, %v32897_v6  ;;  %20885 = vmatpush3.bf16.msra.mxu0 %v32886_v59  ;;  %v28132_v8 = vsub.f32 %v32900_v26, %v32901_v11  ;;  %v32903_v47 = vand.u32 4294901760, %v28047_v58  ;;  %v32906_v32 = vld [vmem:[#allocation137_spill] sm:$0xff]  ;;  %32908 = vst [vmem:[#allocation128_spill] sm:$0xff] %v28142_v21  ;;  %v32909_v11 = vand.u32 4294901760, %v28061_v16 }
 0x37d   : > { %18505 = vmatprep.mubr.f32.mxu0 %v32781_v60  ;;  %v28127_v2 = vsub.f32 %v28021_v41, %v32899_v23  ;;  %20887 = vmatprep.subr.bf16.mxu0 %v32906_v32  ;;  %v32907_v60 = vld [vmem:[#allocation119_spill] sm:$0xff]  ;;  %v22527_v59 = vld [vmem:[#allocation2 + $0x68] sm:$0xff]  ;;  %v32910_v26 = vand.u32 4294901760, %v28066_v12  ;;  %v28165_v18 = vsub.f32 %v32916_v40, %v32917_v7  ;;  %v32932_v45 = vand.u32 4294901760, %v28114_v38 }
 0x37e   : > { %v28119_v13 = vsub.f32 %v32897_v6, %v32898_v27  ;;  %32902 = vst [vmem:[#allocation81_spill] sm:$0xff] %v28132_v8  ;;  %v32904_v6 = vand.u32 4294901760, %v28052_v36  ;;  %17164 = vmatprep.mubr.f32.mxu1 %v32907_v60  ;;  %v4615_v23 = vrot.slane %v22527_v59, 7  ;;  %v32915_v59 = vand.u32 4294901760, %v32914_v52  ;;  %18506 = vmatmul.mubr.f32.gmra.mrb[10].mxu0 %v32797_v9 }
 0x37f   : > { %v28151_v41 = vpack.c.bf16 %v32910_v26, %v32909_v11  ;;  %18508 = vmatprep.mubr.f32.mxu0 %v32799_v31  ;;  %v32922_v9 = vand.u32 4294901760, %v28035_v44  ;;  %v22529_v26 = vld [vmem:[#allocation2 + $0x70] sm:$0xff]  ;;  %v32929_v31 = vand.u32 4294901760, %v28028_v62  ;;  %v32937_v7 = vrot.slane %v27995_v48, 7 }
 0x380   : > { %v28138_v27 = vpack.c.bf16 %v32904_v6, %v32903_v47  ;;  %v32912_v47 = vld [vmem:[#allocation111_spill] sm:$0xff]  ;;  %v32913_v6 = vld [vmem:[#allocation88_spill] sm:$0xff]  ;;  %v28160_v57 = vsub.f32 %v32914_v52, %v32915_v59  ;;  %v32920_v52 = vld [vmem:[#allocation146_spill] sm:$0xff]  ;;  %20889 = vmatpush3.bf16.msra.mxu0 %v32906_v32  ;;  %v28189_v11 = vand.u32 4294901760, %v22529_v26  ;;  %v32930_v32 = vrot.slane %v28144_v49, 7 }
 0x381   : > { %32911 = vst [vmem:[#allocation63_spill] sm:$0xff] %v28151_v41  ;;  %17165 = vmatmul.mubr.f32.gmra.mrb[12].mxu1 %v32912_v47  ;;  %20123 = vmatprep.subr.bf16.mxu1 %v32913_v6  ;;  %v32918_v47 = vld [vmem:[#allocation93_spill] sm:$0xff]  ;;  %v32921_v59 = vand.u32 4294901760, %v32920_v52  ;;  %v28186_v40 = vsub.f32 %v28035_v44, %v32922_v9  ;;  %v28202_v9 = vsub.f32 %v28028_v62, %v32929_v31  ;;  %v31133_v62 = vand.u32 4294901760, %v28165_v18 }
 0x382   : > { %32905 = vst [vmem:[#allocation138_spill] sm:$0xff] %v28138_v27  ;;  %20125 = vmatpush3.bf16.msra.mxu1 %v32913_v6  ;;  %v32919_v27 = vand.u32 4294901760, %v32918_v47  ;;  %32923 = vst [vmem:[#allocation78_spill] sm:$0xff] %v28189_v11  ;;  %v32928_v6 = vld [vmem:[#allocation116_spill] sm:$0xff]  ;;  %v4623_v44 = vsel %vm32931_vm12, %v4615_v23, %v32930_v32  ;;  %v28218_v31 = vsub.f32 %v4646_v55, %v28142_v21  ;;  %v31134_v32 = vand.u32 4294901760, %v28160_v57 }
 0x383   : > { %v28179_v41 = vsub.f32 %v32920_v52, %v32921_v59  ;;  %v32927_v59 = vld [vmem:[#allocation117_spill] sm:$0xff]  ;;  %17167 = vmatprep.mubr.f32.mxu1 %v32928_v6  ;;  %18509 = vmatmul.mubr.f32.gmra.mrb[12].mxu0 %v32811_v42  ;;  %v32939_v48 = vand.u32 4294901760, %v28132_v8  ;;  %v28236_v42 = vsub.f32 %v22529_v26, %v28189_v11  ;;  %v32943_v21 = vld [vmem:[#allocation68_spill] sm:$0xff]  ;;  %v5026_v35 = vand.u32 4294901760, %v28127_v2  ;;  %v32961_v2 = vld [vmem:[#allocation95_spill] sm:$0xff] }
 0x384   : > { %v28174_v60 = vsub.f32 %v32918_v47, %v32919_v27  ;;  %v32924_v27 = vand.u32 4294901760, %v28100_v1  ;;  %v32925_v47 = vand.u32 4294901760, %v28105_v43  ;;  %20891 = vmatprep.subr.bf16.mxu0 %v32927_v59  ;;  %v32935_v6 = vld [vmem:[#allocation57_spill] sm:$0xff]  ;;  %32936 = vst [vmem:[#allocation133_spill] sm:$0xff] %v28218_v31  ;;  %18511 = vmatprep.mubr.f32.mxu0 %v32814_v20  ;;  %v32944_v55 = vld [vmem:[#allocation36_spill] sm:$0xff]  ;;  %v31146_v50 = vand.u32 4294901760, %v28218_v31 }
 0x385   : > { %17168 = vmatmul.mubr.f32.gmra.mrb[14].mxu1 %v32806_v4  ;;  %20127 = vmatprep.subr.bf16.mxu1 %v32935_v6  ;;  %32940 = vst [vmem:[#allocation120_spill] sm:$0xff] %v28236_v42  ;;  %v32945_v20 = vand.u32 4294901760, %v32944_v55  ;;  %v32954_v55 = vld [vmem:[#allocation109_spill] sm:$0xff] }
 0x386   : > { %v28195_v52 = vpack.c.bf16 %v32925_v47, %v32924_v27  ;;  %v32933_v27 = vand.u32 4294901760, %v28119_v13  ;;  %20129 = vmatpush3.bf16.msra.mxu1 %v32935_v6  ;;  %20893 = vmatpush3.bf16.msra.mxu0 %v32927_v59  ;;  %v32946_v6 = vand.u32 4294901760, %v28076_v28  ;;  %v32949_v59 = vand.u32 4294901760, %v28174_v60 }
 0x387   : > { %20895 = vmatprep.subr.bf16.mxu0 %v32943_v21  ;;  %17202 = vmatprep.mubr.f32.mxu1 %v32945_v20  ;;  %v32955_v20 = vand.u32 4294901760, %v27962_v37  ;;  %v32958_v37 = vrot.slane %v28144_v49, 7 }
 0x388   : > { %32926 = vst [vmem:[#allocation77_spill] sm:$0xff] %v28195_v52  ;;  %v28213_v47 = vpack.c.bf16 %v32933_v27, %v32932_v45  ;;  %v4624_v52 = vsel %vm32938_vm1, %v32937_v7, %v4615_v23  ;;  %v22530_v45 = vld [vmem:[#allocation2 + $0x78] sm:$0xff]  ;;  %v22531_v27 = vld [vmem:[#allocation2 + $0x80] sm:$0xff]  ;;  %v10413_v23 = vsub.f32 %v28132_v8, %v32939_v48  ;;  %v28252_v48 = vsub.f32 %v28076_v28, %v32946_v6 }
 0x389   : > { %v4617_v4 = vrot.slane %v22530_v45, 7  ;;  %v4648_v45 = vsel %vm32445_vm2, %v4623_v44, 0.0  ;;  %v28254_v26 = vand.u32 4294901760, %v4624_v52  ;;  %v22532_v7 = vld [vmem:[#allocation2 + $0x78] sm:$0xff]  ;;  %20131 = vmatprep.subr.bf16.mxu1 %v32954_v55  ;;  %v32956_v6 = vand.u32 4294901760, %v28010_v17  ;;  %18512 = vmatmul.mubr.f32.gmra.mrb[14].mxu0 %v32827_v10  ;;  %vm32959_vm2 = vmmov %vm32458_vm0 }
 0x38a   : > { %32934 = vst [vmem:[#allocation131_spill] sm:$0xff] %v28213_v47  ;;  %v4618_v47 = vrot.slane %v22531_v27, 7  ;;  %v28244_v27 = vpack.c.bf16 %v31133_v62, %v31134_v32  ;;  %v28256_v44 = vand.u32 4294901760, %v22532_v7  ;;  %v32950_v62 = vand.u32 4294901760, %v28179_v41  ;;  %20897 = vmatpush3.bf16.msra.mxu0 %v32943_v21 }
 0x38b   : > { %32947 = vst [vmem:[#allocation56_spill] sm:$0xff] %v28254_v26  ;;  %v28271_v28 = vpack.c.bf16 %v32956_v6, %v32955_v20  ;;  %v5019_v8 = vand.u32 4294901760, %v28081_v63  ;;  %v4622_v17 = vsel %vm32959_vm2, %v32958_v37, %v4617_v4  ;;  %v32963_v10 = vand.u32 4294901760, %v28088_v22  ;;  %v32964_v6 = vld [vmem:[#allocation33_spill] sm:$0xff]  ;;  %v32965_v37 = vld [vmem:[#allocation130_spill] sm:$0xff] }
 0x38c   : > { %32942 = vst [vmem:[#allocation40_spill] sm:$0xff] %v28244_v27  ;;  %32948 = vst [vmem:[#allocation86_spill] sm:$0xff] %v28256_v44  ;;  %v28262_v32 = vpack.c.bf16 %v32950_v62, %v32949_v59  ;;  %v32952_v27 = vld [vmem:[#allocation35_spill] sm:$0xff]  ;;  %v4621_v63 = vsel %vm32960_vm6, %v4617_v4, %v4618_v47  ;;  %v32962_v59 = vand.u32 4294901760, %v32961_v2  ;;  %v10414_v20 = vand.u32 4294901760, %v10413_v23  ;;  %20899 = vmatprep.subr.bf16.mxu0 %v32964_v6  ;;  %v32972_v4 = vld [vmem:[#allocation54_spill] sm:$0xff] }
 0x38d   : > { %v32953_v11 = vand.u32 4294901760, %v32952_v27  ;;  %v28293_v27 = vsub.f32 %v28088_v22, %v32963_v10  ;;  %v32966_v62 = vand.u32 4294901760, %v32965_v37  ;;  %v28306_v10 = vsub.f32 %v22532_v7, %v28256_v44  ;;  %v32969_v23 = vld [vmem:[#allocation79_spill] sm:$0xff] }
 0x38e   : > { %32951 = vst [vmem:[#allocation44_spill] sm:$0xff] %v28262_v32  ;;  %18546 = vmatprep.mubr.f32.mxu0 %v32962_v59  ;;  %v28303_v59 = vsub.f32 %v4624_v52, %v28254_v26  ;;  %v28311_v49 = vpack.c.bf16 %v5026_v35, %v5019_v8  ;;  %v28318_v37 = vand.u32 4294901760, %v4622_v17  ;;  %v4650_v52 = vsel %vm32471_vm14, %v4621_v63, 0.0  ;;  %v32976_v32 = vld [vmem:[#allocation107_spill] sm:$0xff]  ;;  %vm32978_vm14 = vmmov %vm32458_vm0 }
 0x38f   : > { %17203 = vmatmul.mubr.f32.vlgmr.msra.gmra.mrb[0].mxu1 %v32953_v11  ;;  %v28279_v11 = vand.u32 4294901760, %v4648_v45  ;;  %32967 = vst [vmem:[#allocation94_spill] sm:$0xff] %v28306_v10  ;;  %v32973_v7 = vand.u32 4294901760, %v32972_v4  ;;  %v32977_v21 = vrot.slane %v32976_v32, 7  ;;  %v32979_v4 = vld [vmem:[#allocation58_spill] sm:$0xff]  ;;  %v32982_v22 = vand.u32 4294901760, %v28052_v36 }
 0x390   : > { %20133 = vmatpush3.bf16.msra.mxu1 %v32954_v55  ;;  %v10407_v55 = vand.u32 4294901760, %v28186_v40  ;;  %17205 = vmatprep.mubr.f32.mxu1 %v32966_v62  ;;  %v32968_v40 = vand.u32 4294901760, %v27759_v29  ;;  %v28316_v62 = vsub.f32 %v28218_v31, %v31146_v50  ;;  %32970 = vst [vmem:[#allocation59_spill] sm:$0xff] %v28318_v37  ;;  %v32974_v29 = vand.u32 4294901760, %v28047_v58 }
 0x391   : > { %32957 = vst [vmem:[#allocation100_spill] sm:$0xff] %v28279_v11  ;;  %20135 = vmatprep.subr.bf16.mxu1 %v32969_v23  ;;  %18547 = vmatmul.mubr.f32.vlgmr.msra.gmra.mrb[0].mxu0 %v32973_v7  ;;  %v28331_v8 = vsub.f32 %v4648_v45, %v28279_v11  ;;  %v4620_v63 = vsel %vm32978_vm14, %v4618_v47, %v32977_v21  ;;  %v32980_v2 = vand.u32 4294901760, %v32979_v4  ;;  %v32981_v45 = vand.u32 4294901760, %v28236_v42  ;;  %v22534_v47 = vld [vmem:[#allocation2 + $0x88] sm:$0xff] }
 0x392   : > { %v28328_v35 = vsub.f32 %v28047_v58, %v32974_v29  ;;  %20901 = vmatpush3.bf16.msra.mxu0 %v32964_v6  ;;  %v28343_v7 = vpack.c.bf16 %v10414_v20, %v10407_v55  ;;  %v5039_v32 = vsub.f32 %v28052_v36, %v32982_v22  ;;  %v32983_v21 = vand.u32 4294901760, %v27879_v54  ;;  %v32989_v6 = vld [vmem:[#allocation102_spill] sm:$0xff] }
 0x393   : > { %17206 = vmatmul.mubr.f32.gmra.mrb[2].mxu1 %v32968_v40  ;;  %v22533_v40 = vld [vmem:[#allocation2 + $0x80] sm:$0xff]  ;;  %18549 = vmatprep.mubr.f32.mxu0 %v32980_v2  ;;  %v28348_v29 = vsub.f32 %v28236_v42, %v32981_v45  ;;  %v32984_v55 = vand.u32 4294901760, %v28061_v16  ;;  %v28361_v4 = vand.u32 4294901760, %v4650_v52  ;;  %v32986_v2 = vand.u32 4294901760, %v27887_v5 }
 0x394   : > { %20137 = vmatpush3.bf16.msra.mxu1 %v32969_v23  ;;  %v28333_v50 = vand.u32 4294901760, %v22533_v40  ;;  %20903 = vmatprep.subr.bf16.mxu0 %v27811_v51  ;;  %v32987_v54 = vand.u32 4294901760, %v28066_v12  ;;  %v28373_v23 = vand.u32 4294901760, %v4620_v63  ;;  %v5033_v5 = vand.u32 4294901760, %v28328_v35 }
 0x395   : > { %17208 = vmatprep.mubr.f32.mxu1 %v32983_v21  ;;  %v10420_v20 = vsub.f32 %v28061_v16, %v32984_v55  ;;  %32985 = vst [vmem:[#allocation112_spill] sm:$0xff] %v28361_v4  ;;  %20139 = vmatprep.subr.bf16.mxu1 %v27924_v3  ;;  %v28371_v21 = vsub.f32 %v4622_v17, %v28318_v37  ;;  %v32990_v55 = vand.u32 4294901760, %v32989_v6  ;;  %v28383_v25 = vand.u32 4294901760, %v22534_v47 }
 0x396   : > { %32975 = vst [vmem:[#allocation83_spill] sm:$0xff] %v28333_v50  ;;  %v10427_v45 = vsub.f32 %v28066_v12, %v32987_v54  ;;  %32988 = vst [vmem:[#allocation124_spill] sm:$0xff] %v28373_v23  ;;  %v28381_v22 = vsub.f32 %v22533_v40, %v28333_v50  ;;  %20905 = vmatpush3.bf16.msra.mxu0 %v27811_v51  ;;  %v32992_v17 = vand.u32 4294901760, %v27816_v15  ;;  %v32993_v54 = vand.u32 4294901760, %v28100_v1  ;;  %v22535_v40 = vld [vmem:[#allocation2 + $0x90] sm:$0xff] }
 0x397   : > { %17209 = vmatmul.mubr.f32.gmra.mrb[4].mxu1 %v32986_v2  ;;  %18550 = vmatmul.mubr.f32.gmra.mrb[2].mxu0 %v32990_v55  ;;  %32991 = vst [vmem:[#allocation106_spill] sm:$0xff] %v28383_v25  ;;  %v32994_v35 = vand.u32 4294901760, %v28105_v43  ;;  %v28395_v2 = vand.u32 4294901760, %v22535_v40  ;;  %v32996_v51 = vand.u32 4294901760, %v27956_v24  ;;  %v32997_v15 = vand.u32 4294901760, %v28303_v59 }
 0x398   : > { %20141 = vmatpush3.bf16.msra.mxu1 %v27924_v3  ;;  %18552 = vmatprep.mubr.f32.mxu0 %v32992_v17  ;;  %v5046_v3 = vsub.f32 %v28100_v1, %v32993_v54  ;;  %v5040_v6 = vand.u32 4294901760, %v5039_v32  ;;  %v32998_v42 = vand.u32 4294901760, %v28306_v10  ;;  %v32999_v31 = vand.u32 4294901760, %v28004_v53 }
 0x399   : > { %v5053_v55 = vsub.f32 %v28105_v43, %v32994_v35  ;;  %32995 = vst [vmem:[#allocation67_spill] sm:$0xff] %v28395_v2  ;;  %20907 = vmatprep.subr.bf16.mxu0 %v27987_v33  ;;  %17211 = vmatprep.mubr.f32.mxu1 %v32996_v51  ;;  %v4911_v17 = vsub.f32 %v28303_v59, %v32997_v15  ;;  %v10421_v24 = vand.u32 4294901760, %v10420_v20  ;;  %v10428_v51 = vand.u32 4294901760, %v10427_v45  ;;  %v22536_v20 = vld [vmem:[#allocation2 + $0x98] sm:$0xff] }
 0x39a   : > { %v28406_v54 = vsub.f32 %v28306_v10, %v32998_v42  ;;  %v28409_v35 = vsub.f32 %v4650_v52, %v28361_v4  ;;  %20143 = vmatprep.subr.bf16.mxu1 %v28025_v34  ;;  %v28416_v15 = vsub.f32 %v4620_v63, %v28373_v23  ;;  %v33000_v32 = vand.u32 4294901760, %v27929_v14  ;;  %20909 = vmatpush3.bf16.msra.mxu0 %v27987_v33 }
 0x39b   : > { %17212 = vmatmul.mubr.f32.gmra.mrb[6].mxu1 %v32999_v31  ;;  %v33001_v42 = vand.u32 4294901760, %v28331_v8  ;;  %v28426_v31 = vsub.f32 %v22534_v47, %v28383_v25  ;;  %v28428_v45 = vand.u32 4294901760, %v22536_v20  ;;  %v33003_v63 = vand.u32 4294901760, %v27946_v39  ;;  %20911 = vmatprep.subr.bf16.mxu0 %v28271_v28 }
 0x39c   : > { %18553 = vmatmul.mubr.f32.gmra.mrb[4].mxu0 %v33000_v32  ;;  %20145 = vmatpush3.bf16.msra.mxu1 %v28025_v34  ;;  %v5047_v14 = vand.u32 4294901760, %v5046_v3  ;;  %v5054_v32 = vand.u32 4294901760, %v5053_v55  ;;  %v33004_v34 = vand.u32 4294901760, %v28114_v38  ;;  %v33005_v47 = vand.u32 4294901760, %v28202_v9 }
 0x39d   : > { %v4921_v52 = vsub.f32 %v28331_v8, %v33001_v42  ;;  %33002 = vst [vmem:[#allocation73_spill] sm:$0xff] %v28428_v45  ;;  %18555 = vmatprep.mubr.f32.mxu0 %v33003_v63  ;;  %v28437_v42 = vsub.f32 %v22535_v40, %v28395_v2  ;;  %v4912_v53 = vand.u32 4294901760, %v4911_v17  ;;  %v20150_v10 = vpack.c.bf16 %v5040_v6, %v5033_v5 }
 0x39e   : > { %v10434_v50 = vsub.f32 %v28114_v38, %v33004_v34  ;;  %17214 = vmatprep.mubr.f32.mxu1 %v33005_v47  ;;  %v33006_v33 = vand.u32 4294901760, %v28119_v13  ;;  %v31163_v3 = vand.u32 4294901760, %v28409_v35  ;;  %v33007_v55 = vand.u32 4294901760, %v28252_v48  ;;  %20147 = vmatprep.subr.bf16.mxu1 %v28311_v49 }
 0x39f   : > { %v33008_v40 = vand.u32 4294901760, %v28371_v21  ;;  %v33009_v17 = vand.u32 4294901760, %v28160_v57  ;;  %v33010_v6 = vand.u32 4294901760, %v28165_v18  ;;  %v33011_v47 = vand.u32 4294901760, %v27993_v56  ;;  %20913 = vmatpush3.bf16.msra.mxu0 %v28271_v28 }
 0x3a0   : > { %v10441_v39 = vsub.f32 %v28119_v13, %v33006_v33  ;;  %17215 = vmatmul.mubr.f32.gmra.mrb[8].mxu1 %v33007_v55  ;;  %v20918_v48 = vpack.c.bf16 %v10428_v51, %v10421_v24  ;;  %v33012_v33 = vand.u32 4294901760, %v28381_v22  ;;  %v28467_v9 = vsub.f32 %v22536_v20, %v28428_v45  ;;  %20915 = vmatprep.subr.bf16.mxu0 %v28343_v7 }
 0x3a1   : > { %v4931_v63 = vsub.f32 %v28371_v21, %v33008_v40  ;;  %v5060_v5 = vsub.f32 %v28160_v57, %v33009_v17  ;;  %v5067_v34 = vsub.f32 %v28165_v18, %v33010_v6  ;;  %18556 = vmatmul.mubr.f32.gmra.mrb[6].mxu0 %v33011_v47  ;;  %20149 = vmatpush3.bf16.msra.mxu1 %v28311_v49  ;;  %v31162_v40 = vand.u32 4294901760, %v28426_v31 }
 0x3a2   : > { %v10309_v55 = vsub.f32 %v28381_v22, %v33012_v33  ;;  %v33013_v17 = vand.u32 4294901760, %v28073_v46  ;;  %v4922_v6 = vand.u32 4294901760, %v4921_v52  ;;  %v20154_v56 = vpack.c.bf16 %v5054_v32, %v5047_v14  ;;  %20151 = vmatprep.subr.bf16.mxu1 %v20150_v10 }
 0x3a3   : > { %v10435_v47 = vand.u32 4294901760, %v10434_v50  ;;  %v31161_v49 = vand.u32 4294901760, %v28437_v42  ;;  %v33014_v24 = vand.u32 4294901760, %v28316_v62  ;;  %v10442_v51 = vand.u32 4294901760, %v10441_v39  ;;  %20917 = vmatpush3.bf16.msra.mxu0 %v28343_v7 }
 0x3a4   : > { %18558 = vmatprep.mubr.f32.mxu0 %v33013_v17  ;;  %v4941_v20 = vsub.f32 %v28409_v35, %v31163_v3  ;;  %v33015_v28 = vand.u32 4294901760, %v28174_v60  ;;  %v33016_v52 = vand.u32 4294901760, %v28179_v41  ;;  %v4932_v14 = vand.u32 4294901760, %v4931_v63  ;;  %20919 = vmatprep.subr.bf16.mxu0 %v20918_v48  ;;  %v33044_v3 = vld [vmem:[#allocation72_spill] sm:$0xff] }
 0x3a5   : > { %17217 = vmatprep.mubr.f32.mxu1 %v33014_v24  ;;  %v33017_v32 = vand.u32 4294901760, %v28416_v15  ;;  %v5061_v39 = vand.u32 4294901760, %v5060_v5  ;;  %v5068_v33 = vand.u32 4294901760, %v5067_v34  ;;  %v33018_v17 = vand.u32 4294901760, %v28293_v27  ;;  %20153 = vmatpush3.bf16.msra.mxu1 %v20150_v10 }
 0x3a6   : > { %v10448_v46 = vsub.f32 %v28174_v60, %v33015_v28  ;;  %v10455_v50 = vsub.f32 %v28179_v41, %v33016_v52  ;;  %17218 = vmatmul.mubr.f32.gmra.mrb[10].mxu1 %v4912_v53  ;;  %v10300_v24 = vand.u32 4294901760, %v28406_v54  ;;  %v10319_v28 = vsub.f32 %v28426_v31, %v31162_v40  ;;  %20155 = vmatprep.subr.bf16.mxu1 %v20154_v56 }
 0x3a7   : > { %v4951_v62 = vsub.f32 %v28416_v15, %v33017_v32  ;;  %18559 = vmatmul.mubr.f32.gmra.mrb[8].mxu0 %v33018_v17  ;;  %v31160_v53 = vand.u32 4294901760, %v28467_v9  ;;  %v33019_v63 = vand.u32 4294901760, %v28348_v29  ;;  %v10310_v52 = vand.u32 4294901760, %v10309_v55  ;;  %17220 = vmatprep.mubr.f32.mxu1 %v4922_v6 }
 0x3a8   : > { %v10329_v27 = vsub.f32 %v28437_v42, %v31161_v49  ;;  %v20922_v54 = vpack.c.bf16 %v10442_v51, %v10435_v47  ;;  %v4942_v10 = vand.u32 4294901760, %v4941_v20  ;;  %v10449_v5 = vand.u32 4294901760, %v10448_v46  ;;  %20921 = vmatpush3.bf16.msra.mxu0 %v20918_v48  ;;  %v33020_v47 = vld [vmem:[#allocation39_spill] sm:$0xff]  ;;  %v33021_v51 = vld [vmem:[#allocation108_spill] sm:$0xff]  ;;  %v33043_v49 = vld [vmem:[#allocation46_spill] sm:$0xff] }
 0x3a9   : > { %18561 = vmatprep.mubr.f32.mxu0 %v33019_v63  ;;  %v10456_v34 = vand.u32 4294901760, %v10455_v50  ;;  %v4952_v32 = vand.u32 4294901760, %v4951_v62  ;;  %v20158_v17 = vpack.c.bf16 %v5068_v33, %v5061_v39  ;;  %v10320_v7 = vand.u32 4294901760, %v10319_v28  ;;  %20157 = vmatpush3.bf16.msra.mxu1 %v20154_v56  ;;  %v33022_v56 = vld [vmem:[#allocation126_spill] sm:$0xff]  ;;  %v33024_v48 = vld [vmem:[#allocation76_spill] sm:$0xff]  ;;  %v33025_v62 = vld [vmem:[#allocation43_spill] sm:$0xff] }
 0x3aa   : > { %17221 = vmatmul.mubr.f32.gmra.mrb[12].mxu1 %v4932_v14  ;;  %v10339_v29 = vsub.f32 %v28467_v9, %v31160_v53  ;;  %v10330_v55 = vand.u32 4294901760, %v10329_v27  ;;  %20923 = vmatprep.subr.bf16.mxu0 %v20922_v54  ;;  %v20162_v20 = vpack.c.bf16 %v33021_v51, %v33020_v47  ;;  %v33023_v50 = vld [vmem:[#allocation142_spill] sm:$0xff]  ;;  %v33026_v39 = vld [vmem:[#allocation101_spill] sm:$0xff] }
 0x3ab   : > { %18562 = vmatmul.mubr.f32.gmra.mrb[10].mxu0 %v10300_v24  ;;  %17223 = vmatprep.mubr.f32.mxu1 %v4942_v10  ;;  %v20926_v6 = vpack.c.bf16 %v10456_v34, %v10449_v5  ;;  %v20930_v14 = vpack.c.bf16 %v33024_v48, %v33023_v50  ;;  %v33027_v33 = vld [vmem:[#allocation62_spill] sm:$0xff]  ;;  %v33028_v28 = vld [vmem:[#allocation85_spill] sm:$0xff]  ;;  %v33032_v10 = vld [vmem:[#allocation103_spill] sm:$0xff]  ;;  %v20170_v5 = vpack.c.bf16 %v27738_v30, %v27727_v61 }
 0x3ac   : > { %18564 = vmatprep.mubr.f32.mxu0 %v10310_v52  ;;  %20159 = vmatprep.subr.bf16.mxu1 %v20158_v17  ;;  %v10340_v46 = vand.u32 4294901760, %v10339_v29  ;;  %v20166_v24 = vpack.c.bf16 %v33027_v33, %v33026_v39  ;;  %v33029_v63 = vld [vmem:[#allocation129_spill] sm:$0xff]  ;;  %v33030_v52 = vld [vmem:[#allocation55_spill] sm:$0xff]  ;;  %v33031_v27 = vld [vmem:[#allocation70_spill] sm:$0xff] }
 0x3ad   : > { %20161 = vmatpush3.bf16.msra.mxu1 %v20158_v17  ;;  %20925 = vmatpush3.bf16.msra.mxu0 %v20922_v54  ;;  %v20934_v54 = vpack.c.bf16 %v33031_v27, %v33030_v52  ;;  %v33033_v34 = vld [vmem:[#allocation141_spill] sm:$0xff]  ;;  %v33035_v17 = vld [vmem:[#allocation28_spill] sm:$0xff] }
 0x3ae   : > { %17224 = vmatmul.mubr.f32.gmra.mrb[14].mxu1 %v4952_v32  ;;  %20927 = vmatprep.subr.bf16.mxu0 %v20926_v6  ;;  %v33034_v32 = vld [vmem:[#allocation51_spill] sm:$0xff]  ;;  %v33036_v29 = vld [vmem:[#allocation64_spill] sm:$0xff]  ;;  %v33042_v53 = vld [vmem:[#allocation49_spill] sm:$0xff] }
 0x3af   : > { %18565 = vmatmul.mubr.f32.gmra.mrb[12].mxu0 %v10320_v7  ;;  %17258 = vmatprep.mubr.f32.mxu1 %v33022_v56  ;;  %v20938_v7 = vpack.c.bf16 %v27802_v19, %v27794_v0  ;;  %v20942_v40 = vpack.c.bf16 %v33043_v49, %v33042_v53 }
 0x3b0   : > { %18567 = vmatprep.mubr.f32.mxu0 %v10330_v55  ;;  %20163 = vmatprep.subr.bf16.mxu1 %v20162_v20  ;;  %v33037_v55 = vld [vmem:[#allocation122_spill] sm:$0xff] }
 0x3b1   : > { %20929 = vmatpush3.bf16.msra.mxu0 %v20926_v6  ;;  %v33038_v6 = vld [vmem:[#allocation87_spill] sm:$0xff] }
 0x3b2   : > { %17259 = vmatmul.mubr.f32.vlgmr.msra.gmra.mrb[0].mxu1 %v33025_v62  ;;  %20931 = vmatprep.subr.bf16.mxu0 %v20930_v14 }
 0x3b3   : > { %18568 = vmatmul.mubr.f32.gmra.mrb[14].mxu0 %v10340_v46  ;;  %20165 = vmatpush3.bf16.msra.mxu1 %v20162_v20  ;;  %v20174_v20 = vpack.c.bf16 %v33038_v6, %v33037_v55  ;;  %v33039_v46 = vld [vmem:[#allocation148_spill] sm:$0xff] }
 0x3b4   : > { %18602 = vmatprep.mubr.f32.mxu0 %v33028_v28  ;;  %17261 = vmatprep.mubr.f32.mxu1 %v33029_v63  ;;  %v33053_v63 = vld [vmem:[#allocation89_spill] sm:$0xff] }
 0x3b5   : > { %20167 = vmatprep.subr.bf16.mxu1 %v20166_v24 }
 0x3b6   : > { %17262 = vmatmul.mubr.f32.gmra.mrb[2].mxu1 %v33032_v10  ;;  %v33052_v10 = vld [vmem:[#allocation90_spill] sm:$0xff] }
 0x3b7   : > { %18603 = vmatmul.mubr.f32.vlgmr.msra.gmra.mrb[0].mxu0 %v33033_v34  ;;  %20169 = vmatpush3.bf16.msra.mxu1 %v20166_v24  ;;  %v33040_v24 = vld [vmem:[#allocation144_spill] sm:$0xff]  ;;  %v33047_v34 = vld [vmem:[#allocation45_spill] sm:$0xff] }
 0x3b8   : > { %20933 = vmatpush3.bf16.msra.mxu0 %v20930_v14  ;;  %18605 = vmatprep.mubr.f32.mxu0 %v33034_v32  ;;  %v33041_v14 = vld [vmem:[#allocation114_spill] sm:$0xff] }
 0x3b9   : > { %20935 = vmatprep.subr.bf16.mxu0 %v20934_v54  ;;  %17264 = vmatprep.mubr.f32.mxu1 %v33035_v17  ;;  %v33046_v17 = vld [vmem:[#allocation30_spill] sm:$0xff] }
 0x3ba   : > { %17265 = vmatmul.mubr.f32.gmra.mrb[4].mxu1 %v33036_v29  ;;  %20171 = vmatprep.subr.bf16.mxu1 %v20170_v5  ;;  %v33045_v29 = vld [vmem:[#allocation50_spill] sm:$0xff] }
 0x3bb   : > { %18606 = vmatmul.mubr.f32.gmra.mrb[2].mxu0 %v33039_v46  ;;  %20173 = vmatpush3.bf16.msra.mxu1 %v20170_v5  ;;  %v20178_v32 = vpack.c.bf16 %v33046_v17, %v33045_v29  ;;  %v33048_v5 = vld [vmem:[#allocation97_spill] sm:$0xff] }
 0x3bc   : > { %20937 = vmatpush3.bf16.msra.mxu0 %v20934_v54  ;;  %18608 = vmatprep.mubr.f32.mxu0 %v33040_v24  ;;  %v33049_v54 = vld [vmem:[#allocation145_spill] sm:$0xff] }
 0x3bd   : > { %20939 = vmatprep.subr.bf16.mxu0 %v20938_v7  ;;  %17267 = vmatprep.mubr.f32.mxu1 %v33041_v14  ;;  %v33050_v24 = vld [vmem:[#allocation37_spill] sm:$0xff] }
 0x3be   : > { %17268 = vmatmul.mubr.f32.gmra.mrb[6].mxu1 %v33044_v3  ;;  %20175 = vmatprep.subr.bf16.mxu1 %v20174_v20  ;;  %v33051_v14 = vld [vmem:[#allocation81_spill] sm:$0xff]  ;;  %v20182_v3 = vpack.c.bf16 %v28052_v36, %v28047_v58  ;;  %v33057_v58 = vld [vmem:[#allocation78_spill] sm:$0xff]  ;;  %v20954_v36 = vpack.c.bf16 %v28119_v13, %v28114_v38  ;;  %v33063_v38 = vld [vmem:[#allocation71_spill] sm:$0xff] }
 0x3bf   : > { %18609 = vmatmul.mubr.f32.gmra.mrb[4].mxu0 %v33047_v34  ;;  %20177 = vmatpush3.bf16.msra.mxu1 %v20174_v20  ;;  %v20946_v46 = vpack.c.bf16 %v33051_v14, %v33050_v24  ;;  %v33054_v20 = vld [vmem:[#allocation110_spill] sm:$0xff]  ;;  %v33090_v34 = vld [vmem:[#allocation91_spill] sm:$0xff] }
 0x3c0   : > { %20941 = vmatpush3.bf16.msra.mxu0 %v20938_v7  ;;  %18611 = vmatprep.mubr.f32.mxu0 %v33048_v5  ;;  %v33055_v7 = vld [vmem:[#allocation128_spill] sm:$0xff]  ;;  %v33056_v5 = vld [vmem:[#allocation31_spill] sm:$0xff]  ;;  %v33060_v13 = vld [vmem:[#allocation66_spill] sm:$0xff] }
 0x3c1   : > { %20943 = vmatprep.subr.bf16.mxu0 %v20942_v40  ;;  %17270 = vmatprep.mubr.f32.mxu1 %v33049_v54  ;;  %v20950_v54 = vpack.c.bf16 %v28066_v12, %v28061_v16  ;;  %v20190_v12 = vpack.c.bf16 %v28165_v18, %v28160_v57  ;;  %v33058_v16 = vld [vmem:[#allocation83_spill] sm:$0xff]  ;;  %v33061_v57 = vld [vmem:[#allocation140_spill] sm:$0xff] }
 0x3c2   : > { %17271 = vmatmul.mubr.f32.gmra.mrb[8].mxu1 %v33052_v10  ;;  %20179 = vmatprep.subr.bf16.mxu1 %v20178_v32  ;;  %v20186_v10 = vpack.c.bf16 %v28105_v43, %v28100_v1  ;;  %v20958_v1 = vpack.c.bf16 %v28179_v41, %v28174_v60  ;;  %v33059_v18 = vld [vmem:[#allocation147_spill] sm:$0xff]  ;;  %v33062_v41 = vld [vmem:[#allocation104_spill] sm:$0xff]  ;;  %v33064_v43 = vld [vmem:[#allocation149_spill] sm:$0xff] }
 0x3c3   : > { %18612 = vmatmul.mubr.f32.gmra.mrb[6].mxu0 %v33053_v63  ;;  %20181 = vmatpush3.bf16.msra.mxu1 %v20178_v32  ;;  %v33065_v60 = vld [vmem:[#allocation92_spill] sm:$0xff]  ;;  %v33069_v32 = vld [vmem:[#allocation113_spill] sm:$0xff] }
 0x3c4   : > { %20945 = vmatpush3.bf16.msra.mxu0 %v20942_v40  ;;  %18614 = vmatprep.mubr.f32.mxu0 %v33054_v20  ;;  %v33067_v40 = vld [vmem:[#allocation34_spill] sm:$0xff]  ;;  %v33088_v20 = vld [vmem:[#allocation133_spill] sm:$0xff] }
 0x3c5   : > { %20947 = vmatprep.subr.bf16.mxu0 %v20946_v46  ;;  %17273 = vmatprep.mubr.f32.mxu1 %v33055_v7  ;;  %v33087_v7 = vld [vmem:[#allocation42_spill] sm:$0xff]  ;;  %v33089_v63 = vld [vmem:[#allocation125_spill] sm:$0xff] }
 0x3c6   : > { %17274 = vmatmul.mubr.f32.gmra.mrb[10].mxu1 %v28254_v26  ;;  %20183 = vmatprep.subr.bf16.mxu1 %v20182_v3  ;;  %v33086_v26 = vld [vmem:[#allocation65_spill] sm:$0xff] }
 0x3c7   : > { %18615 = vmatmul.mubr.f32.gmra.mrb[8].mxu0 %v33056_v5  ;;  %20185 = vmatpush3.bf16.msra.mxu1 %v20182_v3  ;;  %v33066_v3 = vld [vmem:[#allocation80_spill] sm:$0xff]  ;;  %v33085_v5 = vld [vmem:[#allocation115_spill] sm:$0xff] }
 0x3c8   : > { %20949 = vmatpush3.bf16.msra.mxu0 %v20946_v46  ;;  %18617 = vmatprep.mubr.f32.mxu0 %v33057_v58  ;;  %v33070_v46 = vld [vmem:[#allocation29_spill] sm:$0xff]  ;;  %v33084_v58 = vld [vmem:[#allocation74_spill] sm:$0xff] }
 0x3c9   : > { %20951 = vmatprep.subr.bf16.mxu0 %v20950_v54  ;;  %17276 = vmatprep.mubr.f32.mxu1 %v28279_v11  ;;  %v33083_v11 = vld [vmem:[#allocation84_spill] sm:$0xff] }
 0x3ca   : > { %17277 = vmatmul.mubr.f32.gmra.mrb[12].mxu1 %v28318_v37  ;;  %20187 = vmatprep.subr.bf16.mxu1 %v20186_v10  ;;  %v33082_v37 = vld [vmem:[#allocation98_spill] sm:$0xff] }
 0x3cb   : > { %18618 = vmatmul.mubr.f32.gmra.mrb[10].mxu0 %v28256_v44  ;;  %20189 = vmatpush3.bf16.msra.mxu1 %v20186_v10  ;;  %v33068_v10 = vld [vmem:[#allocation75_spill] sm:$0xff]  ;;  %v33081_v44 = vld [vmem:[#allocation121_spill] sm:$0xff] }
 0x3cc   : > { %20953 = vmatpush3.bf16.msra.mxu0 %v20950_v54  ;;  %18620 = vmatprep.mubr.f32.mxu0 %v33058_v16  ;;  %v33071_v54 = vld [vmem:[#allocation99_spill] sm:$0xff]  ;;  %v33080_v16 = vld [vmem:[#allocation41_spill] sm:$0xff] }
 0x3cd   : > { %20955 = vmatprep.subr.bf16.mxu0 %v20954_v36  ;;  %17279 = vmatprep.mubr.f32.mxu1 %v28361_v4  ;;  %v33079_v4 = vld [vmem:[#allocation134_spill] sm:$0xff] }
 0x3ce   : > { %17280 = vmatmul.mubr.f32.gmra.mrb[14].mxu1 %v28373_v23  ;;  %20191 = vmatprep.subr.bf16.mxu1 %v20190_v12  ;;  %v33078_v23 = vld [vmem:[#allocation136_spill] sm:$0xff] }
 0x3cf   : > { %18621 = vmatmul.mubr.f32.gmra.mrb[12].mxu0 %v28383_v25  ;;  %20193 = vmatpush3.bf16.msra.mxu1 %v20190_v12  ;;  %v33073_v12 = vld [vmem:[#allocation132_spill] sm:$0xff] }
 0x3d0   : > { %20957 = vmatpush3.bf16.msra.mxu0 %v20954_v36  ;;  %18623 = vmatprep.mubr.f32.mxu0 %v28395_v2  ;;  %v33072_v36 = vld [vmem:[#allocation123_spill] sm:$0xff]  ;;  %v33076_v2 = vld [vmem:[#allocation48_spill] sm:$0xff] }
 0x3d1   : > { %20959 = vmatprep.subr.bf16.mxu0 %v20958_v1  ;;  %17314 = vmatprep.mubr.f32.mxu1 %v33059_v18  ;;  %v33077_v25 = vld [vmem:[#allocation32_spill] sm:$0xff] }
 0x3d2   : > { %17315 = vmatmul.mubr.f32.vlgmr.msra.gmra.mrb[0].mxu1 %v33060_v13  ;;  %20195 = vmatprep.subr.bf16.mxu1 %v33061_v57 }
 0x3d3   : > { %18624 = vmatmul.mubr.f32.gmra.mrb[14].mxu0 %v28428_v45  ;;  %20197 = vmatpush3.bf16.msra.mxu1 %v33061_v57  ;;  %v33075_v45 = vld [vmem:[#allocation60_spill] sm:$0xff] }
 0x3d4   : > { %20961 = vmatpush3.bf16.msra.mxu0 %v20958_v1  ;;  %18658 = vmatprep.mubr.f32.mxu0 %v33062_v41  ;;  %v33074_v1 = vld [vmem:[#allocation96_spill] sm:$0xff] }
 0x3d5   : > { %20963 = vmatprep.subr.bf16.mxu0 %v33063_v38  ;;  %17317 = vmatprep.mubr.f32.mxu1 %v33064_v43 }
 0x3d6   : > { %17318 = vmatmul.mubr.f32.gmra.mrb[2].mxu1 %v33065_v60  ;;  %20199 = vmatprep.subr.bf16.mxu1 %v33066_v3 }
 0x3d7   : > { %18659 = vmatmul.mubr.f32.vlgmr.msra.gmra.mrb[0].mxu0 %v33067_v40  ;;  %20201 = vmatpush3.bf16.msra.mxu1 %v33066_v3 }
 0x3d8   : > { %20965 = vmatpush3.bf16.msra.mxu0 %v33063_v38  ;;  %18661 = vmatprep.mubr.f32.mxu0 %v33068_v10  ;;  %v33101_v38 = vand.u32 4294901760, %v33023_v50  ;;  %v33107_v50 = vand.u32 4294901760, %v33064_v43  ;;  %v33114_v43 = vand.u32 4294901760, %v33068_v10  ;;  %v33121_v10 = vand.u32 4294901760, %v33073_v12 }
 0x3d9   : > { %20967 = vmatprep.subr.bf16.mxu0 %v33069_v32  ;;  %17320 = vmatprep.mubr.f32.mxu1 %v33070_v46 }
 0x3da   : > { %17321 = vmatmul.mubr.f32.gmra.mrb[4].mxu1 %v33071_v54  ;;  %20203 = vmatprep.subr.bf16.mxu1 %v33072_v36 }
 0x3db   : > { %18662 = vmatmul.mubr.f32.gmra.mrb[2].mxu0 %v33073_v12  ;;  %20205 = vmatpush3.bf16.msra.mxu1 %v33072_v36  ;;  %v33097_v36 = vand.u32 4294901760, %v33020_v47  ;;  %v33102_v47 = vand.u32 4294901760, %v33024_v48  ;;  %v33108_v48 = vand.u32 4294901760, %v33030_v52  ;;  %v33115_v52 = vand.u32 4294901760, %v33070_v46 }
 0x3dc   : > { %20969 = vmatpush3.bf16.msra.mxu0 %v33069_v32  ;;  %18664 = vmatprep.mubr.f32.mxu0 %v33074_v1  ;;  %v33098_v32 = vand.u32 4294901760, %v33021_v51  ;;  %v33103_v51 = vand.u32 4294901760, %v33060_v13  ;;  %v33111_v13 = vand.u32 4294901760, %v27727_v61  ;;  %v33122_v46 = vand.u32 4294901760, %v33074_v1 }
 0x3dd   : > { %20971 = vmatprep.subr.bf16.mxu0 %v33075_v45  ;;  %17323 = vmatprep.mubr.f32.mxu1 %v33076_v2  ;;  %v20994_v28 = vpack.c.bf16 %v33102_v47, %v33101_v38  ;;  %v33112_v38 = vand.u32 4294901760, %v27738_v30  ;;  %v33118_v30 = vand.u32 4294901760, %v33071_v54  ;;  %v33125_v54 = vand.u32 4294901760, %v33043_v49 }
 0x3de   : > { %17324 = vmatmul.mubr.f32.gmra.mrb[6].mxu1 %v33077_v25  ;;  %20207 = vmatprep.subr.bf16.mxu1 %v33078_v23  ;;  %v20226_v3 = vpack.c.bf16 %v33098_v32, %v33097_v36  ;;  %v33104_v32 = vand.u32 4294901760, %v33026_v39  ;;  %v33105_v36 = vand.u32 4294901760, %v33027_v33  ;;  %v33110_v33 = vand.u32 4294901760, %v33065_v60 }
 0x3df   : > { %18665 = vmatmul.mubr.f32.gmra.mrb[4].mxu0 %v33079_v4  ;;  %20209 = vmatpush3.bf16.msra.mxu1 %v33078_v23  ;;  %v33091_v23 = vld [vmem:[#allocation120_spill] sm:$0xff]  ;;  %v33117_v60 = vand.u32 4294901760, %v27802_v19  ;;  %v33124_v19 = vand.u32 4294901760, %v33042_v53  ;;  %v33127_v12 = vand.u32 4294901760, %v33045_v29  ;;  %v33128_v47 = vand.u32 4294901760, %v33046_v17 }
 0x3e0   : > { %20973 = vmatpush3.bf16.msra.mxu0 %v33075_v45  ;;  %18667 = vmatprep.mubr.f32.mxu0 %v33080_v16  ;;  %v33094_v45 = vld [vmem:[#allocation94_spill] sm:$0xff]  ;;  %v33129_v1 = vand.u32 4294901760, %v33079_v4  ;;  %v33131_v49 = vand.u32 4294901760, %v33082_v37  ;;  %v33133_v53 = vand.u32 4294901760, %v33051_v14  ;;  %v33134_v17 = vand.u32 4294901760, %v33083_v11 }
 0x3e1   : > { %20975 = vmatprep.subr.bf16.mxu0 %v33081_v44  ;;  %17326 = vmatprep.mubr.f32.mxu1 %v33082_v37  ;;  %v33135_v4 = vand.u32 4294901760, %v33085_v5  ;;  %v33137_v37 = vand.u32 4294901760, %v33088_v20  ;;  %v33139_v14 = vld [vmem:[#allocation138_spill] sm:$0xff] }
 0x3e2   : > { %17327 = vmatmul.mubr.f32.gmra.mrb[8].mxu1 %v33083_v11  ;;  %20211 = vmatprep.subr.bf16.mxu1 %v33084_v58  ;;  %v33140_v11 = vand.u32 4294901760, %v33090_v34 }
 0x3e3   : > { %18668 = vmatmul.mubr.f32.gmra.mrb[6].mxu0 %v33085_v5  ;;  %20213 = vmatpush3.bf16.msra.mxu1 %v33084_v58  ;;  %v33092_v58 = vld [vmem:[#allocation137_spill] sm:$0xff]  ;;  %v33141_v5 = vand.u32 4294901760, %v33091_v23 }
 0x3e4   : > { %20977 = vmatpush3.bf16.msra.mxu0 %v33081_v44  ;;  %18670 = vmatprep.mubr.f32.mxu0 %v33086_v26  ;;  %v33093_v44 = vld [vmem:[#allocation88_spill] sm:$0xff] }
 0x3e5   : > { %20979 = vmatprep.subr.bf16.mxu0 %v33087_v7  ;;  %17329 = vmatprep.mubr.f32.mxu1 %v33088_v20  ;;  %v33144_v20 = vand.u32 4294901760, %v28371_v21 }
 0x3e6   : > { %17330 = vmatmul.mubr.f32.gmra.mrb[10].mxu1 %v28303_v59  ;;  %20215 = vmatprep.subr.bf16.mxu1 %v33089_v63 }
 0x3e7   : > { %18671 = vmatmul.mubr.f32.gmra.mrb[8].mxu0 %v33090_v34  ;;  %20217 = vmatpush3.bf16.msra.mxu1 %v33089_v63  ;;  %v33095_v63 = vld [vmem:[#allocation117_spill] sm:$0xff]  ;;  %v33148_v34 = vld [vmem:[#allocation131_spill] sm:$0xff] }
 0x3e8   : > { %20981 = vmatpush3.bf16.msra.mxu0 %v33087_v7  ;;  %18673 = vmatprep.mubr.f32.mxu0 %v33091_v23  ;;  %v33096_v7 = vld [vmem:[#allocation57_spill] sm:$0xff]  ;;  %v33147_v23 = vand.u32 4294901760, %v28381_v22 }
 0x3e9   : > { %20983 = vmatprep.subr.bf16.mxu0 %v33092_v58  ;;  %17332 = vmatprep.mubr.f32.mxu1 %v28331_v8 }
 0x3ea   : > { %17333 = vmatmul.mubr.f32.gmra.mrb[12].mxu1 %v28371_v21  ;;  %20219 = vmatprep.subr.bf16.mxu1 %v33093_v44  ;;  %v33150_v21 = vand.u32 4294901760, %v28416_v15 }
 0x3eb   : > { %18674 = vmatmul.mubr.f32.gmra.mrb[10].mxu0 %v33094_v45  ;;  %20221 = vmatpush3.bf16.msra.mxu1 %v33093_v44  ;;  %v33099_v44 = vld [vmem:[#allocation68_spill] sm:$0xff] }
 0x3ec   : > { %20985 = vmatpush3.bf16.msra.mxu0 %v33092_v58  ;;  %18676 = vmatprep.mubr.f32.mxu0 %v28381_v22  ;;  %v33100_v58 = vand.u32 4294901760, %v33059_v18  ;;  %v33109_v18 = vand.u32 4294901760, %v33031_v27  ;;  %v33116_v27 = vand.u32 4294901760, %v27794_v0  ;;  %v33123_v0 = vand.u32 4294901760, %v33076_v2 }
 0x3ed   : > { %20987 = vmatprep.subr.bf16.mxu0 %v33095_v63  ;;  %17335 = vmatprep.mubr.f32.mxu1 %v28409_v35  ;;  %v33130_v2 = vand.u32 4294901760, %v33080_v16  ;;  %v33136_v16 = vand.u32 4294901760, %v33086_v26  ;;  %v33142_v26 = vld [vmem:[#allocation63_spill] sm:$0xff]  ;;  %v33153_v22 = vand.u32 4294901760, %v28437_v42 }
 0x3ee   : > { %17336 = vmatmul.mubr.f32.gmra.mrb[14].mxu1 %v28416_v15  ;;  %20223 = vmatprep.subr.bf16.mxu1 %v33096_v7  ;;  %v20998_v39 = vpack.c.bf16 %v33109_v18, %v33108_v48  ;;  %v21002_v61 = vpack.c.bf16 %v33117_v60, %v33116_v27  ;;  %v33156_v15 = vld [vmem:[#allocation85_spill] sm:$0xff]  ;;  %v33159_v48 = vld [vmem:[#allocation103_spill] sm:$0xff]  ;;  %v33160_v18 = vld [vmem:[#allocation80_spill] sm:$0xff] }
 0x3ef   : > { %18677 = vmatmul.mubr.f32.gmra.mrb[12].mxu0 %v28426_v31  ;;  %20225 = vmatpush3.bf16.msra.mxu1 %v33096_v7  ;;  %v20230_v7 = vpack.c.bf16 %v33105_v36, %v33104_v32  ;;  %v33143_v32 = vand.u32 4294901760, %v28331_v8  ;;  %v33146_v36 = vand.u32 4294901760, %v33094_v45  ;;  %v33149_v8 = vand.u32 4294901760, %v28409_v35  ;;  %v33171_v27 = vld [vmem:[#allocation72_spill] sm:$0xff] }
 0x3f0   : > { %20989 = vmatpush3.bf16.msra.mxu0 %v33095_v63  ;;  %18679 = vmatprep.mubr.f32.mxu0 %v28437_v42  ;;  %v33152_v45 = vand.u32 4294901760, %v28426_v31  ;;  %v33155_v35 = vand.u32 4294901760, %v28467_v9  ;;  %v33157_v31 = vld [vmem:[#allocation71_spill] sm:$0xff]  ;;  %v33158_v42 = vld [vmem:[#allocation129_spill] sm:$0xff]  ;;  %v33172_v60 = vld [vmem:[#allocation136_spill] sm:$0xff] }
 0x3f1   : > { %20991 = vmatprep.subr.bf16.mxu0 %v33099_v44  ;;  %17370 = vmatprep.mubr.f32.mxu1 %v33100_v58  ;;  %v33106_v58 = vand.u32 4294901760, %v33062_v41  ;;  %v33113_v41 = vand.u32 4294901760, %v33067_v40  ;;  %v33119_v40 = vand.u32 4294901760, %v33037_v55  ;;  %v21006_v55 = vpack.c.bf16 %v33125_v54, %v33124_v19  ;;  %v33181_v19 = vld [vmem:[#allocation42_spill] sm:$0xff]  ;;  %v33182_v54 = vld [vmem:[#allocation128_spill] sm:$0xff] }
 0x3f2   : > { %17371 = vmatmul.mubr.f32.vlgmr.msra.gmra.mrb[0].mxu1 %v33103_v51  ;;  %20227 = vmatprep.subr.bf16.mxu1 %v20226_v3  ;;  %v20242_v51 = vpack.c.bf16 %v33128_v47, %v33127_v12  ;;  %v33185_v12 = vld [vmem:[#allocation31_spill] sm:$0xff]  ;;  %v33186_v47 = vld [vmem:[#allocation78_spill] sm:$0xff] }
 0x3f3   : > { %18680 = vmatmul.mubr.f32.gmra.mrb[14].mxu0 %v28467_v9  ;;  %20229 = vmatpush3.bf16.msra.mxu1 %v20226_v3  ;;  %v20234_v3 = vpack.c.bf16 %v33112_v38, %v33111_v13  ;;  %v33162_v9 = vld [vmem:[#allocation51_spill] sm:$0xff]  ;;  %v33165_v13 = vld [vmem:[#allocation64_spill] sm:$0xff] }
 0x3f4   : > { %20993 = vmatpush3.bf16.msra.mxu0 %v33099_v44  ;;  %18714 = vmatprep.mubr.f32.mxu0 %v33106_v58  ;;  %v33151_v58 = vld [vmem:[#allocation40_spill] sm:$0xff]  ;;  %v33166_v38 = vld [vmem:[#allocation123_spill] sm:$0xff] }
 0x3f5   : > { %20995 = vmatprep.subr.bf16.mxu0 %v20994_v28  ;;  %17373 = vmatprep.mubr.f32.mxu1 %v33107_v50  ;;  %v33154_v50 = vld [vmem:[#allocation44_spill] sm:$0xff] }
 0x3f6   : > { %17374 = vmatmul.mubr.f32.gmra.mrb[2].mxu1 %v33110_v33  ;;  %20231 = vmatprep.subr.bf16.mxu1 %v20230_v7  ;;  %v33164_v33 = vld [vmem:[#allocation28_spill] sm:$0xff] }
 0x3f7   : > { %18715 = vmatmul.mubr.f32.vlgmr.msra.gmra.mrb[0].mxu0 %v33113_v41  ;;  %20233 = vmatpush3.bf16.msra.mxu1 %v20230_v7  ;;  %v33168_v41 = vld [vmem:[#allocation144_spill] sm:$0xff] }
 0x3f8   : > { %20997 = vmatpush3.bf16.msra.mxu0 %v20994_v28  ;;  %18717 = vmatprep.mubr.f32.mxu0 %v33114_v43  ;;  %v33120_v28 = vand.u32 4294901760, %v33038_v6  ;;  %v33126_v6 = vand.u32 4294901760, %v33077_v25  ;;  %v33132_v25 = vand.u32 4294901760, %v33050_v24  ;;  %v33138_v24 = vand.u32 4294901760, %v28303_v59  ;;  %v33145_v59 = vld [vmem:[#allocation77_spill] sm:$0xff]  ;;  %v33169_v43 = vld [vmem:[#allocation60_spill] sm:$0xff] }
 0x3f9   : > { %20999 = vmatprep.subr.bf16.mxu0 %v20998_v39  ;;  %17376 = vmatprep.mubr.f32.mxu1 %v33115_v52  ;;  %v33170_v52 = vld [vmem:[#allocation114_spill] sm:$0xff] }
 0x3fa   : > { %17377 = vmatmul.mubr.f32.gmra.mrb[4].mxu1 %v33118_v30  ;;  %20235 = vmatprep.subr.bf16.mxu1 %v20234_v3  ;;  %v20238_v7 = vpack.c.bf16 %v33120_v28, %v33119_v40  ;;  %v21010_v29 = vpack.c.bf16 %v33133_v53, %v33132_v25  ;;  %v33174_v30 = vld [vmem:[#allocation97_spill] sm:$0xff]  ;;  %v33190_v25 = vld [vmem:[#allocation88_spill] sm:$0xff] }
 0x3fb   : > { %18718 = vmatmul.mubr.f32.gmra.mrb[2].mxu0 %v33121_v10  ;;  %20237 = vmatpush3.bf16.msra.mxu1 %v20234_v3  ;;  %v33167_v3 = vld [vmem:[#allocation148_spill] sm:$0xff]  ;;  %v33175_v40 = vld [vmem:[#allocation121_spill] sm:$0xff]  ;;  %v33178_v10 = vld [vmem:[#allocation74_spill] sm:$0xff] }
 0x3fc   : > { %21001 = vmatpush3.bf16.msra.mxu0 %v20998_v39  ;;  %18720 = vmatprep.mubr.f32.mxu0 %v33122_v46  ;;  %v33161_v39 = vld [vmem:[#allocation141_spill] sm:$0xff] }
 0x3fd   : > { %21003 = vmatprep.subr.bf16.mxu0 %v21002_v61  ;;  %17379 = vmatprep.mubr.f32.mxu1 %v33123_v0  ;;  %v33176_v28 = vld [vmem:[#allocation145_spill] sm:$0xff]  ;;  %v33180_v0 = vld [vmem:[#allocation110_spill] sm:$0xff] }
 0x3fe   : > { %17380 = vmatmul.mubr.f32.gmra.mrb[6].mxu1 %v33126_v6  ;;  %20239 = vmatprep.subr.bf16.mxu1 %v20238_v7  ;;  %v33179_v46 = vld [vmem:[#allocation89_spill] sm:$0xff] }
 0x3ff   : > { %18721 = vmatmul.mubr.f32.gmra.mrb[4].mxu0 %v33129_v1  ;;  %20241 = vmatpush3.bf16.msra.mxu1 %v20238_v7  ;;  %v33177_v7 = vld [vmem:[#allocation90_spill] sm:$0xff]  ;;  %v33184_v6 = vld [vmem:[#allocation125_spill] sm:$0xff]  ;;  %v33188_v1 = vld [vmem:[#allocation100_spill] sm:$0xff] }
 0x400   : > { %21005 = vmatpush3.bf16.msra.mxu0 %v21002_v61  ;;  %18723 = vmatprep.mubr.f32.mxu0 %v33130_v2  ;;  %v33173_v61 = vld [vmem:[#allocation45_spill] sm:$0xff]  ;;  %v28795_v2 = vld [vmem:[#allocation4 + $0x400] sm:$0xff] }
 0x401   : > { %21007 = vmatprep.subr.bf16.mxu0 %v21006_v55  ;;  %17382 = vmatprep.mubr.f32.mxu1 %v33131_v49  ;;  %v33189_v49 = vld [vmem:[#allocation59_spill] sm:$0xff]  ;;  %v28799_v53 = vld [vmem:[#allocation4 + $0x408] sm:$0xff] }
 0x402   : > { %17383 = vmatmul.mubr.f32.gmra.mrb[8].mxu1 %v33134_v17  ;;  %20243 = vmatprep.subr.bf16.mxu1 %v20242_v51  ;;  %v33192_v17 = vld [vmem:[#allocation83_spill] sm:$0xff] }
 0x403   : > { %18724 = vmatmul.mubr.f32.gmra.mrb[6].mxu0 %v33135_v4  ;;  %20245 = vmatpush3.bf16.msra.mxu1 %v20242_v51  ;;  %v33187_v51 = vld [vmem:[#allocation137_spill] sm:$0xff]  ;;  %v11425_v4 = vand.u32 4294901760, %v28795_v2 }
 0x404   : > { %21009 = vmatpush3.bf16.msra.mxu0 %v21006_v55  ;;  %18726 = vmatprep.mubr.f32.mxu0 %v33136_v16  ;;  %v33183_v55 = vld [vmem:[#allocation56_spill] sm:$0xff] }
 0x405   : > { %21011 = vmatprep.subr.bf16.mxu0 %v21010_v29  ;;  %17385 = vmatprep.mubr.f32.mxu1 %v33137_v37  ;;  %v33193_v16 = vld [vmem:[#allocation112_spill] sm:$0xff]  ;;  %v11428_v37 = vand.u32 4294901760, %v28799_v53 }
 0x406   : > { %17386 = vmatmul.mubr.f32.gmra.mrb[10].mxu1 %v33138_v24  ;;  %20247 = vmatprep.subr.bf16.mxu1 %v33139_v14  ;;  %v28809_v24 = vld [vmem:[#allocation4 + $0x410] sm:$0xff] }
 0x407   : > { %18727 = vmatmul.mubr.f32.gmra.mrb[8].mxu0 %v33140_v11  ;;  %20249 = vmatpush3.bf16.msra.mxu1 %v33139_v14  ;;  %v28811_v14 = vld [vmem:[#allocation4 + $0x418] sm:$0xff]  ;;  %v28813_v11 = vld [vmem:[#allocation2 + $0x20] sm:$0xff] }
 0x408   : > { %21013 = vmatpush3.bf16.msra.mxu0 %v21010_v29  ;;  %18729 = vmatprep.mubr.f32.mxu0 %v33141_v5  ;;  %v33191_v29 = vld [vmem:[#allocation86_spill] sm:$0xff]  ;;  %v31195_v5 = vrot.slane %v28813_v11, 1 }
 0x409   : > { %21015 = vmatprep.subr.bf16.mxu0 %v33142_v26  ;;  %17388 = vmatprep.mubr.f32.mxu1 %v33143_v32 }
 0x40a   : > { %17389 = vmatmul.mubr.f32.gmra.mrb[12].mxu1 %v33144_v20  ;;  %20251 = vmatprep.subr.bf16.mxu1 %v33145_v59  ;;  %v22539_v20 = vld [vmem:[#allocation2 + $0x30] sm:$0xff] }
 0x40b   : > { %18730 = vmatmul.mubr.f32.gmra.mrb[10].mxu0 %v33146_v36  ;;  %20253 = vmatpush3.bf16.msra.mxu1 %v33145_v59  ;;  %v8723_v59 = vrot.slane %v22539_v20, 1  ;;  %v33194_v36 = vld [vmem:[#allocation124_spill] sm:$0xff]  ;;  %v22542_v20 = vld [vmem:[#allocation2 + $0x48] sm:$0xff] }
 0x40c   : > { %21017 = vmatpush3.bf16.msra.mxu0 %v33142_v26  ;;  %18732 = vmatprep.mubr.f32.mxu0 %v33147_v23  ;;  %v22538_v26 = vld [vmem:[#allocation2 + $0x28] sm:$0xff] }
 0x40d   : > { %21019 = vmatprep.subr.bf16.mxu0 %v33148_v34  ;;  %17391 = vmatprep.mubr.f32.mxu1 %v33149_v8  ;;  %v8722_v32 = vrot.slane %v22538_v26, 1  ;;  %v33195_v23 = vld [vmem:[#allocation57_spill] sm:$0xff]  ;;  %v33197_v8 = vld [vmem:[#allocation67_spill] sm:$0xff] }
 0x40e   : > { %17392 = vmatmul.mubr.f32.gmra.mrb[14].mxu1 %v33150_v21  ;;  %20255 = vmatprep.subr.bf16.mxu1 %v33151_v58  ;;  %v31197_v21 = vand.u32 4294901760, %v28809_v24  ;;  %v28868_v26 = vld [vmem:[#allocation4 + $0x448] sm:$0xff] }
 0x40f   : > { %18733 = vmatmul.mubr.f32.gmra.mrb[12].mxu0 %v33152_v45  ;;  %20257 = vmatpush3.bf16.msra.mxu1 %v33151_v58  ;;  %v31196_v58 = vand.u32 4294901760, %v28811_v14  ;;  %v28830_v45 = vpack.c.bf16 %v11428_v37, %v11425_v4 }
 0x410   : > { %21021 = vmatpush3.bf16.msra.mxu0 %v33148_v34  ;;  %18735 = vmatprep.mubr.f32.mxu0 %v33153_v22  ;;  %v33196_v34 = vld [vmem:[#allocation106_spill] sm:$0xff]  ;;  %v28832_v22 = vld [vmem:[#allocation4 + $0x420] sm:$0xff] }
 0x411   : > { %21023 = vmatprep.subr.bf16.mxu0 %v33154_v50  ;;  %17426 = vmatprep.mubr.f32.mxu1 %v33022_v56  ;;  %33198 = vst [vmem:[#allocation119_spill] sm:$0xff] %v28830_v45 }
 0x412   : > { %17427 = vmatmul.mubr.f32.vlgmr.msra.gmra.mrb[0].mxu1 %v33025_v62  ;;  %20259 = vmatprep.subr.bf16.mxu1 %v33061_v57 }
 0x413   : > { %18736 = vmatmul.mubr.f32.gmra.mrb[14].mxu0 %v33155_v35  ;;  %20261 = vmatpush3.bf16.msra.mxu1 %v33061_v57  ;;  %v33163_v57 = vld [vmem:[#allocation113_spill] sm:$0xff] }
 0x414   : > { %21025 = vmatpush3.bf16.msra.mxu0 %v33154_v50  ;;  %18770 = vmatprep.mubr.f32.mxu0 %v33156_v15 }
 0x415   : > { %21027 = vmatprep.subr.bf16.mxu0 %v33157_v31  ;;  %17429 = vmatprep.mubr.f32.mxu1 %v33158_v42 }
 0x416   : > { %17430 = vmatmul.mubr.f32.gmra.mrb[2].mxu1 %v33159_v48  ;;  %20263 = vmatprep.subr.bf16.mxu1 %v33160_v18 }
 0x417   : > { %18771 = vmatmul.mubr.f32.vlgmr.msra.gmra.mrb[0].mxu0 %v33161_v39  ;;  %20265 = vmatpush3.bf16.msra.mxu1 %v33160_v18  ;;  %v28845_v18 = vld [vmem:[#allocation4 + $0x438] sm:$0xff] }
 0x418   : > { %21029 = vmatpush3.bf16.msra.mxu0 %v33157_v31  ;;  %18773 = vmatprep.mubr.f32.mxu0 %v33162_v9  ;;  %v28841_v31 = vld [vmem:[#allocation4 + $0x428] sm:$0xff] }
 0x419   : > { %21031 = vmatprep.subr.bf16.mxu0 %v33163_v57  ;;  %17432 = vmatprep.mubr.f32.mxu1 %v33164_v33 }
 0x41a   : > { %17433 = vmatmul.mubr.f32.gmra.mrb[4].mxu1 %v33165_v13  ;;  %20267 = vmatprep.subr.bf16.mxu1 %v33166_v38 }
 0x41b   : > { %18774 = vmatmul.mubr.f32.gmra.mrb[2].mxu0 %v33167_v3  ;;  %20269 = vmatpush3.bf16.msra.mxu1 %v33166_v38  ;;  %v22540_v38 = vld [vmem:[#allocation2 + $0x38] sm:$0xff] }
 0x41c   : > { %21033 = vmatpush3.bf16.msra.mxu0 %v33163_v57  ;;  %18776 = vmatprep.mubr.f32.mxu0 %v33168_v41  ;;  %v33202_v57 = vld [vmem:[#allocation73_spill] sm:$0xff] }
 0x41d   : > { %21035 = vmatprep.subr.bf16.mxu0 %v33169_v43  ;;  %17435 = vmatprep.mubr.f32.mxu1 %v33170_v52 }
 0x41e   : > { %17436 = vmatmul.mubr.f32.gmra.mrb[6].mxu1 %v33171_v27  ;;  %20271 = vmatprep.subr.bf16.mxu1 %v33172_v60 }
 0x41f   : > { %18777 = vmatmul.mubr.f32.gmra.mrb[4].mxu0 %v33173_v61  ;;  %20273 = vmatpush3.bf16.msra.mxu1 %v33172_v60  ;;  %v22541_v60 = vld [vmem:[#allocation2 + $0x40] sm:$0xff] }
 0x420   : > { %21037 = vmatpush3.bf16.msra.mxu0 %v33169_v43  ;;  %18779 = vmatprep.mubr.f32.mxu0 %v33174_v30  ;;  %v8724_v43 = vrot.slane %v22540_v38, 1 }
 0x421   : > { %21039 = vmatprep.subr.bf16.mxu0 %v33175_v40  ;;  %17438 = vmatprep.mubr.f32.mxu1 %v33176_v28 }
 0x422   : > { %17439 = vmatmul.mubr.f32.gmra.mrb[8].mxu1 %v33177_v7  ;;  %20275 = vmatprep.subr.bf16.mxu1 %v33178_v10 }
 0x423   : > { %18780 = vmatmul.mubr.f32.gmra.mrb[6].mxu0 %v33179_v46  ;;  %20277 = vmatpush3.bf16.msra.mxu1 %v33178_v10 }
 0x424   : > { %21041 = vmatpush3.bf16.msra.mxu0 %v33175_v40  ;;  %18782 = vmatprep.mubr.f32.mxu0 %v33180_v0  ;;  %v8725_v40 = vrot.slane %v22541_v60, 1  ;;  %v28878_v60 = vld [vmem:[#allocation4 + $0x458] sm:$0xff] }
 0x425   : > { %21043 = vmatprep.subr.bf16.mxu0 %v33181_v19  ;;  %17441 = vmatprep.mubr.f32.mxu1 %v33182_v54 }
 0x426   : > { %17442 = vmatmul.mubr.f32.gmra.mrb[10].mxu1 %v33183_v55  ;;  %20279 = vmatprep.subr.bf16.mxu1 %v33184_v6 }
 0x427   : > { %18783 = vmatmul.mubr.f32.gmra.mrb[8].mxu0 %v33185_v12  ;;  %20281 = vmatpush3.bf16.msra.mxu1 %v33184_v6 }
 0x428   : > { %21045 = vmatpush3.bf16.msra.mxu0 %v33181_v19  ;;  %18785 = vmatprep.mubr.f32.mxu0 %v33186_v47 }
 0x429   : > { %21047 = vmatprep.subr.bf16.mxu0 %v33187_v51  ;;  %17444 = vmatprep.mubr.f32.mxu1 %v33188_v1 }
 0x42a   : > { %17445 = vmatmul.mubr.f32.gmra.mrb[12].mxu1 %v33189_v49  ;;  %20283 = vmatprep.subr.bf16.mxu1 %v33190_v25 }
 0x42b   : > { %18786 = vmatmul.mubr.f32.gmra.mrb[10].mxu0 %v33191_v29  ;;  %20285 = vmatpush3.bf16.msra.mxu1 %v33190_v25  ;;  %v28866_v25 = vld [vmem:[#allocation4 + $0x440] sm:$0xff] }
 0x42c   : > { %21049 = vmatpush3.bf16.msra.mxu0 %v33187_v51  ;;  %18788 = vmatprep.mubr.f32.mxu0 %v33192_v17  ;;  %v31198_v51 = vand.u32 4294901760, %v28841_v31 }
 0x42d   : > { %21051 = vmatprep.subr.bf16.mxu0 %v33095_v63  ;;  %17447 = vmatprep.mubr.f32.mxu1 %v33193_v16 }
 0x42e   : > { %17448 = vmatmul.mubr.f32.gmra.mrb[14].mxu1 %v33194_v36  ;;  %20287 = vmatprep.subr.bf16.mxu1 %v33195_v23 }
 0x42f   : > { %18789 = vmatmul.mubr.f32.gmra.mrb[12].mxu0 %v33196_v34  ;;  %20289 = vmatpush3.bf16.msra.mxu1 %v33195_v23  ;;  %v8726_v23 = vrot.slane %v22542_v20, 1  ;;  %v31203_v20 = vand.u32 4294901760, %v28866_v25 }
 0x430   : > { %21053 = vmatpush3.bf16.msra.mxu0 %v33095_v63  ;;  %18791 = vmatprep.mubr.f32.mxu0 %v33197_v8  ;;  %v33199_v63 = vld [vmem:[#allocation52_spill] sm:$0xff] }
 0x431   : > { %21055 = vmatprep.subr.bf16.mxu0 %v33099_v44  ;;  %17482 = vmatprep.mubr.f32.mxu1 %v33022_v56  ;;  %vm33200_vm8 = vcmp.lt.s32.totalorder %v33199_v63, 7  ;;  %v28843_v56 = vld [vmem:[#allocation4 + $0x430] sm:$0xff] }
 0x432   : > { %v8751_v50 = vsel %vm33200_vm8, %v31195_v5, %v8722_v32  ;;  %vm33201_vm4 = vmmov %vm33200_vm8  ;;  %17483 = vmatmul.mubr.f32.vlgmr.msra.gmra.mrb[0].mxu1 %v33025_v62  ;;  %v28855_v62 = vpack.c.bf16 %v31196_v58, %v31197_v21  ;;  %v28890_v58 = vld [vmem:[#allocation4 + $0x460] sm:$0xff] }
 0x433   : > { %v8750_v35 = vsel %vm33201_vm4, %v8722_v32, %v8723_v59  ;;  %18792 = vmatmul.mubr.f32.gmra.mrb[14].mxu0 %v33202_v57  ;;  %17485 = vmatprep.mubr.f32.mxu1 %v33158_v42  ;;  %v28857_v10 = vand.u32 4294901760, %v8751_v50  ;;  %v31199_v42 = vand.u32 4294901760, %v28832_v22  ;;  %v28871_v32 = vld [vmem:[#allocation4 + $0x450] sm:$0xff] }
 0x434   : > { %21057 = vmatpush3.bf16.msra.mxu0 %v33099_v44  ;;  %18826 = vmatprep.mubr.f32.mxu0 %v33156_v15  ;;  %33203 = vst [vmem:[#allocation111_spill] sm:$0xff] %v28855_v62  ;;  %v8754_v6 = vsel %vm24189_vm3, %v8750_v35, 0.0  ;;  %v31201_v44 = vand.u32 4294901760, %v28843_v56  ;;  %v31200_v15 = vand.u32 4294901760, %v28845_v18  ;;  %v28873_v35 = vld [vmem:[#allocation2 + $0x50] sm:$0xff]  ;;  %vm33205_vm3 = vmmov %vm33201_vm4 }
 0x435   : > { %21059 = vmatprep.subr.bf16.mxu0 %v28830_v45  ;;  %v31202_v38 = vrot.slane %v28873_v35, 1  ;;  %v28880_v19 = vand.u32 4294901760, %v8754_v6  ;;  %v8749_v5 = vsel %vm33205_vm3, %v8723_v59, %v8724_v43  ;;  %vm33206_vm10 = vmmov %vm33205_vm3  ;;  %v28895_v21 = vsub.f32 %v8751_v50, %v28857_v10 }
 0x436   : > { %17486 = vmatmul.mubr.f32.gmra.mrb[2].mxu1 %v33159_v48  ;;  %v8748_v48 = vsel %vm33206_vm10, %v8724_v43, %v8725_v40  ;;  %v28900_v59 = vsub.f32 %v28795_v2, %v11425_v4  ;;  %v28913_v43 = vpack.c.bf16 %v31200_v15, %v31201_v44  ;;  %v31207_v50 = vand.u32 4294901760, %v28871_v32  ;;  %vm33210_vm0 = vmmov %vm33205_vm3  ;;  %v28950_v44 = vld [vmem:[#allocation4 + $0x478] sm:$0xff] }
 0x437   : > { %18827 = vmatmul.mubr.f32.vlgmr.msra.gmra.mrb[0].mxu0 %v33161_v39  ;;  %17488 = vmatprep.mubr.f32.mxu1 %v33164_v33  ;;  %v28892_v33 = vld [vmem:[#allocation4 + $0x468] sm:$0xff]  ;;  %v28919_v2 = vsub.f32 %v28799_v53, %v11428_v37  ;;  %v31206_v4 = vand.u32 4294901760, %v28878_v60  ;;  %v28923_v39 = vand.u32 4294901760, %v8749_v5  ;;  %v8746_v15 = vsel %vm33210_vm0, %v8726_v23, %v31202_v38  ;;  %vm33211_vm12 = vmmov %vm33210_vm0  ;;  %v22544_v38 = vld [vmem:[#allocation2 + $0x58] sm:$0xff] }
 0x438   : > { %21061 = vmatpush3.bf16.msra.mxu0 %v28830_v45  ;;  %18829 = vmatprep.mubr.f32.mxu0 %v33162_v9  ;;  %v28907_v9 = vpack.c.bf16 %v31198_v51, %v31199_v42  ;;  %33208 = vst [vmem:[#allocation82_spill] sm:$0xff] %v28913_v43  ;;  %v8756_v42 = vsel %vm24376_vm5, %v8748_v48, 0.0  ;;  %v28936_v37 = vsub.f32 %v8754_v6, %v28880_v19  ;;  %v8758_v6 = vsel %vm24555_vm7, %v8746_v15, 0.0  ;;  %vm33227_vm5 = vmmov %vm33210_vm0 }
 0x439   : > { %21063 = vmatprep.subr.bf16.mxu0 %v28855_v62  ;;  %v8747_v51 = vsel %vm33211_vm12, %v8725_v40, %v8726_v23  ;;  %v33214_v40 = vand.u32 4294901760, %v28809_v24  ;;  %vm33235_vm7 = vmmov %vm33210_vm0 }
 0x43a   : > { %33207 = vst [vmem:[#allocation69_spill] sm:$0xff] %v28907_v9  ;;  %17489 = vmatmul.mubr.f32.gmra.mrb[4].mxu1 %v33165_v13  ;;  %v28961_v13 = vand.u32 4294901760, %v8756_v42  ;;  %vm33247_vm1 = vmmov %vm33210_vm0 }
 0x43b   : > { %18830 = vmatmul.mubr.f32.gmra.mrb[2].mxu0 %v33167_v3  ;;  %17491 = vmatprep.mubr.f32.mxu1 %v33170_v52  ;;  %v33212_v3 = vand.u32 4294901760, %v28868_v26  ;;  %v28948_v52 = vld [vmem:[#allocation4 + $0x470] sm:$0xff]  ;;  %v28957_v23 = vsub.f32 %v28809_v24, %v33214_v40  ;;  %v28975_v24 = vpack.c.bf16 %v31206_v4, %v31207_v50  ;;  %v28978_v40 = vsub.f32 %v8749_v5, %v28923_v39  ;;  %vm33254_vm2 = vmmov %vm33210_vm0 }
 0x43c   : > { %21065 = vmatpush3.bf16.msra.mxu0 %v28855_v62  ;;  %18832 = vmatprep.mubr.f32.mxu0 %v33168_v41  ;;  %v28980_v41 = vand.u32 4294901760, %v8747_v51  ;;  %v8728_v62 = vrot.slane %v22544_v38, 1  ;;  %v33223_v38 = vand.u32 4294901760, %v28900_v59  ;;  %v29004_v4 = vand.u32 4294901760, %v8758_v6  ;;  %vm33261_vm6 = vmmov %vm33210_vm0 }
 0x43d   : > { %v28946_v48 = vpack.c.bf16 %v33212_v3, %v31203_v20  ;;  %21067 = vmatprep.subr.bf16.mxu0 %v28907_v9  ;;  %v33215_v3 = vand.u32 4294901760, %v28811_v14  ;;  %33217 = vst [vmem:[#allocation146_spill] sm:$0xff] %v28975_v24  ;;  %33218 = vst [vmem:[#allocation116_spill] sm:$0xff] %v28978_v40  ;;  %v33224_v50 = vand.u32 4294901760, %v28919_v2 }
 0x43e   : > { %17492 = vmatmul.mubr.f32.gmra.mrb[6].mxu1 %v33171_v27  ;;  %v33220_v27 = vand.u32 4294901760, %v28892_v33  ;;  %vm33262_vm14 = vmmov %vm33210_vm0 }
 0x43f   : > { %33213 = vst [vmem:[#allocation93_spill] sm:$0xff] %v28946_v48  ;;  %v28966_v20 = vsub.f32 %v28811_v14, %v33215_v3  ;;  %18833 = vmatmul.mubr.f32.gmra.mrb[4].mxu0 %v33173_v61  ;;  %17494 = vmatprep.mubr.f32.mxu1 %v33176_v28  ;;  %v33219_v14 = vand.u32 4294901760, %v28890_v58  ;;  %v33222_v61 = vand.u32 4294901760, %v28895_v21  ;;  %v11676_v5 = vsub.f32 %v28919_v2, %v33224_v50  ;;  %v22545_v3 = vld [vmem:[#allocation2 + $0x60] sm:$0xff]  ;;  %vm33272_vm8 = vmmov %vm33210_vm0 }
 0x440   : > { %21069 = vmatpush3.bf16.msra.mxu0 %v28907_v9  ;;  %18835 = vmatprep.mubr.f32.mxu0 %v33174_v30  ;;  %v29011_v30 = vsub.f32 %v8756_v42, %v28961_v13  ;;  %v8729_v53 = vrot.slane %v22545_v3, 1  ;;  %v33225_v9 = vand.u32 4294901760, %v28832_v22  ;;  %v33226_v50 = vrot.slane %v28873_v35, 1  ;;  %vm33274_vm4 = vmmov %vm33210_vm0 }
 0x441   : > { %v28988_v15 = vpack.c.bf16 %v33220_v27, %v33219_v14  ;;  %v28998_v28 = vsub.f32 %v28895_v21, %v33222_v61  ;;  %v11669_v14 = vsub.f32 %v28900_v59, %v33223_v38  ;;  %21071 = vmatprep.subr.bf16.mxu0 %v28913_v43  ;;  %v31212_v61 = vand.u32 4294901760, %v28966_v20 }
 0x442   : > { %17495 = vmatmul.mubr.f32.gmra.mrb[8].mxu1 %v33177_v7  ;;  %v29017_v27 = vsub.f32 %v8747_v51, %v28980_v41  ;;  %v29022_v45 = vsub.f32 %v28832_v22, %v33225_v9  ;;  %v8745_v42 = vsel %vm33227_vm5, %v33226_v50, %v8728_v62  ;;  %v33228_v7 = vand.u32 4294901760, %v28948_v52 }
 0x443   : > { %33221 = vst [vmem:[#allocation139_spill] sm:$0xff] %v28988_v15  ;;  %18836 = vmatmul.mubr.f32.gmra.mrb[6].mxu0 %v33179_v46  ;;  %17497 = vmatprep.mubr.f32.mxu1 %v33182_v54  ;;  %v33229_v3 = vand.u32 4294901760, %v28950_v44  ;;  %v33231_v38 = vand.u32 4294901760, %v28936_v37  ;;  %v33232_v35 = vand.u32 4294901760, %v28841_v31  ;;  %v11670_v54 = vand.u32 4294901760, %v11669_v14  ;;  %v22547_v46 = vld [vmem:[#allocation2 + $0x70] sm:$0xff] }
 0x444   : > { %21073 = vmatpush3.bf16.msra.mxu0 %v28913_v43  ;;  %18838 = vmatprep.mubr.f32.mxu0 %v33180_v0  ;;  %v33233_v50 = vand.u32 4294901760, %v28957_v23  ;;  %v8744_v0 = vsel %vm33235_vm7, %v8728_v62, %v8729_v53  ;;  %v11677_v14 = vand.u32 4294901760, %v11676_v5  ;;  %v22546_v43 = vld [vmem:[#allocation2 + $0x68] sm:$0xff] }
 0x445   : > { %v29034_v51 = vpack.c.bf16 %v33229_v3, %v33228_v7  ;;  %v29039_v22 = vsub.f32 %v28936_v37, %v33231_v38  ;;  %v29044_v9 = vsub.f32 %v28841_v31, %v33232_v35  ;;  %v29053_v3 = vsub.f32 %v8758_v6, %v29004_v4  ;;  %21075 = vmatprep.subr.bf16.mxu0 %v28946_v48 }
 0x446   : > { %v11683_v7 = vsub.f32 %v28957_v23, %v33233_v50  ;;  %v11690_v31 = vsub.f32 %v28966_v20, %v31212_v61  ;;  %v29060_v35 = vand.u32 4294901760, %v8745_v42  ;;  %17498 = vmatmul.mubr.f32.gmra.mrb[10].mxu1 %v33183_v55  ;;  %v33236_v50 = vand.u32 4294901760, %v28978_v40 }
 0x447   : > { %33230 = vst [vmem:[#allocation36_spill] sm:$0xff] %v29034_v51  ;;  %33234 = vst [vmem:[#allocation35_spill] sm:$0xff] %v29053_v3  ;;  %18839 = vmatmul.mubr.f32.gmra.mrb[8].mxu0 %v33185_v12  ;;  %17500 = vmatprep.mubr.f32.mxu1 %v33188_v1  ;;  %v33237_v55 = vand.u32 4294901760, %v28843_v56  ;;  %v8760_v1 = vsel %vm24711_vm9, %v8744_v0, 0.0  ;;  %v33239_v61 = vand.u32 4294901760, %v28845_v18  ;;  %v29101_v0 = vpack.c.bf16 %v11677_v14, %v11670_v54 }
 0x448   : > { %v29068_v6 = vsub.f32 %v28978_v40, %v33236_v50  ;;  %v8730_v50 = vrot.slane %v22546_v43, 1  ;;  %21077 = vmatpush3.bf16.msra.mxu0 %v28946_v48  ;;  %18841 = vmatprep.mubr.f32.mxu0 %v33186_v47  ;;  %v8731_v40 = vrot.slane %v22547_v46, 1  ;;  %v11684_v47 = vand.u32 4294901760, %v11683_v7  ;;  %vm33245_vm9 = vmmov %vm33210_vm0  ;;  %v22549_v7 = vld [vmem:[#allocation2 + $0x80] sm:$0xff] }
 0x449   : > { %v29079_v5 = vsub.f32 %v28843_v56, %v33237_v55  ;;  %v29089_v62 = vsub.f32 %v28845_v18, %v33239_v61  ;;  %21079 = vmatprep.subr.bf16.mxu0 %v28975_v24  ;;  %v33240_v56 = vand.u32 4294901760, %v29011_v30  ;;  %v11691_v55 = vand.u32 4294901760, %v11690_v31 }
 0x44a   : > { %v29098_v38 = vsub.f32 %v8745_v42, %v29060_v35  ;;  %17501 = vmatmul.mubr.f32.gmra.mrb[12].mxu1 %v33189_v49  ;;  %v33242_v61 = vand.u32 4294901760, %v29017_v27  ;;  %v33243_v12 = vand.u32 4294901760, %v29022_v45  ;;  %v33244_v42 = vand.u32 4294901760, %v29044_v9 }
 0x44b   : > { %v29095_v43 = vsub.f32 %v29011_v30, %v33240_v56  ;;  %18842 = vmatmul.mubr.f32.gmra.mrb[10].mxu0 %v33191_v29  ;;  %17503 = vmatprep.mubr.f32.mxu1 %v33193_v16  ;;  %v29117_v54 = vand.u32 4294901760, %v8760_v1  ;;  %v8743_v31 = vsel %vm33245_vm9, %v8729_v53, %v8730_v50  ;;  %v33246_v14 = vand.u32 4294901760, %v29053_v3 }
 0x44c   : > { %33241 = vst [vmem:[#allocation109_spill] sm:$0xff] %v29098_v38  ;;  %v29107_v46 = vsub.f32 %v29017_v27, %v33242_v61  ;;  %v11697_v56 = vsub.f32 %v29022_v45, %v33243_v12  ;;  %v11704_v49 = vsub.f32 %v29044_v9, %v33244_v42  ;;  %21081 = vmatpush3.bf16.msra.mxu0 %v28975_v24  ;;  %v22548_v12 = vld [vmem:[#allocation2 + $0x78] sm:$0xff]  ;;  %v8733_v24 = vrot.slane %v22549_v7, 1 }
 0x44d   : > { %18844 = vmatprep.mubr.f32.mxu0 %v33192_v17  ;;  %v29127_v29 = vsub.f32 %v29053_v3, %v33246_v14  ;;  %v8742_v61 = vsel %vm33247_vm1, %v8730_v50, %v8731_v40  ;;  %v8732_v42 = vrot.slane %v22548_v12, 1  ;;  %21083 = vmatprep.subr.bf16.mxu0 %v28988_v15  ;;  %v29134_v18 = vpack.c.bf16 %v11691_v55, %v11684_v47 }
 0x44e   : > { %v31223_v17 = vand.u32 4294901760, %v29098_v38  ;;  %17504 = vmatmul.mubr.f32.gmra.mrb[14].mxu1 %v33194_v36  ;;  %v11698_v14 = vand.u32 4294901760, %v11697_v56  ;;  %v29138_v48 = vand.u32 4294901760, %v8743_v31  ;;  %v33248_v16 = vand.u32 4294901760, %v28866_v25 }
 0x44f   : > { %v33249_v12 = vand.u32 4294901760, %v28868_v26  ;;  %18845 = vmatmul.mubr.f32.gmra.mrb[12].mxu0 %v33196_v34  ;;  %v11705_v55 = vand.u32 4294901760, %v11704_v49  ;;  %v29153_v36 = vsub.f32 %v8760_v1, %v29117_v54  ;;  %v8762_v7 = vsel %vm24848_vm11, %v8742_v61, 0.0  ;;  %vm33255_vm11 = vmmov %vm33210_vm0 }
 0x450   : > { %v29143_v50 = vsub.f32 %v28866_v25, %v33248_v16  ;;  %21085 = vmatpush3.bf16.msra.mxu0 %v28988_v15  ;;  %18847 = vmatprep.mubr.f32.mxu0 %v33197_v8  ;;  %v33253_v34 = vand.u32 4294901760, %v29089_v62  ;;  %v8741_v1 = vsel %vm33254_vm2, %v8731_v40, %v8732_v42  ;;  %v29172_v61 = vsub.f32 %v29098_v38, %v31223_v17 }
 0x451   : > { %v29148_v53 = vsub.f32 %v28868_v26, %v33249_v12  ;;  %33250 = vst [vmem:[#allocation95_spill] sm:$0xff] %v29153_v36  ;;  %v33252_v26 = vand.u32 4294901760, %v29079_v5  ;;  %21087 = vmatprep.subr.bf16.mxu0 %v29034_v51  ;;  %v8740_v8 = vsel %vm33255_vm11, %v8732_v42, %v8733_v24  ;;  %v22550_v12 = vld [vmem:[#allocation2 + $0x88] sm:$0xff]  ;;  %v29177_v47 = vsub.f32 %v8743_v31, %v29138_v48 }
 0x452   : > { %v11718_v49 = vsub.f32 %v29089_v62, %v33253_v34  ;;  %v8734_v56 = vrot.slane %v22550_v12, 1  ;;  %v29179_v34 = vand.u32 4294901760, %v8762_v7  ;;  %v29184_v17 = vpack.c.bf16 %v11705_v55, %v11698_v14 }
 0x453   : > { %v11711_v16 = vsub.f32 %v29079_v5, %v33252_v26  ;;  %v22551_v26 = vld [vmem:[#allocation2 + $0x90] sm:$0xff]  ;;  %33256 = vst [vmem:[#allocation33_spill] sm:$0xff] %v29177_v47  ;;  %18848 = vmatmul.mubr.f32.gmra.mrb[14].mxu0 %v33202_v57  ;;  %v31230_v38 = vand.u32 4294901760, %v29153_v36  ;;  %v29187_v42 = vand.u32 4294901760, %v8741_v1  ;;  %v33257_v12 = vand.u32 4294901760, %v28871_v32 }
 0x454   : > { %v8735_v25 = vrot.slane %v22551_v26, 1  ;;  %21089 = vmatpush3.bf16.msra.mxu0 %v29034_v51  ;;  %v33258_v31 = vand.u32 4294901760, %v28998_v28  ;;  %v11719_v15 = vand.u32 4294901760, %v11718_v49  ;;  %v8764_v57 = vsel %vm25100_vm13, %v8740_v8, 0.0  ;;  %v33268_v51 = vld [vmem:[#allocation118_spill] sm:$0xff] }
 0x455   : > { %v29192_v26 = vsub.f32 %v28871_v32, %v33257_v12  ;;  %v11712_v40 = vand.u32 4294901760, %v11711_v16  ;;  %v33260_v14 = vand.u32 4294901760, %v28878_v60  ;;  %21091 = vmatprep.subr.bf16.mxu0 %v29101_v0  ;;  %v11569_v32 = vand.u32 4294901760, %v29172_v61  ;;  %v22552_v16 = vld [vmem:[#allocation2 + $0x98] sm:$0xff] }
 0x456   : > { %18882 = vmatprep.mubr.f32.mxu0 %v33258_v31  ;;  %v8739_v12 = vsel %vm33261_vm6, %v8733_v24, %v8734_v56  ;;  %v8738_v28 = vsel %vm33262_vm14, %v8734_v56, %v8735_v25  ;;  %v8736_v49 = vrot.slane %v22552_v16, 1  ;;  %v29212_v8 = vsub.f32 %v8762_v7, %v29179_v34 }
 0x457   : > { %v29202_v55 = vsub.f32 %v28878_v60, %v33260_v14  ;;  %v33263_v60 = vand.u32 4294901760, %v29143_v50  ;;  %v33264_v14 = vand.u32 4294901760, %v29148_v53  ;;  %v33265_v24 = vand.u32 4294901760, %v29039_v22 }
 0x458   : > { %v11578_v56 = vsub.f32 %v29153_v36, %v31230_v38  ;;  %v29226_v16 = vsub.f32 %v8741_v1, %v29187_v42  ;;  %v29228_v7 = vand.u32 4294901760, %v8764_v57  ;;  %vm33269_vm13 = vnez %v33268_v51 }
 0x459   : > { %v11725_v31 = vsub.f32 %v29143_v50, %v33263_v60  ;;  %v11732_v61 = vsub.f32 %v29148_v53, %v33264_v14  ;;  %18883 = vmatmul.mubr.f32.vlgmr.msra.gmra.mrb[0].mxu0 %v33265_v24  ;;  %v33266_v60 = vand.u32 4294901760, %v29068_v6  ;;  %v21102_v14 = vpack.c.bf16 %v11719_v15, %v11712_v40 }
 0x45a   : > { %21093 = vmatpush3.bf16.msra.mxu0 %v29101_v0  ;;  %v29235_v24 = vand.u32 4294901760, %v8739_v12  ;;  %v8766_v38 = vsel %vm33269_vm13, %v8738_v28, 0.0  ;;  %v33270_v1 = vand.u32 4294901760, %v28890_v58  ;;  %v33271_v0 = vand.u32 4294901760, %v28892_v33 }
 0x45b   : > { %18885 = vmatprep.mubr.f32.mxu0 %v33266_v60  ;;  %21095 = vmatprep.subr.bf16.mxu0 %v29134_v18  ;;  %v8737_v15 = vsel %vm33272_vm8, %v8735_v25, %v8736_v49  ;;  %v33273_v40 = vrot.slane %v28813_v11, 1  ;;  %v33275_v28 = vand.u32 4294901760, %v29177_v47  ;;  %v11733_v22 = vand.u32 4294901760, %v11732_v61 }
 0x45c   : > { %33267 = vst [vmem:[#allocation130_spill] sm:$0xff] %v29235_v24  ;;  %v29243_v36 = vsub.f32 %v28890_v58, %v33270_v1  ;;  %v29248_v6 = vsub.f32 %v28892_v33, %v33271_v0  ;;  %v31235_v58 = vand.u32 4294901760, %v29212_v8  ;;  %v11726_v1 = vand.u32 4294901760, %v11725_v31 }
 0x45d   : > { %v8752_v51 = vsel %vm33274_vm4, %v8736_v49, %v33273_v40  ;;  %v11588_v60 = vsub.f32 %v29177_v47, %v33275_v28  ;;  %v33276_v3 = vand.u32 4294901760, %v29095_v43  ;;  %v29264_v25 = vsub.f32 %v8764_v57, %v29228_v7 }
 0x45e   : > { %v33277_v11 = vand.u32 4294901760, %v29192_v26  ;;  %v29269_v49 = vand.u32 4294901760, %v8766_v38  ;;  %21097 = vmatpush3.bf16.msra.mxu0 %v29134_v18  ;;  %v33279_v0 = vand.u32 4294901760, %v29107_v46  ;;  %v33280_v31 = vand.u32 4294901760, %v29202_v55 }
 0x45f   : > { %18886 = vmatmul.mubr.f32.gmra.mrb[2].mxu0 %v33276_v3  ;;  %v29278_v3 = vsub.f32 %v8739_v12, %v29235_v24  ;;  %v29280_v57 = vand.u32 4294901760, %v8737_v15  ;;  %v8768_v40 = vsel %vm25323_vm15, %v8752_v51, 0.0  ;;  %21099 = vmatprep.subr.bf16.mxu0 %v29184_v17  ;;  %v33283_v46 = vand.u32 4294901760, %v28948_v52 }
 0x460   : > { %v11739_v63 = vsub.f32 %v29192_v26, %v33277_v11  ;;  %33278 = vst [vmem:[#allocation79_spill] sm:$0xff] %v29269_v49  ;;  %18888 = vmatprep.mubr.f32.mxu0 %v33279_v0  ;;  %v11746_v43 = vsub.f32 %v29202_v55, %v33280_v31  ;;  %v33284_v0 = vand.u32 4294901760, %v28950_v44  ;;  %v11579_v31 = vand.u32 4294901760, %v11578_v56 }
 0x461   : > { %33281 = vst [vmem:[#allocation143_spill] sm:$0xff] %v29280_v57  ;;  %v29290_v11 = vsub.f32 %v28948_v52, %v33283_v46  ;;  %v11589_v33 = vand.u32 4294901760, %v11588_v60  ;;  %v11598_v51 = vsub.f32 %v29212_v8, %v31235_v58  ;;  %v21106_v61 = vpack.c.bf16 %v11733_v22, %v11726_v1 }
 0x462   : > { %v29295_v12 = vsub.f32 %v28950_v44, %v33284_v0  ;;  %v33285_v28 = vand.u32 4294901760, %v29127_v29  ;;  %v33286_v18 = vand.u32 4294901760, %v29226_v16  ;;  %v31236_v46 = vand.u32 4294901760, %v29264_v25  ;;  %21101 = vmatpush3.bf16.msra.mxu0 %v29184_v17 }
 0x463   : > { %v29307_v47 = vsub.f32 %v8766_v38, %v29269_v49  ;;  %v29309_v44 = vand.u32 4294901760, %v8768_v40  ;;  %v11740_v56 = vand.u32 4294901760, %v11739_v63  ;;  %v11747_v60 = vand.u32 4294901760, %v11746_v43  ;;  %21103 = vmatprep.subr.bf16.mxu0 %v21102_v14 }
 0x464   : > { %18889 = vmatmul.mubr.f32.gmra.mrb[4].mxu0 %v33285_v28  ;;  %v11608_v52 = vsub.f32 %v29226_v16, %v33286_v18  ;;  %v31238_v22 = vand.u32 4294901760, %v29278_v3  ;;  %v29314_v29 = vsub.f32 %v8737_v15, %v29280_v57  ;;  %v33288_v1 = vand.u32 4294901760, %v29243_v36 }
 0x465   : > { %33287 = vst [vmem:[#allocation54_spill] sm:$0xff] %v29309_v44  ;;  %18891 = vmatprep.mubr.f32.mxu0 %v11569_v32  ;;  %v33289_v38 = vand.u32 4294901760, %v29248_v6  ;;  %v31237_v0 = vand.u32 4294901760, %v29290_v11  ;;  %v11599_v32 = vand.u32 4294901760, %v11598_v51  ;;  %v11618_v15 = vsub.f32 %v29264_v25, %v31236_v46 }
 0x466   : > { %v11753_v28 = vsub.f32 %v29243_v36, %v33288_v1  ;;  %v31241_v63 = vand.u32 4294901760, %v29307_v47  ;;  %v29329_v43 = vsub.f32 %v8768_v40, %v29309_v44  ;;  %21105 = vmatpush3.bf16.msra.mxu0 %v21102_v14  ;;  %v11609_v1 = vand.u32 4294901760, %v11608_v52 }
 0x467   : > { %v11760_v18 = vsub.f32 %v29248_v6, %v33289_v38  ;;  %v21110_v58 = vpack.c.bf16 %v11747_v60, %v11740_v56  ;;  %v11628_v38 = vsub.f32 %v29278_v3, %v31238_v22  ;;  %21107 = vmatprep.subr.bf16.mxu0 %v21106_v61  ;;  %v11767_v46 = vsub.f32 %v29290_v11, %v31237_v0 }
 0x468   : > { %18892 = vmatmul.mubr.f32.gmra.mrb[6].mxu0 %v11579_v31  ;;  %v31240_v31 = vand.u32 4294901760, %v29314_v29  ;;  %v11754_v51 = vand.u32 4294901760, %v11753_v28  ;;  %v33290_v40 = vand.u32 4294901760, %v29295_v12  ;;  %v11638_v52 = vsub.f32 %v29307_v47, %v31241_v63 }
 0x469   : > { %18894 = vmatprep.mubr.f32.mxu0 %v11589_v33  ;;  %v11761_v17 = vand.u32 4294901760, %v11760_v18  ;;  %v11619_v33 = vand.u32 4294901760, %v11618_v15  ;;  %v31239_v56 = vand.u32 4294901760, %v29329_v43  ;;  %v11629_v60 = vand.u32 4294901760, %v11628_v38 }
 0x46a   : > { %v11774_v14 = vsub.f32 %v29295_v12, %v33290_v40  ;;  %21109 = vmatpush3.bf16.msra.mxu0 %v21106_v61  ;;  %v11648_v28 = vsub.f32 %v29314_v29, %v31240_v31  ;;  %v11768_v0 = vand.u32 4294901760, %v11767_v46  ;;  %v21122_v46 = vpack.c.bf16 %v28919_v2, %v28900_v59  ;;  %v33303_v31 = vld [vmem:[#allocation93_spill] sm:$0xff] }
 0x46b   : > { %21111 = vmatprep.subr.bf16.mxu0 %v21110_v58  ;;  %v21114_v18 = vpack.c.bf16 %v11761_v17, %v11754_v51  ;;  %v11658_v15 = vsub.f32 %v29329_v43, %v31239_v56  ;;  %v21138_v17 = vpack.c.bf16 %v29148_v53, %v29143_v50  ;;  %v21142_v38 = vpack.c.bf16 %v29202_v55, %v29192_v26 }
 0x46c   : > { %18895 = vmatmul.mubr.f32.gmra.mrb[8].mxu0 %v11599_v32  ;;  %v11775_v22 = vand.u32 4294901760, %v11774_v14  ;;  %v11639_v32 = vand.u32 4294901760, %v11638_v52  ;;  %v11649_v40 = vand.u32 4294901760, %v11648_v28  ;;  %v21146_v51 = vpack.c.bf16 %v29248_v6, %v29243_v36  ;;  %v33292_v52 = vld [vmem:[#allocation116_spill] sm:$0xff]  ;;  %v33294_v28 = vld [vmem:[#allocation69_spill] sm:$0xff] }
 0x46d   : > { %18897 = vmatprep.mubr.f32.mxu0 %v11609_v1  ;;  %v11659_v1 = vand.u32 4294901760, %v11658_v15  ;;  %v21150_v14 = vpack.c.bf16 %v29295_v12, %v29290_v11  ;;  %v33297_v15 = vld [vmem:[#allocation82_spill] sm:$0xff] }
 0x46e   : > { %21113 = vmatpush3.bf16.msra.mxu0 %v21110_v58  ;;  %v21118_v61 = vpack.c.bf16 %v11775_v22, %v11768_v0  ;;  %v21126_v58 = vpack.c.bf16 %v28966_v20, %v28957_v23  ;;  %v21130_v22 = vpack.c.bf16 %v29044_v9, %v29022_v45  ;;  %v21134_v0 = vpack.c.bf16 %v29089_v62, %v29079_v5 }
 0x46f   : > { %21115 = vmatprep.subr.bf16.mxu0 %v21114_v18 }
 0x470   : > { %18898 = vmatmul.mubr.f32.gmra.mrb[10].mxu0 %v11619_v33  ;;  %v33291_v33 = vld [vmem:[#allocation119_spill] sm:$0xff] }
 0x471   : > { %18900 = vmatprep.mubr.f32.mxu0 %v11629_v60  ;;  %v33293_v60 = vld [vmem:[#allocation111_spill] sm:$0xff] }
 0x472   : > { %21117 = vmatpush3.bf16.msra.mxu0 %v21114_v18  ;;  %v33295_v18 = vld [vmem:[#allocation35_spill] sm:$0xff] }
 0x473   : > { %21119 = vmatprep.subr.bf16.mxu0 %v21118_v61 }
 0x474   : > { %18901 = vmatmul.mubr.f32.gmra.mrb[12].mxu0 %v11639_v32  ;;  %v33296_v32 = vld [vmem:[#allocation109_spill] sm:$0xff] }
 0x475   : > { %18903 = vmatprep.mubr.f32.mxu0 %v11649_v40  ;;  %v29397_v40 = vld [vmem:[#allocation7] sm:$0xff] }
 0x476   : > { %21121 = vmatpush3.bf16.msra.mxu0 %v21118_v61  ;;  %33298 = vst [vmem:[#allocation107_spill] sm:$0xff] %v29397_v40  ;;  %v29399_v61 = vld [vmem:[#allocation7 + $0x8] sm:$0xff] }
 0x477   : > { %21123 = vmatprep.subr.bf16.mxu0 %v21122_v46 }
 0x478   : > { %18904 = vmatmul.mubr.f32.gmra.mrb[14].mxu0 %v11659_v1  ;;  %v29401_v1 = vld [vmem:[#allocation7 + $0x10] sm:$0xff] }
 0x479   : > { %18938 = vmatprep.mubr.f32.mxu0 %v28857_v10 }
 0x47c   : > { %18939 = vmatmul.mubr.f32.vlgmr.msra.gmra.mrb[0].mxu0 %v28880_v19 }
 0x47d   : > { %21125 = vmatpush3.bf16.msra.mxu0 %v21122_v46  ;;  %18941 = vmatprep.mubr.f32.mxu0 %v28923_v39  ;;  %v33299_v46 = vld [vmem:[#allocation95_spill] sm:$0xff] }
 0x47e   : > { %21127 = vmatprep.subr.bf16.mxu0 %v21126_v58 }
 0x480   : > { %18942 = vmatmul.mubr.f32.gmra.mrb[2].mxu0 %v28961_v13 }
 0x481   : > { %21129 = vmatpush3.bf16.msra.mxu0 %v21126_v58  ;;  %18944 = vmatprep.mubr.f32.mxu0 %v28980_v41  ;;  %v31255_v58 = vand.u32 4294901760, %v29397_v40  ;;  %v29435_v40 = vld [vmem:[#allocation7 + $0x38] sm:$0xff] }
 0x482   : > { %21131 = vmatprep.subr.bf16.mxu0 %v21130_v22  ;;  %33306 = vst [vmem:[#allocation126_spill] sm:$0xff] %v29435_v40 }
 0x484   : > { %18945 = vmatmul.mubr.f32.gmra.mrb[4].mxu0 %v29004_v4 }
 0x485   : > { %21133 = vmatpush3.bf16.msra.mxu0 %v21130_v22  ;;  %18947 = vmatprep.mubr.f32.mxu0 %v29060_v35  ;;  %v31252_v22 = vand.u32 4294901760, %v29399_v61 }
 0x486   : > { %21135 = vmatprep.subr.bf16.mxu0 %v21134_v0 }
 0x487   : > { %v29421_v63 = vpack.c.bf16 %v31252_v22, %v31255_v58  ;;  %v33307_v22 = vld [vmem:[#allocation146_spill] sm:$0xff]  ;;  %v31266_v58 = vand.u32 4294901760, %v29435_v40  ;;  %v33314_v40 = vand.u32 4294901760, %v28966_v20  ;;  %v33320_v20 = vand.u32 4294901760, %v29017_v27 }
 0x488   : > { %18948 = vmatmul.mubr.f32.gmra.mrb[6].mxu0 %v29117_v54 }
 0x489   : > { %21137 = vmatpush3.bf16.msra.mxu0 %v21134_v0  ;;  %18950 = vmatprep.mubr.f32.mxu0 %v29138_v48  ;;  %v29406_v0 = vld [vmem:[#allocation7 + $0x18] sm:$0xff]  ;;  %33304 = vst [vmem:[#allocation39_spill] sm:$0xff] %v29421_v63 }
 0x48a   : > { %21139 = vmatprep.subr.bf16.mxu0 %v21138_v17  ;;  %33300 = vst [vmem:[#allocation58_spill] sm:$0xff] %v29406_v0  ;;  %v31253_v56 = vand.u32 4294901760, %v29406_v0  ;;  %21251 = vmatprep.subr.bf16.mxu1 %v29421_v63  ;;  %v33308_v0 = vld [vmem:[#allocation139_spill] sm:$0xff] }
 0x48b   : > { %21253 = vmatpush3.bf16.msra.mxu1 %v29421_v63  ;;  %v33310_v63 = vand.u32 4294901760, %v28900_v59 }
 0x48c   : > { %18951 = vmatmul.mubr.f32.gmra.mrb[8].mxu0 %v29179_v34 }
 0x48d   : > { %21141 = vmatpush3.bf16.msra.mxu0 %v21138_v17  ;;  %18953 = vmatprep.mubr.f32.mxu0 %v29187_v42  ;;  %v31254_v17 = vand.u32 4294901760, %v29401_v1 }
 0x48e   : > { %21143 = vmatprep.subr.bf16.mxu0 %v21142_v38 }
 0x490   : > { %18954 = vmatmul.mubr.f32.gmra.mrb[10].mxu0 %v29228_v7 }
 0x491   : > { %21145 = vmatpush3.bf16.msra.mxu0 %v21142_v38  ;;  %18956 = vmatprep.mubr.f32.mxu0 %v29235_v24  ;;  %v29409_v38 = vld [vmem:[#allocation7 + $0x20] sm:$0xff]  ;;  %v29433_v24 = vld [vmem:[#allocation7 + $0x30] sm:$0xff] }
 0x492   : > { %21147 = vmatprep.subr.bf16.mxu0 %v21146_v51 }
 0x494   : > { %18957 = vmatmul.mubr.f32.gmra.mrb[12].mxu0 %v29269_v49 }
 0x495   : > { %21149 = vmatpush3.bf16.msra.mxu0 %v21146_v51  ;;  %18959 = vmatprep.mubr.f32.mxu0 %v29280_v57  ;;  %v29411_v51 = vld [vmem:[#allocation7 + $0x28] sm:$0xff]  ;;  %v31259_v57 = vand.u32 4294901760, %v29409_v38 }
 0x496   : > { %21151 = vmatprep.subr.bf16.mxu0 %v21150_v14  ;;  %33301 = vst [vmem:[#allocation102_spill] sm:$0xff] %v29411_v51  ;;  %v31258_v49 = vand.u32 4294901760, %v29411_v51 }
 0x498   : > { %18960 = vmatmul.mubr.f32.gmra.mrb[14].mxu0 %v29309_v44  ;;  %v29427_v44 = vpack.c.bf16 %v31253_v56, %v31254_v17  ;;  %v29446_v56 = vpack.c.bf16 %v31258_v49, %v31259_v57  ;;  %v31267_v17 = vand.u32 4294901760, %v29433_v24  ;;  %v33309_v57 = vld [vmem:[#allocation36_spill] sm:$0xff] }
 0x499   : > { %21153 = vmatpush3.bf16.msra.mxu0 %v21150_v14  ;;  %18994 = vmatprep.mubr.f32.mxu0 %v28895_v21  ;;  %v33302_v14 = vld [vmem:[#allocation33_spill] sm:$0xff] }
 0x49a   : > { %21155 = vmatprep.subr.bf16.mxu0 %v33291_v33  ;;  %33305 = vst [vmem:[#allocation108_spill] sm:$0xff] %v29427_v44  ;;  %21255 = vmatprep.subr.bf16.mxu1 %v29427_v44  ;;  %v29460_v49 = vpack.c.bf16 %v31266_v58, %v31267_v17  ;;  %v33312_v58 = vand.u32 4294901760, %v28895_v21  ;;  %v33313_v17 = vand.u32 4294901760, %v28957_v23  ;;  %v33318_v21 = vand.u32 4294901760, %v29044_v9 }
 0x49b   : > { %21257 = vmatpush3.bf16.msra.mxu1 %v29427_v44  ;;  %v33311_v44 = vand.u32 4294901760, %v28919_v2  ;;  %v33315_v2 = vand.u32 4294901760, %v28936_v37  ;;  %v33319_v23 = vand.u32 4294901760, %v29011_v30  ;;  %v33326_v9 = vand.u32 4294901760, %v29148_v53 }
 0x49c   : > { %18995 = vmatmul.mubr.f32.vlgmr.msra.gmra.mrb[0].mxu0 %v28936_v37  ;;  %21259 = vmatprep.subr.bf16.mxu1 %v29446_v56  ;;  %v21190_v59 = vpack.c.bf16 %v33314_v40, %v33313_v17  ;;  %v33321_v37 = vand.u32 4294901760, %v29079_v5  ;;  %v33322_v40 = vand.u32 4294901760, %v29089_v62  ;;  %v33323_v17 = vand.u32 4294901760, %v33295_v18 }
 0x49d   : > { %21157 = vmatpush3.bf16.msra.mxu0 %v33291_v33  ;;  %18997 = vmatprep.mubr.f32.mxu0 %v33292_v52  ;;  %v21186_v51 = vpack.c.bf16 %v33311_v44, %v33310_v63  ;;  %v33316_v44 = vand.u32 4294901760, %v33292_v52  ;;  %v33317_v63 = vand.u32 4294901760, %v29022_v45  ;;  %v33324_v45 = vand.u32 4294901760, %v33296_v32 }
 0x49e   : > { %21159 = vmatprep.subr.bf16.mxu0 %v33293_v60  ;;  %v21198_v52 = vpack.c.bf16 %v33322_v40, %v33321_v37  ;;  %v33328_v62 = vand.u32 4294901760, %v33302_v14  ;;  %v33329_v5 = vand.u32 4294901760, %v29192_v26  ;;  %v33332_v53 = vand.u32 4294901760, %v29226_v16 }
 0x49f   : > { %21261 = vmatpush3.bf16.msra.mxu1 %v29446_v56  ;;  %v33336_v26 = vand.u32 4294901760, %v29278_v3 }
 0x4a0   : > { %18998 = vmatmul.mubr.f32.gmra.mrb[2].mxu0 %v29011_v30  ;;  %21263 = vmatprep.subr.bf16.mxu1 %v29460_v49  ;;  %v33325_v30 = vand.u32 4294901760, %v29143_v50  ;;  %v33333_v50 = vand.u32 4294901760, %v29243_v36  ;;  %v33340_v36 = vand.u32 4294901760, %v29314_v29 }
 0x4a1   : > { %21161 = vmatpush3.bf16.msra.mxu0 %v33293_v60  ;;  %19000 = vmatprep.mubr.f32.mxu0 %v29017_v27 }
 0x4a2   : > { %21163 = vmatprep.subr.bf16.mxu0 %v33294_v28  ;;  %v21202_v27 = vpack.c.bf16 %v33326_v9, %v33325_v30  ;;  %v33349_v9 = vand.u32 4294901760, %v29399_v61 }
 0x4a3   : > { %21265 = vmatpush3.bf16.msra.mxu1 %v29460_v49 }
 0x4a4   : > { %19001 = vmatmul.mubr.f32.gmra.mrb[4].mxu0 %v33295_v18  ;;  %v33330_v18 = vand.u32 4294901760, %v29202_v55  ;;  %v33337_v55 = vand.u32 4294901760, %v29290_v11  ;;  %v33345_v11 = vld [vmem:[#allocation54_spill] sm:$0xff] }
 0x4a5   : > { %21165 = vmatpush3.bf16.msra.mxu0 %v33294_v28  ;;  %19003 = vmatprep.mubr.f32.mxu0 %v33296_v32 }
 0x4a6   : > { %21167 = vmatprep.subr.bf16.mxu0 %v33297_v15  ;;  %v21206_v32 = vpack.c.bf16 %v33330_v18, %v33329_v5 }
 0x4a8   : > { %19004 = vmatmul.mubr.f32.gmra.mrb[6].mxu0 %v33299_v46 }
 0x4a9   : > { %21169 = vmatpush3.bf16.msra.mxu0 %v33297_v15  ;;  %19006 = vmatprep.mubr.f32.mxu0 %v33302_v14 }
 0x4aa   : > { %21171 = vmatprep.subr.bf16.mxu0 %v33303_v31 }
 0x4ac   : > { %19007 = vmatmul.mubr.f32.gmra.mrb[8].mxu0 %v29212_v8 }
 0x4ad   : > { %21173 = vmatpush3.bf16.msra.mxu0 %v33303_v31  ;;  %19009 = vmatprep.mubr.f32.mxu0 %v29226_v16 }
 0x4ae   : > { %21175 = vmatprep.subr.bf16.mxu0 %v33307_v22 }
 0x4b0   : > { %19010 = vmatmul.mubr.f32.gmra.mrb[10].mxu0 %v29264_v25 }
 0x4b1   : > { %21177 = vmatpush3.bf16.msra.mxu0 %v33307_v22  ;;  %19012 = vmatprep.mubr.f32.mxu0 %v29278_v3  ;;  %v33344_v3 = vld [vmem:[#allocation143_spill] sm:$0xff] }
 0x4b2   : > { %21179 = vmatprep.subr.bf16.mxu0 %v33308_v0 }
 0x4b4   : > { %19013 = vmatmul.mubr.f32.gmra.mrb[12].mxu0 %v29307_v47 }
 0x4b5   : > { %21181 = vmatpush3.bf16.msra.mxu0 %v33308_v0  ;;  %19015 = vmatprep.mubr.f32.mxu0 %v29314_v29 }
 0x4b6   : > { %21183 = vmatprep.subr.bf16.mxu0 %v33309_v57 }
 0x4b8   : > { %19016 = vmatmul.mubr.f32.gmra.mrb[14].mxu0 %v29329_v43 }
 0x4b9   : > { %21185 = vmatpush3.bf16.msra.mxu0 %v33309_v57  ;;  %19050 = vmatprep.mubr.f32.mxu0 %v33312_v58  ;;  %v21194_v58 = vpack.c.bf16 %v33318_v21, %v33317_v63 }
 0x4ba   : > { %21187 = vmatprep.subr.bf16.mxu0 %v21186_v51 }
 0x4bc   : > { %19051 = vmatmul.mubr.f32.vlgmr.msra.gmra.mrb[0].mxu0 %v33315_v2  ;;  %v33335_v2 = vand.u32 4294901760, %v29264_v25  ;;  %v33343_v25 = vld [vmem:[#allocation79_spill] sm:$0xff] }
 0x4bd   : > { %21189 = vmatpush3.bf16.msra.mxu0 %v21186_v51  ;;  %19053 = vmatprep.mubr.f32.mxu0 %v33316_v44  ;;  %v33327_v51 = vand.u32 4294901760, %v33299_v46  ;;  %v33334_v46 = vand.u32 4294901760, %v29248_v6  ;;  %v33339_v44 = vand.u32 4294901760, %v29307_v47  ;;  %v33341_v6 = vand.u32 4294901760, %v29329_v43  ;;  %v33342_v47 = vld [vmem:[#allocation130_spill] sm:$0xff] }
 0x4be   : > { %21191 = vmatprep.subr.bf16.mxu0 %v21190_v59 }
 0x4bf   : > { %v21210_v14 = vpack.c.bf16 %v33334_v46, %v33333_v50 }
 0x4c0   : > { %19054 = vmatmul.mubr.f32.gmra.mrb[2].mxu0 %v33319_v23  ;;  %v12754_v23 = vld [vmem:[#allocation7 + $0x60] sm:$0xff] }
 0x4c1   : > { %21193 = vmatpush3.bf16.msra.mxu0 %v21190_v59  ;;  %19056 = vmatprep.mubr.f32.mxu0 %v33320_v20  ;;  %v33331_v59 = vand.u32 4294901760, %v29212_v8  ;;  %v33338_v8 = vand.u32 4294901760, %v29295_v12  ;;  %v12755_v20 = vld [vmem:[#allocation7 + $0x68] sm:$0xff]  ;;  %v12795_v37 = vand.u32 4294901760, %v12754_v23 }
 0x4c2   : > { %21195 = vmatprep.subr.bf16.mxu0 %v21194_v58  ;;  %v12798_v40 = vand.u32 4294901760, %v12755_v20 }
 0x4c3   : > { %v21214_v16 = vpack.c.bf16 %v33338_v8, %v33337_v55 }
 0x4c4   : > { %19057 = vmatmul.mubr.f32.gmra.mrb[4].mxu0 %v33323_v17  ;;  %v33346_v17 = vld [vmem:[#allocation107_spill] sm:$0xff] }
 0x4c5   : > { %21197 = vmatpush3.bf16.msra.mxu0 %v21194_v58  ;;  %19059 = vmatprep.mubr.f32.mxu0 %v33324_v45  ;;  %v33347_v45 = vand.u32 4294901760, %v33346_v17 }
 0x4c6   : > { %21199 = vmatprep.subr.bf16.mxu0 %v21198_v52 }
 0x4c7   : > { %v29628_v30 = vsub.f32 %v33346_v17, %v33347_v45 }
 0x4c8   : > { %19060 = vmatmul.mubr.f32.gmra.mrb[6].mxu0 %v33327_v51  ;;  %v12756_v51 = vld [vmem:[#allocation7 + $0x70] sm:$0xff] }
 0x4c9   : > { %21201 = vmatpush3.bf16.msra.mxu0 %v21198_v52  ;;  %19062 = vmatprep.mubr.f32.mxu0 %v33328_v62  ;;  %v29623_v52 = vpack.c.bf16 %v12798_v40, %v12795_v37  ;;  %33348 = vst [vmem:[#allocation142_spill] sm:$0xff] %v29628_v30  ;;  %v12757_v62 = vld [vmem:[#allocation7 + $0x78] sm:$0xff]  ;;  %v12801_v5 = vand.u32 4294901760, %v12756_v51 }
 0x4ca   : > { %21203 = vmatprep.subr.bf16.mxu0 %v21202_v27  ;;  %v12804_v18 = vand.u32 4294901760, %v12757_v62 }
 0x4cc   : > { %19063 = vmatmul.mubr.f32.gmra.mrb[8].mxu0 %v33331_v59 }
 0x4cd   : > { %21205 = vmatpush3.bf16.msra.mxu0 %v21202_v27  ;;  %19065 = vmatprep.mubr.f32.mxu0 %v33332_v53  ;;  %v29633_v27 = vsub.f32 %v29399_v61, %v33349_v9  ;;  %v29639_v53 = vpack.c.bf16 %v12804_v18, %v12801_v5 }
 0x4ce   : > { %21207 = vmatprep.subr.bf16.mxu0 %v21206_v32 }
 0x4cf   : > { %33350 = vst [vmem:[#allocation76_spill] sm:$0xff] %v29633_v27  ;;  %v31281_v59 = vand.u32 4294901760, %v29633_v27  ;;  %33351 = vst [vmem:[#allocation43_spill] sm:$0xff] %v29639_v53 }
 0x4d0   : > { %19066 = vmatmul.mubr.f32.gmra.mrb[10].mxu0 %v33335_v2 }
 0x4d1   : > { %21209 = vmatpush3.bf16.msra.mxu0 %v21206_v32  ;;  %19068 = vmatprep.mubr.f32.mxu0 %v33336_v26  ;;  %v31283_v32 = vand.u32 4294901760, %v29628_v30  ;;  %v13010_v61 = vsub.f32 %v29633_v27, %v31281_v59 }
 0x4d2   : > { %21211 = vmatprep.subr.bf16.mxu0 %v21210_v14 }
 0x4d3   : > { %v13003_v50 = vsub.f32 %v29628_v30, %v31283_v32 }
 0x4d4   : > { %19069 = vmatmul.mubr.f32.gmra.mrb[12].mxu0 %v33339_v44 }
 0x4d5   : > { %21213 = vmatpush3.bf16.msra.mxu0 %v21210_v14  ;;  %19071 = vmatprep.mubr.f32.mxu0 %v33340_v36  ;;  %v13004_v46 = vand.u32 4294901760, %v13003_v50  ;;  %v13011_v14 = vand.u32 4294901760, %v13010_v61 }
 0x4d6   : > { %21215 = vmatprep.subr.bf16.mxu0 %v21214_v16 }
 0x4d7   : > { %v29649_v2 = vpack.c.bf16 %v13011_v14, %v13004_v46 }
 0x4d8   : > { %19072 = vmatmul.mubr.f32.gmra.mrb[14].mxu0 %v33341_v6 }
 0x4d9   : > { %21217 = vmatpush3.bf16.msra.mxu0 %v21214_v16  ;;  %19106 = vmatprep.mubr.f32.mxu0 %v28857_v10 }
 0x4da   : > { %21219 = vmatprep.subr.bf16.mxu0 %v33291_v33 }
 0x4dc   : > { %19107 = vmatmul.mubr.f32.vlgmr.msra.gmra.mrb[0].mxu0 %v28880_v19 }
 0x4dd   : > { %21221 = vmatpush3.bf16.msra.mxu0 %v33291_v33  ;;  %19109 = vmatprep.mubr.f32.mxu0 %v28923_v39  ;;  %v12751_v33 = vld [vmem:[#allocation7 + $0x48] sm:$0xff] }
 0x4de   : > { %21223 = vmatprep.subr.bf16.mxu0 %v33293_v60 }
 0x4e0   : > { %19110 = vmatmul.mubr.f32.gmra.mrb[2].mxu0 %v28961_v13 }
 0x4e1   : > { %21225 = vmatpush3.bf16.msra.mxu0 %v33293_v60  ;;  %19112 = vmatprep.mubr.f32.mxu0 %v28980_v41 }
 0x4e2   : > { %21227 = vmatprep.subr.bf16.mxu0 %v33294_v28 }
 0x4e4   : > { %19113 = vmatmul.mubr.f32.gmra.mrb[4].mxu0 %v29004_v4 }
 0x4e5   : > { %21229 = vmatpush3.bf16.msra.mxu0 %v33294_v28  ;;  %19115 = vmatprep.mubr.f32.mxu0 %v29060_v35  ;;  %v12786_v28 = vand.u32 4294901760, %v12751_v33 }
 0x4e6   : > { %21231 = vmatprep.subr.bf16.mxu0 %v33297_v15 }
 0x4e7   : > { %v29654_v55 = vsub.f32 %v12751_v33, %v12786_v28 }
 0x4e8   : > { %19116 = vmatmul.mubr.f32.gmra.mrb[6].mxu0 %v29117_v54 }
 0x4e9   : > { %21233 = vmatpush3.bf16.msra.mxu0 %v33297_v15  ;;  %19118 = vmatprep.mubr.f32.mxu0 %v29138_v48  ;;  %33353 = vst [vmem:[#allocation62_spill] sm:$0xff] %v29654_v55  ;;  %v31276_v16 = vand.u32 4294901760, %v29654_v55 }
 0x4ea   : > { %21235 = vmatprep.subr.bf16.mxu0 %v33303_v31 }
 0x4ec   : > { %19119 = vmatmul.mubr.f32.gmra.mrb[8].mxu0 %v29179_v34 }
 0x4ed   : > { %21237 = vmatpush3.bf16.msra.mxu0 %v33303_v31  ;;  %19121 = vmatprep.mubr.f32.mxu0 %v29187_v42  ;;  %v12750_v31 = vld [vmem:[#allocation7 + $0x40] sm:$0xff] }
 0x4ee   : > { %21239 = vmatprep.subr.bf16.mxu0 %v33307_v22  ;;  %v12783_v60 = vand.u32 4294901760, %v12750_v31 }
 0x4f0   : > { %19122 = vmatmul.mubr.f32.gmra.mrb[10].mxu0 %v29228_v7  ;;  %v29615_v15 = vpack.c.bf16 %v12786_v28, %v12783_v60  ;;  %v29652_v26 = vsub.f32 %v12750_v31, %v12783_v60  ;;  %v29676_v28 = vsub.f32 %v12754_v23, %v12795_v37  ;;  %v29694_v37 = vsub.f32 %v12757_v62, %v12804_v18 }
 0x4f1   : > { %21241 = vmatpush3.bf16.msra.mxu0 %v33307_v22  ;;  %19124 = vmatprep.mubr.f32.mxu0 %v33342_v47  ;;  %v12752_v22 = vld [vmem:[#allocation7 + $0x50] sm:$0xff]  ;;  %v29710_v18 = vpack.c.bf16 %v29633_v27, %v29628_v30 }
 0x4f2   : > { %21243 = vmatprep.subr.bf16.mxu0 %v33308_v0  ;;  %21267 = vmatprep.subr.bf16.mxu1 %v29615_v15  ;;  %v12789_v63 = vand.u32 4294901760, %v12752_v22  ;;  %33352 = vst [vmem:[#allocation101_spill] sm:$0xff] %v29652_v26  ;;  %v31277_v8 = vand.u32 4294901760, %v29652_v26  ;;  %33356 = vst [vmem:[#allocation122_spill] sm:$0xff] %v29676_v28  ;;  %v31273_v17 = vand.u32 4294901760, %v29676_v28  ;;  %v31270_v14 = vand.u32 4294901760, %v29694_v37 }
 0x4f3   : > { %21269 = vmatpush3.bf16.msra.mxu1 %v29615_v15  ;;  %33359 = vst [vmem:[#allocation46_spill] sm:$0xff] %v29694_v37 }
 0x4f4   : > { %19125 = vmatmul.mubr.f32.gmra.mrb[12].mxu0 %v33343_v25  ;;  %v13059_v44 = vsub.f32 %v29652_v26, %v31277_v8  ;;  %v29661_v36 = vsub.f32 %v12752_v22, %v12789_v63  ;;  %v29678_v22 = vsub.f32 %v12755_v20, %v12798_v40  ;;  %v13087_v50 = vsub.f32 %v29676_v28, %v31273_v17 }
 0x4f5   : > { %21245 = vmatpush3.bf16.msra.mxu0 %v33308_v0  ;;  %19127 = vmatprep.mubr.f32.mxu0 %v33344_v3  ;;  %v12753_v0 = vld [vmem:[#allocation7 + $0x58] sm:$0xff]  ;;  %v29692_v20 = vsub.f32 %v12756_v51, %v12801_v5 }
 0x4f6   : > { %21247 = vmatprep.subr.bf16.mxu0 %v33309_v57  ;;  %v12792_v21 = vand.u32 4294901760, %v12753_v0  ;;  %33354 = vst [vmem:[#allocation55_spill] sm:$0xff] %v29661_v36  ;;  %33357 = vst [vmem:[#allocation87_spill] sm:$0xff] %v29678_v22  ;;  %v31272_v45 = vand.u32 4294901760, %v29678_v22  ;;  %v13088_v40 = vand.u32 4294901760, %v13087_v50 }
 0x4f7   : > { %33358 = vst [vmem:[#allocation49_spill] sm:$0xff] %v29692_v20  ;;  %v31271_v46 = vand.u32 4294901760, %v29692_v20 }
 0x4f8   : > { %19128 = vmatmul.mubr.f32.gmra.mrb[14].mxu0 %v33345_v11  ;;  %v29619_v58 = vpack.c.bf16 %v12792_v21, %v12789_v63  ;;  %v29663_v6 = vsub.f32 %v12753_v0, %v12792_v21  ;;  %v13094_v23 = vsub.f32 %v29678_v22, %v31272_v45 }
 0x4f9   : > { %21249 = vmatpush3.bf16.msra.mxu0 %v33309_v57  ;;  %19162 = vmatprep.mubr.f32.mxu0 %v28857_v10 }
 0x4fa   : > { %21271 = vmatprep.subr.bf16.mxu1 %v29619_v58  ;;  %33355 = vst [vmem:[#allocation70_spill] sm:$0xff] %v29663_v6  ;;  %v13095_v61 = vand.u32 4294901760, %v13094_v23  ;;  %v33361_v23 = vld [vmem:[#allocation58_spill] sm:$0xff] }
 0x4fb   : > { %21273 = vmatpush3.bf16.msra.mxu1 %v29619_v58 }
 0x4fc   : > { %19163 = vmatmul.mubr.f32.vlgmr.msra.gmra.mrb[0].mxu0 %v28880_v19  ;;  %21275 = vmatprep.subr.bf16.mxu1 %v29623_v52 }
 0x4fd   : > { %19165 = vmatprep.mubr.f32.mxu0 %v28923_v39 }
 0x4ff   : > { %21277 = vmatpush3.bf16.msra.mxu1 %v29623_v52 }
 0x500   : > { %19166 = vmatmul.mubr.f32.gmra.mrb[2].mxu0 %v28961_v13  ;;  %21279 = vmatprep.subr.bf16.mxu1 %v29639_v53 }
 0x501   : > { %19168 = vmatprep.mubr.f32.mxu0 %v28980_v41 }
 0x503   : > { %21281 = vmatpush3.bf16.msra.mxu1 %v29639_v53 }
 0x504   : > { %19169 = vmatmul.mubr.f32.gmra.mrb[4].mxu0 %v29004_v4  ;;  %21283 = vmatprep.subr.bf16.mxu1 %v29649_v2 }
 0x505   : > { %19171 = vmatprep.mubr.f32.mxu0 %v29060_v35  ;;  %v29576_v12 = vpop.f32.mrb[0].mxu1 }
 0x506   : > { %v29578_v57 = vpop.f32.mrb[1].mxu1 }
 0x508   : > { %19172 = vmatmul.mubr.f32.gmra.mrb[6].mxu0 %v29117_v54 }
 0x509   : > { %19174 = vmatprep.mubr.f32.mxu0 %v29138_v48  ;;  %v29582_v10 = vpop.f32.mrb[2].mxu1 }
 0x50a   : > { %v29584_v19 = vpop.f32.mrb[3].mxu1 }
 0x50c   : > { %19175 = vmatmul.mubr.f32.gmra.mrb[8].mxu0 %v29179_v34 }
 0x50d   : > { %19177 = vmatprep.mubr.f32.mxu0 %v29187_v42  ;;  %v29588_v39 = vpop.f32.mrb[4].mxu1 }
 0x50e   : > { %v29590_v4 = vpop.f32.mrb[5].mxu1 }
 0x510   : > { %19178 = vmatmul.mubr.f32.gmra.mrb[10].mxu0 %v29228_v7 }
 0x511   : > { %19180 = vmatprep.mubr.f32.mxu0 %v33342_v47  ;;  %v29594_v13 = vpop.f32.mrb[6].mxu1  ;;  %v13066_v47 = vsub.f32 %v29654_v55, %v31276_v16 }
 0x512   : > { %v29596_v48 = vpop.f32.mrb[7].mxu1 }
 0x513   : > { %v13067_v31 = vand.u32 4294901760, %v13066_v47  ;;  %v13101_v47 = vsub.f32 %v29692_v20, %v31271_v46 }
 0x514   : > { %19181 = vmatmul.mubr.f32.gmra.mrb[12].mxu0 %v33343_v25  ;;  %v13060_v25 = vand.u32 4294901760, %v13059_v44  ;;  %v29698_v44 = vpack.c.bf16 %v13095_v61, %v13088_v40  ;;  %v33362_v40 = vand.u32 4294901760, %v33361_v23 }
 0x515   : > { %19183 = vmatprep.mubr.f32.mxu0 %v33344_v3  ;;  %v29599_v41 = vpop.f32.mrb[8].mxu1  ;;  %v31275_v3 = vand.u32 4294901760, %v29661_v36  ;;  %v13102_v51 = vand.u32 4294901760, %v13101_v47  ;;  %v33363_v47 = vand.u32 4294901760, %v29409_v38 }
 0x516   : > { %v29601_v35 = vpop.f32.mrb[9].mxu1  ;;  %v29680_v0 = vpack.c.bf16 %v13067_v31, %v13060_v25  ;;  %v13108_v25 = vsub.f32 %v29694_v37, %v31270_v14  ;;  %v29714_v31 = vpack.c.bf16 %v29654_v55, %v29652_v26  ;;  %v29736_v61 = vsub.f32 %v33361_v23, %v33362_v40 }
 0x517   : > { %v13073_v33 = vsub.f32 %v29661_v36, %v31275_v3 }
 0x518   : > { %19184 = vmatmul.mubr.f32.gmra.mrb[14].mxu0 %v33345_v11  ;;  %v31274_v11 = vand.u32 4294901760, %v29663_v6  ;;  %v13109_v5 = vand.u32 4294901760, %v13108_v25  ;;  %v29741_v25 = vsub.f32 %v29409_v38, %v33363_v47 }
 0x519   : > { %v29603_v54 = vpop.f32.mrb[10].mxu1  ;;  %v13074_v63 = vand.u32 4294901760, %v13073_v33  ;;  %v29718_v33 = vpack.c.bf16 %v29663_v6, %v29661_v36 }
 0x51a   : > { %v29605_v34 = vpop.f32.mrb[11].mxu1  ;;  %v13080_v60 = vsub.f32 %v29663_v6, %v31274_v11  ;;  %v29706_v62 = vpack.c.bf16 %v13109_v5, %v13102_v51  ;;  %v33364_v51 = vld [vmem:[#allocation102_spill] sm:$0xff] }
 0x51b   : > { %v33365_v5 = vand.u32 4294901760, %v33364_v51 }
 0x51c   : > { %v13081_v21 = vand.u32 4294901760, %v13080_v60  ;;  %v29722_v60 = vpack.c.bf16 %v29678_v22, %v29676_v28 }
 0x51d   : > { %v29607_v42 = vpop.f32.mrb[12].mxu1  ;;  %v29746_v14 = vsub.f32 %v33364_v51, %v33365_v5 }
 0x51e   : > { %v29609_v7 = vpop.f32.mrb[13].mxu1  ;;  %v29684_v9 = vpack.c.bf16 %v13081_v21, %v13074_v63  ;;  %v29726_v63 = vpack.c.bf16 %v29694_v37, %v29692_v20  ;;  %v33360_v21 = vand.u32 4294901760, %v29401_v1 }
 0x51f   : > { %v31282_v45 = vand.u32 4294901760, %v29746_v14 }
 0x520   : > { %v29731_v50 = vsub.f32 %v29401_v1, %v33360_v21  ;;  %v31278_v1 = vand.u32 4294901760, %v29736_v61  ;;  %v31280_v21 = vand.u32 4294901760, %v29741_v25 }
 0x521   : > { %v29611_v29 = vpop.f32.mrb[14].mxu1 }
 0x522   : > { %v29613_v43 = vpop.f32.mrb[15].mxu1  ;;  %v31279_v46 = vand.u32 4294901760, %v29731_v50  ;;  %v13024_v51 = vsub.f32 %v29736_v61, %v31278_v1  ;;  %v13031_v11 = vsub.f32 %v29741_v25, %v31280_v21  ;;  %v33367_v1 = vld [vmem:[#allocation126_spill] sm:$0xff] }
 0x524   : > { %v13017_v47 = vsub.f32 %v29731_v50, %v31279_v46  ;;  %v33368_v46 = vand.u32 4294901760, %v33367_v1  ;;  %v13025_v32 = vand.u32 4294901760, %v13024_v51 }
 0x526   : > { %v29777_v21 = vsub.f32 %v33367_v1, %v33368_v46 }
 0x5cf   : > { %v19164_v23 = vpop.f32.mrb[0].mxu0 }
 0x5d0   : > { %v21442_v40 = vadd.f32 %v19164_v23, %v29576_v12  ;;  %v12616_v17 = vpop.f32.mrb[1].mxu0  ;;  %v13038_v12 = vsub.f32 %v29746_v14, %v31282_v45  ;;  %v13018_v45 = vand.u32 4294901760, %v13017_v47 }
 0x5d1   : > { %v21443_v38 = vadd.f32 %v12616_v17, %v29578_v57  ;;  %v33366_v57 = vand.u32 4294901760, %v29433_v24 }
 0x5d2   : > { %v12727_v5 = vmax.f32 %v21442_v40, 0.0  ;;  %v13039_v20 = vand.u32 4294901760, %v13038_v12  ;;  %v21286_v12 = vpack.c.bf16 %v13025_v32, %v13018_v45 }
 0x5d3   : > { %v12726_v23 = vmax.f32 %v21443_v38, 0.0  ;;  %v19167_v3 = vpop.f32.mrb[2].mxu0  ;;  %v29769_v17 = vsub.f32 %v29433_v24, %v33366_v57  ;;  %v13032_v57 = vand.u32 4294901760, %v13031_v11 }
 0x5d4   : > { %v29771_v16 = vand.u32 4294901760, %v12727_v5  ;;  %v21444_v8 = vadd.f32 %v19167_v3, %v29582_v10  ;;  %v12628_v40 = vpop.f32.mrb[3].mxu0 }
 0x5d5   : > { %v29779_v59 = vand.u32 4294901760, %v12726_v23  ;;  %v21445_v38 = vadd.f32 %v12628_v40, %v29584_v19  ;;  %v29804_v46 = vpack.c.bf16 %v13039_v20, %v13032_v57  ;;  %v33369_v32 = vand.u32 4294901760, %v29769_v17 }
 0x5d6   : > { %v29783_v37 = vsub.f32 %v12727_v5, %v29771_v16  ;;  %v12729_v24 = vmax.f32 %v21444_v8, 0.0  ;;  %v33370_v57 = vand.u32 4294901760, %v29777_v21 }
 0x5d7   : > { %v29786_v10 = vsub.f32 %v12726_v23, %v29779_v59  ;;  %v12728_v3 = vmax.f32 %v21445_v38, 0.0  ;;  %v19170_v22 = vpop.f32.mrb[4].mxu0  ;;  %v13045_v45 = vsub.f32 %v29769_v17, %v33369_v32 }
 0x5d8   : > { %v31288_v1 = vand.u32 4294901760, %v29783_v37  ;;  %v29790_v28 = vand.u32 4294901760, %v12729_v24  ;;  %v21446_v19 = vadd.f32 %v19170_v22, %v29588_v39  ;;  %v12640_v47 = vpop.f32.mrb[5].mxu0 }
 0x5d9   : > { %v29794_v5 = vand.u32 4294901760, %v12728_v3  ;;  %v21447_v8 = vadd.f32 %v12640_v47, %v29590_v4  ;;  %v31289_v11 = vand.u32 4294901760, %v29786_v10 }
 0x5da   : > { %v12852_v23 = vsub.f32 %v29783_v37, %v31288_v1  ;;  %v29802_v40 = vsub.f32 %v12729_v24, %v29790_v28  ;;  %v12731_v38 = vmax.f32 %v21446_v19, 0.0 }
 0x5db   : > { %v29807_v39 = vsub.f32 %v12728_v3, %v29794_v5  ;;  %v12730_v22 = vmax.f32 %v21447_v8, 0.0  ;;  %v19173_v51 = vpop.f32.mrb[6].mxu0  ;;  %v12842_v4 = vsub.f32 %v29786_v10, %v31289_v11  ;;  %v13052_v3 = vsub.f32 %v29777_v21, %v33370_v57 }
 0x5dc   : > { %v29815_v47 = vand.u32 4294901760, %v12731_v38  ;;  %v21448_v24 = vadd.f32 %v19173_v51, %v29594_v13  ;;  %v12652_v19 = vpop.f32.mrb[7].mxu0  ;;  %v31294_v20 = vand.u32 4294901760, %v29802_v40  ;;  %v12853_v36 = vand.u32 4294901760, %v12852_v23 }
 0x5dd   : > { %v29822_v8 = vand.u32 4294901760, %v12730_v22  ;;  %v21449_v1 = vadd.f32 %v12652_v19, %v29596_v48  ;;  %v12843_v11 = vand.u32 4294901760, %v12842_v4  ;;  %v31296_v6 = vand.u32 4294901760, %v29807_v39 }
 0x5de   : > { %v29827_v32 = vsub.f32 %v12731_v38, %v29815_v47  ;;  %v12733_v55 = vmax.f32 %v21448_v24, 0.0  ;;  %v12872_v13 = vsub.f32 %v29802_v40, %v31294_v20  ;;  %v13046_v4 = vand.u32 4294901760, %v13045_v45 }
 0x5df   : > { %v29833_v51 = vsub.f32 %v12730_v22, %v29822_v8  ;;  %v12732_v57 = vmax.f32 %v21449_v1, 0.0  ;;  %v19176_v26 = vpop.f32.mrb[8].mxu0  ;;  %19218 = vmatprep.mubr.f32.mxu1 %v12843_v11  ;;  %v12862_v48 = vsub.f32 %v29807_v39, %v31296_v6  ;;  %v13053_v20 = vand.u32 4294901760, %v13052_v3 }
 0x5e0   : > { %v29838_v23 = vand.u32 4294901760, %v12733_v55  ;;  %v21450_v38 = vadd.f32 %v19176_v26, %v29599_v41  ;;  %v12664_v24 = vpop.f32.mrb[9].mxu0  ;;  %19219 = vmatmul.mubr.f32.vlgmr.msra.gmra.mrb[16].mxu1 %v12853_v36  ;;  %v31298_v19 = vand.u32 4294901760, %v29827_v32  ;;  %v12873_v30 = vand.u32 4294901760, %v12872_v13 }
 0x5e1   : > { %v29842_v27 = vand.u32 4294901760, %v12732_v57  ;;  %v21451_v1 = vadd.f32 %v12664_v24, %v29601_v35  ;;  %21285 = vmatpush3.bf16.msra.mxu1 %v29649_v2  ;;  %v12863_v11 = vand.u32 4294901760, %v12862_v48  ;;  %v31299_v22 = vand.u32 4294901760, %v29833_v51 }
 0x5e2   : > { %v29848_v45 = vsub.f32 %v12733_v55, %v29838_v23  ;;  %v12735_v6 = vmax.f32 %v21450_v38, 0.0  ;;  %21287 = vmatprep.subr.bf16.mxu1 %v21286_v12  ;;  %v12892_v41 = vsub.f32 %v29827_v32, %v31298_v19  ;;  %v21294_v38 = vpack.c.bf16 %v13053_v20, %v13046_v4 }
 0x5e3   : > { %v29854_v26 = vsub.f32 %v12732_v57, %v29842_v27  ;;  %v12734_v36 = vmax.f32 %v21451_v1, 0.0  ;;  %v19179_v35 = vpop.f32.mrb[10].mxu0  ;;  %19221 = vmatprep.mubr.f32.mxu1 %v12863_v11  ;;  %v12882_v2 = vsub.f32 %v29833_v51, %v31299_v22 }
 0x5e4   : > { %v29859_v3 = vand.u32 4294901760, %v12735_v6  ;;  %v21452_v55 = vadd.f32 %v19179_v35, %v29603_v54  ;;  %v12676_v13 = vpop.f32.mrb[11].mxu0  ;;  %19222 = vmatmul.mubr.f32.gmra.mrb[18].mxu1 %v12873_v30  ;;  %v31302_v48 = vand.u32 4294901760, %v29848_v45  ;;  %v12893_v53 = vand.u32 4294901760, %v12892_v41 }
 0x5e5   : > { %v29863_v24 = vand.u32 4294901760, %v12734_v36  ;;  %v21453_v57 = vadd.f32 %v12676_v13, %v29605_v34  ;;  %21289 = vmatpush3.bf16.msra.mxu1 %v21286_v12  ;;  %v12883_v1 = vand.u32 4294901760, %v12882_v2  ;;  %v31305_v11 = vand.u32 4294901760, %v29854_v26 }
 0x5e6   : > { %v29868_v19 = vsub.f32 %v12735_v6, %v29859_v3  ;;  %v12737_v22 = vmax.f32 %v21452_v55, 0.0  ;;  %21291 = vmatprep.subr.bf16.mxu1 %v29804_v46  ;;  %v12912_v54 = vsub.f32 %v29848_v45, %v31302_v48 }
 0x5e7   : > { %v29875_v30 = vsub.f32 %v12734_v36, %v29863_v24  ;;  %v12736_v20 = vmax.f32 %v21453_v57, 0.0  ;;  %v19182_v34 = vpop.f32.mrb[12].mxu0  ;;  %19224 = vmatprep.mubr.f32.mxu1 %v12883_v1  ;;  %v12902_v12 = vsub.f32 %v29854_v26, %v31305_v11 }
 0x5e8   : > { %v29880_v6 = vand.u32 4294901760, %v12737_v22  ;;  %v21454_v4 = vadd.f32 %v19182_v34, %v29607_v42  ;;  %v12688_v41 = vpop.f32.mrb[13].mxu0  ;;  %19225 = vmatmul.mubr.f32.gmra.mrb[20].mxu1 %v12893_v53  ;;  %v31303_v35 = vand.u32 4294901760, %v29868_v19  ;;  %v12913_v48 = vand.u32 4294901760, %v12912_v54 }
 0x5e9   : > { %v29884_v2 = vand.u32 4294901760, %v12736_v20  ;;  %v21455_v36 = vadd.f32 %v12688_v41, %v29609_v7  ;;  %21293 = vmatpush3.bf16.msra.mxu1 %v29804_v46  ;;  %v12903_v55 = vand.u32 4294901760, %v12902_v12  ;;  %v31304_v13 = vand.u32 4294901760, %v29875_v30 }
 0x5ea   : > { %v29890_v57 = vsub.f32 %v12737_v22, %v29880_v6  ;;  %v12739_v1 = vmax.f32 %v21454_v4, 0.0  ;;  %21295 = vmatprep.subr.bf16.mxu1 %v21294_v38  ;;  %v12932_v42 = vsub.f32 %v29868_v19, %v31303_v35 }
 0x5eb   : > { %v29896_v53 = vsub.f32 %v12736_v20, %v29884_v2  ;;  %v12738_v34 = vmax.f32 %v21455_v36, 0.0  ;;  %v19185_v7 = vpop.f32.mrb[14].mxu0  ;;  %19227 = vmatprep.mubr.f32.mxu1 %v12903_v55  ;;  %v12922_v46 = vsub.f32 %v29875_v30, %v31304_v13 }
 0x5ec   : > { %v29901_v12 = vand.u32 4294901760, %v12739_v1  ;;  %v21456_v22 = vadd.f32 %v19185_v7, %v29611_v29  ;;  %v12700_v54 = vpop.f32.mrb[15].mxu0  ;;  %19228 = vmatmul.mubr.f32.gmra.mrb[22].mxu1 %v12913_v48  ;;  %v12951_v4 = vand.u32 4294901760, %v29890_v57  ;;  %v12933_v11 = vand.u32 4294901760, %v12932_v42 }
 0x5ed   : > { %v29905_v41 = vand.u32 4294901760, %v12738_v34  ;;  %v21457_v20 = vadd.f32 %v12700_v54, %v29613_v43  ;;  %21297 = vmatpush3.bf16.msra.mxu1 %v21294_v38  ;;  %v12923_v36 = vand.u32 4294901760, %v12922_v46  ;;  %v12941_v55 = vand.u32 4294901760, %v29896_v53 }
 0x5ee   : > { %v29910_v35 = vsub.f32 %v12739_v1, %v29901_v12  ;;  %v12741_v13 = vmax.f32 %v21456_v22, 0.0  ;;  %21299 = vmatprep.subr.bf16.mxu1 %v29680_v0  ;;  %v12952_v29 = vsub.f32 %v29890_v57, %v12951_v4 }
 0x5ef   : > { %v29917_v48 = vsub.f32 %v12738_v34, %v29905_v41  ;;  %v12740_v7 = vmax.f32 %v21457_v20, 0.0  ;;  %19230 = vmatprep.mubr.f32.mxu1 %v12923_v36  ;;  %v12942_v43 = vsub.f32 %v29896_v53, %v12941_v55 }
 0x5f0   : > { %v29922_v38 = vand.u32 4294901760, %v12741_v13  ;;  %19231 = vmatmul.mubr.f32.gmra.mrb[24].mxu1 %v12933_v11  ;;  %v12971_v1 = vand.u32 4294901760, %v29910_v35  ;;  %v12953_v54 = vand.u32 4294901760, %v12952_v29 }
 0x5f1   : > { %v29925_v42 = vand.u32 4294901760, %v12740_v7  ;;  %21301 = vmatpush3.bf16.msra.mxu1 %v29680_v0  ;;  %v12943_v46 = vand.u32 4294901760, %v12942_v43  ;;  %v12961_v22 = vand.u32 4294901760, %v29917_v48 }
 0x5f2   : > { %v29930_v34 = vsub.f32 %v12741_v13, %v29922_v38  ;;  %21303 = vmatprep.subr.bf16.mxu1 %v29684_v9  ;;  %v12972_v20 = vsub.f32 %v29910_v35, %v12971_v1 }
 0x5f3   : > { %v29937_v11 = vsub.f32 %v12740_v7, %v29925_v42  ;;  %19233 = vmatprep.mubr.f32.mxu1 %v12943_v46  ;;  %v12962_v0 = vsub.f32 %v29917_v48, %v12961_v22 }
 0x5f4   : > { %19234 = vmatmul.mubr.f32.gmra.mrb[26].mxu1 %v12953_v54  ;;  %v12991_v36 = vand.u32 4294901760, %v29930_v34  ;;  %v12973_v43 = vand.u32 4294901760, %v12972_v20  ;;  %v21318_v20 = vpack.c.bf16 %v29736_v61, %v29731_v50 }
 0x5f5   : > { %21305 = vmatpush3.bf16.msra.mxu1 %v29684_v9  ;;  %v12963_v13 = vand.u32 4294901760, %v12962_v0  ;;  %v12981_v29 = vand.u32 4294901760, %v29937_v11  ;;  %v33376_v0 = vld [vmem:[#allocation76_spill] sm:$0xff] }
 0x5f6   : > { %21307 = vmatprep.subr.bf16.mxu1 %v29698_v44  ;;  %v12992_v7 = vsub.f32 %v29930_v34, %v12991_v36 }
 0x5f7   : > { %19236 = vmatprep.mubr.f32.mxu1 %v12963_v13  ;;  %v12982_v46 = vsub.f32 %v29937_v11, %v12981_v29  ;;  %v33377_v13 = vand.u32 4294901760, %v33376_v0  ;;  %v33389_v0 = vand.u32 4294901760, %v29827_v32 }
 0x5f8   : > { %19237 = vmatmul.mubr.f32.gmra.mrb[28].mxu1 %v12973_v43  ;;  %v12993_v9 = vand.u32 4294901760, %v12992_v7  ;;  %v33378_v7 = vand.u32 4294901760, %v29786_v10 }
 0x5f9   : > { %21309 = vmatpush3.bf16.msra.mxu1 %v29698_v44  ;;  %v12983_v54 = vand.u32 4294901760, %v12982_v46  ;;  %v21322_v44 = vpack.c.bf16 %v29746_v14, %v29741_v25  ;;  %v33379_v46 = vand.u32 4294901760, %v29731_v50  ;;  %v33386_v50 = vand.u32 4294901760, %v29833_v51 }
 0x5fa   : > { %21311 = vmatprep.subr.bf16.mxu1 %v29706_v62 }
 0x5fb   : > { %19239 = vmatprep.mubr.f32.mxu1 %v12983_v54  ;;  %v33380_v54 = vand.u32 4294901760, %v29736_v61  ;;  %v33388_v61 = vand.u32 4294901760, %v29777_v21 }
 0x5fc   : > { %19240 = vmatmul.mubr.f32.gmra.mrb[30].mxu1 %v12993_v9 }
 0x5fd   : > { %21313 = vmatpush3.bf16.msra.mxu1 %v29706_v62  ;;  %19274 = vmatprep.mubr.f32.mxu1 %v29779_v59  ;;  %v21326_v62 = vpack.c.bf16 %v29777_v21, %v29769_v17  ;;  %v21382_v9 = vpack.c.bf16 %v33380_v54, %v33379_v46  ;;  %v33397_v21 = vld [vmem:[#allocation55_spill] sm:$0xff]  ;;  %v33399_v46 = vld [vmem:[#allocation70_spill] sm:$0xff] }
 0x5fe   : > { %21315 = vmatprep.subr.bf16.mxu1 %v29710_v18 }
 0x600   : > { %19275 = vmatmul.mubr.f32.vlgmr.msra.gmra.mrb[16].mxu1 %v29771_v16 }
 0x601   : > { %19277 = vmatprep.mubr.f32.mxu1 %v29794_v5  ;;  %21317 = vmatpush3.bf16.msra.mxu1 %v29710_v18  ;;  %v33371_v18 = vld [vmem:[#allocation39_spill] sm:$0xff] }
 0x602   : > { %21319 = vmatprep.subr.bf16.mxu1 %v21318_v20 }
 0x604   : > { %19278 = vmatmul.mubr.f32.gmra.mrb[18].mxu1 %v29790_v28 }
 0x605   : > { %19280 = vmatprep.mubr.f32.mxu1 %v29822_v8  ;;  %21321 = vmatpush3.bf16.msra.mxu1 %v21318_v20  ;;  %v33381_v20 = vand.u32 4294901760, %v29783_v37 }
 0x606   : > { %21323 = vmatprep.subr.bf16.mxu1 %v21322_v44 }
 0x608   : > { %19281 = vmatmul.mubr.f32.gmra.mrb[20].mxu1 %v29815_v47 }
 0x609   : > { %19283 = vmatprep.mubr.f32.mxu1 %v29842_v27  ;;  %21325 = vmatpush3.bf16.msra.mxu1 %v21322_v44  ;;  %v33382_v44 = vand.u32 4294901760, %v29807_v39 }
 0x60a   : > { %21327 = vmatprep.subr.bf16.mxu1 %v21326_v62 }
 0x60c   : > { %19284 = vmatmul.mubr.f32.gmra.mrb[22].mxu1 %v29838_v23 }
 0x60d   : > { %19286 = vmatprep.mubr.f32.mxu1 %v29863_v24  ;;  %21329 = vmatpush3.bf16.msra.mxu1 %v21326_v62  ;;  %v33383_v62 = vand.u32 4294901760, %v29741_v25  ;;  %v33390_v25 = vand.u32 4294901760, %v29854_v26 }
 0x60e   : > { %21331 = vmatprep.subr.bf16.mxu1 %v29714_v31 }
 0x610   : > { %19287 = vmatmul.mubr.f32.gmra.mrb[24].mxu1 %v29859_v3 }
 0x611   : > { %19289 = vmatprep.mubr.f32.mxu1 %v29884_v2  ;;  %21333 = vmatpush3.bf16.msra.mxu1 %v29714_v31  ;;  %v33372_v31 = vld [vmem:[#allocation108_spill] sm:$0xff] }
 0x612   : > { %21335 = vmatprep.subr.bf16.mxu1 %v29718_v33 }
 0x614   : > { %19290 = vmatmul.mubr.f32.gmra.mrb[26].mxu1 %v29880_v6 }
 0x615   : > { %19292 = vmatprep.mubr.f32.mxu1 %v29905_v41  ;;  %21337 = vmatpush3.bf16.msra.mxu1 %v29718_v33  ;;  %v33373_v33 = vld [vmem:[#allocation43_spill] sm:$0xff] }
 0x616   : > { %21339 = vmatprep.subr.bf16.mxu1 %v29722_v60 }
 0x618   : > { %19293 = vmatmul.mubr.f32.gmra.mrb[28].mxu1 %v29901_v12 }
 0x619   : > { %19295 = vmatprep.mubr.f32.mxu1 %v29925_v42  ;;  %21341 = vmatpush3.bf16.msra.mxu1 %v29722_v60  ;;  %v33374_v60 = vld [vmem:[#allocation142_spill] sm:$0xff] }
 0x61a   : > { %21343 = vmatprep.subr.bf16.mxu1 %v29726_v63 }
 0x61c   : > { %19296 = vmatmul.mubr.f32.gmra.mrb[30].mxu1 %v29922_v38 }
 0x61d   : > { %21345 = vmatpush3.bf16.msra.mxu1 %v29726_v63  ;;  %19330 = vmatprep.mubr.f32.mxu1 %v29786_v10  ;;  %v33375_v63 = vand.u32 4294901760, %v33374_v60  ;;  %v33384_v60 = vand.u32 4294901760, %v29746_v14  ;;  %v33391_v14 = vld [vmem:[#allocation101_spill] sm:$0xff] }
 0x61e   : > { %21347 = vmatprep.subr.bf16.mxu1 %v33371_v18 }
 0x61f   : > { %v21378_v43 = vpack.c.bf16 %v33377_v13, %v33375_v63  ;;  %v21386_v10 = vpack.c.bf16 %v33384_v60, %v33383_v62  ;;  %v33385_v63 = vand.u32 4294901760, %v29802_v40  ;;  %v33393_v13 = vld [vmem:[#allocation62_spill] sm:$0xff] }
 0x620   : > { %19331 = vmatmul.mubr.f32.vlgmr.msra.gmra.mrb[16].mxu1 %v29783_v37  ;;  %v33387_v37 = vand.u32 4294901760, %v29769_v17  ;;  %v33396_v17 = vand.u32 4294901760, %v29875_v30 }
 0x621   : > { %19333 = vmatprep.mubr.f32.mxu1 %v29807_v39  ;;  %21349 = vmatpush3.bf16.msra.mxu1 %v33371_v18 }
 0x622   : > { %21351 = vmatprep.subr.bf16.mxu1 %v33372_v31  ;;  %v21390_v39 = vpack.c.bf16 %v33388_v61, %v33387_v37  ;;  %v22565_v61 = vld [vmem:[#allocation2 + $0x78] sm:$0xff] }
 0x624   : > { %19334 = vmatmul.mubr.f32.gmra.mrb[18].mxu1 %v29802_v40  ;;  %v33392_v40 = vand.u32 4294901760, %v33391_v14 }
 0x625   : > { %19336 = vmatprep.mubr.f32.mxu1 %v29833_v51  ;;  %21353 = vmatpush3.bf16.msra.mxu1 %v33372_v31  ;;  %v33394_v51 = vand.u32 4294901760, %v33393_v13  ;;  %v22567_v13 = vld [vmem:[#allocation2 + $0x88] sm:$0xff] }
 0x626   : > { %21355 = vmatprep.subr.bf16.mxu1 %v29446_v56 }
 0x628   : > { %19337 = vmatmul.mubr.f32.gmra.mrb[20].mxu1 %v29827_v32  ;;  %v33398_v32 = vand.u32 4294901760, %v33397_v21 }
 0x629   : > { %19339 = vmatprep.mubr.f32.mxu1 %v29854_v26  ;;  %21357 = vmatpush3.bf16.msra.mxu1 %v29446_v56  ;;  %v33400_v26 = vand.u32 4294901760, %v33399_v46 }
 0x62a   : > { %21359 = vmatprep.subr.bf16.mxu1 %v29460_v49 }
 0x62b   : > { %v21398_v54 = vpack.c.bf16 %v33400_v26, %v33398_v32 }
 0x62c   : > { %19340 = vmatmul.mubr.f32.gmra.mrb[22].mxu1 %v29848_v45 }
 0x62d   : > { %19342 = vmatprep.mubr.f32.mxu1 %v29875_v30  ;;  %21361 = vmatpush3.bf16.msra.mxu1 %v29460_v49 }
 0x62e   : > { %21363 = vmatprep.subr.bf16.mxu1 %v29615_v15 }
 0x630   : > { %19343 = vmatmul.mubr.f32.gmra.mrb[24].mxu1 %v29868_v19 }
 0x631   : > { %19345 = vmatprep.mubr.f32.mxu1 %v29896_v53  ;;  %21365 = vmatpush3.bf16.msra.mxu1 %v29615_v15 }
 0x632   : > { %21367 = vmatprep.subr.bf16.mxu1 %v29619_v58 }
 0x634   : > { %19346 = vmatmul.mubr.f32.gmra.mrb[26].mxu1 %v29890_v57 }
 0x635   : > { %19348 = vmatprep.mubr.f32.mxu1 %v29917_v48  ;;  %21369 = vmatpush3.bf16.msra.mxu1 %v29619_v58  ;;  %v22560_v48 = vld [vmem:[#allocation2 + $0x40] sm:$0xff] }
 0x636   : > { %21371 = vmatprep.subr.bf16.mxu1 %v29623_v52 }
 0x638   : > { %19349 = vmatmul.mubr.f32.gmra.mrb[28].mxu1 %v29910_v35  ;;  %v22558_v35 = vld [vmem:[#allocation2 + $0x30] sm:$0xff] }
 0x639   : > { %19351 = vmatprep.mubr.f32.mxu1 %v29937_v11  ;;  %21373 = vmatpush3.bf16.msra.mxu1 %v29623_v52  ;;  %v22562_v11 = vld [vmem:[#allocation2 + $0x50] sm:$0xff] }
 0x63a   : > { %21375 = vmatprep.subr.bf16.mxu1 %v33373_v33 }
 0x63c   : > { %19352 = vmatmul.mubr.f32.gmra.mrb[30].mxu1 %v29930_v34 }
 0x63d   : > { %21377 = vmatpush3.bf16.msra.mxu1 %v33373_v33  ;;  %19386 = vmatprep.mubr.f32.mxu1 %v33378_v7  ;;  %v33395_v7 = vand.u32 4294901760, %v29848_v45  ;;  %v33402_v45 = vld [vmem:[#allocation122_spill] sm:$0xff] }
 0x63e   : > { %21379 = vmatprep.subr.bf16.mxu1 %v21378_v43 }
 0x640   : > { %19387 = vmatmul.mubr.f32.vlgmr.msra.gmra.mrb[16].mxu1 %v33381_v20  ;;  %v33403_v20 = vand.u32 4294901760, %v33402_v45 }
 0x641   : > { %19389 = vmatprep.mubr.f32.mxu1 %v33382_v44  ;;  %21381 = vmatpush3.bf16.msra.mxu1 %v21378_v43  ;;  %v21394_v43 = vpack.c.bf16 %v33394_v51, %v33392_v40  ;;  %v33404_v44 = vld [vmem:[#allocation87_spill] sm:$0xff] }
 0x642   : > { %21383 = vmatprep.subr.bf16.mxu1 %v21382_v9  ;;  %v33405_v30 = vand.u32 4294901760, %v33404_v44 }
 0x644   : > { %19390 = vmatmul.mubr.f32.gmra.mrb[18].mxu1 %v33385_v63  ;;  %v21402_v62 = vpack.c.bf16 %v33405_v30, %v33403_v20  ;;  %v22564_v63 = vld [vmem:[#allocation2 + $0x60] sm:$0xff] }
 0x645   : > { %19392 = vmatprep.mubr.f32.mxu1 %v33386_v50  ;;  %21385 = vmatpush3.bf16.msra.mxu1 %v21382_v9  ;;  %v33401_v9 = vand.u32 4294901760, %v29868_v19  ;;  %v33406_v19 = vld [vmem:[#allocation49_spill] sm:$0xff] }
 0x646   : > { %21387 = vmatprep.subr.bf16.mxu1 %v21386_v10  ;;  %v33407_v60 = vand.u32 4294901760, %v33406_v19 }
 0x648   : > { %19393 = vmatmul.mubr.f32.gmra.mrb[20].mxu1 %v33389_v0 }
 0x649   : > { %19395 = vmatprep.mubr.f32.mxu1 %v33390_v25  ;;  %21389 = vmatpush3.bf16.msra.mxu1 %v21386_v10  ;;  %v33408_v10 = vld [vmem:[#allocation46_spill] sm:$0xff] }
 0x64a   : > { %21391 = vmatprep.subr.bf16.mxu1 %v21390_v39  ;;  %v33409_v53 = vand.u32 4294901760, %v33408_v10  ;;  %v22566_v25 = vld [vmem:[#allocation2 + $0x70] sm:$0xff] }
 0x64c   : > { %19396 = vmatmul.mubr.f32.gmra.mrb[22].mxu1 %v33395_v7  ;;  %v22568_v7 = vld [vmem:[#allocation2 + $0x80] sm:$0xff] }
 0x64d   : > { %19398 = vmatprep.mubr.f32.mxu1 %v33396_v17  ;;  %21393 = vmatpush3.bf16.msra.mxu1 %v21390_v39 }
 0x64e   : > { %21395 = vmatprep.subr.bf16.mxu1 %v21394_v43 }
 0x650   : > { %19399 = vmatmul.mubr.f32.gmra.mrb[24].mxu1 %v33401_v9 }
 0x651   : > { %19401 = vmatprep.mubr.f32.mxu1 %v12941_v55  ;;  %21397 = vmatpush3.bf16.msra.mxu1 %v21394_v43  ;;  %v21406_v55 = vpack.c.bf16 %v33409_v53, %v33407_v60 }
 0x652   : > { %21399 = vmatprep.subr.bf16.mxu1 %v21398_v54 }
 0x654   : > { %19402 = vmatmul.mubr.f32.gmra.mrb[26].mxu1 %v12951_v4 }
 0x655   : > { %19404 = vmatprep.mubr.f32.mxu1 %v12961_v22  ;;  %21401 = vmatpush3.bf16.msra.mxu1 %v21398_v54 }
 0x656   : > { %21403 = vmatprep.subr.bf16.mxu1 %v21402_v62 }
 0x658   : > { %19405 = vmatmul.mubr.f32.gmra.mrb[28].mxu1 %v12971_v1 }
 0x659   : > { %19407 = vmatprep.mubr.f32.mxu1 %v12981_v29  ;;  %21405 = vmatpush3.bf16.msra.mxu1 %v21402_v62 }
 0x65a   : > { %21407 = vmatprep.subr.bf16.mxu1 %v21406_v55 }
 0x65c   : > { %19408 = vmatmul.mubr.f32.gmra.mrb[30].mxu1 %v12991_v36 }
 0x65d   : > { %21409 = vmatpush3.bf16.msra.mxu1 %v21406_v55  ;;  %19442 = vmatprep.mubr.f32.mxu1 %v29779_v59 }
 0x65e   : > { %21411 = vmatprep.subr.bf16.mxu1 %v33371_v18 }
 0x660   : > { %19443 = vmatmul.mubr.f32.vlgmr.msra.gmra.mrb[16].mxu1 %v29771_v16 }
 0x661   : > { %19445 = vmatprep.mubr.f32.mxu1 %v29794_v5  ;;  %21413 = vmatpush3.bf16.msra.mxu1 %v33371_v18  ;;  %v22563_v18 = vld [vmem:[#allocation2 + $0x68] sm:$0xff] }
 0x662   : > { %21415 = vmatprep.subr.bf16.mxu1 %v33372_v31 }
 0x664   : > { %19446 = vmatmul.mubr.f32.gmra.mrb[18].mxu1 %v29790_v28 }
 0x665   : > { %19448 = vmatprep.mubr.f32.mxu1 %v29822_v8  ;;  %21417 = vmatpush3.bf16.msra.mxu1 %v33372_v31 }
 0x666   : > { %21419 = vmatprep.subr.bf16.mxu1 %v29446_v56 }
 0x668   : > { %19449 = vmatmul.mubr.f32.gmra.mrb[20].mxu1 %v29815_v47 }
 0x669   : > { %19451 = vmatprep.mubr.f32.mxu1 %v29842_v27  ;;  %21421 = vmatpush3.bf16.msra.mxu1 %v29446_v56  ;;  %v22553_v56 = vld [vmem:[#allocation2 + $0x18] sm:$0xff] }
 0x66a   : > { %21423 = vmatprep.subr.bf16.mxu1 %v29460_v49 }
 0x66c   : > { %19452 = vmatmul.mubr.f32.gmra.mrb[22].mxu1 %v29838_v23 }
 0x66d   : > { %19454 = vmatprep.mubr.f32.mxu1 %v29863_v24  ;;  %21425 = vmatpush3.bf16.msra.mxu1 %v29460_v49 }
 0x66e   : > { %21427 = vmatprep.subr.bf16.mxu1 %v29615_v15 }
 0x670   : > { %19455 = vmatmul.mubr.f32.gmra.mrb[24].mxu1 %v29859_v3 }
 0x671   : > { %19457 = vmatprep.mubr.f32.mxu1 %v29884_v2  ;;  %21429 = vmatpush3.bf16.msra.mxu1 %v29615_v15 }
 0x672   : > { %21431 = vmatprep.subr.bf16.mxu1 %v29619_v58 }
 0x674   : > { %19458 = vmatmul.mubr.f32.gmra.mrb[26].mxu1 %v29880_v6 }
 0x675   : > { %19460 = vmatprep.mubr.f32.mxu1 %v29905_v41  ;;  %21433 = vmatpush3.bf16.msra.mxu1 %v29619_v58 }
 0x676   : > { %21435 = vmatprep.subr.bf16.mxu1 %v29623_v52 }
 0x678   : > { %19461 = vmatmul.mubr.f32.gmra.mrb[28].mxu1 %v29901_v12 }
 0x679   : > { %19463 = vmatprep.mubr.f32.mxu1 %v29925_v42  ;;  %21437 = vmatpush3.bf16.msra.mxu1 %v29623_v52  ;;  %v22554_v52 = vld [vmem:[#allocation2 + $0x10] sm:$0xff] }
 0x67a   : > { %21439 = vmatprep.subr.bf16.mxu1 %v33373_v33 }
 0x67c   : > { %19464 = vmatmul.mubr.f32.gmra.mrb[30].mxu1 %v29922_v38 }
 0x67d   : > { %21441 = vmatpush3.bf16.msra.mxu1 %v33373_v33  ;;  %19498 = vmatprep.mubr.f32.mxu1 %v29779_v59 }
 0x680   : > { %19499 = vmatmul.mubr.f32.vlgmr.msra.gmra.mrb[16].mxu1 %v29771_v16  ;;  %v22555_v16 = vld [vmem:[#allocation2 + $0x28] sm:$0xff] }
 0x681   : > { %19501 = vmatprep.mubr.f32.mxu1 %v29794_v5 }
 0x684   : > { %19502 = vmatmul.mubr.f32.gmra.mrb[18].mxu1 %v29790_v28 }
 0x685   : > { %19504 = vmatprep.mubr.f32.mxu1 %v29822_v8 }
 0x688   : > { %19505 = vmatmul.mubr.f32.gmra.mrb[20].mxu1 %v29815_v47  ;;  %v22556_v47 = vld [vmem:[#allocation2 + $0x20] sm:$0xff] }
 0x689   : > { %19507 = vmatprep.mubr.f32.mxu1 %v29842_v27 }
 0x68c   : > { %19508 = vmatmul.mubr.f32.gmra.mrb[22].mxu1 %v29838_v23 }
 0x68d   : > { %19510 = vmatprep.mubr.f32.mxu1 %v29863_v24 }
 0x690   : > { %19511 = vmatmul.mubr.f32.gmra.mrb[24].mxu1 %v29859_v3  ;;  %v22557_v3 = vld [vmem:[#allocation2 + $0x38] sm:$0xff] }
 0x691   : > { %19513 = vmatprep.mubr.f32.mxu1 %v29884_v2 }
 0x694   : > { %19514 = vmatmul.mubr.f32.gmra.mrb[26].mxu1 %v29880_v6 }
 0x695   : > { %19516 = vmatprep.mubr.f32.mxu1 %v29905_v41 }
 0x698   : > { %19517 = vmatmul.mubr.f32.gmra.mrb[28].mxu1 %v29901_v12  ;;  %v22559_v12 = vld [vmem:[#allocation2 + $0x48] sm:$0xff] }
 0x699   : > { %19519 = vmatprep.mubr.f32.mxu1 %v29925_v42  ;;  %v22561_v42 = vld [vmem:[#allocation2 + $0x58] sm:$0xff] }
 0x69c   : > { %19520 = vmatmul.mubr.f32.gmra.mrb[30].mxu1 %v29922_v38 }
 0x753   : > { %v19500_v49 = vpop.f32.mrb[16].mxu1 }
 0x754   : > { %v14045_v15 = vadd.f32 %v22553_v56, %v19500_v49  ;;  %v13950_v58 = vpop.f32.mrb[17].mxu1 }
 0x755   : > { %v14044_v27 = vadd.f32 %v22554_v52, %v13950_v58 }
 0x756   : > { %14061 = vst [vmem:[%s23034_s8 + $0x8] sm:$0xff] %v14045_v15 }
 0x757   : > { %14060 = vst [vmem:[%s23034_s8] sm:$0xff] %v14044_v27  ;;  %v19503_v59 = vpop.f32.mrb[18].mxu1 }
 0x758   : > { %v14047_v28 = vadd.f32 %v22555_v16, %v19503_v59  ;;  %v13962_v5 = vpop.f32.mrb[19].mxu1 }
 0x759   : > { %v14046_v8 = vadd.f32 %v22556_v47, %v13962_v5 }
 0x75a   : > { %14063 = vst [vmem:[%s23034_s8 + $0x18] sm:$0xff] %v14047_v28 }
 0x75b   : > { %14062 = vst [vmem:[%s23034_s8 + $0x10] sm:$0xff] %v14046_v8  ;;  %v19506_v23 = vpop.f32.mrb[20].mxu1 }
 0x75c   : > { %v14049_v24 = vadd.f32 %v22557_v3, %v19506_v23  ;;  %v13974_v6 = vpop.f32.mrb[21].mxu1 }
 0x75d   : > { %v14048_v2 = vadd.f32 %v22558_v35, %v13974_v6 }
 0x75e   : > { %14065 = vst [vmem:[%s23034_s8 + $0x28] sm:$0xff] %v14049_v24 }
 0x75f   : > { %14064 = vst [vmem:[%s23034_s8 + $0x20] sm:$0xff] %v14048_v2  ;;  %v19509_v57 = vpop.f32.mrb[22].mxu1 }
 0x760   : > { %v14051_v4 = vadd.f32 %v22559_v12, %v19509_v57  ;;  %v13986_v41 = vpop.f32.mrb[23].mxu1 }
 0x761   : > { %v14050_v38 = vadd.f32 %v22560_v48, %v13986_v41 }
 0x762   : > { %14067 = vst [vmem:[%s23034_s8 + $0x38] sm:$0xff] %v14051_v4 }
 0x763   : > { %14066 = vst [vmem:[%s23034_s8 + $0x30] sm:$0xff] %v14050_v38  ;;  %v19512_v1 = vpop.f32.mrb[24].mxu1 }
 0x764   : > { %v14053_v22 = vadd.f32 %v22561_v42, %v19512_v1  ;;  %v13998_v34 = vpop.f32.mrb[25].mxu1 }
 0x765   : > { %v14052_v36 = vadd.f32 %v22562_v11, %v13998_v34 }
 0x766   : > { %14069 = vst [vmem:[%s23034_s8 + $0x48] sm:$0xff] %v14053_v22 }
 0x767   : > { %14068 = vst [vmem:[%s23034_s8 + $0x40] sm:$0xff] %v14052_v36  ;;  %v19515_v29 = vpop.f32.mrb[26].mxu1 }
 0x768   : > { %v14055_v31 = vadd.f32 %v22563_v18, %v19515_v29  ;;  %v14010_v33 = vpop.f32.mrb[27].mxu1 }
 0x769   : > { %v14054_v50 = vadd.f32 %v22564_v63, %v14010_v33 }
 0x76a   : > { %14071 = vst [vmem:[%s23034_s8 + $0x58] sm:$0xff] %v14055_v31 }
 0x76b   : > { %14070 = vst [vmem:[%s23034_s8 + $0x50] sm:$0xff] %v14054_v50  ;;  %v19518_v37 = vpop.f32.mrb[28].mxu1 }
 0x76c   : > { %v14057_v39 = vadd.f32 %v22565_v61, %v19518_v37  ;;  %v14022_v0 = vpop.f32.mrb[29].mxu1 }
 0x76d   : > { %v14056_v14 = vadd.f32 %v22566_v25, %v14022_v0 }
 0x76e   : > { %14073 = vst [vmem:[%s23034_s8 + $0x68] sm:$0xff] %v14057_v39 }
 0x76f   : > { %14072 = vst [vmem:[%s23034_s8 + $0x60] sm:$0xff] %v14056_v14  ;;  %v19521_v40 = vpop.f32.mrb[30].mxu1 }
 0x770   : > { %v14059_v51 = vadd.f32 %v22567_v13, %v19521_v40  ;;  %v14034_v43 = vpop.f32.mrb[31].mxu1 }
 0x771   : > { %v14058_v17 = vadd.f32 %v22568_v7, %v14034_v43 }
 0x772   : > { %14075 = vst [vmem:[%s23034_s8 + $0x78] sm:$0xff] %v14059_v51 }
 0x773   : > { %14074 = vst [vmem:[%s23034_s8 + $0x70] sm:$0xff] %v14058_v17 }
 0x774   : > { %22710 = shalt.err (!%p22707_p8)
}
 0x775   : > { %s22711_s24 = scalar_lea.hbm %s30151_s29, 2048  ;;  %s22715_s25 = scalar_lea.hbm %s30214_s3, 8192 }
 0x776   : > { %p22712_p5 = scmp.ne.s32.totalorder %s30151_s29, %s22711_s24  ;;  %p22716_p9 = scmp.lt.u32.totalorder %s30151_s29, %s30214_s3 }
 0x777   : > { %p22717_p11 = scmp.lt.u32.totalorder %s22715_s25, %s22711_s24  ;;  %p22719_p3 = scmp.lt.u32.totalorder %s22711_s24, %s30151_s29 }
 0x778   : > { %p22713_p6 = pnand %p22712_p5, %p33411_p0 }
 0x779   : > { %p22718_p13 = por %p22717_p11, %p22716_p9 }
 0x77a   : > { %p22714_p7 = pneg %p22713_p6 }
 0x77b   : > { %p22720_p2 = por %p22719_p3, %p22718_p13 }
 0x77d   : > { %p22721_p10 = pnand %p22720_p2, %p22714_p7 }
 0x77f   : > { %22724 = shalt.err (!%p22721_p10)
}
 0x780   : > { %s22817_s11 = smov 128   ;;  %s22818_s8 = smov 8  }
 0x781   : > { %22378 = dma.vmem_to_hbm [thread:$0]  (%p33411_p0), %s30153_s16, 2048, %s30151_s29, %s30159_s4, %s22817_s11, %s22817_s11, %s22818_s8  }
 0x782 PF: > { %p22395_p12 = scmp.ge.s32.totalorder %s22805_s19, 2  ;;  %s14107_s30 = sand.u32 1, %s22777_s12  }
 0x783   : > { %p33412_p1 = scmp.ne.s32.totalorder %s31313_s27, 0  ;;  %s14108_s23 = scalar_lea.sflag [#allocation6], %s14107_s30 }
 0x785   : > { %p22388_p4 = pnand %p22395_p12, %p33412_p1 }
 0x787   : > { %22772 = dma.done.wait (!%p22388_p4), %s14108_s23, 2048  }
 0x788   : > { %22774 = vsyncadd (!%p22388_p4), %s14108_s23, 4294965248  ;;  %s18_s19 = sadd.s32 1, %s22805_s19   ;;  %s33413_s15 = sld [smem:[#allocation24_spill]] }
 0x789   : > { %p15_p8 = scmp.ge.s32.totalorder %s18_s19, 6   ;;  %s33414_s16 = sld [smem:[#allocation25_spill]] }
 0x78a   : > { %s33415_s17 = sld [smem:[#allocation26_spill]]  ;;  %s33416_s18 = sld [smem:[#allocation27_spill]] }
 0x78b   : > { %s33417_s12 = smov %s22781_s13  ;;  %s33418_s13 = smov %s22785_s14 }
 0x78c   : > { %s33419_s14 = smov %s22918_s5  ;;  %17 = sbr.rel (!%p15_p8) target bundleno = 10 (0xa), region = 106 }
 0x793   :  { %14113 = vsyncpa [#allocation5], 1 }
 0x794   :  { %14115 = vsyncpa [#allocation5 + $0x1], 1 }
 0x795   :  { %14116 = vsyncpa [#allocation8], 1 }
 0x796   :  { %14117 = vsyncpa [#allocation6], 1 }
 0x797   :  { %14119 = vsyncpa [#allocation6 + $0x1], 1 }
 0x798   :  { %14120 = vsyncmov [#allocation3] }
 0x79b   :  { %s14121_s26 = vpop.sfrf %14120 }
 0x79c   :  { %p14239_p0 = scmp.ne.s32.totalorder %s14121_s26, 0 }
 0x79e   :  { %14125 = shalt.err (%p14239_p0)  }
 0x79f   :  { %14127 = vsyncmov [#allocation3 + $0x1] }
 0x7a2   :  { %s14128_s27 = vpop.sfrf %14127 }
 0x7a3   :  { %p14240_p5 = scmp.ne.s32.totalorder %s14128_s27, 0 }
 0x7a5   :  { %14132 = shalt.err (%p14240_p5)  }
 0x7a6   :  { %14134 = vsyncmov [#allocation3 + $0x2] }
 0x7a9   :  { %s14135_s5 = vpop.sfrf %14134 }
 0x7aa   :  { %p14241_p6 = scmp.ne.s32.totalorder %s14135_s5, 0 }
 0x7ac   :  { %14139 = shalt.err (%p14241_p6)  }

</bundles_post_ra>
